<compile_context>
chip_gen: v6e
topology: v6e:2x2x1
jax: 0.10.0
libtpu: 0.0.40
codegen_flags: <defaults>
</compile_context>

<pallas_src>
import functools
from itertools import product as iter_product

import numpy as np
import jax
import jax.numpy as jnp
from jax.experimental import pallas as pl
from jax.experimental.pallas import tpu as pltpu


P_PAD = 128  # lane-dense coefficient width (output row / w2 / b2 / sel padded to this)


# ----------------------------------------------------------------------------
# Static setup: multi-index set (order_mat), selector tables, core count
# ----------------------------------------------------------------------------
def build_order_mat(d, order):
    """Total-degree multi-index set; first row is the constant (all-zero) term."""
    idxs = []
    for total in range(order + 1):
        for alpha in iter_product(range(order + 1), repeat=d):
            if sum(alpha) == total:
                idxs.append(alpha)
    return np.asarray(idxs, dtype=np.int32)  # (P, d)


def build_select_table(order_mat, order, p_pad=P_PAD):
    """sel[j, o*d + j, k] = 1 iff order_mat[k, j] == o; everything else 0.

    The K = d*(order+1) axis matches hfull = concat([He_0(x),...,He_order(x)],
    axis=1): column o*d + jj holds He_o(x[:, jj]).  Padded lanes k >= P are
    all-zero, so psi is exactly 0 there.
    """
    P, d = order_mat.shape
    K = d * (order + 1)
    sel = np.zeros((d, K, p_pad), dtype=np.float32)
    for j in range(d):
        for k in range(P):
            o = int(order_mat[k, j])
            sel[j, o * d + j, k] = 1.0
    return sel


def build_stats_onehots(n_true_p, p_pad=P_PAD):
    """Resident one-hot rows: row 0 -> lane P (y_sum), row 1 -> lane P+1 (y_sum_sq)."""
    eb = np.zeros((2, p_pad), dtype=np.float32)
    eb[0, n_true_p] = 1.0
    eb[1, n_true_p + 1] = 1.0
    return eb


def default_num_cores():
    """2 only on 2-TensorCore parts (v7x); v5e/v6e are single-TC chips."""
    try:
        kind = jax.devices()[0].device_kind.lower()
    except Exception:
        return 1
    return 2 if "v7" in kind else 1


# ----------------------------------------------------------------------------
# Pallas kernel: fused net + MXU-built PCE basis + packed running sums
# ----------------------------------------------------------------------------
def _pce_loss_stats_kernel(x_ref, w1_ref, b1_ref, w2_ref, b2_ref, sel_ref,
                           eb_ref, out_ref, *, order, d):
    s = pl.program_id(1)

    @pl.when(s == 0)
    def _():
        out_ref[...] = jnp.zeros_like(out_ref)

    x = x_ref[...].astype(jnp.float32)                         # (tm, d)

    # Fused coefficient net: tanh runs on the EUP, both dots on the MXU.
    hid = jnp.tanh(
        jnp.dot(x, w1_ref[...], preferred_element_type=jnp.float32)
        + b1_ref[...])                                         # (tm, H)
    c = (jnp.dot(hid, w2_ref[...], preferred_element_type=jnp.float32)
         + b2_ref[...])                                        # (tm, P_PAD)
    # Padded lanes of c are exactly 0 (w2 / b2 zero-padded in the wrapper).

    # Probabilists' Hermite recurrence He_0..He_order on the FULL (tm, d) block.
    hs = [jnp.ones_like(x)]
    if order >= 1:
        hs.append(x)
    for n in range(2, order + 1):
        hs.append(x * hs[n - 1] - float(n - 1) * hs[n - 2])
    hfull = jnp.concatenate(hs, axis=1)                        # (tm, d*(order+1))

    # psi[n, k] = prod_j He_{order_mat[k, j]}(x[n, j]), built with d small MXU
    # dots against the resident 0/1 selector table (sel[j] picks He_o(x[:, j])).
    psi = None
    for j in range(d):
        pj = jnp.dot(hfull, sel_ref[j],
                     preferred_element_type=jnp.float32)       # (tm, P_PAD)
        psi = pj if psi is None else psi * pj
    # Padded lanes of psi are 0 (selector columns are all-zero there).

    y = jnp.sum(c * psi, axis=1, keepdims=True)                # (tm, 1)

    # Pack c_sum (lanes [0, P)), y_sum (lane P), y_sum_sq (lane P+1) into one
    # lane-dense row; the one-hot rows are resident (no per-step iota/compares).
    stats = (jnp.sum(c, axis=0, keepdims=True)
             + jnp.sum(y) * eb_ref[0:1, :]
             + jnp.sum(y * y) * eb_ref[1:2, :])                # (1, P_PAD)
    out_ref[...] += stats


def pce_loss_stats(x, w1, b1p, w2p, b2p, sel, eb, order, *, tm, num_cores,
                   vmem_limit_bytes=None):
    N, d = x.shape
    p_pad = w2p.shape[1]
    assert N % (num_cores * tm) == 0, "N must be divisible by num_cores * tm"
    steps = N // (num_cores * tm)

    kernel = functools.partial(_pce_loss_stats_kernel, order=order, d=d)

    grid_spec = pltpu.PrefetchScalarGridSpec(
        num_scalar_prefetch=0,
        grid=(num_cores, steps),
        in_specs=[
            pl.BlockSpec((tm, d), lambda core, s: (core * steps + s, 0)),
            pl.BlockSpec(w1.shape, lambda core, s: (0, 0)),
            pl.BlockSpec(b1p.shape, lambda core, s: (0, 0)),
            pl.BlockSpec(w2p.shape, lambda core, s: (0, 0)),
            pl.BlockSpec(b2p.shape, lambda core, s: (0, 0)),
            pl.BlockSpec(sel.shape, lambda core, s: (0, 0, 0)),
            pl.BlockSpec(eb.shape, lambda core, s: (0, 0)),
        ],
        out_specs=pl.BlockSpec((None, 1, p_pad), lambda core, s: (core, 0, 0)),
    )
    cp = dict(dimension_semantics=("parallel", "arbitrary"))
    if vmem_limit_bytes is not None:
        cp["vmem_limit_bytes"] = vmem_limit_bytes
    return pl.pallas_call(
        kernel,
        out_shape=jax.ShapeDtypeStruct((num_cores, 1, p_pad), jnp.float32),
        grid_spec=grid_spec,
        compiler_params=pltpu.CompilerParams(**cp),
    )(x, w1, b1p, w2p, b2p, sel, eb)


# ----------------------------------------------------------------------------
# "net": deterministic small MLP (module takes it as a forward argument)
# ----------------------------------------------------------------------------
def init_net(key, d, P, hidden=32):
    k1, k2 = jax.random.split(key)
    w1 = jax.random.normal(k1, (d, hidden), jnp.float32) / np.sqrt(d)
    b1 = jnp.zeros((hidden,), jnp.float32)
    w2 = jax.random.normal(k2, (hidden, P), jnp.float32) / np.sqrt(hidden)
    b2 = jnp.zeros((P,), jnp.float32)
    return (w1, b1, w2, b2)


def net_apply(params, x):
    w1, b1, w2, b2 = params
    hid = jnp.tanh(x @ w1 + b1)
    return (hid @ w2 + b2, hid)   # module uses net(x)[0]


# ----------------------------------------------------------------------------
# Module forward: CoefficientPCELoss_coeff_batch.forward (net fused in-kernel)
# ----------------------------------------------------------------------------
def coefficient_pce_loss(x_coeff, net_params, order, order_mat, *,
                         tm=1024, num_cores=None, vmem_limit_bytes=None):
    N, d = x_coeff.shape
    w1, b1, w2, b2 = net_params
    P = w2.shape[1]
    assert P + 2 <= P_PAD, "need room for the packed y_sum / y_sum_sq lanes"

    if num_cores is None:
        num_cores = default_num_cores()
    tm = min(tm, N // num_cores)   # clamp the sweep knob for small N

    # Lane-dense zero-padding of the output layer (so padded c lanes are 0).
    w2p = jnp.zeros((w2.shape[0], P_PAD), jnp.float32).at[:, :P].set(w2)
    b2p = jnp.zeros((1, P_PAD), jnp.float32).at[0, :P].set(b2)
    b1p = b1.reshape(1, -1)
    sel = jnp.asarray(build_select_table(np.asarray(order_mat), order, P_PAD))
    eb = jnp.asarray(build_stats_onehots(P, P_PAD))

    partials = pce_loss_stats(x_coeff, w1, b1p, w2p, b2p, sel, eb, order,
                              tm=tm, num_cores=num_cores,
                              vmem_limit_bytes=vmem_limit_bytes)
    totals = jnp.sum(partials, axis=(0, 1))                   # (P_PAD,)

    c_mean = totals[:P] / N
    c_inter = c_mean[1:]
    y_mean = totals[P] / N
    y_var = totals[P + 1] / N - y_mean ** 2
    loss = jnp.abs(c_mean[0] - y_mean) + jnp.abs(jnp.sum(c_inter ** 2) - y_var)
    return loss


# ----------------------------------------------------------------------------
# Pure-JAX reference (for correctness check)
# ----------------------------------------------------------------------------
def _deep_pce_ref(x, c, order, order_mat):
    h = [jnp.ones_like(x)]
    if order >= 1:
        h.append(x)
    for n in range(2, order + 1):
        h.append(x * h[n - 1] - float(n - 1) * h[n - 2])
    H = jnp.stack(h, axis=-1)                                 # (N, d, order+1)
    P, d = order_mat.shape
    psi_cols = []
    for k in range(P):
        pk = jnp.ones((x.shape[0],), jnp.float32)
        for j in range(d):
            pk = pk * H[:, j, int(order_mat[k, j])]
        psi_cols.append(pk)
    psi = jnp.stack(psi_cols, axis=1)                         # (N, P)
    return jnp.sum(c * psi, axis=1)                           # (N,)


def _loss_ref(x_coeff, net, order, order_mat):
    N = x_coeff.shape[0]
    c = net(x_coeff)[0]
    y = _deep_pce_ref(x_coeff, c, order, order_mat)
    c_mean = (jnp.sum(c, axis=0) / N).reshape(-1)
    c_inter = c_mean[1:]
    y_mean = jnp.sum(y) / N
    y_var = jnp.sum(y ** 2) / N - y_mean ** 2
    return jnp.abs(c_mean[0] - y_mean) + jnp.abs(jnp.sum(c_inter ** 2) - y_var)


# ----------------------------------------------------------------------------
if __name__ == "__main__":
    d = 4
    order = 3
    N = 2048          # small, but enough for multiple accumulation steps at tm=1024
    tm = 1024         # primary sweep knob (review: 1024-4096 for real N)

    order_mat = build_order_mat(d, order)   # (P, d), P = C(d+order, d) = 35
    P = order_mat.shape[0]

    key = jax.random.PRNGKey(0)
    kx, knet = jax.random.split(key)
    x_coeff = jax.random.normal(kx, (N, d), jnp.float32)
    params = init_net(knet, d, P, hidden=32)

    loss = coefficient_pce_loss(x_coeff, params, order, order_mat, tm=tm)
    loss = jax.block_until_ready(loss)

    net = functools.partial(net_apply, params)
    loss_ref = jax.block_until_ready(_loss_ref(x_coeff, net, order, order_mat))
    np.testing.assert_allclose(np.asarray(loss), np.asarray(loss_ref),
                               rtol=2e-4, atol=1e-3)

    print("KERNEL_OK")
</pallas_src>

<mosaic_0001>
module attributes {stable_mosaic.version = 11 : i64} {
  func.func @_pce_loss_stats_kernel(%arg0: i32, %arg1: i32, %arg2: memref<1024x4xf32, #tpu.memory_space<vmem>>, %arg3: memref<4x32xf32, #tpu.memory_space<vmem>>, %arg4: memref<1x32xf32, #tpu.memory_space<vmem>>, %arg5: memref<32x128xf32, #tpu.memory_space<vmem>>, %arg6: memref<1x128xf32, #tpu.memory_space<vmem>>, %arg7: memref<4x16x128xf32, #tpu.memory_space<vmem>>, %arg8: memref<2x128xf32, #tpu.memory_space<vmem>>, %arg9: memref<1x1x128xf32, #tpu.memory_space<vmem>>) attributes {dimension_semantics = [#tpu.dimension_semantics<parallel>, #tpu.dimension_semantics<arbitrary>], iteration_bounds = array<i64: 1, 2>, scalar_prefetch = 0 : i64, scratch_operands = 0 : i64, tpu.core_type = #tpu.core_type<tc>, window_params = [{transform_indices = @transform_0, window_bounds = array<i64: 1024, 4>}, {pipeline_mode = #tpu.pipeline_mode<synchronous>, transform_indices = @transform_1, window_bounds = array<i64: 4, 32>}, {pipeline_mode = #tpu.pipeline_mode<synchronous>, transform_indices = @transform_2, window_bounds = array<i64: 1, 32>}, {pipeline_mode = #tpu.pipeline_mode<synchronous>, transform_indices = @transform_3, window_bounds = array<i64: 32, 128>}, {pipeline_mode = #tpu.pipeline_mode<synchronous>, transform_indices = @transform_4, window_bounds = array<i64: 1, 128>}, {pipeline_mode = #tpu.pipeline_mode<synchronous>, transform_indices = @transform_5, window_bounds = array<i64: 4, 16, 128>}, {pipeline_mode = #tpu.pipeline_mode<synchronous>, transform_indices = @transform_6, window_bounds = array<i64: 2, 128>}, {transform_indices = @transform_7, window_bounds = array<i64: 1, 1, 128>}]} {
    %c0_i32 = arith.constant 0 : i32
    %0 = arith.cmpi eq, %arg1, %c0_i32 : i32
    %1 = arith.extui %0 : i1 to i32
    %c0_i32_0 = arith.constant 0 : i32
    %2 = arith.cmpi ne, %1, %c0_i32_0 : i32
    scf.if %2 {
      %cst_41 = arith.constant 0.000000e+00 : f32
      %68 = vector.broadcast %cst_41 : f32 to vector<1x128xf32>
      %c0_42 = arith.constant 0 : index
      %c0_43 = arith.constant 0 : index
      %c0_44 = arith.constant 0 : index
      %69 = vector.load %arg9[%c0_42, %c0_43, %c0_44] : memref<1x1x128xf32, #tpu.memory_space<vmem>>, vector<1x1x128xf32>
      %70 = vector.shape_cast %69 : vector<1x1x128xf32> to vector<1x128xf32>
      %71 = vector.shape_cast %68 : vector<1x128xf32> to vector<1x1x128xf32>
      tpu.vector_store %arg9[%c0_42, %c0_43, %c0_44], %71 {strides = array<i32>} : memref<1x1x128xf32, #tpu.memory_space<vmem>>, vector<1x1x128xf32>,
    } else {
    }
    %c0 = arith.constant 0 : index
    %c0_1 = arith.constant 0 : index
    %3 = vector.load %arg2[%c0, %c0_1] : memref<1024x4xf32, #tpu.memory_space<vmem>>, vector<1024x4xf32>
    %c0_2 = arith.constant 0 : index
    %c0_3 = arith.constant 0 : index
    %4 = vector.load %arg3[%c0_2, %c0_3] : memref<4x32xf32, #tpu.memory_space<vmem>>, vector<4x32xf32>
    %cst = arith.constant dense<0.000000e+00> : vector<1024x32xf32>
    %5 = tpu.matmul %3, %4, %cst {dimension_numbers = #tpu.dot_dimension_numbers<[1], [0], [0], [1], [0, 0, 1, 1], [], []>} : vector<1024x4xf32>, vector<4x32xf32>, vector<1024x32xf32> -> vector<1024x32xf32>
    %c0_4 = arith.constant 0 : index
    %c0_5 = arith.constant 0 : index
    %6 = vector.load %arg4[%c0_4, %c0_5] : memref<1x32xf32, #tpu.memory_space<vmem>>, vector<1x32xf32>
    %7 = vector.broadcast %6 : vector<1x32xf32> to vector<1024x32xf32>
    %8 = arith.addf %5, %7 : vector<1024x32xf32>
    %9 = math.tanh %8 : vector<1024x32xf32>
    %c0_6 = arith.constant 0 : index
    %c0_7 = arith.constant 0 : index
    %10 = vector.load %arg5[%c0_6, %c0_7] : memref<32x128xf32, #tpu.memory_space<vmem>>, vector<32x128xf32>
    %cst_8 = arith.constant dense<0.000000e+00> : vector<1024x128xf32>
    %11 = tpu.matmul %9, %10, %cst_8 {dimension_numbers = #tpu.dot_dimension_numbers<[1], [0], [0], [1], [0, 0, 1, 1], [], []>} : vector<1024x32xf32>, vector<32x128xf32>, vector<1024x128xf32> -> vector<1024x128xf32>
    %c0_9 = arith.constant 0 : index
    %c0_10 = arith.constant 0 : index
    %12 = vector.load %arg6[%c0_9, %c0_10] : memref<1x128xf32, #tpu.memory_space<vmem>>, vector<1x128xf32>
    %13 = vector.broadcast %12 : vector<1x128xf32> to vector<1024x128xf32>
    %14 = arith.addf %11, %13 : vector<1024x128xf32>
    %cst_11 = arith.constant 1.000000e+00 : f32
    %15 = vector.broadcast %cst_11 : f32 to vector<1024x4xf32>
    %16 = arith.mulf %3, %3 : vector<1024x4xf32>
    %cst_12 = arith.constant 1.000000e+00 : f32
    %17 = vector.broadcast %cst_12 : f32 to vector<1024x4xf32>
    %18 = arith.mulf %17, %15 : vector<1024x4xf32>
    %19 = arith.subf %16, %18 : vector<1024x4xf32>
    %20 = arith.mulf %3, %19 : vector<1024x4xf32>
    %cst_13 = arith.constant 2.000000e+00 : f32
    %21 = vector.broadcast %cst_13 : f32 to vector<1024x4xf32>
    %22 = arith.mulf %21, %3 : vector<1024x4xf32>
    %23 = arith.subf %20, %22 : vector<1024x4xf32>
    %24 = tpu.concatenate %15, %3, %19, %23 in 1 : vector<1024x4xf32>, vector<1024x4xf32>, vector<1024x4xf32>, vector<1024x4xf32> -> vector<1024x16xf32>
    %c0_14 = arith.constant 0 : index
    %c0_15 = arith.constant 0 : index
    %c0_16 = arith.constant 0 : index
    %25 = vector.load %arg7[%c0_14, %c0_15, %c0_16] : memref<4x16x128xf32, #tpu.memory_space<vmem>>, vector<1x16x128xf32>
    %26 = vector.shape_cast %25 : vector<1x16x128xf32> to vector<16x128xf32>
    %cst_17 = arith.constant dense<0.000000e+00> : vector<1024x128xf32>
    %27 = tpu.matmul %24, %26, %cst_17 {dimension_numbers = #tpu.dot_dimension_numbers<[1], [0], [0], [1], [0, 0, 1, 1], [], []>} : vector<1024x16xf32>, vector<16x128xf32>, vector<1024x128xf32> -> vector<1024x128xf32>
    %c1 = arith.constant 1 : index
    %c0_18 = arith.constant 0 : index
    %c0_19 = arith.constant 0 : index
    %28 = vector.load %arg7[%c1, %c0_18, %c0_19] : memref<4x16x128xf32, #tpu.memory_space<vmem>>, vector<1x16x128xf32>
    %29 = vector.shape_cast %28 : vector<1x16x128xf32> to vector<16x128xf32>
    %cst_20 = arith.constant dense<0.000000e+00> : vector<1024x128xf32>
    %30 = tpu.matmul %24, %29, %cst_20 {dimension_numbers = #tpu.dot_dimension_numbers<[1], [0], [0], [1], [0, 0, 1, 1], [], []>} : vector<1024x16xf32>, vector<16x128xf32>, vector<1024x128xf32> -> vector<1024x128xf32>
    %31 = arith.mulf %27, %30 : vector<1024x128xf32>
    %c2 = arith.constant 2 : index
    %c0_21 = arith.constant 0 : index
    %c0_22 = arith.constant 0 : index
    %32 = vector.load %arg7[%c2, %c0_21, %c0_22] : memref<4x16x128xf32, #tpu.memory_space<vmem>>, vector<1x16x128xf32>
    %33 = vector.shape_cast %32 : vector<1x16x128xf32> to vector<16x128xf32>
    %cst_23 = arith.constant dense<0.000000e+00> : vector<1024x128xf32>
    %34 = tpu.matmul %24, %33, %cst_23 {dimension_numbers = #tpu.dot_dimension_numbers<[1], [0], [0], [1], [0, 0, 1, 1], [], []>} : vector<1024x16xf32>, vector<16x128xf32>, vector<1024x128xf32> -> vector<1024x128xf32>
    %35 = arith.mulf %31, %34 : vector<1024x128xf32>
    %c3 = arith.constant 3 : index
    %c0_24 = arith.constant 0 : index
    %c0_25 = arith.constant 0 : index
    %36 = vector.load %arg7[%c3, %c0_24, %c0_25] : memref<4x16x128xf32, #tpu.memory_space<vmem>>, vector<1x16x128xf32>
    %37 = vector.shape_cast %36 : vector<1x16x128xf32> to vector<16x128xf32>
    %cst_26 = arith.constant dense<0.000000e+00> : vector<1024x128xf32>
    %38 = tpu.matmul %24, %37, %cst_26 {dimension_numbers = #tpu.dot_dimension_numbers<[1], [0], [0], [1], [0, 0, 1, 1], [], []>} : vector<1024x16xf32>, vector<16x128xf32>, vector<1024x128xf32> -> vector<1024x128xf32>
    %39 = arith.mulf %35, %38 : vector<1024x128xf32>
    %40 = arith.mulf %14, %39 : vector<1024x128xf32>
    %cst_27 = arith.constant dense<0.000000e+00> : vector<1024xf32>
    %41 = vector.multi_reduction <add>, %40, %cst_27 [1] : vector<1024x128xf32> to vector<1024xf32>
    %42 = vector.shape_cast %41 : vector<1024xf32> to vector<1024x1xf32>
    %cst_28 = arith.constant dense<0.000000e+00> : vector<128xf32>
    %43 = vector.multi_reduction <add>, %14, %cst_28 [0] : vector<1024x128xf32> to vector<128xf32>
    %44 = vector.shape_cast %43 : vector<128xf32> to vector<1x128xf32>
    %45 = vector.shape_cast %42 : vector<1024x1xf32> to vector<1x1024x1xf32>
    %cst_29 = arith.constant dense<0.000000e+00> : vector<1xf32>
    %46 = vector.multi_reduction <add>, %45, %cst_29 [1, 2] : vector<1x1024x1xf32> to vector<1xf32>
    %47 = vector.shape_cast %46 : vector<1xf32> to vector<1x1x1xf32>
    %48 = vector.extract %47[0, 0, 0] : f32 from vector<1x1x1xf32>
    %c0_30 = arith.constant 0 : index
    %c0_31 = arith.constant 0 : index
    %49 = vector.load %arg8[%c0_30, %c0_31] : memref<2x128xf32, #tpu.memory_space<vmem>>, vector<1x128xf32>
    %50 = vector.broadcast %48 : f32 to vector<1x128xf32>
    %51 = arith.mulf %50, %49 : vector<1x128xf32>
    %52 = arith.addf %44, %51 : vector<1x128xf32>
    %53 = arith.mulf %42, %42 : vector<1024x1xf32>
    %54 = vector.shape_cast %53 : vector<1024x1xf32> to vector<1x1024x1xf32>
    %cst_32 = arith.constant dense<0.000000e+00> : vector<1xf32>
    %55 = vector.multi_reduction <add>, %54, %cst_32 [1, 2] : vector<1x1024x1xf32> to vector<1xf32>
    %56 = vector.shape_cast %55 : vector<1xf32> to vector<1x1x1xf32>
    %57 = vector.extract %56[0, 0, 0] : f32 from vector<1x1x1xf32>
    %c1_33 = arith.constant 1 : index
    %c0_34 = arith.constant 0 : index
    %58 = vector.load %arg8[%c1_33, %c0_34] : memref<2x128xf32, #tpu.memory_space<vmem>>, vector<1x128xf32>
    %59 = vector.broadcast %57 : f32 to vector<1x128xf32>
    %60 = arith.mulf %59, %58 : vector<1x128xf32>
    %61 = arith.addf %52, %60 : vector<1x128xf32>
    %c0_35 = arith.constant 0 : index
    %c0_36 = arith.constant 0 : index
    %c0_37 = arith.constant 0 : index
    %62 = vector.load %arg9[%c0_35, %c0_36, %c0_37] : memref<1x1x128xf32, #tpu.memory_space<vmem>>, vector<1x1x128xf32>
    %63 = vector.shape_cast %62 : vector<1x1x128xf32> to vector<1x128xf32>
    %64 = arith.addf %63, %61 : vector<1x128xf32>
    %c0_38 = arith.constant 0 : index
    %c0_39 = arith.constant 0 : index
    %c0_40 = arith.constant 0 : index
    %65 = vector.load %arg9[%c0_38, %c0_39, %c0_40] : memref<1x1x128xf32, #tpu.memory_space<vmem>>, vector<1x1x128xf32>
    %66 = vector.shape_cast %65 : vector<1x1x128xf32> to vector<1x128xf32>
    %67 = vector.shape_cast %64 : vector<1x128xf32> to vector<1x1x128xf32>
    tpu.vector_store %arg9[%c0_38, %c0_39, %c0_40], %67 {strides = array<i32>} : memref<1x1x128xf32, #tpu.memory_space<vmem>>, vector<1x1x128xf32>,
    return
  }
  func.func @transform_0(%arg0: i32, %arg1: i32) -> (i32, i32) {
    %c2_i32 = arith.constant 2 : i32
    %0 = arith.muli %arg0, %c2_i32 : i32
    %1 = arith.addi %0, %arg1 : i32
    %c0_i32 = arith.constant 0 : i32
    %c0_i32_0 = arith.constant 0 : i32
    return %1, %c0_i32 : i32, i32
  }
  func.func @transform_1(%arg0: i32, %arg1: i32) -> (i32, i32) {
    %c0_i32 = arith.constant 0 : i32
    %c0_i32_0 = arith.constant 0 : i32
    %c0_i32_1 = arith.constant 0 : i32
    return %c0_i32, %c0_i32_0 : i32, i32
  }
  func.func @transform_2(%arg0: i32, %arg1: i32) -> (i32, i32) {
    %c0_i32 = arith.constant 0 : i32
    %c0_i32_0 = arith.constant 0 : i32
    %c0_i32_1 = arith.constant 0 : i32
    return %c0_i32, %c0_i32_0 : i32, i32
  }
  func.func @transform_3(%arg0: i32, %arg1: i32) -> (i32, i32) {
    %c0_i32 = arith.constant 0 : i32
    %c0_i32_0 = arith.constant 0 : i32
    %c0_i32_1 = arith.constant 0 : i32
    return %c0_i32, %c0_i32_0 : i32, i32
  }
  func.func @transform_4(%arg0: i32, %arg1: i32) -> (i32, i32) {
    %c0_i32 = arith.constant 0 : i32
    %c0_i32_0 = arith.constant 0 : i32
    %c0_i32_1 = arith.constant 0 : i32
    return %c0_i32, %c0_i32_0 : i32, i32
  }
  func.func @transform_5(%arg0: i32, %arg1: i32) -> (i32, i32, i32) {
    %c0_i32 = arith.constant 0 : i32
    %c0_i32_0 = arith.constant 0 : i32
    %c0_i32_1 = arith.constant 0 : i32
    %c0_i32_2 = arith.constant 0 : i32
    return %c0_i32, %c0_i32_0, %c0_i32_1 : i32, i32, i32
  }
  func.func @transform_6(%arg0: i32, %arg1: i32) -> (i32, i32) {
    %c0_i32 = arith.constant 0 : i32
    %c0_i32_0 = arith.constant 0 : i32
    %c0_i32_1 = arith.constant 0 : i32
    return %c0_i32, %c0_i32_0 : i32, i32
  }
  func.func @transform_7(%arg0: i32, %arg1: i32) -> (i32, i32, i32) {
    %c0_i32 = arith.constant 0 : i32
    %c0_i32_0 = arith.constant 0 : i32
    %c0_i32_1 = arith.constant 0 : i32
    return %arg0, %c0_i32, %c0_i32_0 : i32, i32, i32
  }
}

</mosaic_0001>

<bundles_post_ra>
// kernel: tpu_custom_call.1
= control target key start
LH: loop header
LB: loop body
LE: loop exit
PB: predicated region body
PF: predicated region fallthrough
CT: control target
= control target key end

     0   :  { %12 = vsyncpa [#allocation3], 0  ;;  %s13401_s24 = smov 0   ;;  %s13403_s25 = smov 0   ;;  %s18786_s0 = inlined_call_operand.vmem [shape: f32[2048,4], index: 0, kind: input, shape index: {}]   ;;  %s18787_s1 = inlined_call_operand.vmem [shape: f32[4,32], index: 1, kind: input, shape index: {}]   ;;  %s18788_s2 = inlined_call_operand.vmem [shape: f32[1,32], index: 2, kind: input, shape index: {}]   ;;  %s18789_s3 = inlined_call_operand.vmem [shape: f32[32,128], index: 3, kind: input, shape index: {}]   ;;  %s18790_s4 = inlined_call_operand.vmem [shape: f32[1,128], index: 4, kind: input, shape index: {}]   ;;  %s18791_s5 = inlined_call_operand.vmem [shape: f32[4,16,128], index: 5, kind: input, shape index: {}]   ;;  %s18792_s6 = inlined_call_operand.vmem [shape: f32[2,128], index: 6, kind: input, shape index: {}]   ;;  %s18793_s7 = inlined_call_operand.hbm [shape: f32[1,1,128], index: 7, kind: output, shape index: {}]  }
   0x1   :  { %s13405_s26 = smov 0  }
   0x2 LB: > { %s10040_s27 = sadd.s32 4294967295, %s13354_s26   ;;  %s27_s28 = sadd.s32 1, %s13350_s25  ;;  %s13354_s26 = sphi %s13405_s26, %s18_s26   ;;  %s13350_s25 = sphi %s13403_s25, %s20078_s25   ;;  %s13346_s24 = sphi %s13401_s24, %s20077_s24  }
   0x3   : > { %p28_p0 = scmp.ge.s32.totalorder %s27_s28, 2  ;;  %p10043_p1 = scmp.ge.s32.totalorder %s13354_s26, 1 }
   0x4   : > { %p259_p2 = scmp.lt.s32.totalorder %s13354_s26, 3 }
   0x5   : > { %s20080_s28 = smov (%p28_p0, %s27_s28), 0 }
   0x6   : > { %p260_p3 = pnand %p10043_p1, %p259_p2 }
   0x8   : > { %263 = sbr.rel (%p260_p3) target bundleno = 1728 (0x6c0), region = 48 }
   0xd   : > { %s10044_s29 = sshll.u32 %s13346_s24, 7  ;;  %p10046_p5 = scmp.ne.s32.totalorder %s13346_s24, 0 }
   0xe   : > { %p291_p4 = scmp.lt.s32.totalorder %s10044_s29, 255 }
   0xf   : > { %301 = sbr.rel (%p10046_p5) target bundleno = 22 (0x16), region = 52 }
  0x10   : > { %s20082_s29 = smov (!%p291_p4, %s10044_s29), 255 }
  0x11   : > { %s10045_s30 = sshll.u32 %s20082_s29, 3 }
  0x12   : > { %s13423_s10 = scalar_lea.vmem %s18786_s0, %s10045_s30 }
  0x14   : > { %v13356_v0 = vmov 0.0  }
  0x15   : > { %302 = vst [vmem:[#allocation2] sm:$0x1] %v13356_v0 }
  0x16 PF: > { %v431_v1 = vld [vmem:[%s18787_s1] sm:$0xf]  ;;  %vm824_vm0 = vcmask 1043456   ;;  %v13429_v2 = vld [vmem:[%s13423_s10 + $0x10] sm:$0xff]  ;;  %s13357_s13 = smov 4   ;;  %vm439_vm1 = vcmask 31744  }
  0x17   : > { %v13432_v3 = vld [vmem:[%s13423_s10] sm:$0xff]  ;;  %11737 = vmatprep.subr.msk.mxu0 %vm824_vm0, %v431_v1  ;;  %3406 = vrot.lane.b32.xlu1 %v13429_v2, %s13357_s13  ;;  %v13437_v4 = vld [vmem:[%s13423_s10 + $0x8] sm:$0xff]  ;;  %v13442_v5 = vld [vmem:[%s13423_s10 + $0x18] sm:$0xff]  ;;  %v2764_v40 = vmul.f32 %v13429_v2, %v13429_v2  ;;  %s13358_s14 = smov 8   ;;  %s13359_s15 = smov 12   ;;  %v3148_v53 = vmul.f32 2.0, %v13429_v2 }
  0x18   : > { %3402 = vrot.lane.b32.xlu0 %v13432_v3, %s13357_s13  ;;  %11738 = vmatpush3.msk.msra.mxu0 %vm824_vm0, %v431_v1  ;;  %v13455_v6 = vld [vmem:[%s13423_s10 + $0x28] sm:$0xff]  ;;  %v13458_v7 = vld [vmem:[%s13423_s10 + $0x20] sm:$0xff]  ;;  %v13469_v8 = vld [vmem:[%s13423_s10 + $0x38] sm:$0xff]  ;;  %v2763_v26 = vmul.f32 %v13437_v4, %v13437_v4  ;;  %v2762_v29 = vmul.f32 %v13432_v3, %v13432_v3  ;;  %v3147_v35 = vmul.f32 2.0, %v13437_v4  ;;  %v2765_v36 = vmul.f32 %v13442_v5, %v13442_v5  ;;  %s13360_s24 = smov [#allocation2]   ;;  %p18762_p6 = scmp.eq.s32.totalorder %s10040_s27, 1 }
  0x19   : > { %11739 = vmatprep.mubr.msk.f32.mxu0 %vm439_vm1, %v13432_v3  ;;  %v13472_v9 = vld [vmem:[%s13423_s10 + $0x30] sm:$0xff]  ;;  %v13483_v10 = vld [vmem:[%s13423_s10 + $0x48] sm:$0xff]  ;;  %v13486_v11 = vld [vmem:[%s13423_s10 + $0x40] sm:$0xff]  ;;  %v3146_v39 = vmul.f32 2.0, %v13432_v3  ;;  %v10308_v46 = vadd.f32 -1.0, %v2764_v40  ;;  %v3149_v49 = vmul.f32 2.0, %v13442_v5  ;;  %v2767_v50 = vmul.f32 %v13455_v6, %v13455_v6 }
  0x1a   : > { %11740 = vmatmul.mubr.msk.f32.vlgmr.msra.gmra.mxu0 %vm439_vm1, %v13437_v4  ;;  %v13497_v12 = vld [vmem:[%s13423_s10 + $0x58] sm:$0xff]  ;;  %v13500_v13 = vld [vmem:[%s13423_s10 + $0x50] sm:$0xff]  ;;  %v13511_v14 = vld [vmem:[%s13423_s10 + $0x68] sm:$0xff]  ;;  %v10307_v30 = vadd.f32 -1.0, %v2763_v26  ;;  %v10306_v33 = vadd.f32 -1.0, %v2762_v29  ;;  %v10309_v43 = vadd.f32 -1.0, %v2765_v36  ;;  %v2766_v54 = vmul.f32 %v13458_v7, %v13458_v7 }
  0x1b   : > { %3408 = vrot.lane.b32.xlu1 %v13442_v5, %s13357_s13  ;;  %11742 = vmatprep.mubr.msk.f32.mxu0 %vm439_vm1, %v13429_v2  ;;  %v13514_v15 = vld [vmem:[%s13423_s10 + $0x60] sm:$0xff]  ;;  %v13525_v16 = vld [vmem:[%s13423_s10 + $0x78] sm:$0xff]  ;;  %v13528_v17 = vld [vmem:[%s13423_s10 + $0x70] sm:$0xff]  ;;  %v3020_v52 = vmul.f32 %v10308_v46, %v13429_v2  ;;  %v10311_v57 = vadd.f32 -1.0, %v2767_v50  ;;  %v3151_v63 = vmul.f32 2.0, %v13455_v6  ;;  %v2769_v0 = vmul.f32 %v13469_v8, %v13469_v8  ;;  %s9990_s29 = sshll.u32 %s13360_s24, 4  ;;  %s9991_s29 = int_to_ptr.vmem [resolvable:$true] %s9990_s29 }
  0x1c   : > { %3404 = vrot.lane.b32.xlu0 %v13437_v4, %s13357_s13  ;;  %v13539_v18 = vld [vmem:[%s13423_s10 + $0x88] sm:$0xff]  ;;  %v13542_v19 = vld [vmem:[%s13423_s10 + $0x80] sm:$0xff]  ;;  %v13553_v20 = vld [vmem:[%s13423_s10 + $0x98] sm:$0xff]  ;;  %v3019_v34 = vmul.f32 %v10307_v30, %v13437_v4  ;;  %v3018_v38 = vmul.f32 %v10306_v33, %v13432_v3  ;;  %v3021_v48 = vmul.f32 %v10309_v43, %v13442_v5  ;;  %v10310_v60 = vadd.f32 -1.0, %v2766_v54  ;;  %s13304_s8 = scalar_lea.vmem %s9991_s29, 16  ;;  %s13310_s9 = scalar_lea.vmem %s9991_s29, 32 }
  0x1d   : > { %v13556_v21 = vld [vmem:[%s13423_s10 + $0x90] sm:$0xff]  ;;  %v13567_v22 = vld [vmem:[%s13423_s10 + $0xa8] sm:$0xff]  ;;  %v13570_v23 = vld [vmem:[%s13423_s10 + $0xa0] sm:$0xff]  ;;  %v3276_v58 = vsub.f32 %v3020_v52, %v3148_v53  ;;  %v3023_v62 = vmul.f32 %v10311_v57, %v13455_v6  ;;  %v3150_v3 = vmul.f32 2.0, %v13458_v7  ;;  %v2768_v4 = vmul.f32 %v13472_v9, %v13472_v9  ;;  %p13305_p7 = scmp.ne.s32.totalorder %s9991_s29, %s13304_s8  ;;  %p13311_p10 = scmp.lt.s32.totalorder %s9991_s29, %s9991_s29 }
  0x1e   : > { %11743 = vmatmul.mubr.msk.f32.gmra.mxu0 %vm439_vm1, %v13442_v5  ;;  %v13581_v24 = vld [vmem:[%s13423_s10 + $0xb8] sm:$0xff]  ;;  %v13584_v25 = vld [vmem:[%s13423_s10 + $0xb0] sm:$0xff]  ;;  %v13597_v27 = vld [vmem:[%s13423_s10 + $0xc8] sm:$0xff]  ;;  %v3275_v42 = vsub.f32 %v3019_v34, %v3147_v35  ;;  %v3274_v44 = vsub.f32 %v3018_v38, %v3146_v39  ;;  %v3277_v56 = vsub.f32 %v3021_v48, %v3149_v49  ;;  %v3022_v2 = vmul.f32 %v10310_v60, %v13458_v7  ;;  %p13312_p11 = scmp.lt.s32.totalorder %s13310_s9, %s13304_s8 }
  0x1f   : > { %3412 = vrot.lane.b32.xlu1 %v13455_v6, %s13357_s13  ;;  %11745 = vmatprep.mubr.msk.f32.mxu0 %vm439_vm1, %v13458_v7  ;;  %v13600_v28 = vld [vmem:[%s13423_s10 + $0xc0] sm:$0xff]  ;;  %v13613_v31 = vld [vmem:[%s13423_s10 + $0xd8] sm:$0xff]  ;;  %v13616_v32 = vld [vmem:[%s13423_s10 + $0xd0] sm:$0xff]  ;;  %v10313_v26 = vadd.f32 -1.0, %v2769_v0  ;;  %v3153_v35 = vmul.f32 2.0, %v13469_v8  ;;  %v2771_v36 = vmul.f32 %v13483_v10, %v13483_v10  ;;  %v3152_v40 = vmul.f32 2.0, %v13472_v9  ;;  %p13306_p8 = pnand %p13305_p7, %p18762_p6 }
  0x20   : > { %3410 = vrot.lane.b32.xlu0 %v13458_v7, %s13357_s13  ;;  %v13631_v37 = vld [vmem:[%s13423_s10 + $0xe0] sm:$0xff]  ;;  %v13643_v41 = vld [vmem:[%s13423_s10 + $0xe8] sm:$0xff]  ;;  %v13647_v45 = vld [vmem:[%s13423_s10 + $0xf0] sm:$0xff]  ;;  %v3278_v29 = vsub.f32 %v3022_v2, %v3150_v3  ;;  %v2772_v0 = vmul.f32 %v13500_v13, %v13500_v13  ;;  %vm1672_vm2 = vcmask 261120   ;;  %vm4938_vm3 = vcmask 64512   ;;  %p13313_p12 = por %p13312_p11, %p13311_p10 }
  0x21   : > { %v13655_v47 = vld [vmem:[%s13423_s10 + $0xf8] sm:$0xff]  ;;  %v13663_v51 = vld [vmem:[%s13423_s10 + $0x100] sm:$0xff]  ;;  %v13675_v55 = vld [vmem:[%s13423_s10 + $0x108] sm:$0xff]  ;;  %v3025_v34 = vmul.f32 %v10313_v26, %v13469_v8  ;;  %vm5067_vm4 = vcmask 97280   ;;  %vm5198_vm5 = vcmask 130048   ;;  %vm9313_vm6 = vcmask 7168   ;;  %p13307_p9 = pneg %p13306_p8 }
  0x22   : > { %11746 = vmatmul.mubr.msk.f32.gmra.mxu0 %vm439_vm1, %v13455_v6  ;;  %v13679_v59 = vld [vmem:[%s13423_s10 + $0x110] sm:$0xff]  ;;  %v13687_v61 = vld [vmem:[%s13423_s10 + $0x118] sm:$0xff]  ;;  %v13695_v1 = vld [vmem:[%s13423_s10 + $0x120] sm:$0xff]  ;;  %v3279_v6 = vsub.f32 %v3023_v62, %v3151_v63  ;;  %v3154_v63 = vmul.f32 2.0, %v13486_v11 }
  0x23   : > { %3416 = vrot.lane.b32.xlu1 %v13469_v8, %s13357_s13  ;;  %11748 = vmatprep.mubr.msk.f32.mxu0 %vm439_vm1, %v13472_v9  ;;  %v13707_v5 = vld [vmem:[%s13423_s10 + $0x128] sm:$0xff]  ;;  %v13711_v7 = vld [vmem:[%s13423_s10 + $0x130] sm:$0xff]  ;;  %v343_v38 = vld [vmem:[%s13423_s10 + $0x140] sm:$0xff]  ;;  %p13314_p13 = pnand %p13313_p12, %p13307_p9 }
  0x24   : > { %3414 = vrot.lane.b32.xlu0 %v13472_v9, %s13357_s13  ;;  %v345_v49 = vld [vmem:[%s13423_s10 + $0x150] sm:$0xff]  ;;  %v1662_v52 = vld [vmem:[%s18789_s3 + $0x8] sm:$0xff]  ;;  %v346_v53 = vld [vmem:[%s13423_s10 + $0x158] sm:$0xff] }
  0x26   : > { %11749 = vmatmul.mubr.msk.f32.gmra.mxu0 %vm439_vm1, %v13469_v8  ;;  %v344_v8 = vld [vmem:[%s13423_s10 + $0x148] sm:$0xff] }
  0x27   : > { %3420 = vrot.lane.b32.xlu1 %v13483_v10, %s13357_s13  ;;  %11751 = vmatprep.mubr.msk.f32.mxu0 %vm439_vm1, %v13486_v11 }
  0x28   : > { %3418 = vrot.lane.b32.xlu0 %v13486_v11, %s13357_s13 }
  0x2a   : > { %11752 = vmatmul.mubr.msk.f32.gmra.mxu0 %vm439_vm1, %v13483_v10 }
  0x2b   : > { %3424 = vrot.lane.b32.xlu1 %v13497_v12, %s13357_s13  ;;  %11754 = vmatprep.mubr.msk.f32.mxu0 %vm439_vm1, %v13500_v13 }
  0x2c   : > { %3422 = vrot.lane.b32.xlu0 %v13500_v13, %s13357_s13 }
  0x2e   : > { %11755 = vmatmul.mubr.msk.f32.gmra.mxu0 %vm439_vm1, %v13497_v12 }
  0x2f   : > { %3428 = vrot.lane.b32.xlu1 %v13511_v14, %s13357_s13  ;;  %11757 = vmatprep.mubr.msk.f32.mxu0 %vm439_vm1, %v13514_v15 }
  0x30   : > { %3426 = vrot.lane.b32.xlu0 %v13514_v15, %s13357_s13 }
  0x32   : > { %11758 = vmatmul.mubr.msk.f32.gmra.mxu0 %vm439_vm1, %v13511_v14 }
  0x33   : > { %3432 = vrot.lane.b32.xlu1 %v13525_v16, %s13357_s13  ;;  %11760 = vmatprep.mubr.msk.f32.mxu0 %vm439_vm1, %v13528_v17 }
  0x34   : > { %3430 = vrot.lane.b32.xlu0 %v13528_v17, %s13357_s13 }
  0x36   : > { %11761 = vmatmul.mubr.msk.f32.gmra.mxu0 %vm439_vm1, %v13525_v16 }
  0x37   : > { %3436 = vrot.lane.b32.xlu1 %v13539_v18, %s13357_s13  ;;  %11763 = vmatprep.mubr.msk.f32.mxu0 %vm439_vm1, %v13542_v19 }
  0x38   : > { %3434 = vrot.lane.b32.xlu0 %v13542_v19, %s13357_s13 }
  0x3a   : > { %11764 = vmatmul.mubr.msk.f32.gmra.mxu0 %vm439_vm1, %v13539_v18 }
  0x3b   : > { %3440 = vrot.lane.b32.xlu1 %v13553_v20, %s13357_s13  ;;  %11766 = vmatprep.mubr.msk.f32.mxu0 %vm439_vm1, %v13556_v21 }
  0x3c   : > { %3438 = vrot.lane.b32.xlu0 %v13556_v21, %s13357_s13 }
  0x3e   : > { %11767 = vmatmul.mubr.msk.f32.gmra.mxu0 %vm439_vm1, %v13553_v20 }
  0x3f   : > { %3444 = vrot.lane.b32.xlu1 %v13567_v22, %s13357_s13  ;;  %11769 = vmatprep.mubr.msk.f32.mxu0 %vm439_vm1, %v13570_v23 }
  0x40   : > { %3442 = vrot.lane.b32.xlu0 %v13570_v23, %s13357_s13 }
  0x42   : > { %11770 = vmatmul.mubr.msk.f32.gmra.mxu0 %vm439_vm1, %v13567_v22 }
  0x43   : > { %3448 = vrot.lane.b32.xlu1 %v13581_v24, %s13357_s13  ;;  %11772 = vmatprep.mubr.msk.f32.mxu0 %vm439_vm1, %v13584_v25 }
  0x44   : > { %3446 = vrot.lane.b32.xlu0 %v13584_v25, %s13357_s13 }
  0x46   : > { %11773 = vmatmul.mubr.msk.f32.gmra.mxu0 %vm439_vm1, %v13581_v24 }
  0x47   : > { %3452 = vrot.lane.b32.xlu1 %v13597_v27, %s13357_s13  ;;  %11775 = vmatprep.mubr.msk.f32.mxu0 %vm439_vm1, %v13600_v28 }
  0x48   : > { %3450 = vrot.lane.b32.xlu0 %v13600_v28, %s13357_s13 }
  0x4a   : > { %11776 = vmatmul.mubr.msk.f32.gmra.mxu0 %vm439_vm1, %v13597_v27 }
  0x4b   : > { %3456 = vrot.lane.b32.xlu1 %v13613_v31, %s13357_s13  ;;  %11778 = vmatprep.mubr.msk.f32.mxu0 %vm439_vm1, %v13616_v32 }
  0x4c   : > { %3454 = vrot.lane.b32.xlu0 %v13616_v32, %s13357_s13 }
  0x4e   : > { %11779 = vmatmul.mubr.msk.f32.gmra.mxu0 %vm439_vm1, %v13613_v31 }
  0x4f   : > { %3916 = vrot.lane.b32.xlu1 %v10307_v30, %s13358_s14  ;;  %11781 = vmatprep.mubr.msk.f32.mxu0 %vm439_vm1, %v13631_v37  ;;  %v10312_v30 = vadd.f32 -1.0, %v2768_v4  ;;  %v349_v4 = vld [vmem:[%s13423_s10 + $0x170] sm:$0xff] }
  0x50   : > { %3914 = vrot.lane.b32.xlu0 %v10306_v33, %s13358_s14  ;;  %v13719_v33 = vld [vmem:[%s13423_s10 + $0x138] sm:$0xff] }
  0x51   : > { %v3024_v39 = vmul.f32 %v10312_v30, %v13472_v9  ;;  %v1663_v9 = vld [vmem:[%s18789_s3 + $0x10] sm:$0xff] }
  0x52   : > { %11782 = vmatmul.mubr.msk.f32.gmra.mxu0 %vm439_vm1, %v13643_v41 }
  0x53   : > { %4428 = vrot.lane.b32.xlu1 %v3275_v42, %s13359_s15  ;;  %11784 = vmatprep.mubr.msk.f32.mxu0 %vm439_vm1, %v13647_v45  ;;  %v2770_v42 = vmul.f32 %v13486_v11, %v13486_v11  ;;  %v3280_v48 = vsub.f32 %v3024_v39, %v3152_v40  ;;  %v2774_v39 = vmul.f32 %v13514_v15, %v13514_v15 }
  0x54   : > { %4426 = vrot.lane.b32.xlu0 %v3274_v44, %s13359_s15  ;;  %v3281_v44 = vsub.f32 %v3025_v34, %v3153_v35  ;;  %v2775_v34 = vmul.f32 %v13511_v14, %v13511_v14  ;;  %v351_v35 = vld [vmem:[%s13423_s10 + $0x180] sm:$0xff] }
  0x55   : > { %v10314_v50 = vadd.f32 -1.0, %v2770_v42 }
  0x56   : > { %11785 = vmatmul.mubr.msk.f32.gmra.mxu0 %vm439_vm1, %v13655_v47  ;;  %v10319_v42 = vadd.f32 -1.0, %v2775_v34 }
  0x57   : > { %3920 = vrot.lane.b32.xlu1 %v10309_v43, %s13358_s14  ;;  %11787 = vmatprep.mubr.msk.f32.mxu0 %vm439_vm1, %v13663_v51  ;;  %v1664_v43 = vld [vmem:[%s18789_s3 + $0x18] sm:$0xff]  ;;  %v3026_v62 = vmul.f32 %v10314_v50, %v13486_v11 }
  0x58   : > { %3918 = vrot.lane.b32.xlu0 %v10308_v46, %s13358_s14  ;;  %11931 = vmatprep.subr.mxu1 %v1664_v43  ;;  %v10315_v46 = vadd.f32 -1.0, %v2771_v36 }
  0x59   : > { %11932 = vmatpush3.msra.mxu1 %v1664_v43  ;;  %v3282_v11 = vsub.f32 %v3026_v62, %v3154_v63  ;;  %v3161_v63 = vmul.f32 2.0, %v13525_v16 }
  0x5a   : > { %11788 = vmatmul.mubr.msk.f32.gmra.mxu0 %vm439_vm1, %v13675_v55  ;;  %11933 = vmatprep.subr.mxu1 %v1663_v9  ;;  %v3027_v54 = vmul.f32 %v10315_v46, %v13483_v10 }
  0x5b   : > { %4432 = vrot.lane.b32.xlu1 %v3277_v56, %s13359_s15  ;;  %11790 = vmatprep.mubr.msk.f32.mxu0 %vm439_vm1, %v13679_v59  ;;  %v3155_v56 = vmul.f32 2.0, %v13483_v10  ;;  %v348_v10 = vld [vmem:[%s13423_s10 + $0x168] sm:$0xff] }
  0x5c   : > { %4430 = vrot.lane.b32.xlu0 %v3276_v58, %s13359_s15  ;;  %11934 = vmatpush3.msra.mxu1 %v1663_v9  ;;  %v1661_v58 = vld [vmem:[%s18789_s3] sm:$0xff]  ;;  %v3159_v9 = vmul.f32 2.0, %v13511_v14 }
  0x5d   : > { %11935 = vmatprep.subr.mxu1 %v1662_v52  ;;  %v3283_v2 = vsub.f32 %v3027_v54, %v3155_v56 }
  0x5e   : > { %11791 = vmatmul.mubr.msk.f32.gmra.mxu0 %vm439_vm1, %v13687_v61  ;;  %11936 = vmatpush3.msra.mxu1 %v1662_v52  ;;  %v3158_v52 = vmul.f32 2.0, %v13514_v15 }
  0x5f   : > { %3924 = vrot.lane.b32.xlu1 %v10311_v57, %s13358_s14  ;;  %11793 = vmatprep.mubr.msk.f32.mxu0 %vm439_vm1, %v13695_v1  ;;  %v2773_v57 = vmul.f32 %v13497_v12, %v13497_v12 }
  0x60   : > { %3922 = vrot.lane.b32.xlu0 %v10310_v60, %s13358_s14  ;;  %v347_v60 = vld [vmem:[%s13423_s10 + $0x160] sm:$0xff]  ;;  %11937 = vmatprep.subr.mxu1 %v1661_v58 }
  0x61   : > { %v10317_v3 = vadd.f32 -1.0, %v2773_v57  ;;  %11938 = vmatpush3.msra.mxu1 %v1661_v58  ;;  %v357_v58 = vld [vmem:[%s13423_s10 + $0x1b0] sm:$0xff] }
  0x62   : > { %11794 = vmatmul.mubr.msk.f32.gmra.mxu0 %vm439_vm1, %v13707_v5 }
  0x63   : > { %4436 = vrot.lane.b32.xlu1 %v3279_v6, %s13359_s15  ;;  %11796 = vmatprep.mubr.msk.f32.mxu0 %vm439_vm1, %v13711_v7  ;;  %v10316_v6 = vadd.f32 -1.0, %v2772_v0  ;;  %v2779_v0 = vmul.f32 %v13539_v18, %v13539_v18 }
  0x64   : > { %4434 = vrot.lane.b32.xlu0 %v3278_v29, %s13359_s15  ;;  %v3029_v29 = vmul.f32 %v10317_v3, %v13497_v12 }
  0x65   : > { %v3028_v36 = vmul.f32 %v10316_v6, %v13500_v13 }
  0x66   : > { %11797 = vmatmul.mubr.msk.f32.gmra.mxu0 %vm439_vm1, %v13719_v33 }
  0x67   : > { %3928 = vrot.lane.b32.xlu1 %v10313_v26, %s13358_s14  ;;  %11799 = vmatprep.mubr.msk.f32.mxu0 %vm439_vm1, %v343_v38  ;;  %v350_v26 = vld [vmem:[%s13423_s10 + $0x178] sm:$0xff]  ;;  %v3156_v38 = vmul.f32 2.0, %v13500_v13 }
  0x68   : > { %3926 = vrot.lane.b32.xlu0 %v10312_v30, %s13358_s14  ;;  %v3157_v30 = vmul.f32 2.0, %v13497_v12  ;;  %v352_v12 = vld [vmem:[%s13423_s10 + $0x188] sm:$0xff]  ;;  %v354_v13 = vld [vmem:[%s13423_s10 + $0x198] sm:$0xff] }
  0x69   : > { %v3284_v43 = vsub.f32 %v3028_v36, %v3156_v38  ;;  %v3163_v38 = vmul.f32 2.0, %v13539_v18 }
  0x6a   : > { %11800 = vmatmul.mubr.msk.f32.gmra.mxu0 %vm439_vm1, %v344_v8  ;;  %v3285_v40 = vsub.f32 %v3029_v29, %v3157_v30  ;;  %v353_v8 = vld [vmem:[%s13423_s10 + $0x190] sm:$0xff] }
  0x6b   : > { %4440 = vrot.lane.b32.xlu1 %v3281_v44, %s13359_s15  ;;  %11802 = vmatprep.mubr.msk.f32.mxu0 %vm439_vm1, %v345_v49  ;;  %v10318_v44 = vadd.f32 -1.0, %v2774_v39  ;;  %v355_v49 = vld [vmem:[%s13423_s10 + $0x1a0] sm:$0xff]  ;;  %v361_v29 = vld [vmem:[%s13423_s10 + $0x1d0] sm:$0xff]  ;;  %v2781_v39 = vmul.f32 %v13553_v20, %v13553_v20 }
  0x6c   : > { %4438 = vrot.lane.b32.xlu0 %v3280_v48, %s13359_s15  ;;  %v2777_v48 = vmul.f32 %v13525_v16, %v13525_v16 }
  0x6e   : > { %11803 = vmatmul.mubr.msk.f32.gmra.mxu0 %vm439_vm1, %v346_v53  ;;  %v2776_v53 = vmul.f32 %v13528_v17, %v13528_v17  ;;  %v10321_v56 = vadd.f32 -1.0, %v2777_v48 }
  0x6f   : > { %3932 = vrot.lane.b32.xlu1 %v10315_v46, %s13358_s14  ;;  %11805 = vmatprep.mubr.msk.f32.mxu0 %vm439_vm1, %v347_v60  ;;  %v3031_v46 = vmul.f32 %v10319_v42, %v13511_v14  ;;  %v356_v14 = vld [vmem:[%s13423_s10 + $0x1a8] sm:$0xff] }
  0x70   : > { %3930 = vrot.lane.b32.xlu0 %v10314_v50, %s13358_s14  ;;  %v3030_v50 = vmul.f32 %v10318_v44, %v13514_v15  ;;  %v10320_v60 = vadd.f32 -1.0, %v2776_v53  ;;  %v358_v15 = vld [vmem:[%s13423_s10 + $0x1b8] sm:$0xff]  ;;  %v3033_v62 = vmul.f32 %v10321_v56, %v13525_v16  ;;  %v360_v16 = vld [vmem:[%s13423_s10 + $0x1c8] sm:$0xff] }
  0x71   : > { %v3287_v54 = vsub.f32 %v3031_v46, %v3159_v9  ;;  %v10325_v46 = vadd.f32 -1.0, %v2781_v39  ;;  %v365_v9 = vld [vmem:[%s13423_s10 + $0x1f0] sm:$0xff]  ;;  %v2784_v39 = vmul.f32 %v13584_v25, %v13584_v25 }
  0x72   : > { %11806 = vmatmul.mubr.msk.f32.gmra.mxu0 %vm439_vm1, %v348_v10  ;;  %v3286_v57 = vsub.f32 %v3030_v50, %v3158_v52  ;;  %v359_v10 = vld [vmem:[%s13423_s10 + $0x1c0] sm:$0xff]  ;;  %v366_v52 = vld [vmem:[%s13423_s10 + $0x1f8] sm:$0xff] }
  0x73   : > { %4444 = vrot.lane.b32.xlu1 %v3283_v2, %s13359_s15  ;;  %11808 = vmatprep.mubr.msk.f32.mxu0 %vm439_vm1, %v349_v4  ;;  %v3032_v2 = vmul.f32 %v10320_v60, %v13528_v17  ;;  %v3289_v4 = vsub.f32 %v3033_v62, %v3161_v63  ;;  %v3037_v53 = vmul.f32 %v10325_v46, %v13553_v20 }
  0x74   : > { %4442 = vrot.lane.b32.xlu0 %v3282_v11, %s13359_s15  ;;  %v2778_v11 = vmul.f32 %v13542_v19, %v13542_v19 }
  0x76   : > { %11809 = vmatmul.mubr.msk.f32.gmra.mxu0 %vm439_vm1, %v350_v26  ;;  %v10322_v30 = vadd.f32 -1.0, %v2778_v11 }
  0x77   : > { %3936 = vrot.lane.b32.xlu1 %v10317_v3, %s13358_s14  ;;  %11811 = vmatprep.mubr.msk.f32.mxu0 %vm439_vm1, %v351_v35  ;;  %v3160_v3 = vmul.f32 2.0, %v13528_v17  ;;  %v362_v35 = vld [vmem:[%s13423_s10 + $0x1d8] sm:$0xff] }
  0x78   : > { %3934 = vrot.lane.b32.xlu0 %v10316_v6, %s13358_s14  ;;  %v10323_v6 = vadd.f32 -1.0, %v2779_v0 }
  0x79   : > { %v3288_v26 = vsub.f32 %v3032_v2, %v3160_v3  ;;  %v369_v3 = vld [vmem:[%s13423_s10 + $0x210] sm:$0xff] }
  0x7a   : > { %11812 = vmatmul.mubr.msk.f32.gmra.mxu0 %vm439_vm1, %v352_v12  ;;  %v3035_v36 = vmul.f32 %v10323_v6, %v13539_v18  ;;  %v363_v12 = vld [vmem:[%s13423_s10 + $0x1e0] sm:$0xff]  ;;  %v364_v18 = vld [vmem:[%s13423_s10 + $0x1e8] sm:$0xff] }
  0x7b   : > { %4448 = vrot.lane.b32.xlu1 %v3285_v40, %s13359_s15  ;;  %11814 = vmatprep.mubr.msk.f32.mxu0 %vm439_vm1, %v353_v8  ;;  %v3034_v40 = vmul.f32 %v10322_v30, %v13542_v19 }
  0x7c   : > { %4446 = vrot.lane.b32.xlu0 %v3284_v43, %s13359_s15  ;;  %v2780_v43 = vmul.f32 %v13556_v21, %v13556_v21 }
  0x7e   : > { %11815 = vmatmul.mubr.msk.f32.gmra.mxu0 %vm439_vm1, %v354_v13  ;;  %v3291_v13 = vsub.f32 %v3035_v36, %v3163_v38  ;;  %v10324_v48 = vadd.f32 -1.0, %v2780_v43  ;;  %v3166_v38 = vmul.f32 2.0, %v13570_v23 }
  0x7f   : > { %3940 = vrot.lane.b32.xlu1 %v10319_v42, %s13358_s14  ;;  %11817 = vmatprep.mubr.msk.f32.mxu0 %vm439_vm1, %v355_v49  ;;  %v3162_v42 = vmul.f32 2.0, %v13542_v19 }
  0x80   : > { %3938 = vrot.lane.b32.xlu0 %v10318_v44, %s13358_s14 }
  0x81   : > { %v3290_v19 = vsub.f32 %v3034_v40, %v3162_v42 }
  0x82   : > { %11818 = vmatmul.mubr.msk.f32.gmra.mxu0 %vm439_vm1, %v356_v14  ;;  %v3165_v14 = vmul.f32 2.0, %v13553_v20  ;;  %v5197_v20 = vld [vmem:[%s18791_s5 + $0x8] sm:$0xff] }
  0x83   : > { %4452 = vrot.lane.b32.xlu1 %v3287_v54, %s13359_s15  ;;  %11820 = vmatprep.mubr.msk.f32.mxu0 %vm439_vm1, %v357_v58  ;;  %v2783_v54 = vmul.f32 %v13567_v22, %v13567_v22  ;;  %v3164_v58 = vmul.f32 2.0, %v13556_v21 }
  0x84   : > { %4450 = vrot.lane.b32.xlu0 %v3286_v57, %s13359_s15  ;;  %v3036_v57 = vmul.f32 %v10324_v48, %v13556_v21  ;;  %12131 = vmatprep.subr.mxu0 %v5197_v20  ;;  %v368_v21 = vld [vmem:[%s13423_s10 + $0x208] sm:$0xff]  ;;  %v3293_v63 = vsub.f32 %v3037_v53, %v3165_v14  ;;  %v2787_v53 = vmul.f32 %v13597_v27, %v13597_v27  ;;  %v375_v14 = vld [vmem:[%s13423_s10 + $0x240] sm:$0xff] }
  0x85   : > { %v10327_v0 = vadd.f32 -1.0, %v2783_v54  ;;  %12132 = vmatpush3.msra.mxu0 %v5197_v20 }
  0x86   : > { %11821 = vmatmul.mubr.msk.f32.gmra.mxu0 %vm439_vm1, %v358_v15  ;;  %v3292_v2 = vsub.f32 %v3036_v57, %v3164_v58  ;;  %v2786_v57 = vmul.f32 %v13600_v28, %v13600_v28 }
  0x87   : > { %3944 = vrot.lane.b32.xlu1 %v10321_v56, %s13358_s14  ;;  %11823 = vmatprep.mubr.msk.f32.mxu0 %vm439_vm1, %v359_v10  ;;  %v367_v56 = vld [vmem:[%s13423_s10 + $0x200] sm:$0xff] }
  0x88   : > { %3942 = vrot.lane.b32.xlu0 %v10320_v60, %s13358_s14  ;;  %v2782_v60 = vmul.f32 %v13570_v23, %v13570_v23  ;;  %v5196_v10 = vld [vmem:[%s18791_s5] sm:$0xff] }
  0x89   : > { %v13830_v17 = vpop.permute.xlu1 %3406  ;;  %12133 = vmatprep.subr.mxu0 %v5196_v10 }
  0x8a   : > { %v13832_v34 = vpop.permute.xlu0 %3402  ;;  %11824 = vmatmul.mubr.msk.f32.gmra.mxu0 %vm439_vm1, %v360_v16  ;;  %v10326_v11 = vadd.f32 -1.0, %v2782_v60 }
  0x8b   : > { %4456 = vrot.lane.b32.xlu1 %v3289_v4, %s13359_s15  ;;  %11826 = vmatprep.mubr.msk.f32.mxu0 %vm439_vm1, %v361_v29  ;;  %v3167_v29 = vmul.f32 2.0, %v13567_v22 }
  0x8c   : > { %4454 = vrot.lane.b32.xlu0 %v3288_v26, %s13359_s15  ;;  %v3039_v26 = vmul.f32 %v10327_v0, %v13567_v22  ;;  %v3038_v36 = vmul.f32 %v10326_v11, %v13570_v23  ;;  %12134 = vmatpush3.msra.mxu0 %v5196_v10  ;;  %v372_v22 = vld [vmem:[%s13423_s10 + $0x228] sm:$0xff] }
  0x8d   : > { %v13848_v8 = vpop.permute.xlu1 %3408 }
  0x8e   : > { %v13850_v44 = vpop.permute.xlu0 %3404  ;;  %11827 = vmatmul.mubr.msk.f32.gmra.mxu0 %vm439_vm1, %v362_v35  ;;  %v371_v35 = vld [vmem:[%s13423_s10 + $0x220] sm:$0xff]  ;;  %v3295_v42 = vsub.f32 %v3039_v26, %v3167_v29  ;;  %v3294_v23 = vsub.f32 %v3038_v36, %v3166_v38  ;;  %v2789_v26 = vmul.f32 %v13613_v31, %v13613_v31  ;;  %v2788_v36 = vmul.f32 %v13616_v32, %v13616_v32 }
  0x8f   : > { %3948 = vrot.lane.b32.xlu1 %v10323_v6, %s13358_s14  ;;  %11829 = vmatprep.mubr.msk.f32.mxu0 %vm439_vm1, %v363_v12  ;;  %v370_v6 = vld [vmem:[%s13423_s10 + $0x218] sm:$0xff]  ;;  %v379_v29 = vld [vmem:[%s13423_s10 + $0x260] sm:$0xff] }
  0x90   : > { %3946 = vrot.lane.b32.xlu0 %v10322_v30, %s13358_s14  ;;  %v2785_v30 = vmul.f32 %v13581_v24, %v13581_v24 }
  0x91   : > { %v13858_v49 = vpop.permute.xlu1 %3412 }
  0x92   : > { %v13860_v50 = vpop.permute.xlu0 %3410  ;;  %11830 = vmatmul.mubr.msk.f32.gmra.mxu0 %vm439_vm1, %v364_v18  ;;  %v10329_v43 = vadd.f32 -1.0, %v2785_v30  ;;  %v373_v18 = vld [vmem:[%s13423_s10 + $0x230] sm:$0xff] }
  0x93   : > { %4460 = vrot.lane.b32.xlu1 %v3291_v13, %s13359_s15  ;;  %11832 = vmatprep.mubr.msk.f32.mxu0 %vm439_vm1, %v365_v9  ;;  %v10328_v13 = vadd.f32 -1.0, %v2784_v39  ;;  %v374_v9 = vld [vmem:[%s13423_s10 + $0x238] sm:$0xff] }
  0x94   : > { %4458 = vrot.lane.b32.xlu0 %v3290_v19, %s13359_s15 }
  0x95   : > { %v13876_v15 = vpop.permute.xlu1 %3416  ;;  %v3040_v54 = vmul.f32 %v10328_v13, %v13584_v25 }
  0x96   : > { %v13881_v62 = vpop.permute.xlu0 %3414  ;;  %11833 = vmatmul.mubr.msk.f32.gmra.mxu0 %vm439_vm1, %v366_v52  ;;  %v3169_v52 = vmul.f32 2.0, %v13581_v24 }
  0x97   : > { %3952 = vrot.lane.b32.xlu1 %v10325_v46, %s13358_s14  ;;  %11835 = vmatprep.mubr.msk.f32.mxu0 %vm439_vm1, %v367_v56  ;;  %v3168_v56 = vmul.f32 2.0, %v13584_v25 }
  0x98   : > { %3950 = vrot.lane.b32.xlu0 %v10324_v48, %s13358_s14  ;;  %v3041_v48 = vmul.f32 %v10329_v43, %v13581_v24  ;;  %v376_v24 = vld [vmem:[%s13423_s10 + $0x248] sm:$0xff] }
  0x99   : > { %v13892_v16 = vpop.permute.xlu1 %3420  ;;  %v3296_v25 = vsub.f32 %v3040_v54, %v3168_v56  ;;  %v3172_v54 = vmul.f32 2.0, %v13616_v32 }
  0x9a   : > { %v13894_v4 = vpop.permute.xlu0 %3418  ;;  %11836 = vmatmul.mubr.msk.f32.gmra.mxu0 %vm439_vm1, %v368_v21  ;;  %v3297_v20 = vsub.f32 %v3041_v48, %v3169_v52  ;;  %v10331_v21 = vadd.f32 -1.0, %v2787_v53  ;;  %v3173_v52 = vmul.f32 2.0, %v13613_v31  ;;  %v383_v53 = vld [vmem:[%s13423_s10 + $0x280] sm:$0xff] }
  0x9b   : > { %4464 = vrot.lane.b32.xlu1 %v3293_v63, %s13359_s15  ;;  %11838 = vmatprep.mubr.msk.f32.mxu0 %vm439_vm1, %v369_v3  ;;  %v377_v63 = vld [vmem:[%s13423_s10 + $0x250] sm:$0xff]  ;;  %v378_v3 = vld [vmem:[%s13423_s10 + $0x258] sm:$0xff] }
  0x9c   : > { %4462 = vrot.lane.b32.xlu0 %v3292_v2, %s13359_s15 }
  0x9d   : > { %v13910_v12 = vpop.permute.xlu1 %3424 }
  0x9e   : > { %v13912_v40 = vpop.permute.xlu0 %3422  ;;  %11839 = vmatmul.mubr.msk.f32.gmra.mxu0 %vm439_vm1, %v370_v6  ;;  %v3171_v6 = vmul.f32 2.0, %v13597_v27 }
  0x9f   : > { %3956 = vrot.lane.b32.xlu1 %v10327_v0, %s13358_s14  ;;  %11841 = vmatprep.mubr.msk.f32.mxu0 %vm439_vm1, %v371_v35  ;;  %v10330_v0 = vadd.f32 -1.0, %v2786_v57  ;;  %v3170_v35 = vmul.f32 2.0, %v13600_v28 }
  0xa0   : > { %3954 = vrot.lane.b32.xlu0 %v10326_v11, %s13358_s14  ;;  %v3043_v11 = vmul.f32 %v10331_v21, %v13597_v27  ;;  %v380_v27 = vld [vmem:[%s13423_s10 + $0x268] sm:$0xff] }
  0xa1   : > { %v13920_v46 = vpop.permute.xlu1 %3428  ;;  %v3042_v30 = vmul.f32 %v10330_v0, %v13600_v28 }
  0xa2   : > { %v13922_v19 = vpop.permute.xlu0 %3426  ;;  %11842 = vmatmul.mubr.msk.f32.gmra.mxu0 %vm439_vm1, %v372_v22  ;;  %v3299_v22 = vsub.f32 %v3043_v11, %v3171_v6  ;;  %v387_v6 = vld [vmem:[%s13423_s10 + $0x2a0] sm:$0xff] }
  0xa3   : > { %4468 = vrot.lane.b32.xlu1 %v3295_v42, %s13359_s15  ;;  %11844 = vmatprep.mubr.msk.f32.mxu0 %vm439_vm1, %v373_v18  ;;  %v10333_v42 = vadd.f32 -1.0, %v2789_v26  ;;  %v3298_v28 = vsub.f32 %v3042_v30, %v3170_v35  ;;  %v388_v35 = vld [vmem:[%s13423_s10 + $0x2a8] sm:$0xff] }
  0xa4   : > { %4466 = vrot.lane.b32.xlu0 %v3294_v23, %s13359_s15  ;;  %v10332_v23 = vadd.f32 -1.0, %v2788_v36 }
  0xa5   : > { %v13938_v58 = vpop.permute.xlu1 %3432  ;;  %v3045_v48 = vmul.f32 %v10333_v42, %v13613_v31  ;;  %v384_v31 = vld [vmem:[%s13423_s10 + $0x288] sm:$0xff] }
  0xa6   : > { %19014 = vst [vmem:[#allocation5_spill] sm:$0xff] %v13938_v58  ;;  %v13940_v60 = vpop.permute.xlu0 %3430  ;;  %11845 = vmatmul.mubr.msk.f32.gmra.mxu0 %vm439_vm1, %v374_v9  ;;  %v382_v9 = vld [vmem:[%s13423_s10 + $0x278] sm:$0xff] }
  0xa7   : > { %3960 = vrot.lane.b32.xlu1 %v10329_v43, %s13358_s14  ;;  %11847 = vmatprep.mubr.msk.f32.mxu0 %vm439_vm1, %v375_v14  ;;  %v381_v43 = vld [vmem:[%s13423_s10 + $0x270] sm:$0xff]  ;;  %v3044_v14 = vmul.f32 %v10332_v23, %v13616_v32 }
  0xa8   : > { %3958 = vrot.lane.b32.xlu0 %v10328_v13, %s13358_s14 }
  0xa9   : > { %v13948_v10 = vpop.permute.xlu1 %3436  ;;  %v3300_v32 = vsub.f32 %v3044_v14, %v3172_v54 }
  0xaa   : > { %19015 = vst [vmem:[#allocation6_spill] sm:$0xff] %v13948_v10  ;;  %v13950_v2 = vpop.permute.xlu0 %3434  ;;  %11848 = vmatmul.mubr.msk.f32.gmra.mxu0 %vm439_vm1, %v376_v24  ;;  %v3301_v24 = vsub.f32 %v3045_v48, %v3173_v52  ;;  %v2793_v48 = vmul.f32 %v13655_v47, %v13655_v47  ;;  %v391_v52 = vld [vmem:[%s13423_s10 + $0x2c0] sm:$0xff] }
  0xab   : > { %19016 = vst [vmem:[#allocation7_spill] sm:$0xff] %v13950_v2  ;;  %4472 = vrot.lane.b32.xlu1 %v3297_v20, %s13359_s15  ;;  %11850 = vmatprep.mubr.msk.f32.mxu0 %vm439_vm1, %v377_v63  ;;  %v2791_v20 = vmul.f32 %v13643_v41, %v13643_v41 }
  0xac   : > { %4470 = vrot.lane.b32.xlu0 %v3296_v25, %s13359_s15  ;;  %v2790_v25 = vmul.f32 %v13631_v37, %v13631_v37 }
  0xad   : > { %v13966_v38 = vpop.permute.xlu1 %3440  ;;  %v10335_v11 = vadd.f32 -1.0, %v2791_v20  ;;  %v393_v20 = vld [vmem:[%s13423_s10 + $0x2d0] sm:$0xff] }
  0xae   : > { %19017 = vst [vmem:[#allocation8_spill] sm:$0xff] %v13966_v38  ;;  %v13968_v39 = vpop.permute.xlu0 %3438  ;;  %11851 = vmatmul.mubr.msk.f32.gmra.mxu0 %vm439_vm1, %v378_v3  ;;  %v386_v3 = vld [vmem:[%s13423_s10 + $0x298] sm:$0xff]  ;;  %v10334_v26 = vadd.f32 -1.0, %v2790_v25 }
  0xaf   : > { %19018 = vst [vmem:[#allocation9_spill] sm:$0xff] %v13968_v39  ;;  %3964 = vrot.lane.b32.xlu1 %v10331_v21, %s13358_s14  ;;  %11853 = vmatprep.mubr.msk.f32.mxu0 %vm439_vm1, %v379_v29  ;;  %v385_v21 = vld [vmem:[%s13423_s10 + $0x290] sm:$0xff]  ;;  %v3047_v36 = vmul.f32 %v10335_v11, %v13643_v41 }
  0xb0   : > { %3962 = vrot.lane.b32.xlu0 %v10330_v0, %s13358_s14 }
  0xb1   : > { %v13976_v18 = vpop.permute.xlu1 %3444 }
  0xb2   : > { %19019 = vst [vmem:[#allocation10_spill] sm:$0xff] %v13976_v18  ;;  %v13978_v13 = vpop.permute.xlu0 %3442  ;;  %11854 = vmatmul.mubr.msk.f32.gmra.mxu0 %vm439_vm1, %v380_v27  ;;  %v3175_v27 = vmul.f32 2.0, %v13643_v41 }
  0xb3   : > { %19020 = vst [vmem:[#allocation11_spill] sm:$0xff] %v13978_v13  ;;  %4476 = vrot.lane.b32.xlu1 %v3299_v22, %s13359_s15  ;;  %11856 = vmatprep.mubr.msk.f32.mxu0 %vm439_vm1, %v381_v43  ;;  %v389_v22 = vld [vmem:[%s13423_s10 + $0x2b0] sm:$0xff] }
  0xb4   : > { %4474 = vrot.lane.b32.xlu0 %v3298_v28, %s13359_s15  ;;  %v3174_v28 = vmul.f32 2.0, %v13631_v37 }
  0xb5   : > { %v13990_v56 = vpop.permute.xlu1 %3448 }
  0xb6   : > { %19021 = vst [vmem:[#allocation12_spill] sm:$0xff] %v13990_v56  ;;  %v13992_v57 = vpop.permute.xlu0 %3446  ;;  %11857 = vmatmul.mubr.msk.f32.gmra.mxu0 %vm439_vm1, %v382_v9  ;;  %v3303_v9 = vsub.f32 %v3047_v36, %v3175_v27  ;;  %v3176_v36 = vmul.f32 2.0, %v13647_v45 }
  0xb7   : > { %19022 = vst [vmem:[#allocation13_spill] sm:$0xff] %v13992_v57  ;;  %3968 = vrot.lane.b32.xlu1 %v10333_v42, %s13358_s14  ;;  %11859 = vmatprep.mubr.msk.f32.mxu0 %vm439_vm1, %v383_v53  ;;  %v3046_v42 = vmul.f32 %v10334_v26, %v13631_v37  ;;  %v2792_v53 = vmul.f32 %v13647_v45, %v13647_v45  ;;  %v409_v57 = vld [vmem:[%s13423_s10 + $0x350] sm:$0xff] }
  0xb8   : > { %3966 = vrot.lane.b32.xlu0 %v10332_v23, %s13358_s14 }
  0xb9   : > { %v14004_v63 = vpop.permute.xlu1 %3452 }
  0xba   : > { %19023 = vst [vmem:[#allocation14_spill] sm:$0xff] %v14004_v63  ;;  %v14006_v0 = vpop.permute.xlu0 %3450  ;;  %11860 = vmatmul.mubr.msk.f32.gmra.mxu0 %vm439_vm1, %v384_v31  ;;  %v392_v31 = vld [vmem:[%s13423_s10 + $0x2c8] sm:$0xff] }
  0xbb   : > { %19024 = vst [vmem:[#allocation15_spill] sm:$0xff] %v14006_v0  ;;  %4480 = vrot.lane.b32.xlu1 %v3301_v24, %s13359_s15  ;;  %11862 = vmatprep.mubr.msk.f32.mxu0 %vm439_vm1, %v385_v21  ;;  %v10337_v24 = vadd.f32 -1.0, %v2793_v48  ;;  %v408_v0 = vld [vmem:[%s13423_s10 + $0x348] sm:$0xff] }
  0xbc   : > { %4478 = vrot.lane.b32.xlu0 %v3300_v32, %s13359_s15  ;;  %v10336_v32 = vadd.f32 -1.0, %v2792_v53 }
  0xbd   : > { %v14014_v29 = vpop.permute.xlu1 %3456 }
  0xbe   : > { %19025 = vst [vmem:[#allocation16_spill] sm:$0xff] %v14014_v29  ;;  %v14016_v30 = vpop.permute.xlu0 %3454  ;;  %11863 = vmatmul.mubr.msk.f32.gmra.mxu0 %vm439_vm1, %v386_v3  ;;  %v394_v3 = vld [vmem:[%s13423_s10 + $0x2d8] sm:$0xff]  ;;  %v403_v29 = vld [vmem:[%s13423_s10 + $0x320] sm:$0xff] }
  0xbf   : > { %19026 = vst [vmem:[#allocation17_spill] sm:$0xff] %v14016_v30  ;;  %3460 = vrot.lane.b32.xlu1 %v13643_v41, %s13357_s13  ;;  %11865 = vmatprep.mubr.msk.f32.mxu0 %vm439_vm1, %v387_v6  ;;  %v390_v41 = vld [vmem:[%s13423_s10 + $0x2b8] sm:$0xff]  ;;  %v3177_v6 = vmul.f32 2.0, %v13655_v47 }
  0xc0   : > { %3458 = vrot.lane.b32.xlu0 %v13631_v37, %s13357_s13  ;;  %v3302_v37 = vsub.f32 %v3046_v42, %v3174_v28  ;;  %v2795_v28 = vmul.f32 %v13675_v55, %v13675_v55 }
  0xc1   : > { %v14030_v43 = vpop.permute.xlu1 %3916 }
  0xc2   : > { %v14032_v23 = vpop.permute.xlu0 %3914  ;;  %11866 = vmatmul.mubr.msk.f32.gmra.mxu0 %vm439_vm1, %v388_v35  ;;  %v3048_v35 = vmul.f32 %v10336_v32, %v13647_v45  ;;  %v10339_v53 = vadd.f32 -1.0, %v2795_v28 }
  0xc3   : > { %3972 = vrot.lane.b32.xlu1 %v10335_v11, %s13358_s14  ;;  %11868 = vmatprep.mubr.msk.f32.mxu0 %vm439_vm1, %v389_v22  ;;  %v3049_v11 = vmul.f32 %v10337_v24, %v13655_v47 }
  0xc4   : > { %3970 = vrot.lane.b32.xlu0 %v10334_v26, %s13358_s14  ;;  %v395_v26 = vld [vmem:[%s13423_s10 + $0x2e0] sm:$0xff] }
  0xc5   : > { %v14044_v14 = vpop.permute.xlu1 %4428  ;;  %v3305_v42 = vsub.f32 %v3049_v11, %v3177_v6  ;;  %v3051_v11 = vmul.f32 %v10339_v53, %v13675_v55  ;;  %v3179_v6 = vmul.f32 2.0, %v13675_v55 }
  0xc6   : > { %v14046_v54 = vpop.permute.xlu0 %4426  ;;  %11869 = vmatmul.mubr.msk.f32.gmra.mxu0 %vm439_vm1, %v390_v41  ;;  %v397_v41 = vld [vmem:[%s13423_s10 + $0x2f0] sm:$0xff] }
  0xc7   : > { %4484 = vrot.lane.b32.xlu1 %v3303_v9, %s13359_s15  ;;  %11871 = vmatprep.mubr.msk.f32.mxu0 %vm439_vm1, %v391_v52  ;;  %v2794_v9 = vmul.f32 %v13663_v51, %v13663_v51  ;;  %v398_v52 = vld [vmem:[%s13423_s10 + $0x2f8] sm:$0xff] }
  0xc8   : > { %4482 = vrot.lane.b32.xlu0 %v3302_v37, %s13359_s15 }
  0xc9   : > { %v14054_v21 = vpop.permute.xlu1 %3920 }
  0xca   : > { %v14056_v25 = vpop.permute.xlu0 %3918  ;;  %11872 = vmatmul.mubr.msk.f32.gmra.mxu0 %vm439_vm1, %v392_v31  ;;  %v399_v31 = vld [vmem:[%s13423_s10 + $0x300] sm:$0xff] }
  0xcb   : > { %3464 = vrot.lane.b32.xlu1 %v13655_v47, %s13357_s13  ;;  %11874 = vmatprep.mubr.msk.f32.mxu0 %vm439_vm1, %v393_v20  ;;  %v396_v47 = vld [vmem:[%s13423_s10 + $0x2e8] sm:$0xff] }
  0xcc   : > { %3462 = vrot.lane.b32.xlu0 %v13647_v45, %s13357_s13  ;;  %v3304_v45 = vsub.f32 %v3048_v35, %v3176_v36  ;;  %v401_v35 = vld [vmem:[%s13423_s10 + $0x310] sm:$0xff] }
  0xcd   : > { %v14070_v27 = vpop.permute.xlu1 %4432 }
  0xce   : > { %v14072_v22 = vpop.permute.xlu0 %4430  ;;  %11875 = vmatmul.mubr.msk.f32.gmra.mxu0 %vm439_vm1, %v394_v3  ;;  %v400_v3 = vld [vmem:[%s13423_s10 + $0x308] sm:$0xff] }
  0xcf   : > { %3976 = vrot.lane.b32.xlu1 %v10337_v24, %s13358_s14  ;;  %11877 = vmatprep.mubr.msk.f32.mxu0 %vm439_vm1, %v395_v26  ;;  %v10338_v24 = vadd.f32 -1.0, %v2794_v9  ;;  %v14110_v26 = vld [vmem:[%s18788_s2] ss:$0 sm:$0xff]  ;;  %v3307_v9 = vsub.f32 %v3051_v11, %v3179_v6  ;;  %v404_v6 = vld [vmem:[%s13423_s10 + $0x328] sm:$0xff] }
  0xd0   : > { %3974 = vrot.lane.b32.xlu0 %v10336_v32, %s13358_s14 }
  0xd1   : > { %v14084_v48 = vpop.permute.xlu1 %3924  ;;  %v3050_v36 = vmul.f32 %v10338_v24, %v13663_v51 }
  0xd2   : > { %v14086_v37 = vpop.permute.xlu0 %3922  ;;  %11878 = vmatmul.mubr.msk.f32.gmra.mxu0 %vm439_vm1, %v396_v47  ;;  %v3178_v47 = vmul.f32 2.0, %v13663_v51 }
  0xd3   : > { %4488 = vrot.lane.b32.xlu1 %v3305_v42, %s13359_s15  ;;  %11880 = vmatprep.mubr.msk.f32.mxu0 %vm439_vm1, %v397_v41  ;;  %v402_v41 = vld [vmem:[%s13423_s10 + $0x318] sm:$0xff] }
  0xd4   : > { %4486 = vrot.lane.b32.xlu0 %v3304_v45, %s13359_s15 }
  0xd5   : > { %v14094_v20 = vpop.permute.xlu1 %4436 }
  0xd6   : > { %v14096_v32 = vpop.permute.xlu0 %4434  ;;  %11881 = vmatmul.mubr.msk.f32.gmra.mxu0 %vm439_vm1, %v398_v52  ;;  %v2797_v52 = vmul.f32 %v13687_v61, %v13687_v61 }
  0xd7   : > { %3468 = vrot.lane.b32.xlu1 %v13675_v55, %s13357_s13  ;;  %11883 = vmatprep.mubr.msk.f32.mxu0 %vm439_vm1, %v399_v31  ;;  %v3306_v31 = vsub.f32 %v3050_v36, %v3178_v47 }
  0xd8   : > { %3466 = vrot.lane.b32.xlu0 %v13663_v51, %s13357_s13  ;;  %v10341_v36 = vadd.f32 -1.0, %v2797_v52 }
  0xd9   : > { %v14115_v42 = vpop.permute.xlu1 %3928 }
  0xda   : > { %v14117_v28 = vpop.permute.xlu0 %3926  ;;  %v11741_v45 = vpop.f32.mrf.mxu0  ;;  %11884 = vmatmul.mubr.msk.f32.gmra.mxu0 %vm439_vm1, %v400_v3  ;;  %v2796_v3 = vmul.f32 %v13679_v59, %v13679_v59  ;;  %v3053_v52 = vmul.f32 %v10341_v36, %v13687_v61 }
  0xdb   : > { %v900_v55 = vadd.f32 %v11741_v45, %v14110_v26  ;;  %3980 = vrot.lane.b32.xlu1 %v10339_v53, %s13358_s14  ;;  %11886 = vmatprep.mubr.msk.f32.mxu0 %vm439_vm1, %v401_v35 }
  0xdc   : > { %3978 = vrot.lane.b32.xlu0 %v10338_v24, %s13358_s14  ;;  %v894_v51 = vpop.f32.mrf.mxu0 }
  0xdd   : > { %v895_v45 = vadd.f32 %v14110_v26, %v894_v51  ;;  %v14131_v53 = vpop.permute.xlu1 %4440  ;;  %12954 = vtanh.f32 %v900_v55  ;;  %v405_v51 = vld [vmem:[%s13423_s10 + $0x330] sm:$0xff]  ;;  %v10340_v55 = vadd.f32 -1.0, %v2796_v3 }
  0xde   : > { %v14133_v35 = vpop.permute.xlu0 %4438  ;;  %v11744_v11 = vpop.f32.mrf.mxu0  ;;  %11887 = vmatmul.mubr.msk.f32.gmra.mxu0 %vm439_vm1, %v402_v41 }
  0xdf   : > { %12956 = vtanh.f32 %v895_v45  ;;  %v910_v24 = vadd.f32 %v11744_v11, %v14110_v26  ;;  %4492 = vrot.lane.b32.xlu1 %v3307_v9, %s13359_s15  ;;  %11889 = vmatprep.mubr.msk.f32.mxu0 %vm439_vm1, %v403_v29  ;;  %v406_v9 = vld [vmem:[%s13423_s10 + $0x338] sm:$0xff]  ;;  %v407_v11 = vld [vmem:[%s13423_s10 + $0x340] sm:$0xff] }
  0xe0   : > { %4490 = vrot.lane.b32.xlu0 %v3306_v31, %s13359_s15  ;;  %v904_v47 = vpop.f32.mrf.mxu0  ;;  %v3181_v31 = vmul.f32 2.0, %v13687_v61 }
  0xe1   : > { %v905_v30 = vadd.f32 %v14110_v26, %v904_v47  ;;  %v14143_v63 = vpop.permute.xlu1 %3932  ;;  %12958 = vtanh.f32 %v910_v24  ;;  %v3180_v24 = vmul.f32 2.0, %v13679_v59 }
  0xe2   : > { %v14145_v41 = vpop.permute.xlu0 %3930  ;;  %v11747_v45 = vpop.f32.mrf.mxu0  ;;  %11890 = vmatmul.mubr.msk.f32.gmra.mxu0 %vm439_vm1, %v404_v6 }
  0xe3   : > { %12960 = vtanh.f32 %v905_v30  ;;  %v920_v29 = vadd.f32 %v11747_v45, %v14110_v26  ;;  %3472 = vrot.lane.b32.xlu1 %v13687_v61, %s13357_s13  ;;  %11892 = vmatprep.mubr.msk.f32.mxu0 %vm439_vm1, %v405_v51  ;;  %v3052_v30 = vmul.f32 %v10340_v55, %v13679_v59 }
  0xe4   : > { %3470 = vrot.lane.b32.xlu0 %v13679_v59, %s13357_s13  ;;  %v914_v3 = vpop.f32.mrf.mxu0  ;;  %v3309_v59 = vsub.f32 %v3053_v52, %v3181_v31 }
  0xe5   : > { %v915_v6 = vadd.f32 %v14110_v26, %v914_v3  ;;  %v14161_v47 = vpop.permute.xlu1 %4444  ;;  %12962 = vtanh.f32 %v920_v29  ;;  %v2799_v3 = vmul.f32 %v13707_v5, %v13707_v5  ;;  %v3308_v56 = vsub.f32 %v3052_v30, %v3180_v24 }
  0xe6   : > { %v14163_v51 = vpop.permute.xlu0 %4442  ;;  %v11750_v45 = vpop.f32.mrf.mxu0  ;;  %11893 = vmatmul.mubr.msk.f32.gmra.mxu0 %vm439_vm1, %v406_v9  ;;  %v2798_v9 = vmul.f32 %v13695_v1, %v13695_v1 }
  0xe7   : > { %12964 = vtanh.f32 %v915_v6  ;;  %v930_v61 = vadd.f32 %v11750_v45, %v14110_v26  ;;  %3984 = vrot.lane.b32.xlu1 %v10341_v36, %s13358_s14  ;;  %11895 = vmatprep.mubr.msk.f32.mxu0 %vm439_vm1, %v407_v11  ;;  %v410_v11 = vld [vmem:[%s13423_s10 + $0x358] sm:$0xff]  ;;  %v10343_v30 = vadd.f32 -1.0, %v2799_v3 }
  0xe8   : > { %3982 = vrot.lane.b32.xlu0 %v10340_v55, %s13358_s14  ;;  %v924_v29 = vpop.f32.mrf.mxu0  ;;  %v10342_v18 = vadd.f32 -1.0, %v2798_v9  ;;  %v412_v9 = vld [vmem:[%s13423_s10 + $0x368] sm:$0xff] }
  0xe9   : > { %v925_v6 = vadd.f32 %v14110_v26, %v924_v29  ;;  %v14177_v45 = vpop.permute.xlu1 %3936  ;;  %12966 = vtanh.f32 %v930_v61  ;;  %v411_v29 = vld [vmem:[%s13423_s10 + $0x360] sm:$0xff] }
  0xea   : > { %v14179_v36 = vpop.permute.xlu0 %3934  ;;  %v11753_v52 = vpop.f32.mrf.mxu0  ;;  %11896 = vmatmul.mubr.msk.f32.gmra.mxu0 %vm439_vm1, %v408_v0 }
  0xeb   : > { %v12955_v55 = vpop.eup %12954  ;;  %12968 = vtanh.f32 %v925_v6  ;;  %v940_v31 = vadd.f32 %v11753_v52, %v14110_v26  ;;  %4496 = vrot.lane.b32.xlu1 %v3309_v59, %s13359_s15  ;;  %11898 = vmatprep.mubr.msk.f32.mxu0 %vm439_vm1, %v409_v57  ;;  %v3055_v52 = vmul.f32 %v10343_v30, %v13707_v5 }
  0xec   : > { %v12957_v24 = vpop.eup %12956  ;;  %4494 = vrot.lane.b32.xlu0 %v3308_v56, %s13359_s15  ;;  %v934_v61 = vpop.f32.mrf.mxu0 }
  0xed   : > { %v935_v0 = vadd.f32 %v14110_v26, %v934_v61  ;;  %11939 = vmatprep.mubr.msk.f32.mxu1 %vm1672_vm2, %v12957_v24  ;;  %v14190_v6 = vpop.permute.xlu1 %4448  ;;  %12970 = vtanh.f32 %v940_v31  ;;  %v3183_v31 = vmul.f32 2.0, %v13707_v5  ;;  %v3054_v61 = vmul.f32 %v10342_v18, %v13695_v1 }
  0xee   : > { %v14192_v59 = vpop.permute.xlu0 %4446  ;;  %v11756_v57 = vpop.f32.mrf.mxu0  ;;  %11899 = vmatmul.mubr.msk.f32.gmra.mxu0 %vm439_vm1, %v410_v11  ;;  %11940 = vmatmul.mubr.msk.f32.vlgmr.msra.gmra.mxu1 %vm1672_vm2, %v12955_v55  ;;  %v413_v55 = vld [vmem:[%s13423_s10 + $0x370] sm:$0xff] }
  0xef   : > { %v12959_v56 = vpop.eup %12958  ;;  %12972 = vtanh.f32 %v935_v0  ;;  %v950_v3 = vadd.f32 %v11756_v57, %v14110_v26  ;;  %3476 = vrot.lane.b32.xlu1 %v13707_v5, %s13357_s13  ;;  %11901 = vmatprep.mubr.msk.f32.mxu0 %vm439_vm1, %v411_v29  ;;  %v3182_v0 = vmul.f32 2.0, %v13695_v1 }
  0xf0   : > { %v12961_v24 = vpop.eup %12960  ;;  %3474 = vrot.lane.b32.xlu0 %v13695_v1, %s13357_s13  ;;  %v944_v11 = vpop.f32.mrf.mxu0  ;;  %v414_v1 = vld [vmem:[%s13423_s10 + $0x378] sm:$0xff] }
  0xf1   : > { %v945_v57 = vadd.f32 %v14110_v26, %v944_v11  ;;  %11942 = vmatprep.mubr.msk.f32.mxu1 %vm1672_vm2, %v12961_v24  ;;  %v14210_v29 = vpop.permute.xlu1 %3940  ;;  %12974 = vtanh.f32 %v950_v3  ;;  %v3311_v24 = vsub.f32 %v3055_v52, %v3183_v31  ;;  %v2801_v3 = vmul.f32 %v13719_v33, %v13719_v33 }
  0xf2   : > { %v14212_v13 = vpop.permute.xlu0 %3938  ;;  %v11759_v5 = vpop.f32.mrf.mxu0  ;;  %11902 = vmatmul.mubr.msk.f32.gmra.mxu0 %vm439_vm1, %v412_v9  ;;  %11943 = vmatmul.mubr.msk.f32.gmra.mxu1 %vm1672_vm2, %v12959_v56  ;;  %v3310_v9 = vsub.f32 %v3054_v61, %v3182_v0  ;;  %v415_v56 = vld [vmem:[%s13423_s10 + $0x380] sm:$0xff]  ;;  %v417_v61 = vld [vmem:[%s13423_s10 + $0x390] sm:$0xff] }
  0xf3   : > { %v12963_v38 = vpop.eup %12962  ;;  %12976 = vtanh.f32 %v945_v57  ;;  %v960_v39 = vadd.f32 %v11759_v5, %v14110_v26  ;;  %3988 = vrot.lane.b32.xlu1 %v10343_v30, %s13358_s14  ;;  %11904 = vmatprep.mubr.msk.f32.mxu0 %vm439_vm1, %v413_v55  ;;  %v2800_v57 = vmul.f32 %v13711_v7, %v13711_v7  ;;  %v416_v7 = vld [vmem:[%s13423_s10 + $0x388] sm:$0xff] }
  0xf4   : > { %v12965_v11 = vpop.eup %12964  ;;  %3986 = vrot.lane.b32.xlu0 %v10342_v18, %s13358_s14  ;;  %v954_v10 = vpop.f32.mrf.mxu0 }
  0xf5   : > { %v955_v5 = vadd.f32 %v14110_v26, %v954_v10  ;;  %11945 = vmatprep.mubr.msk.f32.mxu1 %vm1672_vm2, %v12965_v11  ;;  %v14228_v30 = vpop.permute.xlu1 %4452  ;;  %12978 = vtanh.f32 %v960_v39  ;;  %v10345_v10 = vadd.f32 -1.0, %v2801_v3  ;;  %v10344_v0 = vadd.f32 -1.0, %v2800_v57  ;;  %v418_v57 = vld [vmem:[%s13423_s10 + $0x398] sm:$0xff] }
  0xf6   : > { %19027 = vst [vmem:[#allocation18_spill] sm:$0xff] %v14228_v30  ;;  %v14230_v52 = vpop.permute.xlu0 %4450  ;;  %v11762_v33 = vpop.f32.mrf.mxu0  ;;  %11905 = vmatmul.mubr.msk.f32.gmra.mxu0 %vm439_vm1, %v414_v1  ;;  %11946 = vmatmul.mubr.msk.f32.gmra.mxu1 %vm1672_vm2, %v12963_v38 }
  0xf7   : > { %v12967_v18 = vpop.eup %12966  ;;  %12980 = vtanh.f32 %v955_v5  ;;  %v970_v31 = vadd.f32 %v11762_v33, %v14110_v26  ;;  %4500 = vrot.lane.b32.xlu1 %v3311_v24, %s13359_s15  ;;  %11907 = vmatprep.mubr.msk.f32.mxu0 %vm439_vm1, %v415_v56  ;;  %v13210_v56 = vld [vmem:[%s13423_s10 + $0x138] sm:$0xff] }
  0xf8   : > { %v12969_v55 = vpop.eup %12968  ;;  %4498 = vrot.lane.b32.xlu0 %v3310_v9, %s13359_s15  ;;  %v964_v39 = vpop.f32.mrf.mxu0  ;;  %v3057_v5 = vmul.f32 %v13210_v56, %v10345_v10  ;;  %v3185_v33 = vmul.f32 2.0, %v13210_v56 }
  0xf9   : > { %v965_v38 = vadd.f32 %v14110_v26, %v964_v39  ;;  %11948 = vmatprep.mubr.msk.f32.mxu1 %vm1672_vm2, %v12969_v55  ;;  %v14242_v1 = vpop.permute.xlu1 %3944  ;;  %12982 = vtanh.f32 %v970_v31  ;;  %v13211_v55 = vld [vmem:[%s13423_s10 + $0x130] sm:$0xff] }
  0xfa   : > { %19028 = vst [vmem:[#allocation19_spill] sm:$0xff] %v14242_v1  ;;  %v14244_v24 = vpop.permute.xlu0 %3942  ;;  %v11765_v11 = vpop.f32.mrf.mxu0  ;;  %11908 = vmatmul.mubr.msk.f32.gmra.mxu0 %vm439_vm1, %v416_v7  ;;  %11949 = vmatmul.mubr.msk.f32.gmra.mxu1 %vm1672_vm2, %v12967_v18  ;;  %v419_v7 = vld [vmem:[%s13423_s10 + $0x3a0] sm:$0xff]  ;;  %v3056_v18 = vmul.f32 %v13211_v55, %v10344_v0  ;;  %v3184_v1 = vmul.f32 2.0, %v13211_v55 }
  0xfb   : > { %19029 = vst [vmem:[#allocation20_spill] sm:$0xff] %v14244_v24  ;;  %v12971_v3 = vpop.eup %12970  ;;  %12984 = vtanh.f32 %v965_v38  ;;  %v980_v9 = vadd.f32 %v11765_v11, %v14110_v26  ;;  %3480 = vrot.lane.b32.xlu1 %v13210_v56, %s13357_s13  ;;  %11910 = vmatprep.mubr.msk.f32.mxu0 %vm439_vm1, %v417_v61  ;;  %v421_v24 = vld [vmem:[%s13423_s10 + $0x3b0] sm:$0xff] }
  0xfc   : > { %v12973_v31 = vpop.eup %12972  ;;  %3478 = vrot.lane.b32.xlu0 %v13211_v55, %s13357_s13  ;;  %v974_v39 = vpop.f32.mrf.mxu0 }
  0xfd   : > { %v975_v38 = vadd.f32 %v14110_v26, %v974_v39  ;;  %11951 = vmatprep.mubr.msk.f32.mxu1 %vm1672_vm2, %v12973_v31  ;;  %v14258_v11 = vpop.permute.xlu1 %4456  ;;  %12986 = vtanh.f32 %v980_v9  ;;  %v420_v31 = vld [vmem:[%s13423_s10 + $0x3a8] sm:$0xff]  ;;  %v3313_v39 = vsub.f32 %v3057_v5, %v3185_v33 }
  0xfe   : > { %19030 = vst [vmem:[#allocation21_spill] sm:$0xff] %v14258_v11  ;;  %v14260_v61 = vpop.permute.xlu0 %4454  ;;  %v11768_v56 = vpop.f32.mrf.mxu0  ;;  %11911 = vmatmul.mubr.msk.f32.gmra.mxu0 %vm439_vm1, %v418_v57  ;;  %11952 = vmatmul.mubr.msk.f32.gmra.mxu1 %vm1672_vm2, %v12971_v3  ;;  %v13212_v9 = vld [vmem:[%s13423_s10 + $0x148] sm:$0xff]  ;;  %v3312_v57 = vsub.f32 %v3056_v18, %v3184_v1  ;;  %v13213_v3 = vld [vmem:[%s13423_s10 + $0x140] sm:$0xff] }
  0xff   : > { %19031 = vst [vmem:[#allocation22_spill] sm:$0xff] %v14260_v61  ;;  %v12975_v2 = vpop.eup %12974  ;;  %12988 = vtanh.f32 %v975_v38  ;;  %v990_v55 = vadd.f32 %v11768_v56, %v14110_v26  ;;  %3992 = vrot.lane.b32.xlu1 %v10345_v10, %s13358_s14  ;;  %11913 = vmatprep.mubr.msk.f32.mxu0 %vm439_vm1, %v419_v7  ;;  %v2803_v11 = vmul.f32 %v13212_v9, %v13212_v9  ;;  %v423_v56 = vld [vmem:[%s13423_s10 + $0x3c0] sm:$0xff] }
 0x100   : > { %v12977_v58 = vpop.eup %12976  ;;  %3990 = vrot.lane.b32.xlu0 %v10344_v0, %s13358_s14  ;;  %v984_v61 = vpop.f32.mrf.mxu0  ;;  %v2802_v30 = vmul.f32 %v13213_v3, %v13213_v3 }
 0x101   : > { %v985_v38 = vadd.f32 %v14110_v26, %v984_v61  ;;  %11954 = vmatprep.mubr.msk.f32.mxu1 %vm1672_vm2, %v12977_v58  ;;  %v14274_v10 = vpop.permute.xlu1 %3948  ;;  %12990 = vtanh.f32 %v990_v55  ;;  %v422_v58 = vld [vmem:[%s13423_s10 + $0x3b8] sm:$0xff]  ;;  %v10347_v7 = vadd.f32 -1.0, %v2803_v11 }
 0x102   : > { %19032 = vst [vmem:[#allocation23_spill] sm:$0xff] %v14274_v10  ;;  %v14276_v5 = vpop.permute.xlu0 %3946  ;;  %v11771_v33 = vpop.f32.mrf.mxu0  ;;  %11914 = vmatmul.mubr.msk.f32.gmra.mxu0 %vm439_vm1, %v420_v31  ;;  %11955 = vmatmul.mubr.msk.f32.gmra.mxu1 %vm1672_vm2, %v12975_v2  ;;  %v10346_v55 = vadd.f32 -1.0, %v2802_v30  ;;  %v424_v30 = vld [vmem:[%s13423_s10 + $0x3c8] sm:$0xff] }
 0x103   : > { %19033 = vst [vmem:[#allocation24_spill] sm:$0xff] %v14276_v5  ;;  %v12979_v0 = vpop.eup %12978  ;;  %12992 = vtanh.f32 %v985_v38  ;;  %v1000_v1 = vadd.f32 %v11771_v33, %v14110_v26  ;;  %4504 = vrot.lane.b32.xlu1 %v3313_v39, %s13359_s15  ;;  %11916 = vmatprep.mubr.msk.f32.mxu0 %vm439_vm1, %v421_v24  ;;  %v3059_v38 = vmul.f32 %v13212_v9, %v10347_v7  ;;  %v3187_v33 = vmul.f32 2.0, %v13212_v9 }
 0x104   : > { %v12981_v18 = vpop.eup %12980  ;;  %4502 = vrot.lane.b32.xlu0 %v3312_v57, %s13359_s15  ;;  %v994_v61 = vpop.f32.mrf.mxu0 }
 0x105   : > { %v995_v31 = vadd.f32 %v14110_v26, %v994_v61  ;;  %11957 = vmatprep.mubr.msk.f32.mxu1 %vm1672_vm2, %v12981_v18  ;;  %v14288_v2 = vpop.permute.xlu1 %4460  ;;  %12994 = vtanh.f32 %v1000_v1  ;;  %v425_v61 = vld [vmem:[%s13423_s10 + $0x3d0] sm:$0xff] }
 0x106   : > { %19034 = vst [vmem:[#allocation25_spill] sm:$0xff] %v14288_v2  ;;  %v14290_v39 = vpop.permute.xlu0 %4458  ;;  %v11774_v24 = vpop.f32.mrf.mxu0  ;;  %11917 = vmatmul.mubr.msk.f32.gmra.mxu0 %vm439_vm1, %v422_v58  ;;  %11958 = vmatmul.mubr.msk.f32.gmra.mxu1 %vm1672_vm2, %v12979_v0  ;;  %v3058_v58 = vmul.f32 %v13213_v3, %v10346_v55  ;;  %v3186_v2 = vmul.f32 2.0, %v13213_v3 }
 0x107   : > { %19035 = vst [vmem:[#allocation26_spill] sm:$0xff] %v14290_v39  ;;  %v12983_v11 = vpop.eup %12982  ;;  %12996 = vtanh.f32 %v995_v31  ;;  %v1010_v57 = vadd.f32 %v11774_v24, %v14110_v26  ;;  %3484 = vrot.lane.b32.xlu1 %v13212_v9, %s13357_s13  ;;  %11919 = vmatprep.mubr.msk.f32.mxu0 %vm439_vm1, %v423_v56  ;;  %v427_v39 = vld [vmem:[%s13423_s10 + $0x3e0] sm:$0xff] }
 0x108   : > { %v12985_v1 = vpop.eup %12984  ;;  %3482 = vrot.lane.b32.xlu0 %v13213_v3, %s13357_s13  ;;  %v1004_v18 = vpop.f32.mrf.mxu0 }
 0x109   : > { %v1005_v0 = vadd.f32 %v14110_v26, %v1004_v18  ;;  %11960 = vmatprep.mubr.msk.f32.mxu1 %vm1672_vm2, %v12985_v1  ;;  %v14302_v31 = vpop.permute.xlu1 %3952  ;;  %12998 = vtanh.f32 %v1010_v57  ;;  %v426_v1 = vld [vmem:[%s13423_s10 + $0x3d8] sm:$0xff]  ;;  %v3315_v18 = vsub.f32 %v3059_v38, %v3187_v33 }
 0x10a   : > { %19036 = vst [vmem:[#allocation27_spill] sm:$0xff] %v14302_v31  ;;  %v14304_v56 = vpop.permute.xlu0 %3950  ;;  %v11777_v24 = vpop.f32.mrf.mxu0  ;;  %11920 = vmatmul.mubr.msk.f32.gmra.mxu0 %vm439_vm1, %v424_v30  ;;  %11961 = vmatmul.mubr.msk.f32.gmra.mxu1 %vm1672_vm2, %v12983_v11  ;;  %v13214_v57 = vld [vmem:[%s13423_s10 + $0x158] sm:$0xff]  ;;  %v3314_v30 = vsub.f32 %v3058_v58, %v3186_v2  ;;  %v13215_v11 = vld [vmem:[%s13423_s10 + $0x150] sm:$0xff] }
 0x10b   : > { %19037 = vst [vmem:[#allocation28_spill] sm:$0xff] %v14304_v56  ;;  %v12987_v9 = vpop.eup %12986  ;;  %13000 = vtanh.f32 %v1005_v0  ;;  %v1020_v3 = vadd.f32 %v11777_v24, %v14110_v26  ;;  %3996 = vrot.lane.b32.xlu1 %v10347_v7, %s13358_s14  ;;  %11922 = vmatprep.mubr.msk.f32.mxu0 %vm439_vm1, %v425_v61  ;;  %v2805_v31 = vmul.f32 %v13214_v57, %v13214_v57  ;;  %v10563_v58 = vld [vmem:[%s18791_s5 + $0x18] sm:$0xff] }
 0x10c   : > { %v12989_v56 = vpop.eup %12988  ;;  %3994 = vrot.lane.b32.xlu0 %v10346_v55, %s13358_s14  ;;  %v1014_v10 = vpop.f32.mrf.mxu0  ;;  %v2804_v5 = vmul.f32 %v13215_v11, %v13215_v11  ;;  %12327 = vmatprep.subr.mxu1 %v10563_v58 }
 0x10d   : > { %v1015_v0 = vadd.f32 %v14110_v26, %v1014_v10  ;;  %11963 = vmatprep.mubr.msk.f32.mxu1 %vm1672_vm2, %v12989_v56  ;;  %v14318_v7 = vpop.permute.xlu1 %4464  ;;  %13002 = vtanh.f32 %v1020_v3  ;;  %v428_v10 = vld [vmem:[%s13423_s10 + $0x3e8] sm:$0xff]  ;;  %v10349_v61 = vadd.f32 -1.0, %v2805_v31  ;;  %v429_v3 = vld [vmem:[%s13423_s10 + $0x3f0] sm:$0xff]  ;;  %12328 = vmatpush3.msra.mxu1 %v10563_v58  ;;  %v3189_v58 = vmul.f32 2.0, %v13214_v57 }
 0x10e   : > { %v14320_v38 = vpop.permute.xlu0 %4462  ;;  %v11780_v33 = vpop.f32.mrf.mxu0  ;;  %11923 = vmatmul.mubr.msk.f32.gmra.mxu0 %vm439_vm1, %v426_v1  ;;  %11964 = vmatmul.mubr.msk.f32.gmra.mxu1 %vm1672_vm2, %v12987_v9  ;;  %v10348_v9 = vadd.f32 -1.0, %v2804_v5 }
 0x10f   : > { %v12991_v55 = vpop.eup %12990  ;;  %13004 = vtanh.f32 %v1015_v0  ;;  %v1030_v2 = vadd.f32 %v11780_v33, %v14110_v26  ;;  %4508 = vrot.lane.b32.xlu1 %v3315_v18, %s13359_s15  ;;  %11925 = vmatprep.mubr.msk.f32.mxu0 %vm439_vm1, %v427_v39  ;;  %v430_v0 = vld [vmem:[%s13423_s10 + $0x3f8] sm:$0xff]  ;;  %v3061_v33 = vmul.f32 %v13214_v57, %v10349_v61 }
 0x110   : > { %v12993_v56 = vpop.eup %12992  ;;  %4506 = vrot.lane.b32.xlu0 %v3314_v30, %s13359_s15  ;;  %v1024_v24 = vpop.f32.mrf.mxu0 }
 0x111   : > { %v1025_v1 = vadd.f32 %v14110_v26, %v1024_v24  ;;  %11966 = vmatprep.mubr.msk.f32.mxu1 %vm1672_vm2, %v12993_v56  ;;  %v14335_v18 = vpop.permute.xlu1 %3956  ;;  %13006 = vtanh.f32 %v1030_v2  ;;  %v4810_v2 = vsel %vm439_vm1, 1.0, %v13832_v34  ;;  %v3188_v24 = vmul.f32 2.0, %v13215_v11 }
 0x112   : > { %19038 = vst [vmem:[#allocation29_spill] sm:$0xff] %v14335_v18  ;;  %v14337_v39 = vpop.permute.xlu0 %3954  ;;  %v11783_v31 = vpop.f32.mrf.mxu0  ;;  %11926 = vmatmul.mubr.msk.f32.gmra.mxu0 %vm439_vm1, %v428_v10  ;;  %11967 = vmatmul.mubr.msk.f32.gmra.mxu1 %vm1672_vm2, %v12991_v55  ;;  %v3060_v55 = vmul.f32 %v13215_v11, %v10348_v9 }
 0x113   : > { %v12995_v5 = vpop.eup %12994  ;;  %13008 = vtanh.f32 %v1025_v1  ;;  %v1040_v30 = vadd.f32 %v11783_v31, %v14110_v26  ;;  %3488 = vrot.lane.b32.xlu1 %v13214_v57, %s13357_s13  ;;  %11928 = vmatprep.mubr.msk.f32.mxu0 %vm439_vm1, %v429_v3  ;;  %v4939_v1 = vsel %vm4938_vm3, %v4810_v2, %v14032_v23  ;;  %v4811_v57 = vsel %vm439_vm1, 1.0, %v13850_v44 }
 0x114   : > { %v12997_v56 = vpop.eup %12996  ;;  %3486 = vrot.lane.b32.xlu0 %v13215_v11, %s13357_s13  ;;  %v1034_v10 = vpop.f32.mrf.mxu0  ;;  %v14358_v34 = vsel %vm5067_vm4, %v4939_v1, %v14046_v54  ;;  %v3317_v44 = vsub.f32 %v3061_v33, %v3189_v58  ;;  %v13216_v54 = vld [vmem:[%s13423_s10 + $0x168] sm:$0xff]  ;;  %v3316_v1 = vsub.f32 %v3060_v55, %v3188_v24 }
 0x115   : > { %v1035_v31 = vadd.f32 %v14110_v26, %v1034_v10  ;;  %11969 = vmatprep.mubr.msk.f32.mxu1 %vm1672_vm2, %v12997_v56  ;;  %v14352_v3 = vpop.permute.xlu1 %4468  ;;  %19039 = vst [vmem:[#allocation30_spill] sm:$0xff] %v14358_v34  ;;  %13010 = vtanh.f32 %v1040_v30  ;;  %v2807_v30 = vmul.f32 %v13216_v54, %v13216_v54  ;;  %v4812_v10 = vsel %vm439_vm1, 1.0, %v13830_v17 }
 0x116   : > { %v14360_v18 = vpop.permute.xlu0 %4466  ;;  %v11786_v11 = vpop.f32.mrf.mxu0  ;;  %11929 = vmatmul.mubr.msk.f32.gmra.mxu0 %vm439_vm1, %v430_v0  ;;  %11970 = vmatmul.mubr.msk.f32.gmra.mxu1 %vm1672_vm2, %v12995_v5  ;;  %v4940_v0 = vsel %vm4938_vm3, %v4811_v57, %v14030_v43  ;;  %v4814_v57 = vsel %vm439_vm1, 1.0, %v13860_v50  ;;  %v4815_v50 = vsel %vm439_vm1, 1.0, %v13858_v49 }
 0x117   : > { %v12999_v23 = vpop.eup %12998  ;;  %13012 = vtanh.f32 %v1035_v31  ;;  %v1050_v56 = vadd.f32 %v11786_v11, %v14110_v26  ;;  %12135 = vmatprep.mubr.msk.f32.mxu0 %vm5198_vm5, %v14358_v34  ;;  %4000 = vrot.lane.b32.xlu1 %v10349_v61, %s13358_s14  ;;  %v13217_v31 = vld [vmem:[%s13423_s10 + $0x160] sm:$0xff]  ;;  %v14377_v34 = vsel %vm5067_vm4, %v4940_v0, %v14044_v14  ;;  %v4941_v61 = vsel %vm4938_vm3, %v4812_v10, %v14056_v25 }
 0x118   : > { %v13001_v2 = vpop.eup %13000  ;;  %3998 = vrot.lane.b32.xlu0 %v10348_v9, %s13358_s14  ;;  %v1044_v5 = vpop.f32.mrf.mxu0  ;;  %v2806_v11 = vmul.f32 %v13217_v31, %v13217_v31  ;;  %v14387_v43 = vsel %vm5067_vm4, %v4941_v61, %v14072_v22  ;;  %v4813_v25 = vsel %vm439_vm1, 1.0, %v13848_v8  ;;  %v10351_v22 = vadd.f32 -1.0, %v2807_v30 }
 0x119   : > { %v1045_v33 = vadd.f32 %v14110_v26, %v1044_v5  ;;  %11972 = vmatprep.mubr.msk.f32.mxu1 %vm1672_vm2, %v13001_v2  ;;  %v14383_v17 = vpop.permute.xlu1 %3960  ;;  %13014 = vtanh.f32 %v1050_v56  ;;  %v4943_v10 = vsel %vm4938_vm3, %v4814_v57, %v14086_v37  ;;  %v4944_v61 = vsel %vm4938_vm3, %v4815_v50, %v14084_v48 }
 0x11a   : > { %v14389_v9 = vpop.permute.xlu0 %3958  ;;  %v11789_v58 = vpop.f32.mrf.mxu0  ;;  %11973 = vmatmul.mubr.msk.f32.gmra.mxu1 %vm1672_vm2, %v12999_v23  ;;  %12136 = vmatmul.mubr.msk.f32.vlgmr.msra.gmra.mxu0 %vm5198_vm5, %v14377_v34  ;;  %v4942_v23 = vsel %vm4938_vm3, %v4813_v25, %v14054_v21  ;;  %v10350_v8 = vadd.f32 -1.0, %v2806_v11  ;;  %v14419_v21 = vsel %vm5067_vm4, %v4943_v10, %v14096_v32  ;;  %v3063_v49 = vmul.f32 %v13216_v54, %v10351_v22 }
 0x11b   : > { %v13003_v14 = vpop.eup %13002  ;;  %13016 = vtanh.f32 %v1045_v33  ;;  %v1060_v55 = vadd.f32 %v11789_v58, %v14110_v26  ;;  %12138 = vmatprep.mubr.msk.f32.mxu0 %vm5198_vm5, %v14387_v43  ;;  %4512 = vrot.lane.b32.xlu1 %v3317_v44, %s13359_s15  ;;  %v14407_v2 = vsel %vm5067_vm4, %v4942_v23, %v14070_v27  ;;  %v3191_v32 = vmul.f32 2.0, %v13216_v54 }
 0x11c   : > { %v13005_v24 = vpop.eup %13004  ;;  %4510 = vrot.lane.b32.xlu0 %v3316_v1, %s13359_s15  ;;  %v1054_v56 = vpop.f32.mrf.mxu0  ;;  %v4816_v11 = vsel %vm439_vm1, 1.0, %v13881_v62  ;;  %v3062_v58 = vmul.f32 %v13217_v31, %v10350_v8  ;;  %v14437_v25 = vsel %vm5067_vm4, %v4944_v61, %v14094_v20  ;;  %v4817_v48 = vsel %vm439_vm1, 1.0, %v13876_v15 }
 0x11d   : > { %v1055_v44 = vadd.f32 %v14110_v26, %v1054_v56  ;;  %11975 = vmatprep.mubr.msk.f32.mxu1 %vm1672_vm2, %v13005_v24  ;;  %v14413_v30 = vpop.permute.xlu1 %4472  ;;  %13018 = vtanh.f32 %v1060_v55  ;;  %19040 = vst [vmem:[#allocation31_spill] sm:$0xff] %v14437_v25  ;;  %v4945_v55 = vsel %vm4938_vm3, %v4816_v11, %v14117_v28  ;;  %v3319_v15 = vsub.f32 %v3063_v49, %v3191_v32 }
 0x11e   : > { %v14421_v0 = vpop.permute.xlu0 %4470  ;;  %v11792_v27 = vpop.f32.mrf.mxu0  ;;  %11976 = vmatmul.mubr.msk.f32.gmra.mxu1 %vm1672_vm2, %v13003_v14  ;;  %12139 = vmatmul.mubr.msk.f32.gmra.mxu0 %vm5198_vm5, %v14407_v2  ;;  %v3190_v14 = vmul.f32 2.0, %v13217_v31  ;;  %v4818_v10 = vsel %vm439_vm1, 1.0, %v13894_v4 }
 0x11f   : > { %v13007_v37 = vpop.eup %13006  ;;  %13020 = vtanh.f32 %v1055_v44  ;;  %v1070_v5 = vadd.f32 %v11792_v27, %v14110_v26  ;;  %12141 = vmatprep.mubr.msk.f32.mxu0 %vm5198_vm5, %v14419_v21  ;;  %3492 = vrot.lane.b32.xlu1 %v13216_v54, %s13357_s13  ;;  %v4946_v44 = vsel %vm4938_vm3, %v4817_v48, %v14115_v42 }
 0x120   : > { %v13009_v1 = vpop.eup %13008  ;;  %3490 = vrot.lane.b32.xlu0 %v13217_v31, %s13357_s13  ;;  %v1064_v33 = vpop.f32.mrf.mxu0  ;;  %v14449_v31 = vsel %vm5067_vm4, %v4945_v55, %v14133_v35  ;;  %v13218_v35 = vld [vmem:[%s13423_s10 + $0x178] sm:$0xff]  ;;  %v3318_v27 = vsub.f32 %v3062_v58, %v3190_v14 }
 0x121   : > { %v1065_v54 = vadd.f32 %v14110_v26, %v1064_v33  ;;  %11978 = vmatprep.mubr.msk.f32.mxu1 %vm1672_vm2, %v13009_v1  ;;  %v14443_v62 = vpop.permute.xlu1 %3964  ;;  %19041 = vst [vmem:[#allocation32_spill] sm:$0xff] %v14449_v31  ;;  %13022 = vtanh.f32 %v1070_v5  ;;  %v2809_v23 = vmul.f32 %v13218_v35, %v13218_v35  ;;  %v14469_v1 = vsel %vm5067_vm4, %v4946_v44, %v14131_v53 }
 0x122   : > { %v14451_v20 = vpop.permute.xlu0 %3962  ;;  %v11795_v24 = vpop.f32.mrf.mxu0  ;;  %11979 = vmatmul.mubr.msk.f32.gmra.mxu1 %vm1672_vm2, %v13007_v37  ;;  %12142 = vmatmul.mubr.msk.f32.gmra.mxu0 %vm5198_vm5, %v14437_v25  ;;  %v13219_v37 = vld [vmem:[%s13423_s10 + $0x170] sm:$0xff]  ;;  %v4820_v33 = vsel %vm439_vm1, 1.0, %v13912_v40  ;;  %v4821_v40 = vsel %vm439_vm1, 1.0, %v13910_v12 }
 0x123   : > { %v13011_v28 = vpop.eup %13010  ;;  %13024 = vtanh.f32 %v1065_v54  ;;  %v1080_v57 = vadd.f32 %v11795_v24, %v14110_v26  ;;  %12144 = vmatprep.mubr.msk.f32.mxu0 %vm5198_vm5, %v14449_v31  ;;  %4004 = vrot.lane.b32.xlu1 %v10351_v22, %s13358_s14  ;;  %v2808_v5 = vmul.f32 %v13219_v37, %v13219_v37  ;;  %v4947_v22 = vsel %vm4938_vm3, %v4818_v10, %v14145_v41 }
 0x124   : > { %v13013_v56 = vpop.eup %13012  ;;  %4002 = vrot.lane.b32.xlu0 %v10350_v8, %s13358_s14  ;;  %v1074_v50 = vpop.f32.mrf.mxu0  ;;  %v14479_v42 = vsel %vm5067_vm4, %v4947_v22, %v14163_v51  ;;  %v4819_v41 = vsel %vm439_vm1, 1.0, %v13892_v16  ;;  %v10353_v51 = vadd.f32 -1.0, %v2809_v23  ;;  %v4949_v54 = vsel %vm4938_vm3, %v4820_v33, %v14179_v36 }
 0x125   : > { %v1075_v49 = vadd.f32 %v14110_v26, %v1074_v50  ;;  %11981 = vmatprep.mubr.msk.f32.mxu1 %vm1672_vm2, %v13013_v56  ;;  %v14475_v4 = vpop.permute.xlu1 %4476  ;;  %13026 = vtanh.f32 %v1080_v57  ;;  %v4948_v58 = vsel %vm4938_vm3, %v4819_v41, %v14143_v63  ;;  %v10352_v16 = vadd.f32 -1.0, %v2808_v5 }
 0x126   : > { %v14481_v8 = vpop.permute.xlu0 %4474  ;;  %v11798_v32 = vpop.f32.mrf.mxu0  ;;  %11982 = vmatmul.mubr.msk.f32.gmra.mxu1 %vm1672_vm2, %v13011_v28  ;;  %12145 = vmatmul.mubr.msk.f32.gmra.mxu0 %vm5198_vm5, %v14469_v1  ;;  %v14499_v55 = vsel %vm5067_vm4, %v4948_v58, %v14161_v47  ;;  %v14511_v63 = vsel %vm5067_vm4, %v4949_v54, %v14192_v59  ;;  %v3065_v12 = vmul.f32 %v13218_v35, %v10353_v51  ;;  %v3193_v59 = vmul.f32 2.0, %v13218_v35  ;;  %v13221_v58 = vld [vmem:[%s13423_s10 + $0x180] sm:$0xff]  ;;  %v19044_v54 = vld [vmem:[#allocation18_spill] sm:$0xff] }
 0x127   : > { %v13015_v53 = vpop.eup %13014  ;;  %13028 = vtanh.f32 %v1075_v49  ;;  %v1090_v11 = vadd.f32 %v11798_v32, %v14110_v26  ;;  %12147 = vmatprep.mubr.msk.f32.mxu0 %vm5198_vm5, %v14479_v42  ;;  %4516 = vrot.lane.b32.xlu1 %v3319_v15, %s13359_s15  ;;  %v4822_v23 = vsel %vm439_vm1, 1.0, %v13922_v19  ;;  %v4950_v56 = vsel %vm4938_vm3, %v4821_v40, %v14177_v45 }
 0x128   : > { %v13017_v61 = vpop.eup %13016  ;;  %4514 = vrot.lane.b32.xlu0 %v3318_v27, %s13359_s15  ;;  %v1084_v14 = vpop.f32.mrf.mxu0  ;;  %v3064_v44 = vmul.f32 %v13219_v37, %v10352_v16  ;;  %v3192_v50 = vmul.f32 2.0, %v13219_v37  ;;  %v14529_v27 = vsel %vm5067_vm4, %v4950_v56, %v14190_v6  ;;  %v4951_v5 = vsel %vm4938_vm3, %v4822_v23, %v14212_v13 }
 0x129   : > { %v1085_v48 = vadd.f32 %v14110_v26, %v1084_v14  ;;  %11984 = vmatprep.mubr.msk.f32.mxu1 %vm1672_vm2, %v13017_v61  ;;  %v14505_v24 = vpop.permute.xlu1 %3968  ;;  %13030 = vtanh.f32 %v1090_v11  ;;  %19042 = vst [vmem:[#allocation33_spill] sm:$0xff] %v14529_v27  ;;  %v4823_v45 = vsel %vm439_vm1, 1.0, %v13920_v46  ;;  %v3321_v46 = vsub.f32 %v3065_v12, %v3193_v59  ;;  %v19047_v59 = vld [vmem:[#allocation5_spill] sm:$0xff] }
 0x12a   : > { %v14513_v28 = vpop.permute.xlu0 %3966  ;;  %v11801_v47 = vpop.f32.mrf.mxu0  ;;  %11985 = vmatmul.mubr.msk.f32.gmra.mxu1 %vm1672_vm2, %v13015_v53  ;;  %12148 = vmatmul.mubr.msk.f32.gmra.mxu0 %vm5198_vm5, %v14499_v55  ;;  %v4824_v41 = vsel %vm439_vm1, 1.0, %v13940_v60  ;;  %v4952_v11 = vsel %vm4938_vm3, %v4823_v45, %v14210_v29  ;;  %v3320_v33 = vsub.f32 %v3064_v44, %v3192_v50  ;;  %v2810_v14 = vmul.f32 %v13221_v58, %v13221_v58  ;;  %v19046_v29 = vld [vmem:[#allocation22_spill] sm:$0xff]  ;;  %v19048_v44 = vld [vmem:[#allocation7_spill] sm:$0xff] }
 0x12b   : > { %v13019_v36 = vpop.eup %13018  ;;  %13032 = vtanh.f32 %v1085_v48  ;;  %v1100_v57 = vadd.f32 %v11801_v47, %v14110_v26  ;;  %12150 = vmatprep.mubr.msk.f32.mxu0 %vm5198_vm5, %v14511_v63  ;;  %3496 = vrot.lane.b32.xlu1 %v13218_v35, %s13357_s13  ;;  %v14561_v48 = vsel %vm5067_vm4, %v4952_v11, %v19044_v54  ;;  %v4826_v50 = vsel %vm439_vm1, 1.0, %v19048_v44  ;;  %v19052_v11 = vld [vmem:[#allocation6_spill] sm:$0xff] }
 0x12c   : > { %v13021_v15 = vpop.eup %13020  ;;  %3494 = vrot.lane.b32.xlu0 %v13219_v37, %s13357_s13  ;;  %v1094_v10 = vpop.f32.mrf.mxu0  ;;  %v14541_v37 = vsel %vm5067_vm4, %v4951_v5, %v14230_v52  ;;  %v13220_v52 = vld [vmem:[%s13423_s10 + $0x188] sm:$0xff]  ;;  %v19049_v5 = vld [vmem:[#allocation19_spill] sm:$0xff] }
 0x12d   : > { %v1095_v35 = vadd.f32 %v14110_v26, %v1094_v10  ;;  %11987 = vmatprep.mubr.msk.f32.mxu1 %vm1672_vm2, %v13021_v15  ;;  %v14535_v19 = vpop.permute.xlu1 %4480  ;;  %19043 = vst [vmem:[#allocation34_spill] sm:$0xff] %v14541_v37  ;;  %13034 = vtanh.f32 %v1100_v57  ;;  %v2811_v32 = vmul.f32 %v13220_v52, %v13220_v52  ;;  %v4825_v15 = vsel %vm439_vm1, 1.0, %v19047_v59 }
 0x12e   : > { %v14543_v6 = vpop.permute.xlu0 %4478  ;;  %v11804_v22 = vpop.f32.mrf.mxu0  ;;  %11988 = vmatmul.mubr.msk.f32.gmra.mxu1 %vm1672_vm2, %v13019_v36  ;;  %12151 = vmatmul.mubr.msk.f32.gmra.mxu0 %vm5198_vm5, %v14529_v27 }
 0x12f   : > { %v13023_v13 = vpop.eup %13022  ;;  %13036 = vtanh.f32 %v1095_v35  ;;  %v1110_v49 = vadd.f32 %v11804_v22, %v14110_v26  ;;  %12153 = vmatprep.mubr.msk.f32.mxu0 %vm5198_vm5, %v14541_v37  ;;  %4008 = vrot.lane.b32.xlu1 %v10353_v51, %s13358_s14  ;;  %v19045_v51 = vld [vmem:[#allocation20_spill] sm:$0xff]  ;;  %v10355_v56 = vadd.f32 -1.0, %v2811_v32  ;;  %v4954_v35 = vsel %vm4938_vm3, %v4825_v15, %v19049_v5  ;;  %v19054_v15 = vld [vmem:[#allocation9_spill] sm:$0xff] }
 0x130   : > { %v13025_v53 = vpop.eup %13024  ;;  %4006 = vrot.lane.b32.xlu0 %v10352_v16, %s13358_s14  ;;  %v1104_v61 = vpop.f32.mrf.mxu0  ;;  %v4953_v40 = vsel %vm4938_vm3, %v4824_v41, %v19045_v51  ;;  %v10354_v22 = vadd.f32 -1.0, %v2810_v14  ;;  %v3194_v5 = vmul.f32 2.0, %v13221_v58 }
 0x131   : > { %v1105_v47 = vadd.f32 %v14110_v26, %v1104_v61  ;;  %11990 = vmatprep.mubr.msk.f32.mxu1 %vm1672_vm2, %v13025_v53  ;;  %v14567_v60 = vpop.permute.xlu1 %3460  ;;  %v14571_v16 = vsel %vm5067_vm4, %v4953_v40, %v19046_v29  ;;  %13038 = vtanh.f32 %v1110_v49  ;;  %v19051_v49 = vld [vmem:[#allocation24_spill] sm:$0xff]  ;;  %v4827_v61 = vsel %vm439_vm1, 1.0, %v19052_v11 }
 0x132   : > { %v14573_v36 = vpop.permute.xlu0 %3458  ;;  %v11807_v57 = vpop.f32.mrf.mxu0  ;;  %11991 = vmatmul.mubr.msk.f32.gmra.mxu1 %vm1672_vm2, %v13023_v13  ;;  %12154 = vmatmul.mubr.msk.f32.gmra.mxu0 %vm5198_vm5, %v14561_v48  ;;  %v19050_v13 = vld [vmem:[#allocation21_spill] sm:$0xff]  ;;  %v4955_v53 = vsel %vm4938_vm3, %v4826_v50, %v19051_v49  ;;  %v3067_v29 = vmul.f32 %v13220_v52, %v10355_v56  ;;  %v3066_v50 = vmul.f32 %v13221_v58, %v10354_v22 }
 0x133   : > { %v13027_v12 = vpop.eup %13026  ;;  %13040 = vtanh.f32 %v1105_v47  ;;  %v1120_v23 = vadd.f32 %v11807_v57, %v14110_v26  ;;  %12156 = vmatprep.mubr.msk.f32.mxu0 %vm5198_vm5, %v14571_v16  ;;  %4520 = vrot.lane.b32.xlu1 %v3321_v46, %s13359_s15  ;;  %v14591_v26 = vsel %vm5067_vm4, %v4954_v35, %v19050_v13  ;;  %v14598_v46 = vld [vmem:[%s18788_s2] ss:$0 sm:$0xff]  ;;  %v3195_v57 = vmul.f32 2.0, %v13220_v52  ;;  %v19056_v35 = vld [vmem:[#allocation25_spill] sm:$0xff] }
 0x134   : > { %v13029_v10 = vpop.eup %13028  ;;  %4518 = vrot.lane.b32.xlu0 %v3320_v33, %s13359_s15  ;;  %v1114_v45 = vpop.f32.mrf.mxu0  ;;  %v19053_v33 = vld [vmem:[#allocation26_spill] sm:$0xff]  ;;  %v19058_v13 = vld [vmem:[#allocation28_spill] sm:$0xff] }
 0x135   : > { %v1115_v32 = vadd.f32 %v14598_v46, %v1114_v45  ;;  %11993 = vmatprep.mubr.msk.f32.mxu1 %vm1672_vm2, %v13029_v10  ;;  %v14602_v41 = vpop.permute.xlu1 %3972  ;;  %v14608_v14 = vsel %vm5067_vm4, %v4955_v53, %v19053_v33  ;;  %13042 = vtanh.f32 %v1120_v23  ;;  %v4828_v23 = vsel %vm439_vm1, 1.0, %v19054_v15  ;;  %v19055_v10 = vld [vmem:[#allocation23_spill] sm:$0xff] }
 0x136   : > { %v14610_v54 = vpop.permute.xlu0 %3970  ;;  %v11810_v51 = vpop.f32.mrf.mxu0  ;;  %11994 = vmatmul.mubr.msk.f32.gmra.mxu1 %vm1672_vm2, %v13027_v12  ;;  %12157 = vmatmul.mubr.msk.f32.gmra.mxu0 %vm5198_vm5, %v14591_v26  ;;  %v4956_v12 = vsel %vm4938_vm3, %v4827_v61, %v19055_v10  ;;  %v4957_v49 = vsel %vm4938_vm3, %v4828_v23, %v19058_v13  ;;  %v19061_v10 = vld [vmem:[#allocation11_spill] sm:$0xff]  ;;  %v3322_v13 = vsub.f32 %v3066_v50, %v3194_v5 }
 0x137   : > { %v13031_v40 = vpop.eup %13030  ;;  %13044 = vtanh.f32 %v1115_v32  ;;  %v1130_v47 = vadd.f32 %v14598_v46, %v11810_v51  ;;  %12159 = vmatprep.mubr.msk.f32.mxu0 %vm5198_vm5, %v14608_v14  ;;  %3500 = vrot.lane.b32.xlu1 %v13220_v52, %s13357_s13  ;;  %v14626_v45 = vsel %vm5067_vm4, %v4956_v12, %v19056_v35  ;;  %v19059_v32 = vld [vmem:[#allocation8_spill] sm:$0xff]  ;;  %v19062_v12 = vld [vmem:[#allocation27_spill] sm:$0xff] }
 0x138   : > { %v13033_v59 = vpop.eup %13032  ;;  %3498 = vrot.lane.b32.xlu0 %v13221_v58, %s13357_s13  ;;  %v1124_v44 = vpop.f32.mrf.mxu0  ;;  %19057 = vst [vmem:[#allocation18_spill] sm:$0xff] %v14626_v45  ;;  %v4829_v11 = vsel %vm439_vm1, 1.0, %v19059_v32  ;;  %v14638_v58 = vsel %vm5067_vm4, %v4957_v49, %v14320_v38  ;;  %v3323_v38 = vsub.f32 %v3067_v29, %v3195_v57  ;;  %v13224_v49 = vld [vmem:[%s13423_s10 + $0x190] sm:$0xff] }
 0x139   : > { %v1125_v52 = vadd.f32 %v14598_v46, %v1124_v44  ;;  %11996 = vmatprep.mubr.msk.f32.mxu1 %vm1672_vm2, %v13033_v59  ;;  %v14632_v53 = vpop.permute.xlu1 %4484  ;;  %19060 = vst [vmem:[#allocation20_spill] sm:$0xff] %v14638_v58  ;;  %13046 = vtanh.f32 %v1130_v47  ;;  %v13223_v47 = vld [vmem:[%s13423_s10 + $0x198] sm:$0xff]  ;;  %v4958_v44 = vsel %vm4938_vm3, %v4829_v11, %v19062_v12 }
 0x13a   : > { %v14640_v61 = vpop.permute.xlu0 %4482  ;;  %v11813_v33 = vpop.f32.mrf.mxu0  ;;  %11997 = vmatmul.mubr.msk.f32.gmra.mxu1 %vm1672_vm2, %v13031_v40  ;;  %12160 = vmatmul.mubr.msk.f32.gmra.mxu0 %vm5198_vm5, %v14626_v45  ;;  %v2813_v15 = vmul.f32 %v13223_v47, %v13223_v47  ;;  %v4830_v40 = vsel %vm439_vm1, 1.0, %v19061_v10  ;;  %v14658_v32 = vsel %vm5067_vm4, %v4958_v44, %v14318_v7  ;;  %v19065_v10 = vld [vmem:[#allocation29_spill] sm:$0xff] }
 0x13b   : > { %v13035_v51 = vpop.eup %13034  ;;  %13048 = vtanh.f32 %v1125_v52  ;;  %v1140_v59 = vadd.f32 %v14598_v46, %v11813_v33  ;;  %12162 = vmatprep.mubr.msk.f32.mxu0 %vm5198_vm5, %v14638_v58  ;;  %4012 = vrot.lane.b32.xlu1 %v10355_v56, %s13358_s14  ;;  %v2812_v52 = vmul.f32 %v13224_v49, %v13224_v49  ;;  %v4959_v56 = vsel %vm4938_vm3, %v4830_v40, %v14337_v39  ;;  %v19063_v39 = vld [vmem:[#allocation10_spill] sm:$0xff] }
 0x13c   : > { %v13037_v23 = vpop.eup %13036  ;;  %4010 = vrot.lane.b32.xlu0 %v10354_v22, %s13358_s14  ;;  %v1134_v35 = vpop.f32.mrf.mxu0  ;;  %v14668_v22 = vsel %vm5067_vm4, %v4959_v56, %v14360_v18  ;;  %v4831_v11 = vsel %vm439_vm1, 1.0, %v19063_v39  ;;  %v10357_v18 = vadd.f32 -1.0, %v2813_v15 }
 0x13d   : > { %v1135_v29 = vadd.f32 %v14598_v46, %v1134_v35  ;;  %11999 = vmatprep.mubr.msk.f32.mxu1 %vm1672_vm2, %v13037_v23  ;;  %v14664_v57 = vpop.permute.xlu1 %3464  ;;  %13050 = vtanh.f32 %v1140_v59  ;;  %v19064_v23 = vld [vmem:[#allocation13_spill] sm:$0xff]  ;;  %v4960_v40 = vsel %vm4938_vm3, %v4831_v11, %v19065_v10  ;;  %v10356_v44 = vadd.f32 -1.0, %v2812_v52 }
 0x13e   : > { %v14670_v50 = vpop.permute.xlu0 %3462  ;;  %v11816_v5 = vpop.f32.mrf.mxu0  ;;  %12000 = vmatmul.mubr.msk.f32.gmra.mxu1 %vm1672_vm2, %v13035_v51  ;;  %12163 = vmatmul.mubr.msk.f32.gmra.mxu0 %vm5198_vm5, %v14658_v32  ;;  %v4832_v51 = vsel %vm439_vm1, 1.0, %v19064_v23  ;;  %v14688_v35 = vsel %vm5067_vm4, %v4960_v40, %v14352_v3  ;;  %v3197_v11 = vmul.f32 2.0, %v13223_v47  ;;  %v3196_v40 = vmul.f32 2.0, %v13224_v49 }
 0x13f   : > { %v13039_v7 = vpop.eup %13038  ;;  %13052 = vtanh.f32 %v1135_v29  ;;  %v1150_v33 = vadd.f32 %v14598_v46, %v11816_v5  ;;  %12165 = vmatprep.mubr.msk.f32.mxu0 %vm5198_vm5, %v14668_v22  ;;  %4524 = vrot.lane.b32.xlu1 %v3323_v38, %s13359_s15  ;;  %v4961_v56 = vsel %vm4938_vm3, %v4832_v51, %v14389_v9  ;;  %v19066_v29 = vld [vmem:[#allocation12_spill] sm:$0xff]  ;;  %v3068_v10 = vmul.f32 %v13224_v49, %v10356_v44 }
 0x140   : > { %v13041_v59 = vpop.eup %13040  ;;  %4522 = vrot.lane.b32.xlu0 %v3322_v13, %s13359_s15  ;;  %v1144_v12 = vpop.f32.mrf.mxu0  ;;  %v4833_v5 = vsel %vm439_vm1, 1.0, %v19066_v29  ;;  %v14700_v13 = vsel %vm5067_vm4, %v4961_v56, %v14421_v0  ;;  %v3069_v0 = vmul.f32 %v13223_v47, %v10357_v18 }
 0x141   : > { %v1145_v38 = vadd.f32 %v14598_v46, %v1144_v12  ;;  %12002 = vmatprep.mubr.msk.f32.mxu1 %vm1672_vm2, %v13041_v59  ;;  %v14694_v15 = vpop.permute.xlu1 %3976  ;;  %19067 = vst [vmem:[#allocation22_spill] sm:$0xff] %v14700_v13  ;;  %13054 = vtanh.f32 %v1150_v33  ;;  %v19068_v59 = vld [vmem:[#allocation15_spill] sm:$0xff] }
 0x142   : > { %v14702_v52 = vpop.permute.xlu0 %3974  ;;  %v11819_v3 = vpop.f32.mrf.mxu0  ;;  %12003 = vmatmul.mubr.msk.f32.gmra.mxu1 %vm1672_vm2, %v13039_v7  ;;  %12166 = vmatmul.mubr.msk.f32.gmra.mxu0 %vm5198_vm5, %v14688_v35  ;;  %v4834_v23 = vsel %vm439_vm1, 1.0, %v19068_v59  ;;  %v4962_v7 = vsel %vm4938_vm3, %v4833_v5, %v14383_v17  ;;  %v19072_v59 = vld [vmem:[#allocation17_spill] sm:$0xff] }
 0x143   : > { %v13043_v9 = vpop.eup %13042  ;;  %13056 = vtanh.f32 %v1145_v38  ;;  %v1160_v39 = vadd.f32 %v14598_v46, %v11819_v3  ;;  %12168 = vmatprep.mubr.msk.f32.mxu0 %vm5198_vm5, %v14700_v13  ;;  %3504 = vrot.lane.b32.xlu1 %v13223_v47, %s13357_s13  ;;  %v14718_v12 = vsel %vm5067_vm4, %v4962_v7, %v14413_v30  ;;  %v4963_v47 = vsel %vm4938_vm3, %v4834_v23, %v14451_v20  ;;  %v13225_v30 = vld [vmem:[%s13423_s10 + $0x1a8] sm:$0xff] }
 0x144   : > { %v13045_v33 = vpop.eup %13044  ;;  %3502 = vrot.lane.b32.xlu0 %v13224_v49, %s13357_s13  ;;  %v1154_v51 = vpop.f32.mrf.mxu0  ;;  %19069 = vst [vmem:[#allocation5_spill] sm:$0xff] %v14718_v12  ;;  %v14728_v17 = vsel %vm5067_vm4, %v4963_v47, %v14481_v8  ;;  %v2815_v20 = vmul.f32 %v13225_v30, %v13225_v30  ;;  %v19071_v3 = vld [vmem:[#allocation14_spill] sm:$0xff]  ;;  %v4836_v23 = vsel %vm439_vm1, 1.0, %v19072_v59  ;;  %v3324_v47 = vsub.f32 %v3068_v10, %v3196_v40  ;;  %v19073_v40 = vld [vmem:[#allocation16_spill] sm:$0xff] }
 0x145   : > { %v1155_v56 = vadd.f32 %v14598_v46, %v1154_v51  ;;  %12005 = vmatprep.mubr.msk.f32.mxu1 %vm1672_vm2, %v13045_v33  ;;  %v14724_v38 = vpop.permute.xlu1 %4488  ;;  %19070 = vst [vmem:[#allocation7_spill] sm:$0xff] %v14728_v17  ;;  %13058 = vtanh.f32 %v1160_v39  ;;  %v4835_v33 = vsel %vm439_vm1, 1.0, %v19071_v3  ;;  %v3325_v39 = vsub.f32 %v3069_v0, %v3197_v11 }
 0x146   : > { %v14730_v29 = vpop.permute.xlu0 %4486  ;;  %v11822_v49 = vpop.f32.mrf.mxu0  ;;  %12006 = vmatmul.mubr.msk.f32.gmra.mxu1 %vm1672_vm2, %v13043_v9  ;;  %12169 = vmatmul.mubr.msk.f32.gmra.mxu0 %vm5198_vm5, %v14718_v12  ;;  %v4964_v7 = vsel %vm4938_vm3, %v4835_v33, %v14443_v62  ;;  %v4837_v33 = vsel %vm439_vm1, 1.0, %v19073_v40 }
 0x147   : > { %v13047_v5 = vpop.eup %13046  ;;  %13060 = vtanh.f32 %v1155_v56  ;;  %v1170_v8 = vadd.f32 %v14598_v46, %v11822_v49  ;;  %12171 = vmatprep.mubr.msk.f32.mxu0 %vm5198_vm5, %v14728_v17  ;;  %4016 = vrot.lane.b32.xlu1 %v10357_v18, %s13358_s14  ;;  %v13226_v56 = vld [vmem:[%s13423_s10 + $0x1a0] sm:$0xff]  ;;  %v14750_v49 = vsel %vm5067_vm4, %v4964_v7, %v14475_v4  ;;  %v4965_v18 = vsel %vm4938_vm3, %v4836_v23, %v14513_v28 }
 0x148   : > { %v13049_v9 = vpop.eup %13048  ;;  %4014 = vrot.lane.b32.xlu0 %v10356_v44, %s13358_s14  ;;  %v1164_v51 = vpop.f32.mrf.mxu0  ;;  %v2814_v3 = vmul.f32 %v13226_v56, %v13226_v56  ;;  %v14760_v62 = vsel %vm5067_vm4, %v4965_v18, %v14543_v6  ;;  %v10359_v4 = vadd.f32 -1.0, %v2815_v20 }
 0x149   : > { %v1165_v0 = vadd.f32 %v14598_v46, %v1164_v51  ;;  %12008 = vmatprep.mubr.msk.f32.mxu1 %vm1672_vm2, %v13049_v9  ;;  %v14756_v11 = vpop.permute.xlu1 %3468  ;;  %13062 = vtanh.f32 %v1170_v8  ;;  %v4838_v8 = vsel %vm439_vm1, 1.0, %v14573_v36 }
 0x14a   : > { %v14762_v44 = vpop.permute.xlu0 %3466  ;;  %v11825_v10 = vpop.f32.mrf.mxu0  ;;  %12009 = vmatmul.mubr.msk.f32.gmra.mxu1 %vm1672_vm2, %v13047_v5  ;;  %12172 = vmatmul.mubr.msk.f32.gmra.mxu0 %vm5198_vm5, %v14750_v49  ;;  %v4966_v5 = vsel %vm4938_vm3, %v4837_v33, %v14505_v24  ;;  %v10358_v59 = vadd.f32 -1.0, %v2814_v3  ;;  %v4967_v7 = vsel %vm4938_vm3, %v4838_v8, %v14610_v54  ;;  %v4839_v3 = vsel %vm439_vm1, 1.0, %v14567_v60 }
 0x14b   : > { %v13051_v28 = vpop.eup %13050  ;;  %13064 = vtanh.f32 %v1165_v0  ;;  %v1180_v9 = vadd.f32 %v14598_v46, %v11825_v10  ;;  %12174 = vmatprep.mubr.msk.f32.mxu0 %vm5198_vm5, %v14760_v62  ;;  %4528 = vrot.lane.b32.xlu1 %v3325_v39, %s13359_s15  ;;  %v14780_v23 = vsel %vm5067_vm4, %v4966_v5, %v14535_v19  ;;  %v14790_v24 = vsel %vm5067_vm4, %v4967_v7, %v14640_v61 }
 0x14c   : > { %v13053_v6 = vpop.eup %13052  ;;  %4526 = vrot.lane.b32.xlu0 %v3324_v47, %s13359_s15  ;;  %v1174_v20 = vpop.f32.mrf.mxu0  ;;  %v3071_v19 = vmul.f32 %v13225_v30, %v10359_v4  ;;  %v3199_v61 = vmul.f32 2.0, %v13225_v30  ;;  %v4968_v10 = vsel %vm4938_vm3, %v4839_v3, %v14602_v41  ;;  %v3070_v40 = vmul.f32 %v13226_v56, %v10358_v59 }
 0x14d   : > { %v1175_v39 = vadd.f32 %v14598_v46, %v1174_v20  ;;  %12011 = vmatprep.mubr.msk.f32.mxu1 %vm1672_vm2, %v13053_v6  ;;  %v14786_v51 = vpop.permute.xlu1 %3980  ;;  %13066 = vtanh.f32 %v1180_v9  ;;  %v3198_v33 = vmul.f32 2.0, %v13226_v56  ;;  %v14808_v9 = vsel %vm5067_vm4, %v4968_v10, %v14632_v53  ;;  %v13227_v53 = vld [vmem:[%s13423_s10 + $0x1b8] sm:$0xff] }
 0x14e   : > { %v3979_v36 = vpop.permute.xlu0 %3978  ;;  %v11828_v47 = vpop.f32.mrf.mxu0  ;;  %12012 = vmatmul.mubr.msk.f32.gmra.mxu1 %vm1672_vm2, %v13051_v28  ;;  %12175 = vmatmul.mubr.msk.f32.gmra.mxu0 %vm5198_vm5, %v14780_v23  ;;  %v4840_v28 = vsel %vm439_vm1, 1.0, %v14670_v50  ;;  %19074 = vst [vmem:[#allocation19_spill] sm:$0xff] %v14808_v9  ;;  %v4841_v20 = vsel %vm439_vm1, 1.0, %v14664_v57 }
 0x14f   : > { %v13055_v54 = vpop.eup %13054  ;;  %13068 = vtanh.f32 %v1175_v39  ;;  %v1190_v18 = vadd.f32 %v14598_v46, %v11828_v47  ;;  %12177 = vmatprep.mubr.msk.f32.mxu0 %vm5198_vm5, %v14790_v24  ;;  %3508 = vrot.lane.b32.xlu1 %v13225_v30, %s13357_s13  ;;  %v4969_v30 = vsel %vm4938_vm3, %v4840_v28, %v14702_v52  ;;  %v2817_v52 = vmul.f32 %v13227_v53, %v13227_v53 }
 0x150   : > { %v13057_v0 = vpop.eup %13056  ;;  %3506 = vrot.lane.b32.xlu0 %v13226_v56, %s13357_s13  ;;  %v1184_v60 = vpop.f32.mrf.mxu0  ;;  %v14816_v50 = vsel %vm5067_vm4, %v4969_v30, %v14730_v29  ;;  %v3327_v29 = vsub.f32 %v3071_v19, %v3199_v61  ;;  %v4970_v47 = vsel %vm4938_vm3, %v4841_v20, %v14694_v15  ;;  %v3326_v57 = vsub.f32 %v3070_v40, %v3198_v33 }
 0x151   : > { %v1185_v6 = vadd.f32 %v14598_v46, %v1184_v60  ;;  %12014 = vmatprep.mubr.msk.f32.mxu1 %vm1672_vm2, %v13057_v0  ;;  %v4493_v41 = vpop.permute.xlu1 %4492  ;;  %19075 = vst [vmem:[#allocation21_spill] sm:$0xff] %v14816_v50  ;;  %13070 = vtanh.f32 %v1190_v18  ;;  %v13228_v18 = vld [vmem:[%s13423_s10 + $0x1b0] sm:$0xff]  ;;  %v14836_v10 = vsel %vm5067_vm4, %v4970_v47, %v14724_v38  ;;  %v10361_v38 = vadd.f32 -1.0, %v2817_v52 }
 0x152   : > { %v4491_v5 = vpop.permute.xlu0 %4490  ;;  %v11831_v8 = vpop.f32.mrf.mxu0  ;;  %12015 = vmatmul.mubr.msk.f32.gmra.mxu1 %vm1672_vm2, %v13055_v54  ;;  %12178 = vmatmul.mubr.msk.f32.gmra.mxu0 %vm5198_vm5, %v14808_v9  ;;  %v4842_v54 = vsel %vm439_vm1, 1.0, %v14762_v44  ;;  %v2816_v0 = vmul.f32 %v13228_v18, %v13228_v18  ;;  %v3201_v20 = vmul.f32 2.0, %v13227_v53 }
 0x153   : > { %v13059_v56 = vpop.eup %13058  ;;  %13072 = vtanh.f32 %v1185_v6  ;;  %v1200_v7 = vadd.f32 %v14598_v46, %v11831_v8  ;;  %12180 = vmatprep.mubr.msk.f32.mxu0 %vm5198_vm5, %v14816_v50  ;;  %4020 = vrot.lane.b32.xlu1 %v10359_v4, %s13358_s14  ;;  %v4971_v4 = vsel %vm4938_vm3, %v4842_v54, %v3979_v36  ;;  %v4843_v36 = vsel %vm439_vm1, 1.0, %v14756_v11 }
 0x154   : > { %v13061_v39 = vpop.eup %13060  ;;  %4018 = vrot.lane.b32.xlu0 %v10358_v59, %s13358_s14  ;;  %v1194_v3 = vpop.f32.mrf.mxu0  ;;  %v14842_v61 = vsel %vm5067_vm4, %v4971_v4, %v4491_v5  ;;  %v4972_v33 = vsel %vm4938_vm3, %v4843_v36, %v14786_v51  ;;  %v10360_v6 = vadd.f32 -1.0, %v2816_v0  ;;  %v3073_v51 = vmul.f32 %v13227_v53, %v10361_v38 }
 0x155   : > { %v1195_v19 = vadd.f32 %v14598_v46, %v1194_v3  ;;  %12017 = vmatprep.mubr.msk.f32.mxu1 %vm1672_vm2, %v13061_v39  ;;  %v3473_v15 = vpop.permute.xlu1 %3472  ;;  %19076 = vst [vmem:[#allocation24_spill] sm:$0xff] %v14842_v61  ;;  %13074 = vtanh.f32 %v1200_v7  ;;  %v14857_v5 = vsel %vm5067_vm4, %v4972_v33, %v4493_v41  ;;  %v3200_v3 = vmul.f32 2.0, %v13228_v18 }
 0x156   : > { %v3471_v44 = vpop.permute.xlu0 %3470  ;;  %v11834_v59 = vpop.f32.mrf.mxu0  ;;  %12018 = vmatmul.mubr.msk.f32.gmra.mxu1 %vm1672_vm2, %v13059_v56  ;;  %12181 = vmatmul.mubr.msk.f32.gmra.mxu0 %vm5198_vm5, %v14836_v10  ;;  %19077 = vst [vmem:[#allocation6_spill] sm:$0xff] %v14857_v5  ;;  %v4845_v39 = vsel %vm439_vm1, 1.0, %v3473_v15  ;;  %v3072_v54 = vmul.f32 %v13228_v18, %v10360_v6 }
 0x157   : > { %v13063_v28 = vpop.eup %13062  ;;  %13076 = vtanh.f32 %v1195_v19  ;;  %v1210_v60 = vadd.f32 %v14598_v46, %v11834_v59  ;;  %12183 = vmatprep.mubr.msk.f32.mxu0 %vm5198_vm5, %v14842_v61  ;;  %4532 = vrot.lane.b32.xlu1 %v3327_v29, %s13359_s15 }
 0x158   : > { %v13065_v40 = vpop.eup %13064  ;;  %4530 = vrot.lane.b32.xlu0 %v3326_v57, %s13359_s15  ;;  %v1204_v30 = vpop.f32.mrf.mxu0  ;;  %v4844_v57 = vsel %vm439_vm1, 1.0, %v3471_v44 }
 0x159   : > { %v1205_v11 = vadd.f32 %v14598_v46, %v1204_v30  ;;  %12020 = vmatprep.mubr.msk.f32.mxu1 %vm1672_vm2, %v13065_v40  ;;  %v3985_v8 = vpop.permute.xlu1 %3984  ;;  %13078 = vtanh.f32 %v1210_v60  ;;  %v13229_v40 = vld [vmem:[%s13423_s10 + $0x1c8] sm:$0xff] }
 0x15a   : > { %v3983_v52 = vpop.permute.xlu0 %3982  ;;  %v11837_v56 = vpop.f32.mrf.mxu0  ;;  %12021 = vmatmul.mubr.msk.f32.gmra.mxu1 %vm1672_vm2, %v13063_v28  ;;  %12184 = vmatmul.mubr.msk.f32.gmra.mxu0 %vm5198_vm5, %v14857_v5  ;;  %v4974_v0 = vsel %vm4938_vm3, %v4845_v39, %v3985_v8  ;;  %v2819_v33 = vmul.f32 %v13229_v40, %v13229_v40  ;;  %v3328_v8 = vsub.f32 %v3072_v54, %v3200_v3 }
 0x15b   : > { %v13067_v7 = vpop.eup %13066  ;;  %13080 = vtanh.f32 %v1205_v11  ;;  %v1220_v41 = vadd.f32 %v14598_v46, %v11837_v56  ;;  %3512 = vrot.lane.b32.xlu1 %v13227_v53, %s13357_s13  ;;  %v4973_v53 = vsel %vm4938_vm3, %v4844_v57, %v3983_v52  ;;  %v13230_v52 = vld [vmem:[%s13423_s10 + $0x1c0] sm:$0xff] }
 0x15c   : > { %v13069_v29 = vpop.eup %13068  ;;  %3510 = vrot.lane.b32.xlu0 %v13228_v18, %s13357_s13  ;;  %v1214_v47 = vpop.f32.mrf.mxu0  ;;  %v3329_v18 = vsub.f32 %v3073_v51, %v3201_v20  ;;  %v2818_v56 = vmul.f32 %v13230_v52, %v13230_v52 }
 0x15d   : > { %v1215_v4 = vadd.f32 %v14598_v46, %v1214_v47  ;;  %12023 = vmatprep.mubr.msk.f32.mxu1 %vm1672_vm2, %v13069_v29  ;;  %v4497_v19 = vpop.permute.xlu1 %4496  ;;  %13082 = vtanh.f32 %v1220_v41  ;;  %v10363_v29 = vadd.f32 -1.0, %v2819_v33 }
 0x15e   : > { %v14874_v15 = vsel %vm5067_vm4, %v4974_v0, %v4497_v19  ;;  %v4495_v59 = vpop.permute.xlu0 %4494  ;;  %v11840_v28 = vpop.f32.mrf.mxu0  ;;  %12024 = vmatmul.mubr.msk.f32.gmra.mxu1 %vm1672_vm2, %v13067_v7  ;;  %v10362_v54 = vadd.f32 -1.0, %v2818_v56 }
 0x15f   : > { %19078 = vst [vmem:[#allocation26_spill] sm:$0xff] %v14874_v15  ;;  %v13071_v44 = vpop.eup %13070  ;;  %13084 = vtanh.f32 %v1215_v4  ;;  %v14878_v36 = vsel %vm5067_vm4, %v4973_v53, %v4495_v59  ;;  %v1230_v60 = vadd.f32 %v14598_v46, %v11840_v28  ;;  %4024 = vrot.lane.b32.xlu1 %v10361_v38, %s13358_s14  ;;  %v3075_v59 = vmul.f32 %v13229_v40, %v10363_v29 }
 0x160   : > { %19079 = vst [vmem:[#allocation9_spill] sm:$0xff] %v14878_v36  ;;  %v13073_v30 = vpop.eup %13072  ;;  %4022 = vrot.lane.b32.xlu0 %v10360_v6, %s13358_s14  ;;  %v1224_v11 = vpop.f32.mrf.mxu0  ;;  %12186 = vmatprep.mubr.msk.f32.mxu0 %vm5198_vm5, %v14878_v36  ;;  %v3203_v28 = vmul.f32 2.0, %v13229_v40  ;;  %v3074_v33 = vmul.f32 %v13230_v52, %v10362_v54 }
 0x161   : > { %v1225_v51 = vadd.f32 %v14598_v46, %v1224_v11  ;;  %12026 = vmatprep.mubr.msk.f32.mxu1 %vm1672_vm2, %v13073_v30  ;;  %12187 = vmatmul.mubr.msk.f32.gmra.mxu0 %vm5198_vm5, %v14874_v15  ;;  %v3477_v38 = vpop.permute.xlu1 %3476  ;;  %13086 = vtanh.f32 %v1230_v60  ;;  %v3202_v30 = vmul.f32 2.0, %v13230_v52 }
 0x162   : > { %v3475_v20 = vpop.permute.xlu0 %3474  ;;  %v11843_v7 = vpop.f32.mrf.mxu0  ;;  %12027 = vmatmul.mubr.msk.f32.gmra.mxu1 %vm1672_vm2, %v13071_v44  ;;  %v4847_v44 = vsel %vm439_vm1, 1.0, %v3477_v38 }
 0x163   : > { %v13075_v6 = vpop.eup %13074  ;;  %13088 = vtanh.f32 %v1225_v51  ;;  %v1240_v41 = vadd.f32 %v14598_v46, %v11843_v7  ;;  %4536 = vrot.lane.b32.xlu1 %v3329_v18, %s13359_s15  ;;  %v4846_v11 = vsel %vm439_vm1, 1.0, %v3475_v20 }
 0x164   : > { %v13077_v39 = vpop.eup %13076  ;;  %4534 = vrot.lane.b32.xlu0 %v3328_v8, %s13359_s15  ;;  %v1234_v47 = vpop.f32.mrf.mxu0 }
 0x165   : > { %v1235_v3 = vadd.f32 %v14598_v46, %v1234_v47  ;;  %12029 = vmatprep.mubr.msk.f32.mxu1 %vm1672_vm2, %v13077_v39  ;;  %v3989_v57 = vpop.permute.xlu1 %3988  ;;  %13090 = vtanh.f32 %v1240_v41 }
 0x166   : > { %v3987_v0 = vpop.permute.xlu0 %3986  ;;  %v11846_v4 = vpop.f32.mrf.mxu0  ;;  %12030 = vmatmul.mubr.msk.f32.gmra.mxu1 %vm1672_vm2, %v13075_v6  ;;  %v4976_v8 = vsel %vm4938_vm3, %v4847_v44, %v3989_v57 }
 0x167   : > { %v13079_v19 = vpop.eup %13078  ;;  %13092 = vtanh.f32 %v1235_v3  ;;  %v1250_v53 = vadd.f32 %v14598_v46, %v11846_v4  ;;  %3516 = vrot.lane.b32.xlu1 %v13229_v40, %s13357_s13  ;;  %v4975_v40 = vsel %vm4938_vm3, %v4846_v11, %v3987_v0  ;;  %v3331_v3 = vsub.f32 %v3075_v59, %v3203_v28 }
 0x168   : > { %v13081_v18 = vpop.eup %13080  ;;  %3514 = vrot.lane.b32.xlu0 %v13230_v52, %s13357_s13  ;;  %v1244_v60 = vpop.f32.mrf.mxu0  ;;  %v13231_v52 = vld [vmem:[%s13423_s10 + $0x1d8] sm:$0xff]  ;;  %v3330_v4 = vsub.f32 %v3074_v33, %v3202_v30 }
 0x169   : > { %v1245_v56 = vadd.f32 %v14598_v46, %v1244_v60  ;;  %12032 = vmatprep.mubr.msk.f32.mxu1 %vm1672_vm2, %v13081_v18  ;;  %v4501_v51 = vpop.permute.xlu1 %4500  ;;  %13094 = vtanh.f32 %v1250_v53  ;;  %v2821_v20 = vmul.f32 %v13231_v52, %v13231_v52  ;;  %v10562_v18 = vld [vmem:[%s18791_s5 + $0x10] sm:$0xff] }
 0x16a   : > { %v14908_v38 = vsel %vm5067_vm4, %v4976_v8, %v4501_v51  ;;  %v4499_v7 = vpop.permute.xlu0 %4498  ;;  %v11849_v6 = vpop.f32.mrf.mxu0  ;;  %12033 = vmatmul.mubr.msk.f32.gmra.mxu1 %vm1672_vm2, %v13079_v19  ;;  %v13232_v19 = vld [vmem:[%s13423_s10 + $0x1d0] sm:$0xff]  ;;  %12329 = vmatprep.subr.mxu1 %v10562_v18 }
 0x16b   : > { %19080 = vst [vmem:[#allocation23_spill] sm:$0xff] %v14908_v38  ;;  %v13083_v41 = vpop.eup %13082  ;;  %13096 = vtanh.f32 %v1245_v56  ;;  %v14913_v39 = vsel %vm5067_vm4, %v4975_v40, %v4499_v7  ;;  %v1260_v47 = vadd.f32 %v14598_v46, %v11849_v6  ;;  %4028 = vrot.lane.b32.xlu1 %v10363_v29, %s13358_s14  ;;  %v2820_v53 = vmul.f32 %v13232_v19, %v13232_v19 }
 0x16c   : > { %19081 = vst [vmem:[#allocation25_spill] sm:$0xff] %v14913_v39  ;;  %v13085_v57 = vpop.eup %13084  ;;  %4026 = vrot.lane.b32.xlu0 %v10362_v54, %s13358_s14  ;;  %v1254_v0 = vpop.f32.mrf.mxu0  ;;  %12189 = vmatprep.mubr.msk.f32.mxu0 %vm5198_vm5, %v14913_v39  ;;  %v10365_v28 = vadd.f32 -1.0, %v2821_v20  ;;  %v3205_v20 = vmul.f32 2.0, %v13231_v52 }
 0x16d   : > { %v1255_v44 = vadd.f32 %v14598_v46, %v1254_v0  ;;  %12035 = vmatprep.mubr.msk.f32.mxu1 %vm1672_vm2, %v13085_v57  ;;  %12190 = vmatmul.mubr.msk.f32.gmra.mxu0 %vm5198_vm5, %v14908_v38  ;;  %v3481_v29 = vpop.permute.xlu1 %3480  ;;  %13098 = vtanh.f32 %v1260_v47  ;;  %v10364_v8 = vadd.f32 -1.0, %v2820_v53  ;;  %v3204_v53 = vmul.f32 2.0, %v13232_v19 }
 0x16e   : > { %v3479_v54 = vpop.permute.xlu0 %3478  ;;  %v11852_v59 = vpop.f32.mrf.mxu0  ;;  %12036 = vmatmul.mubr.msk.f32.gmra.mxu1 %vm1672_vm2, %v13083_v41  ;;  %v3077_v6 = vmul.f32 %v13231_v52, %v10365_v28  ;;  %v4849_v57 = vsel %vm439_vm1, 1.0, %v3481_v29 }
 0x16f   : > { %v13087_v60 = vpop.eup %13086  ;;  %13100 = vtanh.f32 %v1255_v44  ;;  %v1270_v33 = vadd.f32 %v14598_v46, %v11852_v59  ;;  %4540 = vrot.lane.b32.xlu1 %v3331_v3, %s13359_s15  ;;  %12330 = vmatpush3.msra.mxu1 %v10562_v18  ;;  %v4848_v18 = vsel %vm439_vm1, 1.0, %v3479_v54 }
 0x170   : > { %v13089_v30 = vpop.eup %13088  ;;  %4538 = vrot.lane.b32.xlu0 %v3330_v4, %s13359_s15  ;;  %v1264_v11 = vpop.f32.mrf.mxu0  ;;  %v3076_v4 = vmul.f32 %v13232_v19, %v10364_v8 }
 0x171   : > { %v1265_v56 = vadd.f32 %v14598_v46, %v1264_v11  ;;  %12038 = vmatprep.mubr.msk.f32.mxu1 %vm1672_vm2, %v13089_v30  ;;  %v3993_v51 = vpop.permute.xlu1 %3992  ;;  %13102 = vtanh.f32 %v1270_v33 }
 0x172   : > { %v3991_v40 = vpop.permute.xlu0 %3990  ;;  %v11855_v7 = vpop.f32.mrf.mxu0  ;;  %12039 = vmatmul.mubr.msk.f32.gmra.mxu1 %vm1672_vm2, %v13087_v60  ;;  %v4978_v44 = vsel %vm4938_vm3, %v4849_v57, %v3993_v51  ;;  %v13233_v51 = vld [vmem:[%s13423_s10 + $0x1e8] sm:$0xff] }
 0x173   : > { %v13091_v41 = vpop.eup %13090  ;;  %13104 = vtanh.f32 %v1265_v56  ;;  %v1280_v47 = vadd.f32 %v14598_v46, %v11855_v7  ;;  %3520 = vrot.lane.b32.xlu1 %v13231_v52, %s13357_s13  ;;  %v4977_v52 = vsel %vm4938_vm3, %v4848_v18, %v3991_v40  ;;  %v2823_v40 = vmul.f32 %v13233_v51, %v13233_v51 }
 0x174   : > { %v13093_v3 = vpop.eup %13092  ;;  %3518 = vrot.lane.b32.xlu0 %v13232_v19, %s13357_s13  ;;  %v1274_v0 = vpop.f32.mrf.mxu0  ;;  %v3333_v19 = vsub.f32 %v3077_v6, %v3205_v20  ;;  %v13234_v6 = vld [vmem:[%s13423_s10 + $0x1e0] sm:$0xff] }
 0x175   : > { %v1275_v59 = vadd.f32 %v14598_v46, %v1274_v0  ;;  %12041 = vmatprep.mubr.msk.f32.mxu1 %vm1672_vm2, %v13093_v3  ;;  %v4505_v60 = vpop.permute.xlu1 %4504  ;;  %13106 = vtanh.f32 %v1280_v47  ;;  %v2822_v20 = vmul.f32 %v13234_v6, %v13234_v6 }
 0x176   : > { %v14945_v29 = vsel %vm5067_vm4, %v4978_v44, %v4505_v60  ;;  %v4503_v33 = vpop.permute.xlu0 %4502  ;;  %v11858_v30 = vpop.f32.mrf.mxu0  ;;  %12042 = vmatmul.mubr.msk.f32.gmra.mxu1 %vm1672_vm2, %v13091_v41  ;;  %v3332_v41 = vsub.f32 %v3076_v4, %v3204_v53  ;;  %v10367_v4 = vadd.f32 -1.0, %v2823_v40  ;;  %v3207_v40 = vmul.f32 2.0, %v13233_v51 }
 0x177   : > { %19082 = vst [vmem:[#allocation28_spill] sm:$0xff] %v14945_v29  ;;  %v13095_v54 = vpop.eup %13094  ;;  %13108 = vtanh.f32 %v1275_v59  ;;  %v14949_v11 = vsel %vm5067_vm4, %v4977_v52, %v4503_v33  ;;  %v1290_v56 = vadd.f32 %v14598_v46, %v11858_v30  ;;  %4032 = vrot.lane.b32.xlu1 %v10365_v28, %s13358_s14  ;;  %v10366_v59 = vadd.f32 -1.0, %v2822_v20 }
 0x178   : > { %19083 = vst [vmem:[#allocation8_spill] sm:$0xff] %v14949_v11  ;;  %v13097_v7 = vpop.eup %13096  ;;  %4030 = vrot.lane.b32.xlu0 %v10364_v8, %s13358_s14  ;;  %v1284_v47 = vpop.f32.mrf.mxu0  ;;  %12192 = vmatprep.mubr.msk.f32.mxu0 %vm5198_vm5, %v14949_v11 }
 0x179   : > { %v1285_v3 = vadd.f32 %v14598_v46, %v1284_v47  ;;  %12044 = vmatprep.mubr.msk.f32.mxu1 %vm1672_vm2, %v13097_v7  ;;  %12193 = vmatmul.mubr.msk.f32.gmra.mxu0 %vm5198_vm5, %v14945_v29  ;;  %v3485_v28 = vpop.permute.xlu1 %3484  ;;  %13110 = vtanh.f32 %v1290_v56  ;;  %v3079_v56 = vmul.f32 %v13233_v51, %v10367_v4  ;;  %v3078_v20 = vmul.f32 %v13234_v6, %v10366_v59 }
 0x17a   : > { %v3483_v57 = vpop.permute.xlu0 %3482  ;;  %v11861_v0 = vpop.f32.mrf.mxu0  ;;  %12045 = vmatmul.mubr.msk.f32.gmra.mxu1 %vm1672_vm2, %v13095_v54  ;;  %v4851_v47 = vsel %vm439_vm1, 1.0, %v3485_v28 }
 0x17b   : > { %v13099_v8 = vpop.eup %13098  ;;  %13112 = vtanh.f32 %v1285_v3  ;;  %v1300_v18 = vadd.f32 %v14598_v46, %v11861_v0  ;;  %4544 = vrot.lane.b32.xlu1 %v3333_v19, %s13359_s15  ;;  %v3206_v3 = vmul.f32 2.0, %v13234_v6  ;;  %v4850_v0 = vsel %vm439_vm1, 1.0, %v3483_v57 }
 0x17c   : > { %v13101_v53 = vpop.eup %13100  ;;  %4542 = vrot.lane.b32.xlu0 %v3332_v41, %s13359_s15  ;;  %v1294_v44 = vpop.f32.mrf.mxu0 }
 0x17d   : > { %v1295_v60 = vadd.f32 %v14598_v46, %v1294_v44  ;;  %12047 = vmatprep.mubr.msk.f32.mxu1 %vm1672_vm2, %v13101_v53  ;;  %v3997_v52 = vpop.permute.xlu1 %3996  ;;  %13114 = vtanh.f32 %v1300_v18 }
 0x17e   : > { %v3995_v33 = vpop.permute.xlu0 %3994  ;;  %v11864_v30 = vpop.f32.mrf.mxu0  ;;  %12048 = vmatmul.mubr.msk.f32.gmra.mxu1 %vm1672_vm2, %v13099_v8  ;;  %v4980_v8 = vsel %vm4938_vm3, %v4851_v47, %v3997_v52 }
 0x17f   : > { %v13103_v54 = vpop.eup %13102  ;;  %13116 = vtanh.f32 %v1295_v60  ;;  %v1310_v19 = vadd.f32 %v14598_v46, %v11864_v30  ;;  %3524 = vrot.lane.b32.xlu1 %v13233_v51, %s13357_s13  ;;  %v4979_v51 = vsel %vm4938_vm3, %v4850_v0, %v3995_v33  ;;  %v3335_v33 = vsub.f32 %v3079_v56, %v3207_v40 }
 0x180   : > { %v13105_v7 = vpop.eup %13104  ;;  %3522 = vrot.lane.b32.xlu0 %v13234_v6, %s13357_s13  ;;  %v1304_v41 = vpop.f32.mrf.mxu0  ;;  %v13235_v6 = vld [vmem:[%s13423_s10 + $0x1f8] sm:$0xff] }
 0x181   : > { %v1305_v18 = vadd.f32 %v14598_v46, %v1304_v41  ;;  %12050 = vmatprep.mubr.msk.f32.mxu1 %vm1672_vm2, %v13105_v7  ;;  %v4509_v53 = vpop.permute.xlu1 %4508  ;;  %13118 = vtanh.f32 %v1310_v19  ;;  %v2825_v57 = vmul.f32 %v13235_v6, %v13235_v6  ;;  %v13236_v41 = vld [vmem:[%s13423_s10 + $0x1f0] sm:$0xff] }
 0x182   : > { %v14979_v28 = vsel %vm5067_vm4, %v4980_v8, %v4509_v53  ;;  %v4507_v44 = vpop.permute.xlu0 %4506  ;;  %v11867_v60 = vpop.f32.mrf.mxu0  ;;  %12051 = vmatmul.mubr.msk.f32.gmra.mxu1 %vm1672_vm2, %v13103_v54  ;;  %v3334_v54 = vsub.f32 %v3078_v20, %v3206_v3  ;;  %v2824_v0 = vmul.f32 %v13236_v41, %v13236_v41 }
 0x183   : > { %19084 = vst [vmem:[#allocation11_spill] sm:$0xff] %v14979_v28  ;;  %v13107_v30 = vpop.eup %13106  ;;  %13120 = vtanh.f32 %v1305_v18  ;;  %v14984_v52 = vsel %vm5067_vm4, %v4979_v51, %v4507_v44  ;;  %v1320_v7 = vadd.f32 %v14598_v46, %v11867_v60  ;;  %4036 = vrot.lane.b32.xlu1 %v10367_v4, %s13358_s14 }
 0x184   : > { %19085 = vst [vmem:[#allocation27_spill] sm:$0xff] %v14984_v52  ;;  %v13109_v19 = vpop.eup %13108  ;;  %4034 = vrot.lane.b32.xlu0 %v10366_v59, %s13358_s14  ;;  %v1314_v47 = vpop.f32.mrf.mxu0  ;;  %12195 = vmatprep.mubr.msk.f32.mxu0 %vm5198_vm5, %v14984_v52  ;;  %v10369_v59 = vadd.f32 -1.0, %v2825_v57  ;;  %v10368_v51 = vadd.f32 -1.0, %v2824_v0 }
 0x185   : > { %v1315_v8 = vadd.f32 %v14598_v46, %v1314_v47  ;;  %12053 = vmatprep.mubr.msk.f32.mxu1 %vm1672_vm2, %v13109_v19  ;;  %12196 = vmatmul.mubr.msk.f32.gmra.mxu0 %vm5198_vm5, %v14979_v28  ;;  %v3489_v18 = vpop.permute.xlu1 %3488  ;;  %13122 = vtanh.f32 %v1320_v7  ;;  %v3209_v19 = vmul.f32 2.0, %v13235_v6 }
 0x186   : > { %v3487_v4 = vpop.permute.xlu0 %3486  ;;  %v11870_v56 = vpop.f32.mrf.mxu0  ;;  %12054 = vmatmul.mubr.msk.f32.gmra.mxu1 %vm1672_vm2, %v13107_v30  ;;  %v3081_v57 = vmul.f32 %v13235_v6, %v10369_v59  ;;  %v4853_v0 = vsel %vm439_vm1, 1.0, %v3489_v18 }
 0x187   : > { %v13111_v40 = vpop.eup %13110  ;;  %13124 = vtanh.f32 %v1315_v8  ;;  %v1330_v20 = vadd.f32 %v14598_v46, %v11870_v56  ;;  %4548 = vrot.lane.b32.xlu1 %v3335_v33, %s13359_s15  ;;  %v3080_v56 = vmul.f32 %v13236_v41, %v10368_v51 }
 0x188   : > { %v13113_v3 = vpop.eup %13112  ;;  %4546 = vrot.lane.b32.xlu0 %v3334_v54, %s13359_s15  ;;  %v1324_v53 = vpop.f32.mrf.mxu0 }
 0x189   : > { %v1325_v44 = vadd.f32 %v14598_v46, %v1324_v53  ;;  %12056 = vmatprep.mubr.msk.f32.mxu1 %vm1672_vm2, %v13113_v3  ;;  %v4001_v60 = vpop.permute.xlu1 %4000  ;;  %13126 = vtanh.f32 %v1330_v20  ;;  %v3208_v20 = vmul.f32 2.0, %v13236_v41  ;;  %v4852_v3 = vsel %vm439_vm1, 1.0, %v3487_v4 }
 0x18a   : > { %v3999_v7 = vpop.permute.xlu0 %3998  ;;  %v11873_v30 = vpop.f32.mrf.mxu0  ;;  %12057 = vmatmul.mubr.msk.f32.gmra.mxu1 %vm1672_vm2, %v13111_v40  ;;  %v4982_v40 = vsel %vm4938_vm3, %v4853_v0, %v4001_v60 }
 0x18b   : > { %v13115_v47 = vpop.eup %13114  ;;  %13128 = vtanh.f32 %v1325_v44  ;;  %v1340_v33 = vadd.f32 %v14598_v46, %v11873_v30  ;;  %3528 = vrot.lane.b32.xlu1 %v13235_v6, %s13357_s13  ;;  %v4981_v6 = vsel %vm4938_vm3, %v4852_v3, %v3999_v7  ;;  %v13237_v7 = vld [vmem:[%s13423_s10 + $0x208] sm:$0xff]  ;;  %v15029_v3 = vld [vmem:[%s18788_s2] ss:$0 sm:$0xff] }
 0x18c   : > { %v13117_v54 = vpop.eup %13116  ;;  %3526 = vrot.lane.b32.xlu0 %v13236_v41, %s13357_s13  ;;  %v1334_v8 = vpop.f32.mrf.mxu0  ;;  %v3337_v41 = vsub.f32 %v3081_v57, %v3209_v19  ;;  %v13238_v57 = vld [vmem:[%s13423_s10 + $0x200] sm:$0xff] }
 0x18d   : > { %v1335_v53 = vadd.f32 %v14598_v46, %v1334_v8  ;;  %12059 = vmatprep.mubr.msk.f32.mxu1 %vm1672_vm2, %v13117_v54  ;;  %v4513_v44 = vpop.permute.xlu1 %4512  ;;  %13130 = vtanh.f32 %v1340_v33  ;;  %v2827_v33 = vmul.f32 %v13237_v7, %v13237_v7  ;;  %v2826_v19 = vmul.f32 %v13238_v57, %v13238_v57 }
 0x18e   : > { %v15013_v18 = vsel %vm5067_vm4, %v4982_v40, %v4513_v44  ;;  %v4511_v30 = vpop.permute.xlu0 %4510  ;;  %v11876_v28 = vpop.f32.mrf.mxu0  ;;  %12060 = vmatmul.mubr.msk.f32.gmra.mxu1 %vm1672_vm2, %v13115_v47  ;;  %v3336_v47 = vsub.f32 %v3080_v56, %v3208_v20 }
 0x18f   : > { %19086 = vst [vmem:[#allocation10_spill] sm:$0xff] %v15013_v18  ;;  %v13119_v4 = vpop.eup %13118  ;;  %13132 = vtanh.f32 %v1335_v53  ;;  %v15017_v60 = vsel %vm5067_vm4, %v4981_v6, %v4511_v30  ;;  %v1350_v54 = vadd.f32 %v14598_v46, %v11876_v28  ;;  %4040 = vrot.lane.b32.xlu1 %v10369_v59, %s13358_s14  ;;  %v10371_v40 = vadd.f32 -1.0, %v2827_v33 }
 0x190   : > { %19087 = vst [vmem:[#allocation13_spill] sm:$0xff] %v15017_v60  ;;  %v13121_v0 = vpop.eup %13120  ;;  %4038 = vrot.lane.b32.xlu0 %v10368_v51, %s13358_s14  ;;  %v1344_v8 = vpop.f32.mrf.mxu0  ;;  %12198 = vmatprep.mubr.msk.f32.mxu0 %vm5198_vm5, %v15017_v60  ;;  %v10370_v6 = vadd.f32 -1.0, %v2826_v19 }
 0x191   : > { %v1345_v46 = vadd.f32 %v15029_v3, %v1344_v8  ;;  %12062 = vmatprep.mubr.msk.f32.mxu1 %vm1672_vm2, %v13121_v0  ;;  %12199 = vmatmul.mubr.msk.f32.gmra.mxu0 %vm5198_vm5, %v15013_v18  ;;  %v3493_v28 = vpop.permute.xlu1 %3492  ;;  %13134 = vtanh.f32 %v1350_v54  ;;  %v3083_v33 = vmul.f32 %v13237_v7, %v10371_v40 }
 0x192   : > { %v3491_v59 = vpop.permute.xlu0 %3490  ;;  %v11879_v51 = vpop.f32.mrf.mxu0  ;;  %12063 = vmatmul.mubr.msk.f32.gmra.mxu1 %vm1672_vm2, %v13119_v4  ;;  %v4855_v19 = vsel %vm439_vm1, 1.0, %v3493_v28 }
 0x193   : > { %v13123_v56 = vpop.eup %13122  ;;  %13136 = vtanh.f32 %v1345_v46  ;;  %v1360_v20 = vadd.f32 %v15029_v3, %v11879_v51  ;;  %4552 = vrot.lane.b32.xlu1 %v3337_v41, %s13359_s15 }
 0x194   : > { %v13125_v53 = vpop.eup %13124  ;;  %4550 = vrot.lane.b32.xlu0 %v3336_v47, %s13359_s15  ;;  %v1354_v44 = vpop.f32.mrf.mxu0  ;;  %v3211_v47 = vmul.f32 2.0, %v13237_v7 }
 0x195   : > { %v1355_v30 = vadd.f32 %v15029_v3, %v1354_v44  ;;  %12065 = vmatprep.mubr.msk.f32.mxu1 %vm1672_vm2, %v13125_v53  ;;  %v4005_v54 = vpop.permute.xlu1 %4004  ;;  %13138 = vtanh.f32 %v1360_v20  ;;  %v3082_v20 = vmul.f32 %v13238_v57, %v10370_v6  ;;  %v3210_v53 = vmul.f32 2.0, %v13238_v57 }
 0x196   : > { %v4003_v0 = vpop.permute.xlu0 %4002  ;;  %v11882_v4 = vpop.f32.mrf.mxu0  ;;  %12066 = vmatmul.mubr.msk.f32.gmra.mxu1 %vm1672_vm2, %v13123_v56  ;;  %v4854_v44 = vsel %vm439_vm1, 1.0, %v3491_v59  ;;  %v4984_v56 = vsel %vm4938_vm3, %v4855_v19, %v4005_v54 }
 0x197   : > { %v13127_v8 = vpop.eup %13126  ;;  %13140 = vtanh.f32 %v1355_v30  ;;  %v1370_v41 = vadd.f32 %v15029_v3, %v11882_v4  ;;  %3532 = vrot.lane.b32.xlu1 %v13237_v7, %s13357_s13  ;;  %v4983_v7 = vsel %vm4938_vm3, %v4854_v44, %v4003_v0  ;;  %v3339_v0 = vsub.f32 %v3083_v33, %v3211_v47 }
 0x198   : > { %v13129_v46 = vpop.eup %13128  ;;  %3530 = vrot.lane.b32.xlu0 %v13238_v57, %s13357_s13  ;;  %v1364_v51 = vpop.f32.mrf.mxu0  ;;  %v13240_v57 = vld [vmem:[%s13423_s10 + $0x218] sm:$0xff] }
 0x199   : > { %v1365_v30 = vadd.f32 %v15029_v3, %v1364_v51  ;;  %12068 = vmatprep.mubr.msk.f32.mxu1 %vm1672_vm2, %v13129_v46  ;;  %v4517_v4 = vpop.permute.xlu1 %4516  ;;  %13142 = vtanh.f32 %v1370_v41  ;;  %v2829_v59 = vmul.f32 %v13240_v57, %v13240_v57  ;;  %v13241_v51 = vld [vmem:[%s13423_s10 + $0x210] sm:$0xff] }
 0x19a   : > { %v15052_v28 = vsel %vm5067_vm4, %v4984_v56, %v4517_v4  ;;  %v4515_v18 = vpop.permute.xlu0 %4514  ;;  %v11885_v60 = vpop.f32.mrf.mxu0  ;;  %12069 = vmatmul.mubr.msk.f32.gmra.mxu1 %vm1672_vm2, %v13127_v8  ;;  %v3338_v8 = vsub.f32 %v3082_v20, %v3210_v53  ;;  %v2828_v44 = vmul.f32 %v13241_v51, %v13241_v51 }
 0x19b   : > { %19088 = vst [vmem:[#allocation29_spill] sm:$0xff] %v15052_v28  ;;  %v13131_v52 = vpop.eup %13130  ;;  %13144 = vtanh.f32 %v1365_v30  ;;  %v15057_v54 = vsel %vm5067_vm4, %v4983_v7, %v4515_v18  ;;  %v1380_v46 = vadd.f32 %v15029_v3, %v11885_v60  ;;  %4044 = vrot.lane.b32.xlu1 %v10371_v40, %s13358_s14 }
 0x19c   : > { %19089 = vst [vmem:[#allocation12_spill] sm:$0xff] %v15057_v54  ;;  %v13133_v41 = vpop.eup %13132  ;;  %4042 = vrot.lane.b32.xlu0 %v10370_v6, %s13358_s14  ;;  %v1374_v19 = vpop.f32.mrf.mxu0  ;;  %12201 = vmatprep.mubr.msk.f32.mxu0 %vm5198_vm5, %v15057_v54  ;;  %v10373_v6 = vadd.f32 -1.0, %v2829_v59  ;;  %v10372_v30 = vadd.f32 -1.0, %v2828_v44 }
 0x19d   : > { %v1375_v56 = vadd.f32 %v15029_v3, %v1374_v19  ;;  %12071 = vmatprep.mubr.msk.f32.mxu1 %vm1672_vm2, %v13133_v41  ;;  %12202 = vmatmul.mubr.msk.f32.gmra.mxu0 %vm5198_vm5, %v15052_v28  ;;  %v3497_v18 = vpop.permute.xlu1 %3496  ;;  %13146 = vtanh.f32 %v1380_v46  ;;  %v3213_v41 = vmul.f32 2.0, %v13240_v57 }
 0x19e   : > { %v3495_v60 = vpop.permute.xlu0 %3494  ;;  %v11888_v40 = vpop.f32.mrf.mxu0  ;;  %12072 = vmatmul.mubr.msk.f32.gmra.mxu1 %vm1672_vm2, %v13131_v52  ;;  %v3085_v59 = vmul.f32 %v13240_v57, %v10373_v6  ;;  %v4857_v44 = vsel %vm439_vm1, 1.0, %v3497_v18 }
 0x19f   : > { %v13135_v33 = vpop.eup %13134  ;;  %13148 = vtanh.f32 %v1375_v56  ;;  %v1390_v47 = vadd.f32 %v15029_v3, %v11888_v40  ;;  %4556 = vrot.lane.b32.xlu1 %v3339_v0, %s13359_s15  ;;  %v3084_v40 = vmul.f32 %v13241_v51, %v10372_v30 }
 0x1a0   : > { %v13137_v20 = vpop.eup %13136  ;;  %4554 = vrot.lane.b32.xlu0 %v3338_v8, %s13359_s15  ;;  %v1384_v53 = vpop.f32.mrf.mxu0 }
 0x1a1   : > { %v1385_v4 = vadd.f32 %v15029_v3, %v1384_v53  ;;  %12074 = vmatprep.mubr.msk.f32.mxu1 %vm1672_vm2, %v13137_v20  ;;  %v4009_v7 = vpop.permute.xlu1 %4008  ;;  %13150 = vtanh.f32 %v1390_v47  ;;  %v3212_v47 = vmul.f32 2.0, %v13241_v51  ;;  %v4856_v20 = vsel %vm439_vm1, 1.0, %v3495_v60 }
 0x1a2   : > { %v4007_v46 = vpop.permute.xlu0 %4006  ;;  %v11891_v52 = vpop.f32.mrf.mxu0  ;;  %12075 = vmatmul.mubr.msk.f32.gmra.mxu1 %vm1672_vm2, %v13135_v33  ;;  %v4986_v33 = vsel %vm4938_vm3, %v4857_v44, %v4009_v7 }
 0x1a3   : > { %v13139_v19 = vpop.eup %13138  ;;  %13152 = vtanh.f32 %v1385_v4  ;;  %v1400_v0 = vadd.f32 %v15029_v3, %v11891_v52  ;;  %3536 = vrot.lane.b32.xlu1 %v13240_v57, %s13357_s13  ;;  %v4985_v57 = vsel %vm4938_vm3, %v4856_v20, %v4007_v46  ;;  %v13242_v46 = vld [vmem:[%s13423_s10 + $0x228] sm:$0xff] }
 0x1a4   : > { %v13141_v8 = vpop.eup %13140  ;;  %3534 = vrot.lane.b32.xlu0 %v13241_v51, %s13357_s13  ;;  %v1394_v56 = vpop.f32.mrf.mxu0  ;;  %v3341_v51 = vsub.f32 %v3085_v59, %v3213_v41  ;;  %v13243_v59 = vld [vmem:[%s13423_s10 + $0x220] sm:$0xff] }
 0x1a5   : > { %v1395_v53 = vadd.f32 %v15029_v3, %v1394_v56  ;;  %12077 = vmatprep.mubr.msk.f32.mxu1 %vm1672_vm2, %v13141_v8  ;;  %v4521_v4 = vpop.permute.xlu1 %4520  ;;  %13154 = vtanh.f32 %v1400_v0  ;;  %v2831_v0 = vmul.f32 %v13242_v46, %v13242_v46  ;;  %v2830_v41 = vmul.f32 %v13243_v59, %v13243_v59 }
 0x1a6   : > { %v15086_v18 = vsel %vm5067_vm4, %v4986_v33, %v4521_v4  ;;  %v4519_v52 = vpop.permute.xlu0 %4518  ;;  %v11894_v28 = vpop.f32.mrf.mxu0  ;;  %12078 = vmatmul.mubr.msk.f32.gmra.mxu1 %vm1672_vm2, %v13139_v19  ;;  %v3340_v19 = vsub.f32 %v3084_v40, %v3212_v47 }
 0x1a7   : > { %19090 = vst [vmem:[#allocation15_spill] sm:$0xff] %v15086_v18  ;;  %v13143_v60 = vpop.eup %13142  ;;  %13156 = vtanh.f32 %v1395_v53  ;;  %v15090_v7 = vsel %vm5067_vm4, %v4985_v57, %v4519_v52  ;;  %v1410_v8 = vadd.f32 %v15029_v3, %v11894_v28  ;;  %4048 = vrot.lane.b32.xlu1 %v10373_v6, %s13358_s14  ;;  %v10375_v40 = vadd.f32 -1.0, %v2831_v0 }
 0x1a8   : > { %19091 = vst [vmem:[#allocation14_spill] sm:$0xff] %v15090_v7  ;;  %v13145_v44 = vpop.eup %13144  ;;  %4046 = vrot.lane.b32.xlu0 %v10372_v30, %s13358_s14  ;;  %v1404_v56 = vpop.f32.mrf.mxu0  ;;  %12204 = vmatprep.mubr.msk.f32.mxu0 %vm5198_vm5, %v15090_v7  ;;  %v10374_v57 = vadd.f32 -1.0, %v2830_v41  ;;  %v3215_v41 = vmul.f32 2.0, %v13242_v46 }
 0x1a9   : > { %v1405_v20 = vadd.f32 %v15029_v3, %v1404_v56  ;;  %12080 = vmatprep.mubr.msk.f32.mxu1 %vm1672_vm2, %v13145_v44  ;;  %12205 = vmatmul.mubr.msk.f32.gmra.mxu0 %vm5198_vm5, %v15086_v18  ;;  %v3501_v28 = vpop.permute.xlu1 %3500  ;;  %13158 = vtanh.f32 %v1410_v8 }
 0x1aa   : > { %v3499_v6 = vpop.permute.xlu0 %3498  ;;  %v11897_v33 = vpop.f32.mrf.mxu0  ;;  %12081 = vmatmul.mubr.msk.f32.gmra.mxu1 %vm1672_vm2, %v13143_v60 }
 0x1ab   : > { %v13147_v30 = vpop.eup %13146  ;;  %13160 = vtanh.f32 %v1405_v20  ;;  %v1420_v53 = vadd.f32 %v15029_v3, %v11897_v33  ;;  %4560 = vrot.lane.b32.xlu1 %v3341_v51, %s13359_s15  ;;  %v4859_v33 = vsel %vm439_vm1, 1.0, %v3501_v28 }
 0x1ac   : > { %v13149_v47 = vpop.eup %13148  ;;  %4558 = vrot.lane.b32.xlu0 %v3340_v19, %s13359_s15  ;;  %v1414_v4 = vpop.f32.mrf.mxu0  ;;  %v3087_v19 = vmul.f32 %v13242_v46, %v10375_v40 }
 0x1ad   : > { %v1415_v52 = vadd.f32 %v15029_v3, %v1414_v4  ;;  %12083 = vmatprep.mubr.msk.f32.mxu1 %vm1672_vm2, %v13149_v47  ;;  %v4013_v8 = vpop.permute.xlu1 %4012  ;;  %13162 = vtanh.f32 %v1420_v53  ;;  %v3086_v47 = vmul.f32 %v13243_v59, %v10374_v57  ;;  %v3214_v4 = vmul.f32 2.0, %v13243_v59 }
 0x1ae   : > { %v4011_v44 = vpop.permute.xlu0 %4010  ;;  %v11900_v60 = vpop.f32.mrf.mxu0  ;;  %12084 = vmatmul.mubr.msk.f32.gmra.mxu1 %vm1672_vm2, %v13147_v30  ;;  %v4858_v30 = vsel %vm439_vm1, 1.0, %v3499_v6 }
 0x1af   : > { %v13151_v56 = vpop.eup %13150  ;;  %13164 = vtanh.f32 %v1415_v52  ;;  %v1430_v51 = vadd.f32 %v15029_v3, %v11900_v60  ;;  %v15111_v0 = vpop.f32.mrf.mxu1  ;;  %3540 = vrot.lane.b32.xlu1 %v13242_v46, %s13357_s13  ;;  %v4988_v52 = vsel %vm4938_vm3, %v4859_v33, %v4013_v8  ;;  %v4987_v18 = vsel %vm4938_vm3, %v4858_v30, %v4011_v44 }
 0x1b0   : > { %19092 = vst [vmem:[#allocation17_spill] sm:$0xff] %v15111_v0  ;;  %v13153_v20 = vpop.eup %13152  ;;  %3538 = vrot.lane.b32.xlu0 %v13243_v59, %s13357_s13  ;;  %v1424_v53 = vpop.f32.mrf.mxu0  ;;  %v13244_v59 = vld [vmem:[%s13423_s10 + $0x238] sm:$0xff]  ;;  %v3343_v44 = vsub.f32 %v3087_v19, %v3215_v41 }
 0x1b1   : > { %v1425_v60 = vadd.f32 %v15029_v3, %v1424_v53  ;;  %v15119_v0 = vpop.f32.mrf.mxu1  ;;  %12086 = vmatprep.mubr.msk.f32.mxu1 %vm1672_vm2, %v13153_v20  ;;  %v4525_v46 = vpop.permute.xlu1 %4524  ;;  %13166 = vtanh.f32 %v1430_v51  ;;  %v2833_v6 = vmul.f32 %v13244_v59, %v13244_v59 }
 0x1b2   : > { %19093 = vst [vmem:[#allocation16_spill] sm:$0xff] %v15119_v0  ;;  %v15124_v28 = vsel %vm5067_vm4, %v4988_v52, %v4525_v46  ;;  %v4523_v7 = vpop.permute.xlu0 %4522  ;;  %v11903_v54 = vpop.f32.mrf.mxu0  ;;  %12087 = vmatmul.mubr.msk.f32.gmra.mxu1 %vm1672_vm2, %v13151_v56  ;;  %v3342_v56 = vsub.f32 %v3086_v47, %v3214_v4  ;;  %v13245_v52 = vld [vmem:[%s13423_s10 + $0x230] sm:$0xff] }
 0x1b3   : > { %19094 = vst [vmem:[#allocation35_spill] sm:$0xff] %v15124_v28  ;;  %v13155_v8 = vpop.eup %13154  ;;  %13168 = vtanh.f32 %v1425_v60  ;;  %v15129_v33 = vsel %vm5067_vm4, %v4987_v18, %v4523_v7  ;;  %v1440_v20 = vadd.f32 %v15029_v3, %v11903_v54  ;;  %v15132_v53 = vpop.f32.mrf.mxu1  ;;  %4052 = vrot.lane.b32.xlu1 %v10375_v40, %s13358_s14  ;;  %v2832_v60 = vmul.f32 %v13245_v52, %v13245_v52 }
 0x1b4   : > { %19095 = vst [vmem:[#allocation36_spill] sm:$0xff] %v15129_v33  ;;  %19096 = vst [vmem:[#allocation37_spill] sm:$0xff] %v15132_v53  ;;  %v13157_v51 = vpop.eup %13156  ;;  %4050 = vrot.lane.b32.xlu0 %v10374_v57, %s13358_s14  ;;  %v1434_v30 = vpop.f32.mrf.mxu0  ;;  %12207 = vmatprep.mubr.msk.f32.mxu0 %vm5198_vm5, %v15129_v33  ;;  %v10377_v19 = vadd.f32 -1.0, %v2833_v6 }
 0x1b5   : > { %v1435_v18 = vadd.f32 %v15029_v3, %v1434_v30  ;;  %v15140_v7 = vpop.f32.mrf.mxu1  ;;  %12089 = vmatprep.mubr.msk.f32.mxu1 %vm1672_vm2, %v13157_v51  ;;  %12208 = vmatmul.mubr.msk.f32.gmra.mxu0 %vm5198_vm5, %v15124_v28  ;;  %v3505_v54 = vpop.permute.xlu1 %3504  ;;  %13170 = vtanh.f32 %v1440_v20  ;;  %v10376_v30 = vadd.f32 -1.0, %v2832_v60 }
 0x1b6   : > { %19097 = vst [vmem:[#allocation38_spill] sm:$0xff] %v15140_v7  ;;  %v3503_v40 = vpop.permute.xlu0 %3502  ;;  %v11906_v57 = vpop.f32.mrf.mxu0  ;;  %12090 = vmatmul.mubr.msk.f32.gmra.mxu1 %vm1672_vm2, %v13155_v8 }
 0x1b7   : > { %v13159_v41 = vpop.eup %13158  ;;  %13172 = vtanh.f32 %v1435_v18  ;;  %v1450_v47 = vadd.f32 %v15029_v3, %v11906_v57  ;;  %v15147_v4 = vpop.f32.mrf.mxu1  ;;  %4564 = vrot.lane.b32.xlu1 %v3343_v44, %s13359_s15  ;;  %v3089_v57 = vmul.f32 %v13244_v59, %v10377_v19 }
 0x1b8   : > { %19098 = vst [vmem:[#allocation39_spill] sm:$0xff] %v15147_v4  ;;  %v13161_v46 = vpop.eup %13160  ;;  %4562 = vrot.lane.b32.xlu0 %v3342_v56, %s13359_s15  ;;  %v1444_v51 = vpop.f32.mrf.mxu0  ;;  %v3217_v4 = vmul.f32 2.0, %v13244_v59 }
 0x1b9   : > { %v1445_v20 = vadd.f32 %v15029_v3, %v1444_v51  ;;  %v15152_v53 = vpop.f32.mrf.mxu1  ;;  %12092 = vmatprep.mubr.msk.f32.mxu1 %vm1672_vm2, %v13161_v46  ;;  %v4017_v6 = vpop.permute.xlu1 %4016  ;;  %13174 = vtanh.f32 %v1450_v47  ;;  %v4861_v51 = vsel %vm439_vm1, 1.0, %v3505_v54  ;;  %v3088_v46 = vmul.f32 %v13245_v52, %v10376_v30 }
 0x1ba   : > { %19099 = vst [vmem:[#allocation40_spill] sm:$0xff] %v15152_v53  ;;  %v4015_v8 = vpop.permute.xlu0 %4014  ;;  %v11909_v18 = vpop.f32.mrf.mxu0  ;;  %12093 = vmatmul.mubr.msk.f32.gmra.mxu1 %vm1672_vm2, %v13159_v41  ;;  %v3216_v53 = vmul.f32 2.0, %v13245_v52  ;;  %v4860_v41 = vsel %vm439_vm1, 1.0, %v3503_v40  ;;  %v4990_v0 = vsel %vm4938_vm3, %v4861_v51, %v4017_v6  ;;  %v3345_v40 = vsub.f32 %v3089_v57, %v3217_v4  ;;  %v13247_v57 = vld [vmem:[%s13423_s10 + $0x240] sm:$0xff] }
 0x1bb   : > { %v13163_v44 = vpop.eup %13162  ;;  %13176 = vtanh.f32 %v1445_v20  ;;  %v1460_v56 = vadd.f32 %v15029_v3, %v11909_v18  ;;  %v15157_v7 = vpop.f32.mrf.mxu1  ;;  %3544 = vrot.lane.b32.xlu1 %v13244_v59, %s13357_s13  ;;  %v4989_v18 = vsel %vm4938_vm3, %v4860_v41, %v4015_v8  ;;  %v13246_v8 = vld [vmem:[%s13423_s10 + $0x248] sm:$0xff] }
 0x1bc   : > { %19100 = vst [vmem:[#allocation41_spill] sm:$0xff] %v15157_v7  ;;  %v13165_v60 = vpop.eup %13164  ;;  %3542 = vrot.lane.b32.xlu0 %v13245_v52, %s13357_s13  ;;  %v1454_v47 = vpop.f32.mrf.mxu0  ;;  %v3344_v4 = vsub.f32 %v3088_v46, %v3216_v53 }
 0x1bd   : > { %v1455_v20 = vadd.f32 %v15029_v3, %v1454_v47  ;;  %v15165_v28 = vpop.f32.mrf.mxu1  ;;  %12095 = vmatprep.mubr.msk.f32.mxu1 %vm1672_vm2, %v13165_v60  ;;  %v4529_v59 = vpop.permute.xlu1 %4528  ;;  %13178 = vtanh.f32 %v1460_v56 }
 0x1be   : > { %19101 = vst [vmem:[#allocation42_spill] sm:$0xff] %v15165_v28  ;;  %v15170_v54 = vsel %vm5067_vm4, %v4990_v0, %v4529_v59  ;;  %v4527_v7 = vpop.permute.xlu0 %4526  ;;  %v11912_v52 = vpop.f32.mrf.mxu0  ;;  %12096 = vmatmul.mubr.msk.f32.gmra.mxu1 %vm1672_vm2, %v13163_v44  ;;  %v2835_v0 = vmul.f32 %v13246_v8, %v13246_v8  ;;  %v2834_v44 = vmul.f32 %v13247_v57, %v13247_v57  ;;  %v3218_v28 = vmul.f32 2.0, %v13247_v57 }
 0x1bf   : > { %19102 = vst [vmem:[#allocation43_spill] sm:$0xff] %v15170_v54  ;;  %v13167_v6 = vpop.eup %13166  ;;  %13180 = vtanh.f32 %v1455_v20  ;;  %v15174_v51 = vsel %vm5067_vm4, %v4989_v18, %v4527_v7  ;;  %v1470_v60 = vadd.f32 %v15029_v3, %v11912_v52  ;;  %v15177_v47 = vpop.f32.mrf.mxu1  ;;  %4056 = vrot.lane.b32.xlu1 %v10377_v19, %s13358_s14 }
 0x1c0   : > { %19103 = vst [vmem:[#allocation44_spill] sm:$0xff] %v15174_v51  ;;  %19104 = vst [vmem:[#allocation45_spill] sm:$0xff] %v15177_v47  ;;  %v13169_v56 = vpop.eup %13168  ;;  %4054 = vrot.lane.b32.xlu0 %v10376_v30, %s13358_s14  ;;  %v1464_v41 = vpop.f32.mrf.mxu0  ;;  %12210 = vmatprep.mubr.msk.f32.mxu0 %vm5198_vm5, %v15174_v51  ;;  %v10379_v52 = vadd.f32 -1.0, %v2835_v0  ;;  %v10378_v47 = vadd.f32 -1.0, %v2834_v44  ;;  %v3219_v44 = vmul.f32 2.0, %v13246_v8 }
 0x1c1   : > { %v1465_v7 = vadd.f32 %v15029_v3, %v1464_v41  ;;  %v15186_v20 = vpop.f32.mrf.mxu1  ;;  %12098 = vmatprep.mubr.msk.f32.mxu1 %vm1672_vm2, %v13169_v56  ;;  %12211 = vmatmul.mubr.msk.f32.gmra.mxu0 %vm5198_vm5, %v15170_v54  ;;  %v3509_v19 = vpop.permute.xlu1 %3508  ;;  %13182 = vtanh.f32 %v1470_v60 }
 0x1c2   : > { %19105 = vst [vmem:[#allocation46_spill] sm:$0xff] %v15186_v20  ;;  %v3507_v59 = vpop.permute.xlu0 %3506  ;;  %v11915_v30 = vpop.f32.mrf.mxu0  ;;  %12099 = vmatmul.mubr.msk.f32.gmra.mxu1 %vm1672_vm2, %v13167_v6 }
 0x1c3   : > { %v13171_v18 = vpop.eup %13170  ;;  %13184 = vtanh.f32 %v1465_v7  ;;  %v1480_v53 = vadd.f32 %v15029_v3, %v11915_v30  ;;  %v15193_v46 = vpop.f32.mrf.mxu1  ;;  %4568 = vrot.lane.b32.xlu1 %v3345_v40, %s13359_s15 }
 0x1c4   : > { %19106 = vst [vmem:[#allocation47_spill] sm:$0xff] %v15193_v46  ;;  %v13173_v41 = vpop.eup %13172  ;;  %4566 = vrot.lane.b32.xlu0 %v3344_v4, %s13359_s15  ;;  %v1474_v56 = vpop.f32.mrf.mxu0  ;;  %v3091_v4 = vmul.f32 %v13246_v8, %v10379_v52 }
 0x1c5   : > { %v1475_v60 = vadd.f32 %v15029_v3, %v1474_v56  ;;  %v15198_v20 = vpop.f32.mrf.mxu1  ;;  %12101 = vmatprep.mubr.msk.f32.mxu1 %vm1672_vm2, %v13173_v41  ;;  %v4021_v6 = vpop.permute.xlu1 %4020  ;;  %13186 = vtanh.f32 %v1480_v53  ;;  %v3090_v41 = vmul.f32 %v13247_v57, %v10378_v47 }
 0x1c6   : > { %19107 = vst [vmem:[#allocation48_spill] sm:$0xff] %v15198_v20  ;;  %v4019_v7 = vpop.permute.xlu0 %4018  ;;  %v11918_v30 = vpop.f32.mrf.mxu0  ;;  %12102 = vmatmul.mubr.msk.f32.gmra.mxu1 %vm1672_vm2, %v13171_v18  ;;  %v4863_v20 = vsel %vm439_vm1, 1.0, %v3509_v19  ;;  %v4862_v18 = vsel %vm439_vm1, 1.0, %v3507_v59 }
 0x1c7   : > { %v13175_v46 = vpop.eup %13174  ;;  %13188 = vtanh.f32 %v1475_v60  ;;  %v1490_v40 = vadd.f32 %v15029_v3, %v11918_v30  ;;  %v15203_v0 = vpop.f32.mrf.mxu1  ;;  %3548 = vrot.lane.b32.xlu1 %v13246_v8, %s13357_s13  ;;  %v4992_v60 = vsel %vm4938_vm3, %v4863_v20, %v4021_v6  ;;  %v4991_v54 = vsel %vm4938_vm3, %v4862_v18, %v4019_v7 }
 0x1c8   : > { %19108 = vst [vmem:[#allocation49_spill] sm:$0xff] %v15203_v0  ;;  %v13177_v56 = vpop.eup %13176  ;;  %3546 = vrot.lane.b32.xlu0 %v13247_v57, %s13357_s13  ;;  %v1484_v53 = vpop.f32.mrf.mxu0  ;;  %v13248_v57 = vld [vmem:[%s13423_s10 + $0x258] sm:$0xff]  ;;  %v3347_v7 = vsub.f32 %v3091_v4, %v3219_v44 }
 0x1c9   : > { %v1485_v30 = vadd.f32 %v15029_v3, %v1484_v53  ;;  %v15211_v0 = vpop.f32.mrf.mxu1  ;;  %12104 = vmatprep.mubr.msk.f32.mxu1 %vm1672_vm2, %v13177_v56  ;;  %v4533_v8 = vpop.permute.xlu1 %4532  ;;  %13190 = vtanh.f32 %v1490_v40  ;;  %v2837_v20 = vmul.f32 %v13248_v57, %v13248_v57 }
 0x1ca   : > { %19109 = vst [vmem:[#allocation50_spill] sm:$0xff] %v15211_v0  ;;  %v15216_v19 = vsel %vm5067_vm4, %v4992_v60, %v4533_v8  ;;  %v4531_v51 = vpop.permute.xlu0 %4530  ;;  %v11921_v33 = vpop.f32.mrf.mxu0  ;;  %12105 = vmatmul.mubr.msk.f32.gmra.mxu1 %vm1672_vm2, %v13175_v46  ;;  %v3346_v46 = vsub.f32 %v3090_v41, %v3218_v28  ;;  %v13249_v60 = vld [vmem:[%s13423_s10 + $0x250] sm:$0xff] }
 0x1cb   : > { %19110 = vst [vmem:[#allocation51_spill] sm:$0xff] %v15216_v19  ;;  %v13179_v59 = vpop.eup %13178  ;;  %13192 = vtanh.f32 %v1485_v30  ;;  %v15221_v6 = vsel %vm5067_vm4, %v4991_v54, %v4531_v51  ;;  %v1500_v56 = vadd.f32 %v15029_v3, %v11921_v33  ;;  %v15224_v53 = vpop.f32.mrf.mxu1  ;;  %4060 = vrot.lane.b32.xlu1 %v10379_v52, %s13358_s14  ;;  %v2836_v30 = vmul.f32 %v13249_v60, %v13249_v60 }
 0x1cc   : > { %19111 = vst [vmem:[#allocation52_spill] sm:$0xff] %v15221_v6  ;;  %19112 = vst [vmem:[#allocation53_spill] sm:$0xff] %v15224_v53  ;;  %v13181_v40 = vpop.eup %13180  ;;  %4058 = vrot.lane.b32.xlu0 %v10378_v47, %s13358_s14  ;;  %v1494_v18 = vpop.f32.mrf.mxu0  ;;  %12213 = vmatprep.mubr.msk.f32.mxu0 %vm5198_vm5, %v15221_v6  ;;  %v10381_v4 = vadd.f32 -1.0, %v2837_v20 }
 0x1cd   : > { %v1495_v54 = vadd.f32 %v15029_v3, %v1494_v18  ;;  %v15232_v51 = vpop.f32.mrf.mxu1  ;;  %12107 = vmatprep.mubr.msk.f32.mxu1 %vm1672_vm2, %v13181_v40  ;;  %12214 = vmatmul.mubr.msk.f32.gmra.mxu0 %vm5198_vm5, %v15216_v19  ;;  %v3513_v33 = vpop.permute.xlu1 %3512  ;;  %13194 = vtanh.f32 %v1500_v56  ;;  %v10380_v18 = vadd.f32 -1.0, %v2836_v30 }
 0x1ce   : > { %19113 = vst [vmem:[#allocation54_spill] sm:$0xff] %v15232_v51  ;;  %v3511_v52 = vpop.permute.xlu0 %3510  ;;  %v11924_v47 = vpop.f32.mrf.mxu0  ;;  %12108 = vmatmul.mubr.msk.f32.gmra.mxu1 %vm1672_vm2, %v13179_v59 }
 0x1cf   : > { %v13183_v44 = vpop.eup %13182  ;;  %13196 = vtanh.f32 %v1495_v54  ;;  %v1510_v28 = vadd.f32 %v15029_v3, %v11924_v47  ;;  %v15239_v41 = vpop.f32.mrf.mxu1  ;;  %4572 = vrot.lane.b32.xlu1 %v3347_v7, %s13359_s15  ;;  %v3093_v47 = vmul.f32 %v13248_v57, %v10381_v4 }
 0x1d0   : > { %19114 = vst [vmem:[#allocation55_spill] sm:$0xff] %v15239_v41  ;;  %v13185_v8 = vpop.eup %13184  ;;  %4570 = vrot.lane.b32.xlu0 %v3346_v46, %s13359_s15  ;;  %v1504_v40 = vpop.f32.mrf.mxu0  ;;  %v3221_v41 = vmul.f32 2.0, %v13248_v57 }
 0x1d1   : > { %v1505_v56 = vadd.f32 %v15029_v3, %v1504_v40  ;;  %v15244_v53 = vpop.f32.mrf.mxu1  ;;  %12110 = vmatprep.mubr.msk.f32.mxu1 %vm1672_vm2, %v13185_v8  ;;  %v4025_v20 = vpop.permute.xlu1 %4024  ;;  %13198 = vtanh.f32 %v1510_v28  ;;  %v4865_v40 = vsel %vm439_vm1, 1.0, %v3513_v33  ;;  %v3092_v8 = vmul.f32 %v13249_v60, %v10380_v18 }
 0x1d2   : > { %19115 = vst [vmem:[#allocation56_spill] sm:$0xff] %v15244_v53  ;;  %v4023_v59 = vpop.permute.xlu0 %4022  ;;  %v11927_v54 = vpop.f32.mrf.mxu0  ;;  %12111 = vmatmul.mubr.msk.f32.gmra.mxu1 %vm1672_vm2, %v13183_v44  ;;  %v3220_v53 = vmul.f32 2.0, %v13249_v60  ;;  %v4864_v44 = vsel %vm439_vm1, 1.0, %v3511_v52  ;;  %v4994_v0 = vsel %vm4938_vm3, %v4865_v40, %v4025_v20  ;;  %v3349_v52 = vsub.f32 %v3093_v47, %v3221_v41  ;;  %v13251_v47 = vld [vmem:[%s13423_s10 + $0x260] sm:$0xff] }
 0x1d3   : > { %v13187_v7 = vpop.eup %13186  ;;  %13200 = vtanh.f32 %v1505_v56  ;;  %v1520_v46 = vadd.f32 %v15029_v3, %v11927_v54  ;;  %v15249_v51 = vpop.f32.mrf.mxu1  ;;  %3552 = vrot.lane.b32.xlu1 %v13248_v57, %s13357_s13  ;;  %v4993_v54 = vsel %vm4938_vm3, %v4864_v44, %v4023_v59  ;;  %v13250_v59 = vld [vmem:[%s13423_s10 + $0x268] sm:$0xff] }
 0x1d4   : > { %19116 = vst [vmem:[#allocation57_spill] sm:$0xff] %v15249_v51  ;;  %v13189_v30 = vpop.eup %13188  ;;  %3550 = vrot.lane.b32.xlu0 %v13249_v60, %s13357_s13  ;;  %v1514_v28 = vpop.f32.mrf.mxu0  ;;  %v3348_v41 = vsub.f32 %v3092_v8, %v3220_v53 }
 0x1d5   : > { %v1515_v56 = vadd.f32 %v15029_v3, %v1514_v28  ;;  %v15257_v19 = vpop.f32.mrf.mxu1  ;;  %12113 = vmatprep.mubr.msk.f32.mxu1 %vm1672_vm2, %v13189_v30  ;;  %v4537_v57 = vpop.permute.xlu1 %4536  ;;  %13202 = vtanh.f32 %v1520_v46 }
 0x1d6   : > { %19117 = vst [vmem:[#allocation58_spill] sm:$0xff] %v15257_v19  ;;  %v15262_v33 = vsel %vm5067_vm4, %v4994_v0, %v4537_v57  ;;  %v4535_v51 = vpop.permute.xlu0 %4534  ;;  %v11930_v60 = vpop.f32.mrf.mxu0  ;;  %12114 = vmatmul.mubr.msk.f32.gmra.mxu1 %vm1672_vm2, %v13187_v7  ;;  %v2839_v0 = vmul.f32 %v13250_v59, %v13250_v59  ;;  %v2838_v7 = vmul.f32 %v13251_v47, %v13251_v47 }
 0x1d7   : > { %v13191_v20 = vpop.eup %13190  ;;  %13204 = vtanh.f32 %v1515_v56  ;;  %v15266_v40 = vsel %vm5067_vm4, %v4993_v54, %v4535_v51  ;;  %v1530_v30 = vadd.f32 %v15029_v3, %v11930_v60  ;;  %v15269_v28 = vpop.f32.mrf.mxu1  ;;  %4064 = vrot.lane.b32.xlu1 %v10381_v4, %s13358_s14 }
 0x1d8   : > { %19118 = vst [vmem:[#allocation59_spill] sm:$0xff] %v15266_v40  ;;  %19119 = vst [vmem:[#allocation60_spill] sm:$0xff] %v15269_v28  ;;  %v13193_v46 = vpop.eup %13192  ;;  %4062 = vrot.lane.b32.xlu0 %v10380_v18, %s13358_s14  ;;  %v1524_v44 = vpop.f32.mrf.mxu0  ;;  %12216 = vmatprep.mubr.msk.f32.mxu0 %vm5198_vm5, %v15266_v40  ;;  %v10383_v53 = vadd.f32 -1.0, %v2839_v0  ;;  %v10382_v8 = vadd.f32 -1.0, %v2838_v7  ;;  %v3222_v7 = vmul.f32 2.0, %v13251_v47 }
 0x1d9   : > { %v1525_v51 = vadd.f32 %v15029_v3, %v1524_v44  ;;  %v15278_v56 = vpop.f32.mrf.mxu1  ;;  %12116 = vmatprep.mubr.msk.f32.mxu1 %vm1672_vm2, %v13193_v46  ;;  %12217 = vmatmul.mubr.msk.f32.gmra.mxu0 %vm5198_vm5, %v15262_v33  ;;  %v3517_v4 = vpop.permute.xlu1 %3516  ;;  %13206 = vtanh.f32 %v1530_v30 }
 0x1da   : > { %19120 = vst [vmem:[#allocation61_spill] sm:$0xff] %v15278_v56  ;;  %v3515_v57 = vpop.permute.xlu0 %3514  ;;  %12117 = vmatmul.mubr.msk.f32.gmra.mxu1 %vm1672_vm2, %v13191_v20  ;;  %v13195_v18 = vpop.eup %13194 }
 0x1db   : > { %13208 = vtanh.f32 %v1525_v51  ;;  %v15284_v54 = vpop.f32.mrf.mxu1  ;;  %4576 = vrot.lane.b32.xlu1 %v3349_v52, %s13359_s15  ;;  %v3095_v51 = vmul.f32 %v13250_v59, %v10383_v53  ;;  %v3223_v52 = vmul.f32 2.0, %v13250_v59 }
 0x1dc   : > { %19121 = vst [vmem:[#allocation62_spill] sm:$0xff] %v15284_v54  ;;  %v13197_v3 = vpop.eup %13196  ;;  %4574 = vrot.lane.b32.xlu0 %v3348_v41, %s13359_s15  ;;  %v4867_v54 = vsel %vm439_vm1, 1.0, %v3517_v4  ;;  %v3094_v41 = vmul.f32 %v13251_v47, %v10382_v8 }
 0x1dd   : > { %v15288_v60 = vpop.f32.mrf.mxu1  ;;  %12119 = vmatprep.mubr.msk.f32.mxu1 %vm1672_vm2, %v13197_v3  ;;  %v4029_v46 = vpop.permute.xlu1 %4028  ;;  %v4866_v3 = vsel %vm439_vm1, 1.0, %v3515_v57 }
 0x1de   : > { %19122 = vst [vmem:[#allocation63_spill] sm:$0xff] %v15288_v60  ;;  %v4027_v30 = vpop.permute.xlu0 %4026  ;;  %12120 = vmatmul.mubr.msk.f32.gmra.mxu1 %vm1672_vm2, %v13195_v18  ;;  %v13199_v20 = vpop.eup %13198  ;;  %v4996_v60 = vsel %vm4938_vm3, %v4867_v54, %v4029_v46  ;;  %v3351_v54 = vsub.f32 %v3095_v51, %v3223_v52  ;;  %v13252_v46 = vld [vmem:[%s13423_s10 + $0x278] sm:$0xff] }
 0x1df   : > { %v15292_v44 = vpop.f32.mrf.mxu1  ;;  %3556 = vrot.lane.b32.xlu1 %v13250_v59, %s13357_s13  ;;  %v4995_v59 = vsel %vm4938_vm3, %v4866_v3, %v4027_v30  ;;  %v13253_v30 = vld [vmem:[%s13423_s10 + $0x270] sm:$0xff] }
 0x1e0   : > { %19123 = vst [vmem:[#allocation64_spill] sm:$0xff] %v15292_v44  ;;  %v13201_v0 = vpop.eup %13200  ;;  %3554 = vrot.lane.b32.xlu0 %v13251_v47, %s13357_s13 }
 0x1e1   : > { %v15299_v18 = vpop.f32.mrf.mxu1  ;;  %12122 = vmatprep.mubr.msk.f32.mxu1 %vm1672_vm2, %v13201_v0  ;;  %v4541_v44 = vpop.permute.xlu1 %4540  ;;  %v2841_v0 = vmul.f32 %v13252_v46, %v13252_v46 }
 0x1e2   : > { %19124 = vst [vmem:[#allocation65_spill] sm:$0xff] %v15299_v18  ;;  %v15304_v28 = vsel %vm5067_vm4, %v4996_v60, %v4541_v44  ;;  %v4539_v4 = vpop.permute.xlu0 %4538  ;;  %12123 = vmatmul.mubr.msk.f32.gmra.mxu1 %vm1672_vm2, %v13199_v20  ;;  %v13203_v56 = vpop.eup %13202  ;;  %v3350_v60 = vsub.f32 %v3094_v41, %v3222_v7  ;;  %v2840_v20 = vmul.f32 %v13253_v30, %v13253_v30 }
 0x1e3   : > { %v15308_v47 = vsel %vm5067_vm4, %v4995_v59, %v4539_v4  ;;  %v15310_v57 = vpop.f32.mrf.mxu1  ;;  %4068 = vrot.lane.b32.xlu1 %v10383_v53, %s13358_s14 }
 0x1e4   : > { %19125 = vst [vmem:[#allocation66_spill] sm:$0xff] %v15310_v57  ;;  %v13205_v18 = vpop.eup %13204  ;;  %4066 = vrot.lane.b32.xlu0 %v10382_v8, %s13358_s14  ;;  %12219 = vmatprep.mubr.msk.f32.mxu0 %vm5198_vm5, %v15308_v47  ;;  %v10385_v8 = vadd.f32 -1.0, %v2841_v0  ;;  %v10384_v7 = vadd.f32 -1.0, %v2840_v20  ;;  %v3225_v0 = vmul.f32 2.0, %v13252_v46 }
 0x1e5   : > { %v15318_v44 = vpop.f32.mrf.mxu1  ;;  %12125 = vmatprep.mubr.msk.f32.mxu1 %vm1672_vm2, %v13205_v18  ;;  %12220 = vmatmul.mubr.msk.f32.gmra.mxu0 %vm5198_vm5, %v15304_v28  ;;  %v3521_v53 = vpop.permute.xlu1 %3520 }
 0x1e6   : > { %19126 = vst [vmem:[#allocation67_spill] sm:$0xff] %v15318_v44  ;;  %v3519_v51 = vpop.permute.xlu0 %3518  ;;  %12126 = vmatmul.mubr.msk.f32.gmra.mxu1 %vm1672_vm2, %v13203_v56  ;;  %v13207_v52 = vpop.eup %13206  ;;  %v19130_v56 = vld [vmem:[#allocation30_spill] sm:$0xff]  ;;  %v3096_v20 = vmul.f32 %v13253_v30, %v10384_v7 }
 0x1e7   : > { %v15324_v3 = vpop.f32.mrf.mxu1  ;;  %4580 = vrot.lane.b32.xlu1 %v3351_v54, %s13359_s15  ;;  %v3097_v54 = vmul.f32 %v13252_v46, %v10385_v8 }
 0x1e8   : > { %19127 = vst [vmem:[#allocation68_spill] sm:$0xff] %v15324_v3  ;;  %v13209_v41 = vpop.eup %13208  ;;  %4578 = vrot.lane.b32.xlu0 %v3350_v60, %s13359_s15  ;;  %v4869_v60 = vsel %vm439_vm1, 1.0, %v3521_v53  ;;  %v4868_v3 = vsel %vm439_vm1, 1.0, %v3519_v51 }
 0x1e9   : > { %v15328_v59 = vpop.f32.mrf.mxu1  ;;  %12128 = vmatprep.mubr.msk.f32.mxu1 %vm1672_vm2, %v13209_v41  ;;  %v4033_v18 = vpop.permute.xlu1 %4032  ;;  %v3224_v41 = vmul.f32 2.0, %v13253_v30  ;;  %v3353_v51 = vsub.f32 %v3097_v54, %v3225_v0 }
 0x1ea   : > { %19128 = vst [vmem:[#allocation69_spill] sm:$0xff] %v15328_v59  ;;  %v4031_v4 = vpop.permute.xlu0 %4030  ;;  %12129 = vmatmul.mubr.msk.f32.gmra.mxu1 %vm1672_vm2, %v13207_v52  ;;  %v4998_v52 = vsel %vm4938_vm3, %v4869_v60, %v4033_v18  ;;  %v13254_v18 = vld [vmem:[%s13423_s10 + $0x288] sm:$0xff] }
 0x1eb   : > { %v15332_v57 = vpop.f32.mrf.mxu1  ;;  %12331 = vmatprep.mubr.msk.f32.mxu1 %vm5198_vm5, %v19130_v56  ;;  %3560 = vrot.lane.b32.xlu1 %v13252_v46, %s13357_s13  ;;  %v4997_v44 = vsel %vm4938_vm3, %v4868_v3, %v4031_v4  ;;  %v2843_v3 = vmul.f32 %v13254_v18, %v13254_v18  ;;  %v13255_v4 = vld [vmem:[%s13423_s10 + $0x280] sm:$0xff] }
 0x1ec   : > { %19129 = vst [vmem:[#allocation70_spill] sm:$0xff] %v15332_v57  ;;  %3558 = vrot.lane.b32.xlu0 %v13253_v30, %s13357_s13  ;;  %v2842_v60 = vmul.f32 %v13255_v4, %v13255_v4 }
 0x1ed   : > { %v15341_v59 = vpop.f32.mrf.mxu1  ;;  %v4545_v57 = vpop.permute.xlu1 %4544 }
 0x1ee   : > { %19131 = vst [vmem:[#allocation30_spill] sm:$0xff] %v15341_v59  ;;  %v15345_v19 = vsel %vm5067_vm4, %v4998_v52, %v4545_v57  ;;  %v4543_v46 = vpop.permute.xlu0 %4542  ;;  %12332 = vmatmul.mubr.msk.f32.vlgmr.msra.gmra.mxu1 %vm5198_vm5, %v14377_v34  ;;  %v3352_v57 = vsub.f32 %v3096_v20, %v3224_v41  ;;  %v10386_v54 = vadd.f32 -1.0, %v2842_v60  ;;  %v3226_v60 = vmul.f32 2.0, %v13255_v4 }
 0x1ef   : > { %19132 = vst [vmem:[#allocation71_spill] sm:$0xff] %v15345_v19  ;;  %v15350_v53 = vsel %vm5067_vm4, %v4997_v44, %v4543_v46  ;;  %v15352_v30 = vpop.f32.mrf.mxu1  ;;  %12334 = vmatprep.mubr.msk.f32.mxu1 %vm5198_vm5, %v14387_v43  ;;  %4072 = vrot.lane.b32.xlu1 %v10385_v8, %s13358_s14 }
 0x1f0   : > { %19133 = vst [vmem:[#allocation72_spill] sm:$0xff] %v15350_v53  ;;  %19134 = vst [vmem:[#allocation73_spill] sm:$0xff] %v15352_v30  ;;  %4070 = vrot.lane.b32.xlu0 %v10384_v7, %s13358_s14  ;;  %12222 = vmatprep.mubr.msk.f32.mxu0 %vm5198_vm5, %v15350_v53  ;;  %v10387_v7 = vadd.f32 -1.0, %v2843_v3 }
 0x1f1   : > { %v15362_v44 = vpop.f32.mrf.mxu1  ;;  %12223 = vmatmul.mubr.msk.f32.gmra.mxu0 %vm5198_vm5, %v15345_v19  ;;  %v3525_v52 = vpop.permute.xlu1 %3524 }
 0x1f2   : > { %19135 = vst [vmem:[#allocation74_spill] sm:$0xff] %v15362_v44  ;;  %v3523_v46 = vpop.permute.xlu0 %3522  ;;  %12335 = vmatmul.mubr.msk.f32.gmra.mxu1 %vm5198_vm5, %v14407_v2  ;;  %v4871_v3 = vsel %vm439_vm1, 1.0, %v3525_v52 }
 0x1f3   : > { %v15368_v8 = vpop.f32.mrf.mxu1  ;;  %12337 = vmatprep.mubr.msk.f32.mxu1 %vm5198_vm5, %v14419_v21  ;;  %4584 = vrot.lane.b32.xlu1 %v3353_v51, %s13359_s15  ;;  %v3227_v51 = vmul.f32 2.0, %v13254_v18 }
 0x1f4   : > { %19136 = vst [vmem:[#allocation75_spill] sm:$0xff] %v15368_v8  ;;  %4582 = vrot.lane.b32.xlu0 %v3352_v57, %s13359_s15  ;;  %v3099_v8 = vmul.f32 %v13254_v18, %v10387_v7  ;;  %v3098_v57 = vmul.f32 %v13255_v4, %v10386_v54 }
 0x1f5   : > { %v15374_v0 = vpop.f32.mrf.mxu1  ;;  %v4037_v20 = vpop.permute.xlu1 %4036 }
 0x1f6   : > { %19137 = vst [vmem:[#allocation76_spill] sm:$0xff] %v15374_v0  ;;  %v4035_v41 = vpop.permute.xlu0 %4034  ;;  %12338 = vmatmul.mubr.msk.f32.gmra.mxu1 %vm5198_vm5, %v14437_v25  ;;  %v4870_v0 = vsel %vm439_vm1, 1.0, %v3523_v46  ;;  %v5000_v44 = vsel %vm4938_vm3, %v4871_v3, %v4037_v20  ;;  %v3355_v46 = vsub.f32 %v3099_v8, %v3227_v51  ;;  %v13256_v20 = vld [vmem:[%s13423_s10 + $0x298] sm:$0xff] }
 0x1f7   : > { %v15378_v30 = vpop.f32.mrf.mxu1  ;;  %12340 = vmatprep.mubr.msk.f32.mxu1 %vm5198_vm5, %v14449_v31  ;;  %3564 = vrot.lane.b32.xlu1 %v13254_v18, %s13357_s13  ;;  %v4999_v31 = vsel %vm4938_vm3, %v4870_v0, %v4035_v41  ;;  %v2845_v0 = vmul.f32 %v13256_v20, %v13256_v20 }
 0x1f8   : > { %19138 = vst [vmem:[#allocation77_spill] sm:$0xff] %v15378_v30  ;;  %3562 = vrot.lane.b32.xlu0 %v13255_v4, %s13357_s13 }
 0x1f9   : > { %v15387_v59 = vpop.f32.mrf.mxu1  ;;  %v4549_v30 = vpop.permute.xlu1 %4548 }
 0x1fa   : > { %19139 = vst [vmem:[#allocation78_spill] sm:$0xff] %v15387_v59  ;;  %v15391_v25 = vsel %vm5067_vm4, %v5000_v44, %v4549_v30  ;;  %v4547_v18 = vpop.permute.xlu0 %4546  ;;  %12341 = vmatmul.mubr.msk.f32.gmra.mxu1 %vm5198_vm5, %v14469_v1  ;;  %v3354_v30 = vsub.f32 %v3098_v57, %v3226_v60  ;;  %v13257_v44 = vld [vmem:[%s13423_s10 + $0x290] sm:$0xff] }
 0x1fb   : > { %v15396_v52 = vsel %vm5067_vm4, %v4999_v31, %v4547_v18  ;;  %v15398_v4 = vpop.f32.mrf.mxu1  ;;  %12343 = vmatprep.mubr.msk.f32.mxu1 %vm5198_vm5, %v14479_v42  ;;  %4076 = vrot.lane.b32.xlu1 %v10387_v7, %s13358_s14  ;;  %v2844_v41 = vmul.f32 %v13257_v44, %v13257_v44  ;;  %v10389_v7 = vadd.f32 -1.0, %v2845_v0 }
 0x1fc   : > { %19140 = vst [vmem:[#allocation79_spill] sm:$0xff] %v15396_v52  ;;  %19141 = vst [vmem:[#allocation80_spill] sm:$0xff] %v15398_v4  ;;  %4074 = vrot.lane.b32.xlu0 %v10386_v54, %s13358_s14  ;;  %12225 = vmatprep.mubr.msk.f32.mxu0 %vm5198_vm5, %v15396_v52 }
 0x1fd   : > { %v15408_v31 = vpop.f32.mrf.mxu1  ;;  %12226 = vmatmul.mubr.msk.f32.gmra.mxu0 %vm5198_vm5, %v15391_v25  ;;  %v3529_v3 = vpop.permute.xlu1 %3528  ;;  %v10388_v54 = vadd.f32 -1.0, %v2844_v41  ;;  %v3228_v41 = vmul.f32 2.0, %v13257_v44 }
 0x1fe   : > { %19142 = vst [vmem:[#allocation81_spill] sm:$0xff] %v15408_v31  ;;  %v3527_v18 = vpop.permute.xlu0 %3526  ;;  %12344 = vmatmul.mubr.msk.f32.gmra.mxu1 %vm5198_vm5, %v14499_v55  ;;  %v4873_v0 = vsel %vm439_vm1, 1.0, %v3529_v3 }
 0x1ff   : > { %v15414_v8 = vpop.f32.mrf.mxu1  ;;  %12346 = vmatprep.mubr.msk.f32.mxu1 %vm5198_vm5, %v14511_v63  ;;  %4588 = vrot.lane.b32.xlu1 %v3355_v46, %s13359_s15  ;;  %v3229_v46 = vmul.f32 2.0, %v13256_v20 }
 0x200   : > { %19143 = vst [vmem:[#allocation82_spill] sm:$0xff] %v15414_v8  ;;  %4586 = vrot.lane.b32.xlu0 %v3354_v30, %s13359_s15  ;;  %v3101_v8 = vmul.f32 %v13256_v20, %v10389_v7  ;;  %v3100_v30 = vmul.f32 %v13257_v44, %v10388_v54 }
 0x201   : > { %v15420_v51 = vpop.f32.mrf.mxu1  ;;  %v4041_v57 = vpop.permute.xlu1 %4040 }
 0x202   : > { %19144 = vst [vmem:[#allocation83_spill] sm:$0xff] %v15420_v51  ;;  %v4039_v60 = vpop.permute.xlu0 %4038  ;;  %12347 = vmatmul.mubr.msk.f32.gmra.mxu1 %vm5198_vm5, %v14529_v27  ;;  %v4872_v51 = vsel %vm439_vm1, 1.0, %v3527_v18  ;;  %v5002_v31 = vsel %vm4938_vm3, %v4873_v0, %v4041_v57  ;;  %v3357_v18 = vsub.f32 %v3101_v8, %v3229_v46  ;;  %v13258_v57 = vld [vmem:[%s13423_s10 + $0x2a8] sm:$0xff] }
 0x203   : > { %v15424_v4 = vpop.f32.mrf.mxu1  ;;  %12349 = vmatprep.mubr.msk.f32.mxu1 %vm5198_vm5, %v14541_v37  ;;  %3568 = vrot.lane.b32.xlu1 %v13256_v20, %s13357_s13  ;;  %v5001_v37 = vsel %vm4938_vm3, %v4872_v51, %v4039_v60  ;;  %v2847_v51 = vmul.f32 %v13258_v57, %v13258_v57 }
 0x204   : > { %19145 = vst [vmem:[#allocation84_spill] sm:$0xff] %v15424_v4  ;;  %3566 = vrot.lane.b32.xlu0 %v13257_v44, %s13357_s13 }
 0x205   : > { %v15433_v59 = vpop.f32.mrf.mxu1  ;;  %v4553_v4 = vpop.permute.xlu1 %4552 }
 0x206   : > { %19146 = vst [vmem:[#allocation85_spill] sm:$0xff] %v15433_v59  ;;  %v15437_v27 = vsel %vm5067_vm4, %v5002_v31, %v4553_v4  ;;  %v4551_v20 = vpop.permute.xlu0 %4550  ;;  %12350 = vmatmul.mubr.msk.f32.gmra.mxu1 %vm5198_vm5, %v14561_v48  ;;  %v3356_v4 = vsub.f32 %v3100_v30, %v3228_v41  ;;  %v13259_v31 = vld [vmem:[%s13423_s10 + $0x2a0] sm:$0xff] }
 0x207   : > { %v15442_v3 = vsel %vm5067_vm4, %v5001_v37, %v4551_v20  ;;  %v15444_v44 = vpop.f32.mrf.mxu1  ;;  %12352 = vmatprep.mubr.msk.f32.mxu1 %vm5198_vm5, %v14571_v16  ;;  %4080 = vrot.lane.b32.xlu1 %v10389_v7, %s13358_s14  ;;  %v2846_v60 = vmul.f32 %v13259_v31, %v13259_v31  ;;  %v10391_v7 = vadd.f32 -1.0, %v2847_v51 }
 0x208   : > { %19147 = vst [vmem:[#allocation86_spill] sm:$0xff] %v15444_v44  ;;  %4078 = vrot.lane.b32.xlu0 %v10388_v54, %s13358_s14  ;;  %12228 = vmatprep.mubr.msk.f32.mxu0 %vm5198_vm5, %v15442_v3 }
 0x209   : > { %v15454_v37 = vpop.f32.mrf.mxu1  ;;  %12229 = vmatmul.mubr.msk.f32.gmra.mxu0 %vm5198_vm5, %v15437_v27  ;;  %v3533_v0 = vpop.permute.xlu1 %3532  ;;  %v10390_v54 = vadd.f32 -1.0, %v2846_v60  ;;  %v3230_v60 = vmul.f32 2.0, %v13259_v31 }
 0x20a   : > { %19148 = vst [vmem:[#allocation87_spill] sm:$0xff] %v15454_v37  ;;  %v3531_v20 = vpop.permute.xlu0 %3530  ;;  %12353 = vmatmul.mubr.msk.f32.gmra.mxu1 %vm5198_vm5, %v14591_v26  ;;  %v4875_v51 = vsel %vm439_vm1, 1.0, %v3533_v0 }
 0x20b   : > { %v15460_v8 = vpop.f32.mrf.mxu1  ;;  %12355 = vmatprep.mubr.msk.f32.mxu1 %vm5198_vm5, %v14608_v14  ;;  %4592 = vrot.lane.b32.xlu1 %v3357_v18, %s13359_s15  ;;  %v3231_v18 = vmul.f32 2.0, %v13258_v57  ;;  %v4874_v37 = vsel %vm439_vm1, 1.0, %v3531_v20 }
 0x20c   : > { %19149 = vst [vmem:[#allocation88_spill] sm:$0xff] %v15460_v8  ;;  %4590 = vrot.lane.b32.xlu0 %v3356_v4, %s13359_s15  ;;  %v3103_v8 = vmul.f32 %v13258_v57, %v10391_v7  ;;  %v3102_v4 = vmul.f32 %v13259_v31, %v10390_v54 }
 0x20d   : > { %v15466_v46 = vpop.f32.mrf.mxu1  ;;  %v4045_v30 = vpop.permute.xlu1 %4044 }
 0x20e   : > { %19150 = vst [vmem:[#allocation89_spill] sm:$0xff] %v15466_v46  ;;  %v4043_v41 = vpop.permute.xlu0 %4042  ;;  %12356 = vmatmul.mubr.msk.f32.gmra.mxu1 %vm5198_vm5, %v14626_v45  ;;  %v10693_v46 = vld [vmem:[%s18791_s5 + $0x28] sm:$0xff]  ;;  %v5004_v59 = vsel %vm4938_vm3, %v4875_v51, %v4045_v30  ;;  %v3359_v51 = vsub.f32 %v3103_v8, %v3231_v18 }
 0x20f   : > { %v15470_v44 = vpop.f32.mrf.mxu1  ;;  %12358 = vmatprep.mubr.msk.f32.mxu1 %vm5198_vm5, %v14638_v58  ;;  %3572 = vrot.lane.b32.xlu1 %v13258_v57, %s13357_s13 }
 0x210   : > { %19151 = vst [vmem:[#allocation90_spill] sm:$0xff] %v15470_v44  ;;  %3570 = vrot.lane.b32.xlu0 %v13259_v31, %s13357_s13  ;;  %v10823_v44 = vld [vmem:[%s18791_s5 + $0x38] sm:$0xff]  ;;  %12523 = vmatprep.subr.mxu0 %v10693_v46  ;;  %v5003_v31 = vsel %vm4938_vm3, %v4874_v37, %v4043_v41 }
 0x211   : > { %v15485_v57 = vpop.f32.mrf.mxu1  ;;  %v4557_v0 = vpop.permute.xlu1 %4556  ;;  %12719 = vmatprep.subr.mxu1 %v10823_v44  ;;  %12524 = vmatpush3.msra.mxu0 %v10693_v46  ;;  %v13260_v37 = vld [vmem:[%s13423_s10 + $0x2b8] sm:$0xff]  ;;  %v13261_v46 = vld [vmem:[%s13423_s10 + $0x2b0] sm:$0xff] }
 0x212   : > { %19152 = vst [vmem:[#allocation91_spill] sm:$0xff] %v15485_v57  ;;  %v15489_v58 = vsel %vm5067_vm4, %v5004_v59, %v4557_v0  ;;  %v4555_v45 = vpop.permute.xlu0 %4554  ;;  %12359 = vmatmul.mubr.msk.f32.gmra.mxu1 %vm5198_vm5, %v14658_v32  ;;  %v2849_v41 = vmul.f32 %v13260_v37, %v13260_v37  ;;  %v3358_v59 = vsub.f32 %v3102_v4, %v3230_v60 }
 0x213   : > { %v15494_v20 = vsel %vm5067_vm4, %v5003_v31, %v4555_v45  ;;  %v15496_v30 = vpop.f32.mrf.mxu1  ;;  %12361 = vmatprep.mubr.msk.f32.mxu1 %vm5198_vm5, %v14668_v22  ;;  %4084 = vrot.lane.b32.xlu1 %v10391_v7, %s13358_s14  ;;  %v2848_v0 = vmul.f32 %v13261_v46, %v13261_v46 }
 0x214   : > { %19153 = vst [vmem:[#allocation92_spill] sm:$0xff] %v15496_v30  ;;  %4082 = vrot.lane.b32.xlu0 %v10390_v54, %s13358_s14  ;;  %12231 = vmatprep.mubr.msk.f32.mxu0 %vm5198_vm5, %v15494_v20  ;;  %v10393_v7 = vadd.f32 -1.0, %v2849_v41  ;;  %v3233_v41 = vmul.f32 2.0, %v13260_v37 }
 0x215   : > { %v15506_v45 = vpop.f32.mrf.mxu1  ;;  %12232 = vmatmul.mubr.msk.f32.gmra.mxu0 %vm5198_vm5, %v15489_v58  ;;  %v3537_v31 = vpop.permute.xlu1 %3536  ;;  %12720 = vmatpush3.msra.mxu1 %v10823_v44  ;;  %v10392_v54 = vadd.f32 -1.0, %v2848_v0 }
 0x216   : > { %19154 = vst [vmem:[#allocation93_spill] sm:$0xff] %v15506_v45  ;;  %v3535_v30 = vpop.permute.xlu0 %3534  ;;  %12362 = vmatmul.mubr.msk.f32.gmra.mxu1 %vm5198_vm5, %v14688_v35 }
 0x217   : > { %v15512_v8 = vpop.f32.mrf.mxu1  ;;  %12364 = vmatprep.mubr.msk.f32.mxu1 %vm5198_vm5, %v14700_v13  ;;  %4596 = vrot.lane.b32.xlu1 %v3359_v51, %s13359_s15  ;;  %v3105_v51 = vmul.f32 %v13260_v37, %v10393_v7  ;;  %v3104_v0 = vmul.f32 %v13261_v46, %v10392_v54 }
 0x218   : > { %19155 = vst [vmem:[#allocation94_spill] sm:$0xff] %v15512_v8  ;;  %4594 = vrot.lane.b32.xlu0 %v3358_v59, %s13359_s15  ;;  %v4877_v59 = vsel %vm439_vm1, 1.0, %v3537_v31  ;;  %v4876_v8 = vsel %vm439_vm1, 1.0, %v3535_v30  ;;  %v13262_v31 = vld [vmem:[%s13423_s10 + $0x2c8] sm:$0xff] }
 0x219   : > { %v15518_v18 = vpop.f32.mrf.mxu1  ;;  %v4049_v4 = vpop.permute.xlu1 %4048  ;;  %v2851_v13 = vmul.f32 %v13262_v31, %v13262_v31 }
 0x21a   : > { %19156 = vst [vmem:[#allocation95_spill] sm:$0xff] %v15518_v18  ;;  %v4047_v60 = vpop.permute.xlu0 %4046  ;;  %12365 = vmatmul.mubr.msk.f32.gmra.mxu1 %vm5198_vm5, %v14718_v12  ;;  %v3232_v18 = vmul.f32 2.0, %v13261_v46  ;;  %v5006_v45 = vsel %vm4938_vm3, %v4877_v59, %v4049_v4  ;;  %v13263_v4 = vld [vmem:[%s13423_s10 + $0x2c0] sm:$0xff] }
 0x21b   : > { %v15522_v44 = vpop.f32.mrf.mxu1  ;;  %12367 = vmatprep.mubr.msk.f32.mxu1 %vm5198_vm5, %v14728_v17  ;;  %3576 = vrot.lane.b32.xlu1 %v13260_v37, %s13357_s13  ;;  %v5005_v17 = vsel %vm4938_vm3, %v4876_v8, %v4047_v60  ;;  %v3361_v8 = vsub.f32 %v3105_v51, %v3233_v41  ;;  %v2850_v60 = vmul.f32 %v13263_v4, %v13263_v4 }
 0x21c   : > { %19157 = vst [vmem:[#allocation96_spill] sm:$0xff] %v15522_v44  ;;  %3574 = vrot.lane.b32.xlu0 %v13261_v46, %s13357_s13 }
 0x21d   : > { %v15531_v57 = vpop.f32.mrf.mxu1  ;;  %v4561_v44 = vpop.permute.xlu1 %4560 }
 0x21e   : > { %19158 = vst [vmem:[#allocation97_spill] sm:$0xff] %v15531_v57  ;;  %v15535_v12 = vsel %vm5067_vm4, %v5006_v45, %v4561_v44  ;;  %v4559_v37 = vpop.permute.xlu0 %4558  ;;  %12368 = vmatmul.mubr.msk.f32.gmra.mxu1 %vm5198_vm5, %v14750_v49  ;;  %v3360_v45 = vsub.f32 %v3104_v0, %v3232_v18 }
 0x21f   : > { %v15541_v46 = vsel %vm5067_vm4, %v5005_v17, %v4559_v37  ;;  %v15543_v30 = vpop.f32.mrf.mxu1  ;;  %12370 = vmatprep.mubr.msk.f32.mxu1 %vm5198_vm5, %v14760_v62  ;;  %4088 = vrot.lane.b32.xlu1 %v10393_v7, %s13358_s14  ;;  %v10395_v7 = vadd.f32 -1.0, %v2851_v13 }
 0x220   : > { %19159 = vst [vmem:[#allocation98_spill] sm:$0xff] %v15541_v46  ;;  %19160 = vst [vmem:[#allocation99_spill] sm:$0xff] %v15543_v30  ;;  %4086 = vrot.lane.b32.xlu0 %v10392_v54, %s13358_s14  ;;  %12234 = vmatprep.mubr.msk.f32.mxu0 %vm5198_vm5, %v15541_v46  ;;  %v10394_v54 = vadd.f32 -1.0, %v2850_v60 }
 0x221   : > { %v15552_v44 = vpop.f32.mrf.mxu1  ;;  %12235 = vmatmul.mubr.msk.f32.gmra.mxu0 %vm5198_vm5, %v15535_v12  ;;  %v3541_v17 = vpop.permute.xlu1 %3540  ;;  %v3107_v37 = vmul.f32 %v13262_v31, %v10395_v7 }
 0x222   : > { %19161 = vst [vmem:[#allocation100_spill] sm:$0xff] %v15552_v44  ;;  %v3539_v59 = vpop.permute.xlu0 %3538  ;;  %12371 = vmatmul.mubr.msk.f32.gmra.mxu1 %vm5198_vm5, %v14780_v23  ;;  %v3235_v44 = vmul.f32 2.0, %v13262_v31  ;;  %v4879_v60 = vsel %vm439_vm1, 1.0, %v3541_v17 }
 0x223   : > { %v15558_v51 = vpop.f32.mrf.mxu1  ;;  %12373 = vmatprep.mubr.msk.f32.mxu1 %vm5198_vm5, %v14790_v24  ;;  %4600 = vrot.lane.b32.xlu1 %v3361_v8, %s13359_s15  ;;  %v3106_v8 = vmul.f32 %v13263_v4, %v10394_v54 }
 0x224   : > { %19162 = vst [vmem:[#allocation101_spill] sm:$0xff] %v15558_v51  ;;  %4598 = vrot.lane.b32.xlu0 %v3360_v45, %s13359_s15  ;;  %v3234_v45 = vmul.f32 2.0, %v13263_v4 }
 0x225   : > { %v15564_v18 = vpop.f32.mrf.mxu1  ;;  %v4053_v41 = vpop.permute.xlu1 %4052 }
 0x226   : > { %19163 = vst [vmem:[#allocation102_spill] sm:$0xff] %v15564_v18  ;;  %v4051_v0 = vpop.permute.xlu0 %4050  ;;  %12374 = vmatmul.mubr.msk.f32.gmra.mxu1 %vm5198_vm5, %v14808_v9  ;;  %v4878_v18 = vsel %vm439_vm1, 1.0, %v3539_v59  ;;  %v5008_v30 = vsel %vm4938_vm3, %v4879_v60, %v4053_v41  ;;  %v13264_v59 = vld [vmem:[%s13423_s10 + $0x2d8] sm:$0xff] }
 0x227   : > { %v15568_v13 = vpop.f32.mrf.mxu1  ;;  %12376 = vmatprep.mubr.msk.f32.mxu1 %vm5198_vm5, %v14816_v50  ;;  %3580 = vrot.lane.b32.xlu1 %v13262_v31, %s13357_s13  ;;  %v3363_v31 = vsub.f32 %v3107_v37, %v3235_v44  ;;  %v3362_v44 = vsub.f32 %v3106_v8, %v3234_v45 }
 0x228   : > { %19164 = vst [vmem:[#allocation103_spill] sm:$0xff] %v15568_v13  ;;  %3578 = vrot.lane.b32.xlu0 %v13263_v4, %s13357_s13  ;;  %v5007_v13 = vsel %vm4938_vm3, %v4878_v18, %v4051_v0  ;;  %v2853_v18 = vmul.f32 %v13264_v59, %v13264_v59 }
 0x229   : > { %v15576_v51 = vpop.f32.mrf.mxu1  ;;  %v4565_v57 = vpop.permute.xlu1 %4564 }
 0x22a   : > { %19165 = vst [vmem:[#allocation104_spill] sm:$0xff] %v15576_v51  ;;  %v4563_v50 = vpop.permute.xlu0 %4562  ;;  %12377 = vmatmul.mubr.msk.f32.gmra.mxu1 %vm5198_vm5, %v14836_v10  ;;  %v15583_v9 = vsel %vm5067_vm4, %v5008_v30, %v4565_v57  ;;  %v13265_v57 = vld [vmem:[%s13423_s10 + $0x2d0] sm:$0xff] }
 0x22b   : > { %v15586_v4 = vsel %vm5067_vm4, %v5007_v13, %v4563_v50  ;;  %v15588_v17 = vpop.f32.mrf.mxu1  ;;  %12379 = vmatprep.mubr.msk.f32.mxu1 %vm5198_vm5, %v14842_v61  ;;  %4092 = vrot.lane.b32.xlu1 %v10395_v7, %s13358_s14  ;;  %v2852_v30 = vmul.f32 %v13265_v57, %v13265_v57 }
 0x22c   : > { %19166 = vst [vmem:[#allocation105_spill] sm:$0xff] %v15588_v17  ;;  %4090 = vrot.lane.b32.xlu0 %v10394_v54, %s13358_s14  ;;  %12237 = vmatprep.mubr.msk.f32.mxu0 %vm5198_vm5, %v15586_v4  ;;  %v10397_v54 = vadd.f32 -1.0, %v2853_v18  ;;  %v3237_v18 = vmul.f32 2.0, %v13264_v59 }
 0x22d   : > { %v15598_v41 = vpop.f32.mrf.mxu1  ;;  %12238 = vmatmul.mubr.msk.f32.gmra.mxu0 %vm5198_vm5, %v15583_v9  ;;  %v3545_v50 = vpop.permute.xlu1 %3544  ;;  %v10396_v37 = vadd.f32 -1.0, %v2852_v30  ;;  %v3236_v30 = vmul.f32 2.0, %v13265_v57 }
 0x22e   : > { %19167 = vst [vmem:[#allocation106_spill] sm:$0xff] %v15598_v41  ;;  %v3543_v0 = vpop.permute.xlu0 %3542  ;;  %12380 = vmatmul.mubr.msk.f32.gmra.mxu1 %vm5198_vm5, %v14857_v5 }
 0x22f   : > { %v15604_v7 = vpop.f32.mrf.mxu1  ;;  %12382 = vmatprep.mubr.msk.f32.mxu1 %vm5198_vm5, %v14878_v36  ;;  %4604 = vrot.lane.b32.xlu1 %v3363_v31, %s13359_s15  ;;  %v3109_v31 = vmul.f32 %v13264_v59, %v10397_v54  ;;  %v15629_v36 = vpop.f32.mrf.mxu0 }
 0x230   : > { %19168 = vst [vmem:[#allocation107_spill] sm:$0xff] %v15604_v7  ;;  %4602 = vrot.lane.b32.xlu0 %v3362_v44, %s13359_s15  ;;  %v3108_v44 = vmul.f32 %v13265_v57, %v10396_v37  ;;  %v4880_v7 = vsel %vm439_vm1, 1.0, %v3543_v0  ;;  %19172 = vst [vmem:[#allocation111_spill] sm:$0xff] %v15629_v36  ;;  %v19184_v36 = vld [vmem:[#allocation13_spill] sm:$0xff] }
 0x231   : > { %v15610_v13 = vpop.f32.mrf.mxu1  ;;  %v4057_v8 = vpop.permute.xlu1 %4056 }
 0x232   : > { %19169 = vst [vmem:[#allocation108_spill] sm:$0xff] %v15610_v13  ;;  %v4055_v45 = vpop.permute.xlu0 %4054  ;;  %12383 = vmatmul.mubr.msk.f32.gmra.mxu1 %vm5198_vm5, %v14874_v15  ;;  %v4881_v13 = vsel %vm439_vm1, 1.0, %v3545_v50 }
 0x233   : > { %v15614_v60 = vpop.f32.mrf.mxu1  ;;  %12385 = vmatprep.mubr.msk.f32.mxu1 %vm5198_vm5, %v14913_v39  ;;  %3584 = vrot.lane.b32.xlu1 %v13264_v59, %s13357_s13  ;;  %v5009_v17 = vsel %vm4938_vm3, %v4880_v7, %v4055_v45  ;;  %v13266_v59 = vld [vmem:[%s13423_s10 + $0x2e8] sm:$0xff]  ;;  %v3365_v7 = vsub.f32 %v3109_v31, %v3237_v18  ;;  %v19179_v31 = vld [vmem:[#allocation27_spill] sm:$0xff] }
 0x234   : > { %19170 = vst [vmem:[#allocation109_spill] sm:$0xff] %v15614_v60  ;;  %3582 = vrot.lane.b32.xlu0 %v13265_v57, %s13357_s13  ;;  %v5010_v60 = vsel %vm4938_vm3, %v4881_v13, %v4057_v8  ;;  %v2855_v15 = vmul.f32 %v13266_v59, %v13266_v59  ;;  %v3364_v13 = vsub.f32 %v3108_v44, %v3236_v30  ;;  %v13267_v8 = vld [vmem:[%s13423_s10 + $0x2e0] sm:$0xff] }
 0x235   : > { %v15622_v41 = vpop.f32.mrf.mxu1  ;;  %v4569_v51 = vpop.permute.xlu1 %4568 }
 0x236   : > { %19171 = vst [vmem:[#allocation110_spill] sm:$0xff] %v15622_v41  ;;  %v4567_v39 = vpop.permute.xlu0 %4566  ;;  %12386 = vmatmul.mubr.msk.f32.gmra.mxu1 %vm5198_vm5, %v14908_v38  ;;  %v15632_v57 = vsel %vm5067_vm4, %v5010_v60, %v4569_v51  ;;  %v2854_v51 = vmul.f32 %v13267_v8, %v13267_v8  ;;  %v15652_v60 = vpop.f32.mrf.mxu0  ;;  %v3239_v41 = vmul.f32 2.0, %v13266_v59  ;;  %v19202_v38 = vld [vmem:[#allocation35_spill] sm:$0xff] }
 0x237   : > { %19173 = vst [vmem:[#allocation112_spill] sm:$0xff] %v15632_v57  ;;  %v15635_v50 = vsel %vm5067_vm4, %v5009_v17, %v4567_v39  ;;  %v15637_v0 = vpop.f32.mrf.mxu1  ;;  %12388 = vmatprep.mubr.msk.f32.mxu1 %vm5198_vm5, %v14949_v11  ;;  %4096 = vrot.lane.b32.xlu1 %v10397_v54, %s13358_s14  ;;  %v10399_v54 = vadd.f32 -1.0, %v2855_v15  ;;  %19177 = vst [vmem:[#allocation116_spill] sm:$0xff] %v15652_v60 }
 0x238   : > { %19174 = vst [vmem:[#allocation113_spill] sm:$0xff] %v15635_v50  ;;  %19175 = vst [vmem:[#allocation114_spill] sm:$0xff] %v15637_v0  ;;  %4094 = vrot.lane.b32.xlu0 %v10396_v37, %s13358_s14  ;;  %12240 = vmatprep.mubr.msk.f32.mxu0 %vm5198_vm5, %v15635_v50  ;;  %v10398_v18 = vadd.f32 -1.0, %v2854_v51  ;;  %v19181_v0 = vld [vmem:[#allocation11_spill] sm:$0xff]  ;;  %v15664_v60 = vpop.f32.mrf.mxu0 }
 0x239   : > { %v15646_v45 = vpop.f32.mrf.mxu1  ;;  %12241 = vmatmul.mubr.msk.f32.gmra.mxu0 %vm5198_vm5, %v15632_v57  ;;  %v3549_v39 = vpop.permute.xlu1 %3548  ;;  %v3111_v15 = vmul.f32 %v13266_v59, %v10399_v54  ;;  %19182 = vst [vmem:[#allocation119_spill] sm:$0xff] %v15664_v60 }
 0x23a   : > { %19176 = vst [vmem:[#allocation115_spill] sm:$0xff] %v15646_v45  ;;  %v3547_v17 = vpop.permute.xlu0 %3546  ;;  %12389 = vmatmul.mubr.msk.f32.gmra.mxu1 %vm5198_vm5, %v14945_v29  ;;  %v4883_v51 = vsel %vm439_vm1, 1.0, %v3549_v39  ;;  %v19186_v29 = vld [vmem:[#allocation10_spill] sm:$0xff]  ;;  %v15680_v11 = vpop.f32.mrf.mxu0 }
 0x23b   : > { %v15654_v37 = vpop.f32.mrf.mxu1  ;;  %12391 = vmatprep.mubr.msk.f32.mxu1 %vm5198_vm5, %v19179_v31  ;;  %4608 = vrot.lane.b32.xlu1 %v3365_v7, %s13359_s15  ;;  %v3110_v7 = vmul.f32 %v13267_v8, %v10398_v18  ;;  %19187 = vst [vmem:[#allocation122_spill] sm:$0xff] %v15680_v11 }
 0x23c   : > { %19178 = vst [vmem:[#allocation117_spill] sm:$0xff] %v15654_v37  ;;  %4606 = vrot.lane.b32.xlu0 %v3364_v13, %s13359_s15  ;;  %v3238_v13 = vmul.f32 2.0, %v13267_v8 }
 0x23d   : > { %v15660_v44 = vpop.f32.mrf.mxu1  ;;  %v4061_v30 = vpop.permute.xlu1 %4060 }
 0x23e   : > { %19180 = vst [vmem:[#allocation118_spill] sm:$0xff] %v15660_v44  ;;  %v4059_v45 = vpop.permute.xlu0 %4058  ;;  %12392 = vmatmul.mubr.msk.f32.gmra.mxu1 %vm5198_vm5, %v19181_v0  ;;  %v4882_v44 = vsel %vm439_vm1, 1.0, %v3547_v17  ;;  %v5012_v60 = vsel %vm4938_vm3, %v4883_v51, %v4061_v30  ;;  %v19190_v30 = vld [vmem:[#allocation12_spill] sm:$0xff]  ;;  %v19192_v51 = vld [vmem:[#allocation29_spill] sm:$0xff] }
 0x23f   : > { %v15666_v37 = vpop.f32.mrf.mxu1  ;;  %12394 = vmatprep.mubr.msk.f32.mxu1 %vm5198_vm5, %v19184_v36  ;;  %3588 = vrot.lane.b32.xlu1 %v13266_v59, %s13357_s13  ;;  %v3367_v59 = vsub.f32 %v3111_v15, %v3239_v41  ;;  %v3366_v41 = vsub.f32 %v3110_v7, %v3238_v13 }
 0x240   : > { %19183 = vst [vmem:[#allocation120_spill] sm:$0xff] %v15666_v37  ;;  %3586 = vrot.lane.b32.xlu0 %v13267_v8, %s13357_s13  ;;  %v5011_v37 = vsel %vm4938_vm3, %v4882_v44, %v4059_v45  ;;  %v13268_v45 = vld [vmem:[%s13423_s10 + $0x2f8] sm:$0xff] }
 0x241   : > { %v15674_v0 = vpop.f32.mrf.mxu1  ;;  %v4573_v31 = vpop.permute.xlu1 %4572  ;;  %v2857_v44 = vmul.f32 %v13268_v45, %v13268_v45 }
 0x242   : > { %19185 = vst [vmem:[#allocation121_spill] sm:$0xff] %v15674_v0  ;;  %v4571_v36 = vpop.permute.xlu0 %4570  ;;  %12395 = vmatmul.mubr.msk.f32.gmra.mxu1 %vm5198_vm5, %v19186_v29  ;;  %v15683_v8 = vsel %vm5067_vm4, %v5012_v60, %v4573_v31  ;;  %v13269_v60 = vld [vmem:[%s13423_s10 + $0x2f0] sm:$0xff] }
 0x243   : > { %v15686_v39 = vsel %vm5067_vm4, %v5011_v37, %v4571_v36  ;;  %v15688_v17 = vpop.f32.mrf.mxu1  ;;  %12397 = vmatprep.mubr.msk.f32.mxu1 %vm5198_vm5, %v19190_v30  ;;  %4100 = vrot.lane.b32.xlu1 %v10399_v54, %s13358_s14  ;;  %v2856_v31 = vmul.f32 %v13269_v60, %v13269_v60  ;;  %v15704_v54 = vpop.f32.mrf.mxu0  ;;  %v10401_v7 = vadd.f32 -1.0, %v2857_v44  ;;  %v19197_v30 = vld [vmem:[#allocation15_spill] sm:$0xff]  ;;  %v3241_v44 = vmul.f32 2.0, %v13268_v45 }
 0x244   : > { %19188 = vst [vmem:[#allocation123_spill] sm:$0xff] %v15686_v39  ;;  %19189 = vst [vmem:[#allocation124_spill] sm:$0xff] %v15688_v17  ;;  %4098 = vrot.lane.b32.xlu0 %v10398_v18, %s13358_s14  ;;  %12243 = vmatprep.mubr.msk.f32.mxu0 %vm5198_vm5, %v15686_v39  ;;  %v19195_v18 = vld [vmem:[#allocation14_spill] sm:$0xff] }
 0x245   : > { %v15698_v15 = vpop.f32.mrf.mxu1  ;;  %12244 = vmatmul.mubr.msk.f32.gmra.mxu0 %vm5198_vm5, %v15683_v8  ;;  %v3553_v36 = vpop.permute.xlu1 %3552  ;;  %19193 = vst [vmem:[#allocation126_spill] sm:$0xff] %v15704_v54  ;;  %v10400_v13 = vadd.f32 -1.0, %v2856_v31  ;;  %v3240_v31 = vmul.f32 2.0, %v13269_v60 }
 0x246   : > { %19191 = vst [vmem:[#allocation125_spill] sm:$0xff] %v15698_v15  ;;  %v3551_v37 = vpop.permute.xlu0 %3550  ;;  %12398 = vmatmul.mubr.msk.f32.gmra.mxu1 %vm5198_vm5, %v19192_v51  ;;  %v15716_v51 = vpop.f32.mrf.mxu0 }
 0x247   : > { %v15706_v17 = vpop.f32.mrf.mxu1  ;;  %12400 = vmatprep.mubr.msk.f32.mxu1 %vm5198_vm5, %v19195_v18  ;;  %4612 = vrot.lane.b32.xlu1 %v3367_v59, %s13359_s15  ;;  %19198 = vst [vmem:[#allocation129_spill] sm:$0xff] %v15716_v51  ;;  %v3113_v59 = vmul.f32 %v13268_v45, %v10401_v7 }
 0x248   : > { %19194 = vst [vmem:[#allocation127_spill] sm:$0xff] %v15706_v17  ;;  %4610 = vrot.lane.b32.xlu0 %v3366_v41, %s13359_s15  ;;  %v19200_v17 = vld [vmem:[#allocation36_spill] sm:$0xff]  ;;  %v3112_v41 = vmul.f32 %v13269_v60, %v10400_v13  ;;  %v15733_v61 = vpop.f32.mrf.mxu0 }
 0x249   : > { %v15712_v15 = vpop.f32.mrf.mxu1  ;;  %v4065_v0 = vpop.permute.xlu1 %4064  ;;  %19203 = vst [vmem:[#allocation35_spill] sm:$0xff] %v15733_v61 }
 0x24a   : > { %19196 = vst [vmem:[#allocation128_spill] sm:$0xff] %v15712_v15  ;;  %v4063_v11 = vpop.permute.xlu0 %4062  ;;  %12401 = vmatmul.mubr.msk.f32.gmra.mxu1 %vm5198_vm5, %v19197_v30  ;;  %v4885_v15 = vsel %vm439_vm1, 1.0, %v3553_v36  ;;  %v4884_v30 = vsel %vm439_vm1, 1.0, %v3551_v37 }
 0x24b   : > { %v15718_v54 = vpop.f32.mrf.mxu1  ;;  %12403 = vmatprep.mubr.msk.f32.mxu1 %vm5198_vm5, %v19200_v17  ;;  %3592 = vrot.lane.b32.xlu1 %v13268_v45, %s13357_s13  ;;  %v5013_v51 = vsel %vm4938_vm3, %v4884_v30, %v4063_v11  ;;  %v13270_v45 = vld [vmem:[%s13423_s10 + $0x308] sm:$0xff]  ;;  %v3369_v11 = vsub.f32 %v3113_v59, %v3241_v44  ;;  %v3368_v30 = vsub.f32 %v3112_v41, %v3240_v31  ;;  %v15756_v59 = vpop.f32.mrf.mxu0 }
 0x24c   : > { %19199 = vst [vmem:[#allocation130_spill] sm:$0xff] %v15718_v54  ;;  %3590 = vrot.lane.b32.xlu0 %v13269_v60, %s13357_s13  ;;  %v5014_v54 = vsel %vm4938_vm3, %v4885_v15, %v4065_v0  ;;  %v2859_v5 = vmul.f32 %v13270_v45, %v13270_v45  ;;  %v19205_v0 = vld [vmem:[#allocation44_spill] sm:$0xff]  ;;  %19208 = vst [vmem:[#allocation133_spill] sm:$0xff] %v15756_v59  ;;  %v3243_v61 = vmul.f32 2.0, %v13270_v45 }
 0x24d   : > { %v15726_v18 = vpop.f32.mrf.mxu1  ;;  %v4577_v17 = vpop.permute.xlu1 %4576  ;;  %v13271_v15 = vld [vmem:[%s13423_s10 + $0x300] sm:$0xff] }
 0x24e   : > { %19201 = vst [vmem:[#allocation131_spill] sm:$0xff] %v15726_v18  ;;  %v4575_v29 = vpop.permute.xlu0 %4574  ;;  %12404 = vmatmul.mubr.msk.f32.gmra.mxu1 %vm5198_vm5, %v19202_v38  ;;  %v15736_v60 = vsel %vm5067_vm4, %v5014_v54, %v4577_v17  ;;  %v2858_v17 = vmul.f32 %v13271_v15, %v13271_v15  ;;  %v19211_v18 = vld [vmem:[#allocation51_spill] sm:$0xff]  ;;  %v15768_v59 = vpop.f32.mrf.mxu0 }
 0x24f   : > { %v15739_v36 = vsel %vm5067_vm4, %v5013_v51, %v4575_v29  ;;  %v15741_v37 = vpop.f32.mrf.mxu1  ;;  %12406 = vmatprep.mubr.msk.f32.mxu1 %vm5198_vm5, %v19205_v0  ;;  %4104 = vrot.lane.b32.xlu1 %v10401_v7, %s13358_s14  ;;  %v10403_v7 = vadd.f32 -1.0, %v2859_v5  ;;  %19212 = vst [vmem:[#allocation136_spill] sm:$0xff] %v15768_v59 }
 0x250   : > { %19204 = vst [vmem:[#allocation132_spill] sm:$0xff] %v15741_v37  ;;  %4102 = vrot.lane.b32.xlu0 %v10400_v13, %s13358_s14  ;;  %12246 = vmatprep.mubr.msk.f32.mxu0 %vm5198_vm5, %v15739_v36  ;;  %v19207_v37 = vld [vmem:[#allocation43_spill] sm:$0xff]  ;;  %v10402_v44 = vadd.f32 -1.0, %v2858_v17 }
 0x251   : > { %v15750_v54 = vpop.f32.mrf.mxu1  ;;  %12247 = vmatmul.mubr.msk.f32.gmra.mxu0 %vm5198_vm5, %v15736_v60  ;;  %v3557_v29 = vpop.permute.xlu1 %3556  ;;  %v3115_v5 = vmul.f32 %v13270_v45, %v10403_v7 }
 0x252   : > { %19206 = vst [vmem:[#allocation44_spill] sm:$0xff] %v15750_v54  ;;  %v3555_v51 = vpop.permute.xlu0 %3554  ;;  %12407 = vmatmul.mubr.msk.f32.gmra.mxu1 %vm5198_vm5, %v19207_v37  ;;  %v4887_v17 = vsel %vm439_vm1, 1.0, %v3557_v29  ;;  %v15784_v37 = vpop.f32.mrf.mxu0 }
 0x253   : > { %v15758_v13 = vpop.f32.mrf.mxu1  ;;  %12409 = vmatprep.mubr.msk.f32.mxu1 %vm5198_vm5, %v15221_v6  ;;  %4616 = vrot.lane.b32.xlu1 %v3369_v11, %s13359_s15  ;;  %v3114_v11 = vmul.f32 %v13271_v15, %v10402_v44  ;;  %19215 = vst [vmem:[#allocation139_spill] sm:$0xff] %v15784_v37 }
 0x254   : > { %19209 = vst [vmem:[#allocation134_spill] sm:$0xff] %v15758_v13  ;;  %4614 = vrot.lane.b32.xlu0 %v3368_v30, %s13359_s15  ;;  %v3242_v30 = vmul.f32 2.0, %v13271_v15 }
 0x255   : > { %v15764_v41 = vpop.f32.mrf.mxu1  ;;  %v4069_v31 = vpop.permute.xlu1 %4068 }
 0x256   : > { %19210 = vst [vmem:[#allocation135_spill] sm:$0xff] %v15764_v41  ;;  %v4067_v54 = vpop.permute.xlu0 %4066  ;;  %12410 = vmatmul.mubr.msk.f32.gmra.mxu1 %vm5198_vm5, %v19211_v18  ;;  %v4886_v41 = vsel %vm439_vm1, 1.0, %v3555_v51  ;;  %v5016_v59 = vsel %vm4938_vm3, %v4887_v17, %v4069_v31 }
 0x257   : > { %v15770_v13 = vpop.f32.mrf.mxu1  ;;  %12412 = vmatprep.mubr.msk.f32.mxu1 %vm5198_vm5, %v15266_v40  ;;  %3596 = vrot.lane.b32.xlu1 %v13270_v45, %s13357_s13  ;;  %v3371_v45 = vsub.f32 %v3115_v5, %v3243_v61  ;;  %v3370_v61 = vsub.f32 %v3114_v11, %v3242_v30 }
 0x258   : > { %19213 = vst [vmem:[#allocation137_spill] sm:$0xff] %v15770_v13  ;;  %3594 = vrot.lane.b32.xlu0 %v13271_v15, %s13357_s13  ;;  %v5015_v13 = vsel %vm4938_vm3, %v4886_v41, %v4067_v54  ;;  %v13272_v54 = vld [vmem:[%s13423_s10 + $0x318] sm:$0xff] }
 0x259   : > { %v15778_v18 = vpop.f32.mrf.mxu1  ;;  %v4581_v6 = vpop.permute.xlu1 %4580  ;;  %v2861_v41 = vmul.f32 %v13272_v54, %v13272_v54 }
 0x25a   : > { %19214 = vst [vmem:[#allocation138_spill] sm:$0xff] %v15778_v18  ;;  %v4579_v40 = vpop.permute.xlu0 %4578  ;;  %12413 = vmatmul.mubr.msk.f32.gmra.mxu1 %vm5198_vm5, %v15262_v33  ;;  %v15787_v15 = vsel %vm5067_vm4, %v5016_v59, %v4581_v6  ;;  %v13273_v6 = vld [vmem:[%s13423_s10 + $0x310] sm:$0xff] }
 0x25b   : > { %v15790_v29 = vsel %vm5067_vm4, %v5015_v13, %v4579_v40  ;;  %v15792_v51 = vpop.f32.mrf.mxu1  ;;  %12415 = vmatprep.mubr.msk.f32.mxu1 %vm5198_vm5, %v15308_v47  ;;  %4108 = vrot.lane.b32.xlu1 %v10403_v7, %s13358_s14  ;;  %v2860_v59 = vmul.f32 %v13273_v6, %v13273_v6  ;;  %v15808_v7 = vpop.f32.mrf.mxu0 }
 0x25c   : > { %19216 = vst [vmem:[#allocation140_spill] sm:$0xff] %v15792_v51  ;;  %4106 = vrot.lane.b32.xlu0 %v10402_v44, %s13358_s14  ;;  %12249 = vmatprep.mubr.msk.f32.mxu0 %vm5198_vm5, %v15790_v29  ;;  %19218 = vst [vmem:[#allocation142_spill] sm:$0xff] %v15808_v7  ;;  %v10405_v44 = vadd.f32 -1.0, %v2861_v41  ;;  %v3245_v41 = vmul.f32 2.0, %v13272_v54 }
 0x25d   : > { %v15802_v31 = vpop.f32.mrf.mxu1  ;;  %12250 = vmatmul.mubr.msk.f32.gmra.mxu0 %vm5198_vm5, %v15787_v15  ;;  %v3561_v40 = vpop.permute.xlu1 %3560  ;;  %v10404_v11 = vadd.f32 -1.0, %v2860_v59  ;;  %v3244_v59 = vmul.f32 2.0, %v13273_v6 }
 0x25e   : > { %19217 = vst [vmem:[#allocation141_spill] sm:$0xff] %v15802_v31  ;;  %v3559_v13 = vpop.permute.xlu0 %3558  ;;  %12416 = vmatmul.mubr.msk.f32.gmra.mxu1 %vm5198_vm5, %v15304_v28  ;;  %v15820_v51 = vpop.f32.mrf.mxu0 }
 0x25f   : > { %v15810_v5 = vpop.f32.mrf.mxu1  ;;  %12418 = vmatprep.mubr.msk.f32.mxu1 %vm5198_vm5, %v15350_v53  ;;  %4620 = vrot.lane.b32.xlu1 %v3371_v45, %s13359_s15  ;;  %19221 = vst [vmem:[#allocation145_spill] sm:$0xff] %v15820_v51  ;;  %v3117_v45 = vmul.f32 %v13272_v54, %v10405_v44 }
 0x260   : > { %19219 = vst [vmem:[#allocation143_spill] sm:$0xff] %v15810_v5  ;;  %4618 = vrot.lane.b32.xlu0 %v3370_v61, %s13359_s15  ;;  %v3116_v61 = vmul.f32 %v13273_v6, %v10404_v11  ;;  %v4888_v5 = vsel %vm439_vm1, 1.0, %v3559_v13  ;;  %v15837_v53 = vpop.f32.mrf.mxu0 }
 0x261   : > { %v15816_v30 = vpop.f32.mrf.mxu1  ;;  %v4073_v17 = vpop.permute.xlu1 %4072  ;;  %19224 = vst [vmem:[#allocation148_spill] sm:$0xff] %v15837_v53 }
 0x262   : > { %19220 = vst [vmem:[#allocation144_spill] sm:$0xff] %v15816_v30  ;;  %v4071_v31 = vpop.permute.xlu0 %4070  ;;  %12419 = vmatmul.mubr.msk.f32.gmra.mxu1 %vm5198_vm5, %v15345_v19  ;;  %v4889_v30 = vsel %vm439_vm1, 1.0, %v3561_v40 }
 0x263   : > { %v15822_v18 = vpop.f32.mrf.mxu1  ;;  %12421 = vmatprep.mubr.msk.f32.mxu1 %vm5198_vm5, %v15396_v52  ;;  %3600 = vrot.lane.b32.xlu1 %v13272_v54, %s13357_s13  ;;  %v5017_v51 = vsel %vm4938_vm3, %v4888_v5, %v4071_v31  ;;  %v13274_v54 = vld [vmem:[%s13423_s10 + $0x328] sm:$0xff]  ;;  %v3373_v31 = vsub.f32 %v3117_v45, %v3245_v41  ;;  %v3372_v5 = vsub.f32 %v3116_v61, %v3244_v59 }
 0x264   : > { %19222 = vst [vmem:[#allocation146_spill] sm:$0xff] %v15822_v18  ;;  %3598 = vrot.lane.b32.xlu0 %v13273_v6, %s13357_s13  ;;  %v5018_v18 = vsel %vm4938_vm3, %v4889_v30, %v4073_v17  ;;  %v2863_v19 = vmul.f32 %v13274_v54, %v13274_v54  ;;  %v13275_v30 = vld [vmem:[%s13423_s10 + $0x320] sm:$0xff]  ;;  %v15860_v17 = vpop.f32.mrf.mxu0 }
 0x265   : > { %v15830_v7 = vpop.f32.mrf.mxu1  ;;  %v4585_v37 = vpop.permute.xlu1 %4584  ;;  %19228 = vst [vmem:[#allocation152_spill] sm:$0xff] %v15860_v17 }
 0x266   : > { %19223 = vst [vmem:[#allocation147_spill] sm:$0xff] %v15830_v7  ;;  %v4583_v52 = vpop.permute.xlu0 %4582  ;;  %12422 = vmatmul.mubr.msk.f32.gmra.mxu1 %vm5198_vm5, %v15391_v25  ;;  %v15840_v6 = vsel %vm5067_vm4, %v5018_v18, %v4585_v37  ;;  %v2862_v18 = vmul.f32 %v13275_v30, %v13275_v30 }
 0x267   : > { %v15843_v40 = vsel %vm5067_vm4, %v5017_v51, %v4583_v52  ;;  %v15845_v13 = vpop.f32.mrf.mxu1  ;;  %12424 = vmatprep.mubr.msk.f32.mxu1 %vm5198_vm5, %v15442_v3  ;;  %4112 = vrot.lane.b32.xlu1 %v10405_v44, %s13358_s14  ;;  %v10407_v44 = vadd.f32 -1.0, %v2863_v19 }
 0x268   : > { %19225 = vst [vmem:[#allocation149_spill] sm:$0xff] %v15843_v40  ;;  %19226 = vst [vmem:[#allocation150_spill] sm:$0xff] %v15845_v13  ;;  %4110 = vrot.lane.b32.xlu0 %v10404_v11, %s13358_s14  ;;  %12252 = vmatprep.mubr.msk.f32.mxu0 %vm5198_vm5, %v15843_v40  ;;  %v10406_v45 = vadd.f32 -1.0, %v2862_v18  ;;  %v15872_v13 = vpop.f32.mrf.mxu0 }
 0x269   : > { %v15854_v37 = vpop.f32.mrf.mxu1  ;;  %12253 = vmatmul.mubr.msk.f32.gmra.mxu0 %vm5198_vm5, %v15840_v6  ;;  %v3565_v52 = vpop.permute.xlu1 %3564  ;;  %v3119_v19 = vmul.f32 %v13274_v54, %v10407_v44  ;;  %19231 = vst [vmem:[#allocation155_spill] sm:$0xff] %v15872_v13 }
 0x26a   : > { %19227 = vst [vmem:[#allocation151_spill] sm:$0xff] %v15854_v37  ;;  %v3563_v51 = vpop.permute.xlu0 %3562  ;;  %12425 = vmatmul.mubr.msk.f32.gmra.mxu1 %vm5198_vm5, %v15437_v27  ;;  %v3247_v37 = vmul.f32 2.0, %v13274_v54  ;;  %v4891_v18 = vsel %vm439_vm1, 1.0, %v3565_v52 }
 0x26b   : > { %v15862_v11 = vpop.f32.mrf.mxu1  ;;  %12427 = vmatprep.mubr.msk.f32.mxu1 %vm5198_vm5, %v15494_v20  ;;  %4624 = vrot.lane.b32.xlu1 %v3373_v31, %s13359_s15  ;;  %v3118_v31 = vmul.f32 %v13275_v30, %v10406_v45 }
 0x26c   : > { %19229 = vst [vmem:[#allocation153_spill] sm:$0xff] %v15862_v11  ;;  %4622 = vrot.lane.b32.xlu0 %v3372_v5, %s13359_s15  ;;  %v3246_v5 = vmul.f32 2.0, %v13275_v30 }
 0x26d   : > { %v15868_v41 = vpop.f32.mrf.mxu1  ;;  %v4077_v61 = vpop.permute.xlu1 %4076 }
 0x26e   : > { %19230 = vst [vmem:[#allocation154_spill] sm:$0xff] %v15868_v41  ;;  %v4075_v59 = vpop.permute.xlu0 %4074  ;;  %12428 = vmatmul.mubr.msk.f32.gmra.mxu1 %vm5198_vm5, %v15489_v58  ;;  %v4890_v41 = vsel %vm439_vm1, 1.0, %v3563_v51  ;;  %v5020_v13 = vsel %vm4938_vm3, %v4891_v18, %v4077_v61 }
 0x26f   : > { %v15874_v11 = vpop.f32.mrf.mxu1  ;;  %12430 = vmatprep.mubr.msk.f32.mxu1 %vm5198_vm5, %v15541_v46  ;;  %3604 = vrot.lane.b32.xlu1 %v13274_v54, %s13357_s13  ;;  %v3375_v54 = vsub.f32 %v3119_v19, %v3247_v37  ;;  %v15888_v46 = vpop.f32.mrf.mxu0  ;;  %v3374_v37 = vsub.f32 %v3118_v31, %v3246_v5 }
 0x270   : > { %19232 = vst [vmem:[#allocation156_spill] sm:$0xff] %v15874_v11  ;;  %3602 = vrot.lane.b32.xlu0 %v13275_v30, %s13357_s13  ;;  %v5019_v11 = vsel %vm4938_vm3, %v4890_v41, %v4075_v59  ;;  %19234 = vst [vmem:[#allocation158_spill] sm:$0xff] %v15888_v46  ;;  %v13276_v41 = vld [vmem:[%s13423_s10 + $0x338] sm:$0xff] }
 0x271   : > { %v15882_v7 = vpop.f32.mrf.mxu1  ;;  %v4589_v53 = vpop.permute.xlu1 %4588  ;;  %v2865_v61 = vmul.f32 %v13276_v41, %v13276_v41 }
 0x272   : > { %19233 = vst [vmem:[#allocation157_spill] sm:$0xff] %v15882_v7  ;;  %v4587_v17 = vpop.permute.xlu0 %4586  ;;  %12431 = vmatmul.mubr.msk.f32.gmra.mxu1 %vm5198_vm5, %v15535_v12  ;;  %v15891_v30 = vsel %vm5067_vm4, %v5020_v13, %v4589_v53  ;;  %v13277_v53 = vld [vmem:[%s13423_s10 + $0x330] sm:$0xff] }
 0x273   : > { %v15894_v52 = vsel %vm5067_vm4, %v5019_v11, %v4587_v17  ;;  %v15896_v51 = vpop.f32.mrf.mxu1  ;;  %12433 = vmatprep.mubr.msk.f32.mxu1 %vm5198_vm5, %v15586_v4  ;;  %4116 = vrot.lane.b32.xlu1 %v10407_v44, %s13358_s14  ;;  %v2864_v13 = vmul.f32 %v13277_v53, %v13277_v53  ;;  %v15912_v44 = vpop.f32.mrf.mxu0 }
 0x274   : > { %19235 = vst [vmem:[#allocation159_spill] sm:$0xff] %v15896_v51  ;;  %4114 = vrot.lane.b32.xlu0 %v10406_v45, %s13358_s14  ;;  %12255 = vmatprep.mubr.msk.f32.mxu0 %vm5198_vm5, %v15894_v52  ;;  %19237 = vst [vmem:[#allocation161_spill] sm:$0xff] %v15912_v44  ;;  %v10409_v45 = vadd.f32 -1.0, %v2865_v61  ;;  %v3249_v61 = vmul.f32 2.0, %v13276_v41 }
 0x275   : > { %v15906_v59 = vpop.f32.mrf.mxu1  ;;  %12256 = vmatmul.mubr.msk.f32.gmra.mxu0 %vm5198_vm5, %v15891_v30  ;;  %v3569_v17 = vpop.permute.xlu1 %3568  ;;  %v10408_v31 = vadd.f32 -1.0, %v2864_v13  ;;  %v3248_v13 = vmul.f32 2.0, %v13277_v53 }
 0x276   : > { %19236 = vst [vmem:[#allocation160_spill] sm:$0xff] %v15906_v59  ;;  %v3567_v11 = vpop.permute.xlu0 %3566  ;;  %12434 = vmatmul.mubr.msk.f32.gmra.mxu1 %vm5198_vm5, %v15583_v9  ;;  %v15924_v51 = vpop.f32.mrf.mxu0 }
 0x277   : > { %v15914_v19 = vpop.f32.mrf.mxu1  ;;  %12436 = vmatprep.mubr.msk.f32.mxu1 %vm5198_vm5, %v15635_v50  ;;  %4628 = vrot.lane.b32.xlu1 %v3375_v54, %s13359_s15  ;;  %19240 = vst [vmem:[#allocation164_spill] sm:$0xff] %v15924_v51  ;;  %v3121_v54 = vmul.f32 %v13276_v41, %v10409_v45 }
 0x278   : > { %19238 = vst [vmem:[#allocation162_spill] sm:$0xff] %v15914_v19  ;;  %4626 = vrot.lane.b32.xlu0 %v3374_v37, %s13359_s15  ;;  %v3120_v37 = vmul.f32 %v13277_v53, %v10408_v31  ;;  %v4892_v19 = vsel %vm439_vm1, 1.0, %v3567_v11  ;;  %v15941_v50 = vpop.f32.mrf.mxu0 }
 0x279   : > { %v15920_v5 = vpop.f32.mrf.mxu1  ;;  %v4081_v18 = vpop.permute.xlu1 %4080  ;;  %19243 = vst [vmem:[#allocation167_spill] sm:$0xff] %v15941_v50 }
 0x27a   : > { %19239 = vst [vmem:[#allocation163_spill] sm:$0xff] %v15920_v5  ;;  %v4079_v59 = vpop.permute.xlu0 %4078  ;;  %12437 = vmatmul.mubr.msk.f32.gmra.mxu1 %vm5198_vm5, %v15632_v57  ;;  %v4893_v5 = vsel %vm439_vm1, 1.0, %v3569_v17 }
 0x27b   : > { %v15926_v7 = vpop.f32.mrf.mxu1  ;;  %12439 = vmatprep.mubr.msk.f32.mxu1 %vm5198_vm5, %v15686_v39  ;;  %3608 = vrot.lane.b32.xlu1 %v13276_v41, %s13357_s13  ;;  %v5021_v51 = vsel %vm4938_vm3, %v4892_v19, %v4079_v59  ;;  %v13278_v41 = vld [vmem:[%s13423_s10 + $0x348] sm:$0xff]  ;;  %v3377_v59 = vsub.f32 %v3121_v54, %v3249_v61  ;;  %v3376_v19 = vsub.f32 %v3120_v37, %v3248_v13 }
 0x27c   : > { %19241 = vst [vmem:[#allocation165_spill] sm:$0xff] %v15926_v7  ;;  %3606 = vrot.lane.b32.xlu0 %v13277_v53, %s13357_s13  ;;  %v5022_v7 = vsel %vm4938_vm3, %v4893_v5, %v4081_v18  ;;  %v2867_v57 = vmul.f32 %v13278_v41, %v13278_v41  ;;  %v13279_v5 = vld [vmem:[%s13423_s10 + $0x340] sm:$0xff]  ;;  %v15964_v18 = vpop.f32.mrf.mxu0 }
 0x27d   : > { %v15934_v44 = vpop.f32.mrf.mxu1  ;;  %v4593_v46 = vpop.permute.xlu1 %4592  ;;  %19247 = vst [vmem:[#allocation171_spill] sm:$0xff] %v15964_v18 }
 0x27e   : > { %19242 = vst [vmem:[#allocation166_spill] sm:$0xff] %v15934_v44  ;;  %v4591_v39 = vpop.permute.xlu0 %4590  ;;  %12440 = vmatmul.mubr.msk.f32.gmra.mxu1 %vm5198_vm5, %v15683_v8  ;;  %v15944_v53 = vsel %vm5067_vm4, %v5022_v7, %v4593_v46  ;;  %v2866_v46 = vmul.f32 %v13279_v5, %v13279_v5 }
 0x27f   : > { %19244 = vst [vmem:[#allocation168_spill] sm:$0xff] %v15944_v53  ;;  %v15947_v17 = vsel %vm5067_vm4, %v5021_v51, %v4591_v39  ;;  %v15949_v11 = vpop.f32.mrf.mxu1  ;;  %12442 = vmatprep.mubr.msk.f32.mxu1 %vm5198_vm5, %v15739_v36  ;;  %4120 = vrot.lane.b32.xlu1 %v10409_v45, %s13358_s14  ;;  %v10411_v45 = vadd.f32 -1.0, %v2867_v57 }
 0x280   : > { %19245 = vst [vmem:[#allocation169_spill] sm:$0xff] %v15949_v11  ;;  %4118 = vrot.lane.b32.xlu0 %v10408_v31, %s13358_s14  ;;  %12258 = vmatprep.mubr.msk.f32.mxu0 %vm5198_vm5, %v15947_v17  ;;  %v10410_v54 = vadd.f32 -1.0, %v2866_v46  ;;  %v15976_v11 = vpop.f32.mrf.mxu0 }
 0x281   : > { %v15958_v7 = vpop.f32.mrf.mxu1  ;;  %12259 = vmatmul.mubr.msk.f32.gmra.mxu0 %vm5198_vm5, %v15944_v53  ;;  %v3573_v39 = vpop.permute.xlu1 %3572  ;;  %v3123_v57 = vmul.f32 %v13278_v41, %v10411_v45  ;;  %19250 = vst [vmem:[#allocation174_spill] sm:$0xff] %v15976_v11 }
 0x282   : > { %19246 = vst [vmem:[#allocation170_spill] sm:$0xff] %v15958_v7  ;;  %v3571_v51 = vpop.permute.xlu0 %3570  ;;  %12443 = vmatmul.mubr.msk.f32.gmra.mxu1 %vm5198_vm5, %v15736_v60  ;;  %v3251_v7 = vmul.f32 2.0, %v13278_v41  ;;  %v4895_v46 = vsel %vm439_vm1, 1.0, %v3573_v39 }
 0x283   : > { %v15966_v31 = vpop.f32.mrf.mxu1  ;;  %12445 = vmatprep.mubr.msk.f32.mxu1 %vm5198_vm5, %v15790_v29  ;;  %4632 = vrot.lane.b32.xlu1 %v3377_v59, %s13359_s15  ;;  %v3122_v59 = vmul.f32 %v13279_v5, %v10410_v54 }
 0x284   : > { %19248 = vst [vmem:[#allocation172_spill] sm:$0xff] %v15966_v31  ;;  %4630 = vrot.lane.b32.xlu0 %v3376_v19, %s13359_s15  ;;  %v3250_v19 = vmul.f32 2.0, %v13279_v5 }
 0x285   : > { %v15972_v61 = vpop.f32.mrf.mxu1  ;;  %v4085_v37 = vpop.permute.xlu1 %4084 }
 0x286   : > { %19249 = vst [vmem:[#allocation173_spill] sm:$0xff] %v15972_v61  ;;  %v4083_v13 = vpop.permute.xlu0 %4082  ;;  %12446 = vmatmul.mubr.msk.f32.gmra.mxu1 %vm5198_vm5, %v15787_v15  ;;  %v4894_v61 = vsel %vm439_vm1, 1.0, %v3571_v51  ;;  %v5024_v11 = vsel %vm4938_vm3, %v4895_v46, %v4085_v37  ;;  %v10822_v46 = vld [vmem:[%s18791_s5 + $0x30] sm:$0xff] }
 0x287   : > { %v15978_v31 = vpop.f32.mrf.mxu1  ;;  %12448 = vmatprep.mubr.msk.f32.mxu1 %vm5198_vm5, %v15843_v40  ;;  %3612 = vrot.lane.b32.xlu1 %v13278_v41, %s13357_s13  ;;  %v3379_v41 = vsub.f32 %v3123_v57, %v3251_v7  ;;  %v15992_v40 = vpop.f32.mrf.mxu0  ;;  %v3378_v7 = vsub.f32 %v3122_v59, %v3250_v19 }
 0x288   : > { %19251 = vst [vmem:[#allocation175_spill] sm:$0xff] %v15978_v31  ;;  %3610 = vrot.lane.b32.xlu0 %v13279_v5, %s13357_s13  ;;  %v5023_v31 = vsel %vm4938_vm3, %v4894_v61, %v4083_v13  ;;  %19253 = vst [vmem:[#allocation177_spill] sm:$0xff] %v15992_v40  ;;  %v13280_v61 = vld [vmem:[%s13423_s10 + $0x358] sm:$0xff]  ;;  %12721 = vmatprep.subr.mxu1 %v10822_v46 }
 0x289   : > { %v15986_v44 = vpop.f32.mrf.mxu1  ;;  %v4597_v50 = vpop.permute.xlu1 %4596  ;;  %v2869_v37 = vmul.f32 %v13280_v61, %v13280_v61  ;;  %12722 = vmatpush3.msra.mxu1 %v10822_v46  ;;  %v13283_v46 = vld [vmem:[%s13423_s10 + $0x360] sm:$0xff] }
 0x28a   : > { %19252 = vst [vmem:[#allocation176_spill] sm:$0xff] %v15986_v44  ;;  %v4595_v18 = vpop.permute.xlu0 %4594  ;;  %12449 = vmatmul.mubr.msk.f32.gmra.mxu1 %vm5198_vm5, %v15840_v6  ;;  %v15995_v5 = vsel %vm5067_vm4, %v5024_v11, %v4597_v50  ;;  %v13281_v50 = vld [vmem:[%s13423_s10 + $0x350] sm:$0xff] }
 0x28b   : > { %19254 = vst [vmem:[#allocation178_spill] sm:$0xff] %v15995_v5  ;;  %v15998_v39 = vsel %vm5067_vm4, %v5023_v31, %v4595_v18  ;;  %v16000_v51 = vpop.f32.mrf.mxu1  ;;  %12451 = vmatprep.mubr.msk.f32.mxu1 %vm5198_vm5, %v15894_v52  ;;  %4124 = vrot.lane.b32.xlu1 %v10411_v45, %s13358_s14  ;;  %v2868_v11 = vmul.f32 %v13281_v50, %v13281_v50  ;;  %v10692_v45 = vld [vmem:[%s18791_s5 + $0x20] sm:$0xff]  ;;  %v10413_v59 = vadd.f32 -1.0, %v2869_v37 }
 0x28c   : > { %19255 = vst [vmem:[#allocation179_spill] sm:$0xff] %v15998_v39  ;;  %19256 = vst [vmem:[#allocation180_spill] sm:$0xff] %v16000_v51  ;;  %4122 = vrot.lane.b32.xlu0 %v10410_v54, %s13358_s14  ;;  %12261 = vmatprep.mubr.msk.f32.mxu0 %vm5198_vm5, %v15998_v39  ;;  %v16019_v54 = vpop.f32.mrf.mxu0 }
 0x28d   : > { %v16010_v13 = vpop.f32.mrf.mxu1  ;;  %12262 = vmatmul.mubr.msk.f32.gmra.mxu0 %vm5198_vm5, %v15995_v5  ;;  %v3577_v18 = vpop.permute.xlu1 %3576  ;;  %19258 = vst [vmem:[#allocation182_spill] sm:$0xff] %v16019_v54  ;;  %v10412_v19 = vadd.f32 -1.0, %v2868_v11  ;;  %12525 = vmatprep.subr.mxu0 %v10692_v45  ;;  %v3125_v37 = vmul.f32 %v13280_v61, %v10413_v59 }
 0x28e   : > { %19257 = vst [vmem:[#allocation181_spill] sm:$0xff] %v16010_v13  ;;  %v3575_v31 = vpop.permute.xlu0 %3574  ;;  %12452 = vmatmul.mubr.msk.f32.gmra.mxu1 %vm5198_vm5, %v15891_v30  ;;  %12526 = vmatpush3.msra.mxu0 %v10692_v45  ;;  %v16034_v44 = vpop.f32.mrf.mxu0  ;;  %v3252_v45 = vmul.f32 2.0, %v13281_v50 }
 0x28f   : > { %v16021_v57 = vpop.f32.mrf.mxu1  ;;  %12454 = vmatprep.mubr.msk.f32.mxu1 %vm5198_vm5, %v15947_v17  ;;  %4636 = vrot.lane.b32.xlu1 %v3379_v41, %s13359_s15  ;;  %19261 = vst [vmem:[#allocation185_spill] sm:$0xff] %v16034_v44  ;;  %v3124_v11 = vmul.f32 %v13281_v50, %v10412_v19  ;;  %v4896_v54 = vsel %vm439_vm1, 1.0, %v3575_v31 }
 0x290   : > { %19259 = vst [vmem:[#allocation183_spill] sm:$0xff] %v16021_v57  ;;  %4634 = vrot.lane.b32.xlu0 %v3378_v7, %s13359_s15  ;;  %v3253_v7 = vmul.f32 2.0, %v13280_v61 }
 0x291   : > { %v16030_v13 = vpop.f32.mrf.mxu1  ;;  %v4089_v51 = vpop.permute.xlu1 %4088 }
 0x292   : > { %19260 = vst [vmem:[#allocation184_spill] sm:$0xff] %v16030_v13  ;;  %v4087_v57 = vpop.permute.xlu0 %4086  ;;  %12455 = vmatmul.mubr.msk.f32.gmra.mxu1 %vm5198_vm5, %v15944_v53  ;;  %v4897_v13 = vsel %vm439_vm1, 1.0, %v3577_v18 }
 0x293   : > { %v16036_v41 = vpop.f32.mrf.mxu1  ;;  %12457 = vmatprep.mubr.msk.f32.mxu1 %vm5198_vm5, %v15998_v39  ;;  %3616 = vrot.lane.b32.xlu1 %v13280_v61, %s13357_s13  ;;  %v5025_v40 = vsel %vm4938_vm3, %v4896_v54, %v4087_v57  ;;  %v16050_v61 = vpop.f32.mrf.mxu0  ;;  %v3380_v57 = vsub.f32 %v3124_v11, %v3252_v45 }
 0x294   : > { %19262 = vst [vmem:[#allocation186_spill] sm:$0xff] %v16036_v41  ;;  %3614 = vrot.lane.b32.xlu0 %v13281_v50, %s13357_s13  ;;  %v5026_v41 = vsel %vm4938_vm3, %v4897_v13, %v4089_v51  ;;  %19264 = vst [vmem:[#allocation188_spill] sm:$0xff] %v16050_v61  ;;  %v3381_v51 = vsub.f32 %v3125_v37, %v3253_v7  ;;  %v13282_v13 = vld [vmem:[%s13423_s10 + $0x368] sm:$0xff] }
 0x295   : > { %v16044_v44 = vpop.f32.mrf.mxu1  ;;  %v4601_v39 = vpop.permute.xlu1 %4600  ;;  %v2871_v54 = vmul.f32 %v13282_v13, %v13282_v13 }
 0x296   : > { %19263 = vst [vmem:[#allocation187_spill] sm:$0xff] %v16044_v44  ;;  %v4599_v53 = vpop.permute.xlu0 %4598  ;;  %12458 = vmatmul.mubr.msk.f32.gmra.mxu1 %vm5198_vm5, %v15995_v5  ;;  %v16053_v50 = vsel %vm5067_vm4, %v5026_v41, %v4601_v39  ;;  %v2870_v44 = vmul.f32 %v13283_v46, %v13283_v46 }
 0x297   : > { %19265 = vst [vmem:[#allocation189_spill] sm:$0xff] %v16053_v50  ;;  %v16056_v18 = vsel %vm5067_vm4, %v5025_v40, %v4599_v53  ;;  %v16058_v31 = vpop.f32.mrf.mxu1  ;;  %4128 = vrot.lane.b32.xlu1 %v10413_v59, %s13358_s14  ;;  %v16074_v59 = vpop.f32.mrf.mxu0  ;;  %v10415_v41 = vadd.f32 -1.0, %v2871_v54  ;;  %v3254_v54 = vmul.f32 2.0, %v13283_v46 }
 0x298   : > { %19266 = vst [vmem:[#allocation190_spill] sm:$0xff] %v16056_v18  ;;  %19267 = vst [vmem:[#allocation191_spill] sm:$0xff] %v16058_v31  ;;  %4126 = vrot.lane.b32.xlu0 %v10412_v19, %s13358_s14  ;;  %12264 = vmatprep.mubr.msk.f32.mxu0 %vm5198_vm5, %v16056_v18  ;;  %v10414_v37 = vadd.f32 -1.0, %v2870_v44 }
 0x299   : > { %v16066_v39 = vpop.f32.mrf.mxu1  ;;  %12460 = vmatprep.mubr.msk.f32.mxu1 %vm5198_vm5, %v16056_v18  ;;  %12265 = vmatmul.mubr.msk.f32.gmra.mxu0 %vm5198_vm5, %v16053_v50  ;;  %v3581_v40 = vpop.permute.xlu1 %3580  ;;  %19269 = vst [vmem:[#allocation193_spill] sm:$0xff] %v16074_v59  ;;  %v3127_v61 = vmul.f32 %v13282_v13, %v10415_v41  ;;  %v3255_v59 = vmul.f32 2.0, %v13282_v13 }
 0x29a   : > { %19268 = vst [vmem:[#allocation192_spill] sm:$0xff] %v16066_v39  ;;  %v3579_v53 = vpop.permute.xlu0 %3578  ;;  %12461 = vmatmul.mubr.msk.f32.gmra.mxu1 %vm5198_vm5, %v16053_v50  ;;  %v16082_v39 = vpop.f32.mrf.mxu0 }
 0x29b   : > { %v16076_v19 = vpop.f32.mrf.mxu1  ;;  %4640 = vrot.lane.b32.xlu1 %v3381_v51, %s13359_s15  ;;  %19272 = vst [vmem:[#allocation196_spill] sm:$0xff] %v16082_v39  ;;  %v3126_v51 = vmul.f32 %v13283_v46, %v10414_v37  ;;  %v4898_v44 = vsel %vm439_vm1, 1.0, %v3579_v53  ;;  %v3383_v53 = vsub.f32 %v3127_v61, %v3255_v59 }
 0x29c   : > { %19270 = vst [vmem:[#allocation194_spill] sm:$0xff] %v16076_v19  ;;  %4638 = vrot.lane.b32.xlu0 %v3380_v57, %s13359_s15  ;;  %v4899_v57 = vsel %vm439_vm1, 1.0, %v3581_v40  ;;  %v16094_v18 = vpop.f32.mrf.mxu0 }
 0x29d   : > { %v16080_v7 = vpop.f32.mrf.mxu1  ;;  %v4093_v11 = vpop.permute.xlu1 %4092  ;;  %19275 = vst [vmem:[#allocation199_spill] sm:$0xff] %v16094_v18 }
 0x29e   : > { %19271 = vst [vmem:[#allocation195_spill] sm:$0xff] %v16080_v7  ;;  %v4091_v45 = vpop.permute.xlu0 %4090  ;;  %v5028_v19 = vsel %vm4938_vm3, %v4899_v57, %v4093_v11  ;;  %v3382_v11 = vsub.f32 %v3126_v51, %v3254_v54 }
 0x29f   : > { %v16084_v31 = vpop.f32.mrf.mxu1  ;;  %3620 = vrot.lane.b32.xlu1 %v13282_v13, %s13357_s13 }
 0x2a0   : > { %19273 = vst [vmem:[#allocation197_spill] sm:$0xff] %v16084_v31  ;;  %3618 = vrot.lane.b32.xlu0 %v13283_v46, %s13357_s13  ;;  %v5027_v31 = vsel %vm4938_vm3, %v4898_v44, %v4091_v45  ;;  %v13285_v45 = vld [vmem:[%s13423_s10 + $0x370] sm:$0xff] }
 0x2a1   : > { %v16090_v7 = vpop.f32.mrf.mxu1  ;;  %v4605_v39 = vpop.permute.xlu1 %4604  ;;  %v2872_v57 = vmul.f32 %v13285_v45, %v13285_v45 }
 0x2a2   : > { %19274 = vst [vmem:[#allocation198_spill] sm:$0xff] %v16090_v7  ;;  %v4603_v50 = vpop.permute.xlu0 %4602  ;;  %v16097_v13 = vsel %vm5067_vm4, %v5028_v19, %v4605_v39  ;;  %v13284_v7 = vld [vmem:[%s13423_s10 + $0x378] sm:$0xff] }
 0x2a3   : > { %19276 = vst [vmem:[#allocation200_spill] sm:$0xff] %v16097_v13  ;;  %v16100_v46 = vsel %vm5067_vm4, %v5027_v31, %v4603_v50  ;;  %v16102_v40 = vpop.f32.mrf.mxu1  ;;  %4132 = vrot.lane.b32.xlu1 %v10415_v41, %s13358_s14  ;;  %v2873_v5 = vmul.f32 %v13284_v7, %v13284_v7  ;;  %v16118_v31 = vpop.f32.mrf.mxu0  ;;  %v10416_v41 = vadd.f32 -1.0, %v2872_v57 }
 0x2a4   : > { %19277 = vst [vmem:[#allocation201_spill] sm:$0xff] %v16100_v46  ;;  %19278 = vst [vmem:[#allocation202_spill] sm:$0xff] %v16102_v40  ;;  %4130 = vrot.lane.b32.xlu0 %v10414_v37, %s13358_s14  ;;  %12267 = vmatprep.mubr.msk.f32.mxu0 %vm5198_vm5, %v16100_v46 }
 0x2a5   : > { %v16110_v39 = vpop.f32.mrf.mxu1  ;;  %12463 = vmatprep.mubr.msk.f32.mxu1 %vm5198_vm5, %v16100_v46  ;;  %12268 = vmatmul.mubr.msk.f32.gmra.mxu0 %vm5198_vm5, %v16097_v13  ;;  %v3585_v61 = vpop.permute.xlu1 %3584  ;;  %19280 = vst [vmem:[#allocation204_spill] sm:$0xff] %v16118_v31  ;;  %v10417_v19 = vadd.f32 -1.0, %v2873_v5  ;;  %v3257_v31 = vmul.f32 2.0, %v13284_v7  ;;  %v3256_v5 = vmul.f32 2.0, %v13285_v45 }
 0x2a6   : > { %19279 = vst [vmem:[#allocation203_spill] sm:$0xff] %v16110_v39  ;;  %12464 = vmatmul.mubr.msk.f32.gmra.mxu1 %vm5198_vm5, %v16097_v13  ;;  %v3583_v50 = vpop.permute.xlu0 %3582  ;;  %v16126_v44 = vpop.f32.mrf.mxu0 }
 0x2a7   : > { %v16120_v59 = vpop.f32.mrf.mxu1  ;;  %4644 = vrot.lane.b32.xlu1 %v3383_v53, %s13359_s15  ;;  %19283 = vst [vmem:[#allocation207_spill] sm:$0xff] %v16126_v44  ;;  %v3129_v40 = vmul.f32 %v13284_v7, %v10417_v19  ;;  %v3128_v53 = vmul.f32 %v13285_v45, %v10416_v41  ;;  %v4900_v57 = vsel %vm439_vm1, 1.0, %v3583_v50 }
 0x2a8   : > { %19281 = vst [vmem:[#allocation205_spill] sm:$0xff] %v16120_v59  ;;  %4642 = vrot.lane.b32.xlu0 %v3382_v11, %s13359_s15  ;;  %v4901_v11 = vsel %vm439_vm1, 1.0, %v3585_v61  ;;  %v16138_v13 = vpop.f32.mrf.mxu0 }
 0x2a9   : > { %v16124_v37 = vpop.f32.mrf.mxu1  ;;  %v4097_v51 = vpop.permute.xlu1 %4096  ;;  %19286 = vst [vmem:[#allocation210_spill] sm:$0xff] %v16138_v13  ;;  %v3385_v50 = vsub.f32 %v3129_v40, %v3257_v31 }
 0x2aa   : > { %19282 = vst [vmem:[#allocation206_spill] sm:$0xff] %v16124_v37  ;;  %v4095_v54 = vpop.permute.xlu0 %4094  ;;  %v5030_v37 = vsel %vm4938_vm3, %v4901_v11, %v4097_v51  ;;  %v3384_v51 = vsub.f32 %v3128_v53, %v3256_v5 }
 0x2ab   : > { %v16128_v39 = vpop.f32.mrf.mxu1  ;;  %3624 = vrot.lane.b32.xlu1 %v13284_v7, %s13357_s13 }
 0x2ac   : > { %19284 = vst [vmem:[#allocation208_spill] sm:$0xff] %v16128_v39  ;;  %3622 = vrot.lane.b32.xlu0 %v13285_v45, %s13357_s13  ;;  %v5029_v39 = vsel %vm4938_vm3, %v4900_v57, %v4095_v54  ;;  %v13287_v54 = vld [vmem:[%s13423_s10 + $0x380] sm:$0xff] }
 0x2ad   : > { %v16134_v59 = vpop.f32.mrf.mxu1  ;;  %v4609_v44 = vpop.permute.xlu1 %4608  ;;  %v2874_v11 = vmul.f32 %v13287_v54, %v13287_v54 }
 0x2ae   : > { %19285 = vst [vmem:[#allocation209_spill] sm:$0xff] %v16134_v59  ;;  %v4607_v18 = vpop.permute.xlu0 %4606  ;;  %v16141_v7 = vsel %vm5067_vm4, %v5030_v37, %v4609_v44  ;;  %v13286_v59 = vld [vmem:[%s13423_s10 + $0x388] sm:$0xff] }
 0x2af   : > { %19287 = vst [vmem:[#allocation211_spill] sm:$0xff] %v16141_v7  ;;  %v16144_v45 = vsel %vm5067_vm4, %v5029_v39, %v4607_v18  ;;  %v16146_v61 = vpop.f32.mrf.mxu1  ;;  %4136 = vrot.lane.b32.xlu1 %v10417_v19, %s13358_s14  ;;  %v2875_v46 = vmul.f32 %v13286_v59, %v13286_v59  ;;  %v16162_v39 = vpop.f32.mrf.mxu0 }
 0x2b0   : > { %19288 = vst [vmem:[#allocation212_spill] sm:$0xff] %v16144_v45  ;;  %19289 = vst [vmem:[#allocation213_spill] sm:$0xff] %v16146_v61  ;;  %4134 = vrot.lane.b32.xlu0 %v10416_v41, %s13358_s14  ;;  %12270 = vmatprep.mubr.msk.f32.mxu0 %vm5198_vm5, %v16144_v45  ;;  %v10418_v41 = vadd.f32 -1.0, %v2874_v11 }
 0x2b1   : > { %v16154_v37 = vpop.f32.mrf.mxu1  ;;  %12466 = vmatprep.mubr.msk.f32.mxu1 %vm5198_vm5, %v16144_v45  ;;  %12271 = vmatmul.mubr.msk.f32.gmra.mxu0 %vm5198_vm5, %v16141_v7  ;;  %v3589_v18 = vpop.permute.xlu1 %3588  ;;  %19291 = vst [vmem:[#allocation215_spill] sm:$0xff] %v16162_v39  ;;  %v10419_v19 = vadd.f32 -1.0, %v2875_v46  ;;  %v3259_v39 = vmul.f32 2.0, %v13286_v59  ;;  %v3258_v46 = vmul.f32 2.0, %v13287_v54 }
 0x2b2   : > { %19290 = vst [vmem:[#allocation214_spill] sm:$0xff] %v16154_v37  ;;  %12467 = vmatmul.mubr.msk.f32.gmra.mxu1 %vm5198_vm5, %v16141_v7  ;;  %v3587_v40 = vpop.permute.xlu0 %3586  ;;  %v16170_v57 = vpop.f32.mrf.mxu0 }
 0x2b3   : > { %v16164_v31 = vpop.f32.mrf.mxu1  ;;  %4648 = vrot.lane.b32.xlu1 %v3385_v50, %s13359_s15  ;;  %19294 = vst [vmem:[#allocation218_spill] sm:$0xff] %v16170_v57  ;;  %v3131_v37 = vmul.f32 %v13286_v59, %v10419_v19  ;;  %v3130_v50 = vmul.f32 %v13287_v54, %v10418_v41  ;;  %v4902_v11 = vsel %vm439_vm1, 1.0, %v3587_v40 }
 0x2b4   : > { %19292 = vst [vmem:[#allocation216_spill] sm:$0xff] %v16164_v31  ;;  %4646 = vrot.lane.b32.xlu0 %v3384_v51, %s13359_s15  ;;  %v4903_v51 = vsel %vm439_vm1, 1.0, %v3589_v18  ;;  %v16182_v7 = vpop.f32.mrf.mxu0 }
 0x2b5   : > { %v16168_v44 = vpop.f32.mrf.mxu1  ;;  %v4101_v53 = vpop.permute.xlu1 %4100  ;;  %19297 = vst [vmem:[#allocation221_spill] sm:$0xff] %v16182_v7  ;;  %v3387_v40 = vsub.f32 %v3131_v37, %v3259_v39 }
 0x2b6   : > { %19293 = vst [vmem:[#allocation217_spill] sm:$0xff] %v16168_v44  ;;  %v4099_v5 = vpop.permute.xlu0 %4098  ;;  %v5032_v57 = vsel %vm4938_vm3, %v4903_v51, %v4101_v53  ;;  %v3386_v53 = vsub.f32 %v3130_v50, %v3258_v46 }
 0x2b7   : > { %v16172_v13 = vpop.f32.mrf.mxu1  ;;  %3628 = vrot.lane.b32.xlu1 %v13286_v59, %s13357_s13 }
 0x2b8   : > { %19295 = vst [vmem:[#allocation219_spill] sm:$0xff] %v16172_v13  ;;  %3626 = vrot.lane.b32.xlu0 %v13287_v54, %s13357_s13  ;;  %v5031_v13 = vsel %vm4938_vm3, %v4902_v11, %v4099_v5  ;;  %v13289_v5 = vld [vmem:[%s13423_s10 + $0x390] sm:$0xff] }
 0x2b9   : > { %v16178_v31 = vpop.f32.mrf.mxu1  ;;  %v4613_v44 = vpop.permute.xlu1 %4612  ;;  %v2876_v51 = vmul.f32 %v13289_v5, %v13289_v5 }
 0x2ba   : > { %19296 = vst [vmem:[#allocation220_spill] sm:$0xff] %v16178_v31  ;;  %v4611_v61 = vpop.permute.xlu0 %4610  ;;  %v16185_v59 = vsel %vm5067_vm4, %v5032_v57, %v4613_v44  ;;  %v13288_v31 = vld [vmem:[%s13423_s10 + $0x398] sm:$0xff]  ;;  %v16198_v44 = vpop.f32.mrf.mxu0 }
 0x2bb   : > { %19298 = vst [vmem:[#allocation222_spill] sm:$0xff] %v16185_v59  ;;  %v16188_v54 = vsel %vm5067_vm4, %v5031_v13, %v4611_v61  ;;  %v16190_v18 = vpop.f32.mrf.mxu1  ;;  %4140 = vrot.lane.b32.xlu1 %v10419_v19, %s13358_s14  ;;  %v2877_v45 = vmul.f32 %v13288_v31, %v13288_v31  ;;  %19301 = vst [vmem:[#allocation225_spill] sm:$0xff] %v16198_v44  ;;  %v10420_v19 = vadd.f32 -1.0, %v2876_v51 }
 0x2bc   : > { %19299 = vst [vmem:[#allocation223_spill] sm:$0xff] %v16188_v54  ;;  %19300 = vst [vmem:[#allocation224_spill] sm:$0xff] %v16190_v18  ;;  %4138 = vrot.lane.b32.xlu0 %v10418_v41, %s13358_s14  ;;  %12273 = vmatprep.mubr.msk.f32.mxu0 %vm5198_vm5, %v16188_v54  ;;  %v16212_v41 = vpop.f32.mrf.mxu0 }
 0x2bd   : > { %v16200_v57 = vpop.f32.mrf.mxu1  ;;  %12469 = vmatprep.mubr.msk.f32.mxu1 %vm5198_vm5, %v16188_v54  ;;  %12274 = vmatmul.mubr.msk.f32.gmra.mxu0 %vm5198_vm5, %v16185_v59  ;;  %v3593_v13 = vpop.permute.xlu1 %3592  ;;  %v10421_v39 = vadd.f32 -1.0, %v2877_v45  ;;  %19304 = vst [vmem:[#allocation228_spill] sm:$0xff] %v16212_v41  ;;  %v3132_v45 = vmul.f32 %v13289_v5, %v10420_v19 }
 0x2be   : > { %19302 = vst [vmem:[#allocation226_spill] sm:$0xff] %v16200_v57  ;;  %12470 = vmatmul.mubr.msk.f32.gmra.mxu1 %vm5198_vm5, %v16185_v59  ;;  %v3591_v61 = vpop.permute.xlu0 %3590  ;;  %v16216_v44 = vpop.f32.mrf.mxu0 }
 0x2bf   : > { %v16208_v37 = vpop.f32.mrf.mxu1  ;;  %4652 = vrot.lane.b32.xlu1 %v3387_v40, %s13359_s15  ;;  %19306 = vst [vmem:[#allocation230_spill] sm:$0xff] %v16216_v44  ;;  %v3133_v18 = vmul.f32 %v13288_v31, %v10421_v39  ;;  %v3260_v40 = vmul.f32 2.0, %v13289_v5  ;;  %v4904_v51 = vsel %vm439_vm1, 1.0, %v3591_v61 }
 0x2c0   : > { %19303 = vst [vmem:[#allocation227_spill] sm:$0xff] %v16208_v37  ;;  %4650 = vrot.lane.b32.xlu0 %v3386_v53, %s13359_s15  ;;  %v3261_v37 = vmul.f32 2.0, %v13288_v31  ;;  %v4905_v53 = vsel %vm439_vm1, 1.0, %v3593_v13  ;;  %v16228_v59 = vpop.f32.mrf.mxu0 }
 0x2c1   : > { %v16214_v50 = vpop.f32.mrf.mxu1  ;;  %v4105_v46 = vpop.permute.xlu1 %4104  ;;  %19309 = vst [vmem:[#allocation233_spill] sm:$0xff] %v16228_v59 }
 0x2c2   : > { %19305 = vst [vmem:[#allocation229_spill] sm:$0xff] %v16214_v50  ;;  %v4103_v11 = vpop.permute.xlu0 %4102  ;;  %v5034_v44 = vsel %vm4938_vm3, %v4905_v53, %v4105_v46  ;;  %v3389_v61 = vsub.f32 %v3133_v18, %v3261_v37  ;;  %v3388_v46 = vsub.f32 %v3132_v45, %v3260_v40 }
 0x2c3   : > { %v16218_v7 = vpop.f32.mrf.mxu1  ;;  %3632 = vrot.lane.b32.xlu1 %v13288_v31, %s13357_s13 }
 0x2c4   : > { %19307 = vst [vmem:[#allocation231_spill] sm:$0xff] %v16218_v7  ;;  %3630 = vrot.lane.b32.xlu0 %v13289_v5, %s13357_s13  ;;  %v5033_v7 = vsel %vm4938_vm3, %v4904_v51, %v4103_v11  ;;  %v13291_v11 = vld [vmem:[%s13423_s10 + $0x3a0] sm:$0xff] }
 0x2c5   : > { %v16224_v41 = vpop.f32.mrf.mxu1  ;;  %v4617_v50 = vpop.permute.xlu1 %4616  ;;  %v2878_v53 = vmul.f32 %v13291_v11, %v13291_v11 }
 0x2c6   : > { %19308 = vst [vmem:[#allocation232_spill] sm:$0xff] %v16224_v41  ;;  %v4615_v57 = vpop.permute.xlu0 %4614  ;;  %v16231_v31 = vsel %vm5067_vm4, %v5034_v44, %v4617_v50  ;;  %v13290_v41 = vld [vmem:[%s13423_s10 + $0x3a8] sm:$0xff]  ;;  %v16244_v44 = vpop.f32.mrf.mxu0 }
 0x2c7   : > { %19310 = vst [vmem:[#allocation234_spill] sm:$0xff] %v16231_v31  ;;  %v16234_v5 = vsel %vm5067_vm4, %v5033_v7, %v4615_v57  ;;  %v16236_v13 = vpop.f32.mrf.mxu1  ;;  %4144 = vrot.lane.b32.xlu1 %v10421_v39, %s13358_s14  ;;  %v2879_v54 = vmul.f32 %v13290_v41, %v13290_v41  ;;  %19313 = vst [vmem:[#allocation237_spill] sm:$0xff] %v16244_v44  ;;  %v10422_v39 = vadd.f32 -1.0, %v2878_v53 }
 0x2c8   : > { %19311 = vst [vmem:[#allocation235_spill] sm:$0xff] %v16234_v5  ;;  %19312 = vst [vmem:[#allocation236_spill] sm:$0xff] %v16236_v13  ;;  %4142 = vrot.lane.b32.xlu0 %v10420_v19, %s13358_s14  ;;  %12276 = vmatprep.mubr.msk.f32.mxu0 %vm5198_vm5, %v16234_v5  ;;  %v16258_v19 = vpop.f32.mrf.mxu0 }
 0x2c9   : > { %v16246_v50 = vpop.f32.mrf.mxu1  ;;  %12472 = vmatprep.mubr.msk.f32.mxu1 %vm5198_vm5, %v16234_v5  ;;  %12277 = vmatmul.mubr.msk.f32.gmra.mxu0 %vm5198_vm5, %v16231_v31  ;;  %v3597_v7 = vpop.permute.xlu1 %3596  ;;  %v10423_v37 = vadd.f32 -1.0, %v2879_v54  ;;  %19316 = vst [vmem:[#allocation240_spill] sm:$0xff] %v16258_v19  ;;  %v3134_v54 = vmul.f32 %v13291_v11, %v10422_v39 }
 0x2ca   : > { %19314 = vst [vmem:[#allocation238_spill] sm:$0xff] %v16246_v50  ;;  %12473 = vmatmul.mubr.msk.f32.gmra.mxu1 %vm5198_vm5, %v16231_v31  ;;  %v3595_v18 = vpop.permute.xlu0 %3594  ;;  %v16262_v44 = vpop.f32.mrf.mxu0 }
 0x2cb   : > { %v16254_v57 = vpop.f32.mrf.mxu1  ;;  %4656 = vrot.lane.b32.xlu1 %v3389_v61, %s13359_s15  ;;  %19318 = vst [vmem:[#allocation242_spill] sm:$0xff] %v16262_v44  ;;  %v3135_v13 = vmul.f32 %v13290_v41, %v10423_v37  ;;  %v3262_v61 = vmul.f32 2.0, %v13291_v11  ;;  %v4906_v53 = vsel %vm439_vm1, 1.0, %v3595_v18 }
 0x2cc   : > { %19315 = vst [vmem:[#allocation239_spill] sm:$0xff] %v16254_v57  ;;  %4654 = vrot.lane.b32.xlu0 %v3388_v46, %s13359_s15  ;;  %v3263_v57 = vmul.f32 2.0, %v13290_v41  ;;  %v4907_v46 = vsel %vm439_vm1, 1.0, %v3597_v7  ;;  %v16274_v31 = vpop.f32.mrf.mxu0 }
 0x2cd   : > { %v16260_v45 = vpop.f32.mrf.mxu1  ;;  %v4109_v40 = vpop.permute.xlu1 %4108  ;;  %19321 = vst [vmem:[#allocation245_spill] sm:$0xff] %v16274_v31 }
 0x2ce   : > { %19317 = vst [vmem:[#allocation241_spill] sm:$0xff] %v16260_v45  ;;  %v4107_v51 = vpop.permute.xlu0 %4106  ;;  %v5036_v44 = vsel %vm4938_vm3, %v4907_v46, %v4109_v40  ;;  %v3391_v18 = vsub.f32 %v3135_v13, %v3263_v57  ;;  %v3390_v40 = vsub.f32 %v3134_v54, %v3262_v61 }
 0x2cf   : > { %v16264_v59 = vpop.f32.mrf.mxu1  ;;  %3636 = vrot.lane.b32.xlu1 %v13290_v41, %s13357_s13 }
 0x2d0   : > { %19319 = vst [vmem:[#allocation243_spill] sm:$0xff] %v16264_v59  ;;  %3634 = vrot.lane.b32.xlu0 %v13291_v11, %s13357_s13  ;;  %v5035_v59 = vsel %vm4938_vm3, %v4906_v53, %v4107_v51  ;;  %v13293_v51 = vld [vmem:[%s13423_s10 + $0x3b0] sm:$0xff] }
 0x2d1   : > { %v16270_v19 = vpop.f32.mrf.mxu1  ;;  %v4621_v45 = vpop.permute.xlu1 %4620  ;;  %v2880_v46 = vmul.f32 %v13293_v51, %v13293_v51 }
 0x2d2   : > { %19320 = vst [vmem:[#allocation244_spill] sm:$0xff] %v16270_v19  ;;  %v4619_v50 = vpop.permute.xlu0 %4618  ;;  %v16277_v41 = vsel %vm5067_vm4, %v5036_v44, %v4621_v45  ;;  %v13292_v19 = vld [vmem:[%s13423_s10 + $0x3b8] sm:$0xff]  ;;  %v16290_v44 = vpop.f32.mrf.mxu0 }
 0x2d3   : > { %19322 = vst [vmem:[#allocation246_spill] sm:$0xff] %v16277_v41  ;;  %v16280_v11 = vsel %vm5067_vm4, %v5035_v59, %v4619_v50  ;;  %v16282_v7 = vpop.f32.mrf.mxu1  ;;  %4148 = vrot.lane.b32.xlu1 %v10423_v37, %s13358_s14  ;;  %v2881_v5 = vmul.f32 %v13292_v19, %v13292_v19  ;;  %19325 = vst [vmem:[#allocation249_spill] sm:$0xff] %v16290_v44  ;;  %v10424_v37 = vadd.f32 -1.0, %v2880_v46 }
 0x2d4   : > { %19323 = vst [vmem:[#allocation247_spill] sm:$0xff] %v16280_v11  ;;  %19324 = vst [vmem:[#allocation248_spill] sm:$0xff] %v16282_v7  ;;  %4146 = vrot.lane.b32.xlu0 %v10422_v39, %s13358_s14  ;;  %12279 = vmatprep.mubr.msk.f32.mxu0 %vm5198_vm5, %v16280_v11  ;;  %v16304_v39 = vpop.f32.mrf.mxu0 }
 0x2d5   : > { %v16292_v45 = vpop.f32.mrf.mxu1  ;;  %12475 = vmatprep.mubr.msk.f32.mxu1 %vm5198_vm5, %v16280_v11  ;;  %12280 = vmatmul.mubr.msk.f32.gmra.mxu0 %vm5198_vm5, %v16277_v41  ;;  %v3601_v59 = vpop.permute.xlu1 %3600  ;;  %v10425_v57 = vadd.f32 -1.0, %v2881_v5  ;;  %19328 = vst [vmem:[#allocation252_spill] sm:$0xff] %v16304_v39  ;;  %v3136_v5 = vmul.f32 %v13293_v51, %v10424_v37 }
 0x2d6   : > { %19326 = vst [vmem:[#allocation250_spill] sm:$0xff] %v16292_v45  ;;  %12476 = vmatmul.mubr.msk.f32.gmra.mxu1 %vm5198_vm5, %v16277_v41  ;;  %v3599_v13 = vpop.permute.xlu0 %3598  ;;  %v16308_v44 = vpop.f32.mrf.mxu0 }
 0x2d7   : > { %v16300_v50 = vpop.f32.mrf.mxu1  ;;  %4660 = vrot.lane.b32.xlu1 %v3391_v18, %s13359_s15  ;;  %19330 = vst [vmem:[#allocation254_spill] sm:$0xff] %v16308_v44  ;;  %v3137_v7 = vmul.f32 %v13292_v19, %v10425_v57  ;;  %v3264_v18 = vmul.f32 2.0, %v13293_v51  ;;  %v4908_v46 = vsel %vm439_vm1, 1.0, %v3599_v13 }
 0x2d8   : > { %19327 = vst [vmem:[#allocation251_spill] sm:$0xff] %v16300_v50  ;;  %4658 = vrot.lane.b32.xlu0 %v3390_v40, %s13359_s15  ;;  %v3265_v50 = vmul.f32 2.0, %v13292_v19  ;;  %v4909_v40 = vsel %vm439_vm1, 1.0, %v3601_v59  ;;  %v16320_v41 = vpop.f32.mrf.mxu0 }
 0x2d9   : > { %v16306_v54 = vpop.f32.mrf.mxu1  ;;  %v4113_v61 = vpop.permute.xlu1 %4112  ;;  %19333 = vst [vmem:[#allocation257_spill] sm:$0xff] %v16320_v41 }
 0x2da   : > { %19329 = vst [vmem:[#allocation253_spill] sm:$0xff] %v16306_v54  ;;  %v4111_v53 = vpop.permute.xlu0 %4110  ;;  %v5038_v44 = vsel %vm4938_vm3, %v4909_v40, %v4113_v61  ;;  %v3393_v13 = vsub.f32 %v3137_v7, %v3265_v50  ;;  %v3392_v61 = vsub.f32 %v3136_v5, %v3264_v18 }
 0x2db   : > { %v16310_v31 = vpop.f32.mrf.mxu1  ;;  %3640 = vrot.lane.b32.xlu1 %v13292_v19, %s13357_s13 }
 0x2dc   : > { %19331 = vst [vmem:[#allocation255_spill] sm:$0xff] %v16310_v31  ;;  %3638 = vrot.lane.b32.xlu0 %v13293_v51, %s13357_s13  ;;  %v5037_v31 = vsel %vm4938_vm3, %v4908_v46, %v4111_v53  ;;  %v13295_v53 = vld [vmem:[%s13423_s10 + $0x3c0] sm:$0xff] }
 0x2dd   : > { %v16316_v39 = vpop.f32.mrf.mxu1  ;;  %v4625_v54 = vpop.permute.xlu1 %4624  ;;  %v2882_v40 = vmul.f32 %v13295_v53, %v13295_v53 }
 0x2de   : > { %19332 = vst [vmem:[#allocation256_spill] sm:$0xff] %v16316_v39  ;;  %v4623_v45 = vpop.permute.xlu0 %4622  ;;  %v16323_v19 = vsel %vm5067_vm4, %v5038_v44, %v4625_v54  ;;  %v13294_v39 = vld [vmem:[%s13423_s10 + $0x3c8] sm:$0xff]  ;;  %v16336_v44 = vpop.f32.mrf.mxu0 }
 0x2df   : > { %19334 = vst [vmem:[#allocation258_spill] sm:$0xff] %v16323_v19  ;;  %v16326_v51 = vsel %vm5067_vm4, %v5037_v31, %v4623_v45  ;;  %v16328_v59 = vpop.f32.mrf.mxu1  ;;  %4152 = vrot.lane.b32.xlu1 %v10425_v57, %s13358_s14  ;;  %v2883_v11 = vmul.f32 %v13294_v39, %v13294_v39  ;;  %19337 = vst [vmem:[#allocation261_spill] sm:$0xff] %v16336_v44  ;;  %v10426_v57 = vadd.f32 -1.0, %v2882_v40 }
 0x2e0   : > { %19335 = vst [vmem:[#allocation259_spill] sm:$0xff] %v16326_v51  ;;  %19336 = vst [vmem:[#allocation260_spill] sm:$0xff] %v16328_v59  ;;  %4150 = vrot.lane.b32.xlu0 %v10424_v37, %s13358_s14  ;;  %12282 = vmatprep.mubr.msk.f32.mxu0 %vm5198_vm5, %v16326_v51  ;;  %v16350_v37 = vpop.f32.mrf.mxu0 }
 0x2e1   : > { %v16338_v54 = vpop.f32.mrf.mxu1  ;;  %12478 = vmatprep.mubr.msk.f32.mxu1 %vm5198_vm5, %v16326_v51  ;;  %12283 = vmatmul.mubr.msk.f32.gmra.mxu0 %vm5198_vm5, %v16323_v19  ;;  %v3605_v31 = vpop.permute.xlu1 %3604  ;;  %v10427_v50 = vadd.f32 -1.0, %v2883_v11  ;;  %19340 = vst [vmem:[#allocation264_spill] sm:$0xff] %v16350_v37  ;;  %v3138_v11 = vmul.f32 %v13295_v53, %v10426_v57 }
 0x2e2   : > { %19338 = vst [vmem:[#allocation262_spill] sm:$0xff] %v16338_v54  ;;  %12479 = vmatmul.mubr.msk.f32.gmra.mxu1 %vm5198_vm5, %v16323_v19  ;;  %v3603_v7 = vpop.permute.xlu0 %3602  ;;  %v16354_v44 = vpop.f32.mrf.mxu0 }
 0x2e3   : > { %v16346_v45 = vpop.f32.mrf.mxu1  ;;  %4664 = vrot.lane.b32.xlu1 %v3393_v13, %s13359_s15  ;;  %19342 = vst [vmem:[#allocation266_spill] sm:$0xff] %v16354_v44  ;;  %v3139_v59 = vmul.f32 %v13294_v39, %v10427_v50  ;;  %v3266_v13 = vmul.f32 2.0, %v13295_v53  ;;  %v4910_v40 = vsel %vm439_vm1, 1.0, %v3603_v7 }
 0x2e4   : > { %19339 = vst [vmem:[#allocation263_spill] sm:$0xff] %v16346_v45  ;;  %4662 = vrot.lane.b32.xlu0 %v3392_v61, %s13359_s15  ;;  %v3267_v45 = vmul.f32 2.0, %v13294_v39  ;;  %v4911_v61 = vsel %vm439_vm1, 1.0, %v3605_v31  ;;  %v16366_v19 = vpop.f32.mrf.mxu0 }
 0x2e5   : > { %v16352_v5 = vpop.f32.mrf.mxu1  ;;  %v4117_v18 = vpop.permute.xlu1 %4116  ;;  %19345 = vst [vmem:[#allocation269_spill] sm:$0xff] %v16366_v19 }
 0x2e6   : > { %19341 = vst [vmem:[#allocation265_spill] sm:$0xff] %v16352_v5  ;;  %v4115_v46 = vpop.permute.xlu0 %4114  ;;  %v5040_v44 = vsel %vm4938_vm3, %v4911_v61, %v4117_v18  ;;  %v3395_v7 = vsub.f32 %v3139_v59, %v3267_v45  ;;  %v3394_v18 = vsub.f32 %v3138_v11, %v3266_v13 }
 0x2e7   : > { %v16356_v41 = vpop.f32.mrf.mxu1  ;;  %3644 = vrot.lane.b32.xlu1 %v13294_v39, %s13357_s13 }
 0x2e8   : > { %19343 = vst [vmem:[#allocation267_spill] sm:$0xff] %v16356_v41  ;;  %3642 = vrot.lane.b32.xlu0 %v13295_v53, %s13357_s13  ;;  %v5039_v41 = vsel %vm4938_vm3, %v4910_v40, %v4115_v46  ;;  %v13297_v46 = vld [vmem:[%s13423_s10 + $0x3d0] sm:$0xff] }
 0x2e9   : > { %v16362_v37 = vpop.f32.mrf.mxu1  ;;  %v4629_v5 = vpop.permute.xlu1 %4628  ;;  %v2884_v61 = vmul.f32 %v13297_v46, %v13297_v46 }
 0x2ea   : > { %19344 = vst [vmem:[#allocation268_spill] sm:$0xff] %v16362_v37  ;;  %v4627_v54 = vpop.permute.xlu0 %4626  ;;  %v16369_v39 = vsel %vm5067_vm4, %v5040_v44, %v4629_v5  ;;  %v13296_v37 = vld [vmem:[%s13423_s10 + $0x3d8] sm:$0xff]  ;;  %v16382_v44 = vpop.f32.mrf.mxu0 }
 0x2eb   : > { %19346 = vst [vmem:[#allocation270_spill] sm:$0xff] %v16369_v39  ;;  %v16372_v53 = vsel %vm5067_vm4, %v5039_v41, %v4627_v54  ;;  %v16374_v31 = vpop.f32.mrf.mxu1  ;;  %4156 = vrot.lane.b32.xlu1 %v10427_v50, %s13358_s14  ;;  %v2885_v51 = vmul.f32 %v13296_v37, %v13296_v37  ;;  %19349 = vst [vmem:[#allocation273_spill] sm:$0xff] %v16382_v44  ;;  %v10428_v50 = vadd.f32 -1.0, %v2884_v61 }
 0x2ec   : > { %19347 = vst [vmem:[#allocation271_spill] sm:$0xff] %v16372_v53  ;;  %19348 = vst [vmem:[#allocation272_spill] sm:$0xff] %v16374_v31  ;;  %4154 = vrot.lane.b32.xlu0 %v10426_v57, %s13358_s14  ;;  %12285 = vmatprep.mubr.msk.f32.mxu0 %vm5198_vm5, %v16372_v53  ;;  %v16396_v57 = vpop.f32.mrf.mxu0 }
 0x2ed   : > { %v16384_v5 = vpop.f32.mrf.mxu1  ;;  %12481 = vmatprep.mubr.msk.f32.mxu1 %vm5198_vm5, %v16372_v53  ;;  %12286 = vmatmul.mubr.msk.f32.gmra.mxu0 %vm5198_vm5, %v16369_v39  ;;  %v3609_v41 = vpop.permute.xlu1 %3608  ;;  %v10429_v45 = vadd.f32 -1.0, %v2885_v51  ;;  %19352 = vst [vmem:[#allocation276_spill] sm:$0xff] %v16396_v57  ;;  %v3140_v51 = vmul.f32 %v13297_v46, %v10428_v50 }
 0x2ee   : > { %19350 = vst [vmem:[#allocation274_spill] sm:$0xff] %v16384_v5  ;;  %12482 = vmatmul.mubr.msk.f32.gmra.mxu1 %vm5198_vm5, %v16369_v39  ;;  %v3607_v59 = vpop.permute.xlu0 %3606  ;;  %v16400_v44 = vpop.f32.mrf.mxu0 }
 0x2ef   : > { %v16392_v54 = vpop.f32.mrf.mxu1  ;;  %4668 = vrot.lane.b32.xlu1 %v3395_v7, %s13359_s15  ;;  %19354 = vst [vmem:[#allocation278_spill] sm:$0xff] %v16400_v44  ;;  %v3141_v31 = vmul.f32 %v13296_v37, %v10429_v45  ;;  %v3268_v7 = vmul.f32 2.0, %v13297_v46  ;;  %v4912_v61 = vsel %vm439_vm1, 1.0, %v3607_v59 }
 0x2f0   : > { %19351 = vst [vmem:[#allocation275_spill] sm:$0xff] %v16392_v54  ;;  %4666 = vrot.lane.b32.xlu0 %v3394_v18, %s13359_s15  ;;  %v3269_v54 = vmul.f32 2.0, %v13296_v37  ;;  %v4913_v18 = vsel %vm439_vm1, 1.0, %v3609_v41  ;;  %v16412_v39 = vpop.f32.mrf.mxu0 }
 0x2f1   : > { %v16398_v11 = vpop.f32.mrf.mxu1  ;;  %v4121_v13 = vpop.permute.xlu1 %4120  ;;  %19357 = vst [vmem:[#allocation281_spill] sm:$0xff] %v16412_v39 }
 0x2f2   : > { %19353 = vst [vmem:[#allocation277_spill] sm:$0xff] %v16398_v11  ;;  %v4119_v40 = vpop.permute.xlu0 %4118  ;;  %v5042_v44 = vsel %vm4938_vm3, %v4913_v18, %v4121_v13  ;;  %v3397_v59 = vsub.f32 %v3141_v31, %v3269_v54  ;;  %v3396_v13 = vsub.f32 %v3140_v51, %v3268_v7 }
 0x2f3   : > { %v16402_v19 = vpop.f32.mrf.mxu1  ;;  %3648 = vrot.lane.b32.xlu1 %v13296_v37, %s13357_s13 }
 0x2f4   : > { %19355 = vst [vmem:[#allocation279_spill] sm:$0xff] %v16402_v19  ;;  %3646 = vrot.lane.b32.xlu0 %v13297_v46, %s13357_s13  ;;  %v5041_v19 = vsel %vm4938_vm3, %v4912_v61, %v4119_v40  ;;  %v13299_v40 = vld [vmem:[%s13423_s10 + $0x3e0] sm:$0xff] }
 0x2f5   : > { %v16408_v57 = vpop.f32.mrf.mxu1  ;;  %v4633_v11 = vpop.permute.xlu1 %4632  ;;  %v2886_v18 = vmul.f32 %v13299_v40, %v13299_v40 }
 0x2f6   : > { %19356 = vst [vmem:[#allocation280_spill] sm:$0xff] %v16408_v57  ;;  %v4631_v5 = vpop.permute.xlu0 %4630  ;;  %v16415_v37 = vsel %vm5067_vm4, %v5042_v44, %v4633_v11  ;;  %v13298_v57 = vld [vmem:[%s13423_s10 + $0x3e8] sm:$0xff]  ;;  %v16428_v44 = vpop.f32.mrf.mxu0 }
 0x2f7   : > { %19358 = vst [vmem:[#allocation282_spill] sm:$0xff] %v16415_v37  ;;  %v16418_v46 = vsel %vm5067_vm4, %v5041_v19, %v4631_v5  ;;  %v16420_v41 = vpop.f32.mrf.mxu1  ;;  %4160 = vrot.lane.b32.xlu1 %v10429_v45, %s13358_s14  ;;  %v2887_v53 = vmul.f32 %v13298_v57, %v13298_v57  ;;  %19361 = vst [vmem:[#allocation285_spill] sm:$0xff] %v16428_v44  ;;  %v10430_v45 = vadd.f32 -1.0, %v2886_v18 }
 0x2f8   : > { %19359 = vst [vmem:[#allocation283_spill] sm:$0xff] %v16418_v46  ;;  %19360 = vst [vmem:[#allocation284_spill] sm:$0xff] %v16420_v41  ;;  %4158 = vrot.lane.b32.xlu0 %v10428_v50, %s13358_s14  ;;  %12288 = vmatprep.mubr.msk.f32.mxu0 %vm5198_vm5, %v16418_v46  ;;  %v16442_v50 = vpop.f32.mrf.mxu0 }
 0x2f9   : > { %v16430_v11 = vpop.f32.mrf.mxu1  ;;  %12484 = vmatprep.mubr.msk.f32.mxu1 %vm5198_vm5, %v16418_v46  ;;  %12289 = vmatmul.mubr.msk.f32.gmra.mxu0 %vm5198_vm5, %v16415_v37  ;;  %v3613_v19 = vpop.permute.xlu1 %3612  ;;  %v10431_v54 = vadd.f32 -1.0, %v2887_v53  ;;  %19364 = vst [vmem:[#allocation288_spill] sm:$0xff] %v16442_v50  ;;  %v3142_v53 = vmul.f32 %v13299_v40, %v10430_v45 }
 0x2fa   : > { %19362 = vst [vmem:[#allocation286_spill] sm:$0xff] %v16430_v11  ;;  %12485 = vmatmul.mubr.msk.f32.gmra.mxu1 %vm5198_vm5, %v16415_v37  ;;  %v3611_v31 = vpop.permute.xlu0 %3610  ;;  %v16446_v44 = vpop.f32.mrf.mxu0 }
 0x2fb   : > { %v16438_v5 = vpop.f32.mrf.mxu1  ;;  %4672 = vrot.lane.b32.xlu1 %v3397_v59, %s13359_s15  ;;  %19366 = vst [vmem:[#allocation290_spill] sm:$0xff] %v16446_v44  ;;  %v3143_v41 = vmul.f32 %v13298_v57, %v10431_v54  ;;  %v3270_v59 = vmul.f32 2.0, %v13299_v40  ;;  %v4914_v18 = vsel %vm439_vm1, 1.0, %v3611_v31 }
 0x2fc   : > { %19363 = vst [vmem:[#allocation287_spill] sm:$0xff] %v16438_v5  ;;  %4670 = vrot.lane.b32.xlu0 %v3396_v13, %s13359_s15  ;;  %v3271_v5 = vmul.f32 2.0, %v13298_v57  ;;  %v4915_v13 = vsel %vm439_vm1, 1.0, %v3613_v19  ;;  %v16458_v37 = vpop.f32.mrf.mxu0 }
 0x2fd   : > { %v16444_v51 = vpop.f32.mrf.mxu1  ;;  %v4125_v7 = vpop.permute.xlu1 %4124  ;;  %19369 = vst [vmem:[#allocation293_spill] sm:$0xff] %v16458_v37 }
 0x2fe   : > { %19365 = vst [vmem:[#allocation289_spill] sm:$0xff] %v16444_v51  ;;  %v4123_v61 = vpop.permute.xlu0 %4122  ;;  %v5044_v44 = vsel %vm4938_vm3, %v4915_v13, %v4125_v7  ;;  %v3399_v31 = vsub.f32 %v3143_v41, %v3271_v5  ;;  %v3398_v7 = vsub.f32 %v3142_v53, %v3270_v59 }
 0x2ff   : > { %v16448_v39 = vpop.f32.mrf.mxu1  ;;  %3652 = vrot.lane.b32.xlu1 %v13298_v57, %s13357_s13 }
 0x300   : > { %19367 = vst [vmem:[#allocation291_spill] sm:$0xff] %v16448_v39  ;;  %3650 = vrot.lane.b32.xlu0 %v13299_v40, %s13357_s13  ;;  %v5043_v39 = vsel %vm4938_vm3, %v4914_v18, %v4123_v61  ;;  %v13301_v61 = vld [vmem:[%s13423_s10 + $0x3f0] sm:$0xff] }
 0x301   : > { %v16454_v50 = vpop.f32.mrf.mxu1  ;;  %v4637_v51 = vpop.permute.xlu1 %4636  ;;  %v2888_v13 = vmul.f32 %v13301_v61, %v13301_v61 }
 0x302   : > { %19368 = vst [vmem:[#allocation292_spill] sm:$0xff] %v16454_v50  ;;  %v4635_v11 = vpop.permute.xlu0 %4634  ;;  %v16461_v57 = vsel %vm5067_vm4, %v5044_v44, %v4637_v51  ;;  %v13300_v50 = vld [vmem:[%s13423_s10 + $0x3f8] sm:$0xff]  ;;  %v16474_v44 = vpop.f32.mrf.mxu0 }
 0x303   : > { %19370 = vst [vmem:[#allocation294_spill] sm:$0xff] %v16461_v57  ;;  %v16464_v40 = vsel %vm5067_vm4, %v5043_v39, %v4635_v11  ;;  %v16466_v19 = vpop.f32.mrf.mxu1  ;;  %4164 = vrot.lane.b32.xlu1 %v10431_v54, %s13358_s14  ;;  %v2889_v46 = vmul.f32 %v13300_v50, %v13300_v50  ;;  %19373 = vst [vmem:[#allocation297_spill] sm:$0xff] %v16474_v44  ;;  %v10432_v54 = vadd.f32 -1.0, %v2888_v13 }
 0x304   : > { %19371 = vst [vmem:[#allocation295_spill] sm:$0xff] %v16464_v40  ;;  %19372 = vst [vmem:[#allocation296_spill] sm:$0xff] %v16466_v19  ;;  %4162 = vrot.lane.b32.xlu0 %v10430_v45, %s13358_s14  ;;  %12291 = vmatprep.mubr.msk.f32.mxu0 %vm5198_vm5, %v16464_v40  ;;  %v16488_v45 = vpop.f32.mrf.mxu0 }
 0x305   : > { %v16476_v51 = vpop.f32.mrf.mxu1  ;;  %12487 = vmatprep.mubr.msk.f32.mxu1 %vm5198_vm5, %v16464_v40  ;;  %12292 = vmatmul.mubr.msk.f32.gmra.mxu0 %vm5198_vm5, %v16461_v57  ;;  %v3617_v39 = vpop.permute.xlu1 %3616  ;;  %v10433_v5 = vadd.f32 -1.0, %v2889_v46  ;;  %19376 = vst [vmem:[#allocation300_spill] sm:$0xff] %v16488_v45  ;;  %v3144_v46 = vmul.f32 %v13301_v61, %v10432_v54 }
 0x306   : > { %19374 = vst [vmem:[#allocation298_spill] sm:$0xff] %v16476_v51  ;;  %12488 = vmatmul.mubr.msk.f32.gmra.mxu1 %vm5198_vm5, %v16461_v57  ;;  %v3615_v41 = vpop.permute.xlu0 %3614  ;;  %v16492_v44 = vpop.f32.mrf.mxu0 }
 0x307   : > { %v16484_v11 = vpop.f32.mrf.mxu1  ;;  %4676 = vrot.lane.b32.xlu1 %v3399_v31, %s13359_s15  ;;  %19378 = vst [vmem:[#allocation302_spill] sm:$0xff] %v16492_v44  ;;  %v3145_v19 = vmul.f32 %v13300_v50, %v10433_v5  ;;  %v3272_v31 = vmul.f32 2.0, %v13301_v61  ;;  %v4916_v13 = vsel %vm439_vm1, 1.0, %v3615_v41 }
 0x308   : > { %19375 = vst [vmem:[#allocation299_spill] sm:$0xff] %v16484_v11  ;;  %4674 = vrot.lane.b32.xlu0 %v3398_v7, %s13359_s15  ;;  %v3273_v11 = vmul.f32 2.0, %v13300_v50  ;;  %v4917_v7 = vsel %vm439_vm1, 1.0, %v3617_v39  ;;  %v16504_v57 = vpop.f32.mrf.mxu0 }
 0x309   : > { %v16490_v53 = vpop.f32.mrf.mxu1  ;;  %v4129_v59 = vpop.permute.xlu1 %4128  ;;  %19381 = vst [vmem:[#allocation305_spill] sm:$0xff] %v16504_v57  ;;  %v3400_v41 = vsub.f32 %v3144_v46, %v3272_v31 }
 0x30a   : > { %19377 = vst [vmem:[#allocation301_spill] sm:$0xff] %v16490_v53  ;;  %v4127_v18 = vpop.permute.xlu0 %4126  ;;  %v5046_v53 = vsel %vm4938_vm3, %v4917_v7, %v4129_v59  ;;  %v3401_v39 = vsub.f32 %v3145_v19, %v3273_v11  ;;  %v16518_v59 = vpop.f32.mrf.mxu0 }
 0x30b   : > { %v16494_v37 = vpop.f32.mrf.mxu1  ;;  %3656 = vrot.lane.b32.xlu1 %v13300_v50, %s13357_s13  ;;  %v5045_v44 = vsel %vm4938_vm3, %v4916_v13, %v4127_v18  ;;  %19383 = vst [vmem:[#allocation307_spill] sm:$0xff] %v16518_v59 }
 0x30c   : > { %19379 = vst [vmem:[#allocation303_spill] sm:$0xff] %v16494_v37  ;;  %3654 = vrot.lane.b32.xlu0 %v13301_v61, %s13357_s13 }
 0x30d   : > { %v16500_v45 = vpop.f32.mrf.mxu1  ;;  %v4641_v51 = vpop.permute.xlu1 %4640 }
 0x30e   : > { %19380 = vst [vmem:[#allocation304_spill] sm:$0xff] %v16500_v45  ;;  %v4639_v37 = vpop.permute.xlu0 %4638  ;;  %v16507_v50 = vsel %vm5067_vm4, %v5046_v53, %v4641_v51  ;;  %v16532_v51 = vpop.f32.mrf.mxu0 }
 0x30f   : > { %v16510_v40 = vsel %vm5067_vm4, %v5045_v44, %v4639_v37  ;;  %v16512_v61 = vpop.f32.mrf.mxu1  ;;  %4168 = vrot.lane.b32.xlu1 %v10433_v5, %s13358_s14  ;;  %19386 = vst [vmem:[#allocation310_spill] sm:$0xff] %v16532_v51 }
 0x310   : > { %19382 = vst [vmem:[#allocation306_spill] sm:$0xff] %v16512_v61  ;;  %4166 = vrot.lane.b32.xlu0 %v10432_v54, %s13358_s14  ;;  %12294 = vmatprep.mubr.msk.f32.mxu0 %vm5198_vm5, %v16510_v40  ;;  %v16536_v53 = vpop.f32.mrf.mxu0 }
 0x311   : > { %v16520_v18 = vpop.f32.mrf.mxu1  ;;  %12490 = vmatprep.mubr.msk.f32.mxu1 %vm5198_vm5, %v16510_v40  ;;  %12295 = vmatmul.mubr.msk.f32.gmra.mxu0 %vm5198_vm5, %v16507_v50  ;;  %v3621_v37 = vpop.permute.xlu1 %3620  ;;  %19388 = vst [vmem:[#allocation312_spill] sm:$0xff] %v16536_v53 }
 0x312   : > { %19384 = vst [vmem:[#allocation308_spill] sm:$0xff] %v16520_v18  ;;  %12491 = vmatmul.mubr.msk.f32.gmra.mxu1 %vm5198_vm5, %v16507_v50  ;;  %v3619_v19 = vpop.permute.xlu0 %3618  ;;  %v4919_v31 = vsel %vm439_vm1, 1.0, %v3621_v37  ;;  %v16546_v57 = vpop.f32.mrf.mxu0 }
 0x313   : > { %v16528_v44 = vpop.f32.mrf.mxu1  ;;  %4680 = vrot.lane.b32.xlu1 %v3401_v39, %s13359_s15  ;;  %v4918_v7 = vsel %vm439_vm1, 1.0, %v3619_v19  ;;  %19391 = vst [vmem:[#allocation315_spill] sm:$0xff] %v16546_v57 }
 0x314   : > { %19385 = vst [vmem:[#allocation309_spill] sm:$0xff] %v16528_v44  ;;  %4678 = vrot.lane.b32.xlu0 %v3400_v41, %s13359_s15  ;;  %v16560_v37 = vpop.f32.mrf.mxu0 }
 0x315   : > { %v16534_v11 = vpop.f32.mrf.mxu1  ;;  %v4133_v5 = vpop.permute.xlu1 %4132  ;;  %19394 = vst [vmem:[#allocation318_spill] sm:$0xff] %v16560_v37 }
 0x316   : > { %19387 = vst [vmem:[#allocation311_spill] sm:$0xff] %v16534_v11  ;;  %v4131_v54 = vpop.permute.xlu0 %4130  ;;  %v5048_v39 = vsel %vm4938_vm3, %v4919_v31, %v4133_v5 }
 0x317   : > { %v16538_v46 = vpop.f32.mrf.mxu1  ;;  %v5047_v41 = vsel %vm4938_vm3, %v4918_v7, %v4131_v54  ;;  %v16570_v54 = vpop.f32.mrf.mxu0 }
 0x318   : > { %19389 = vst [vmem:[#allocation313_spill] sm:$0xff] %v16538_v46  ;;  %19397 = vst [vmem:[#allocation321_spill] sm:$0xff] %v16570_v54 }
 0x319   : > { %v16542_v13 = vpop.f32.mrf.mxu1  ;;  %v4645_v59 = vpop.permute.xlu1 %4644 }
 0x31a   : > { %19390 = vst [vmem:[#allocation314_spill] sm:$0xff] %v16542_v13  ;;  %v4643_v51 = vpop.permute.xlu0 %4642  ;;  %v16549_v44 = vsel %vm5067_vm4, %v5048_v39, %v4645_v59 }
 0x31b   : > { %19392 = vst [vmem:[#allocation316_spill] sm:$0xff] %v16549_v44  ;;  %v16552_v53 = vsel %vm5067_vm4, %v5047_v41, %v4643_v51  ;;  %v16554_v46 = vpop.f32.mrf.mxu1  ;;  %v16574_v41 = vpop.f32.mrf.mxu0 }
 0x31c   : > { %19393 = vst [vmem:[#allocation317_spill] sm:$0xff] %v16554_v46  ;;  %12297 = vmatprep.mubr.msk.f32.mxu0 %vm5198_vm5, %v16552_v53  ;;  %12493 = vmatprep.mubr.msk.f32.mxu1 %vm5198_vm5, %v16552_v53  ;;  %19399 = vst [vmem:[#allocation323_spill] sm:$0xff] %v16574_v41 }
 0x31d   : > { %v16562_v19 = vpop.f32.mrf.mxu1  ;;  %12298 = vmatmul.mubr.msk.f32.gmra.mxu0 %vm5198_vm5, %v16549_v44  ;;  %12494 = vmatmul.mubr.msk.f32.gmra.mxu1 %vm5198_vm5, %v16549_v44  ;;  %v3625_v59 = vpop.permute.xlu1 %3624 }
 0x31e   : > { %19395 = vst [vmem:[#allocation319_spill] sm:$0xff] %v16562_v19  ;;  %v3623_v51 = vpop.permute.xlu0 %3622  ;;  %v4921_v57 = vsel %vm439_vm1, 1.0, %v3625_v59  ;;  %v16584_v61 = vpop.f32.mrf.mxu0 }
 0x31f   : > { %v16568_v5 = vpop.f32.mrf.mxu1  ;;  %v4920_v46 = vsel %vm439_vm1, 1.0, %v3623_v51  ;;  %19402 = vst [vmem:[#allocation326_spill] sm:$0xff] %v16584_v61 }
 0x320   : > { %19396 = vst [vmem:[#allocation320_spill] sm:$0xff] %v16568_v5 }
 0x321   : > { %v16572_v31 = vpop.f32.mrf.mxu1  ;;  %v4137_v7 = vpop.permute.xlu1 %4136 }
 0x322   : > { %19398 = vst [vmem:[#allocation322_spill] sm:$0xff] %v16572_v31  ;;  %v4135_v39 = vpop.permute.xlu0 %4134  ;;  %v5050_v13 = vsel %vm4938_vm3, %v4921_v57, %v4137_v7  ;;  %v16598_v57 = vpop.f32.mrf.mxu0 }
 0x323   : > { %v16576_v37 = vpop.f32.mrf.mxu1  ;;  %v5049_v5 = vsel %vm4938_vm3, %v4920_v46, %v4135_v39  ;;  %19406 = vst [vmem:[#allocation330_spill] sm:$0xff] %v16598_v57 }
 0x324   : > { %19400 = vst [vmem:[#allocation324_spill] sm:$0xff] %v16576_v37  ;;  %v16608_v51 = vpop.f32.mrf.mxu0 }
 0x325   : > { %v16580_v19 = vpop.f32.mrf.mxu1  ;;  %v4649_v11 = vpop.permute.xlu1 %4648  ;;  %19409 = vst [vmem:[#allocation333_spill] sm:$0xff] %v16608_v51 }
 0x326   : > { %19401 = vst [vmem:[#allocation325_spill] sm:$0xff] %v16580_v19  ;;  %v4647_v54 = vpop.permute.xlu0 %4646  ;;  %v16587_v31 = vsel %vm5067_vm4, %v5050_v13, %v4649_v11  ;;  %v12245_v39 = vpop.f32.mrf.mxu0 }
 0x327   : > { %19403 = vst [vmem:[#allocation327_spill] sm:$0xff] %v16587_v31  ;;  %v16590_v41 = vsel %vm5067_vm4, %v5049_v5, %v4647_v54  ;;  %v16592_v37 = vpop.f32.mrf.mxu1 }
 0x328   : > { %19404 = vst [vmem:[#allocation328_spill] sm:$0xff] %v16590_v41  ;;  %19405 = vst [vmem:[#allocation329_spill] sm:$0xff] %v16592_v37  ;;  %12300 = vmatprep.mubr.msk.f32.mxu0 %vm5198_vm5, %v16590_v41  ;;  %12496 = vmatprep.mubr.msk.f32.mxu1 %vm5198_vm5, %v16590_v41  ;;  %v16620_v51 = vpop.f32.mrf.mxu0 }
 0x329   : > { %v16600_v46 = vpop.f32.mrf.mxu1  ;;  %12301 = vmatmul.mubr.msk.f32.gmra.mxu0 %vm5198_vm5, %v16587_v31  ;;  %12497 = vmatmul.mubr.msk.f32.gmra.mxu1 %vm5198_vm5, %v16587_v31  ;;  %v3629_v11 = vpop.permute.xlu1 %3628  ;;  %19413 = vst [vmem:[#allocation337_spill] sm:$0xff] %v16620_v51 }
 0x32a   : > { %19407 = vst [vmem:[#allocation331_spill] sm:$0xff] %v16600_v46  ;;  %v3627_v13 = vpop.permute.xlu0 %3626  ;;  %v4923_v61 = vsel %vm439_vm1, 1.0, %v3629_v11 }
 0x32b   : > { %v16606_v59 = vpop.f32.mrf.mxu1  ;;  %v4922_v37 = vsel %vm439_vm1, 1.0, %v3627_v13 }
 0x32c   : > { %19408 = vst [vmem:[#allocation332_spill] sm:$0xff] %v16606_v59 }
 0x32d   : > { %v16610_v5 = vpop.f32.mrf.mxu1  ;;  %v4141_v54 = vpop.permute.xlu1 %4140 }
 0x32e   : > { %19410 = vst [vmem:[#allocation334_spill] sm:$0xff] %v16610_v5  ;;  %v4139_v7 = vpop.permute.xlu0 %4138  ;;  %v5052_v19 = vsel %vm4938_vm3, %v4923_v61, %v4141_v54  ;;  %v12248_v61 = vpop.f32.mrf.mxu0 }
 0x32f   : > { %v16612_v57 = vpop.f32.mrf.mxu1  ;;  %v5051_v18 = vsel %vm4938_vm3, %v4922_v37, %v4139_v7 }
 0x330   : > { %19411 = vst [vmem:[#allocation335_spill] sm:$0xff] %v16612_v57  ;;  %v16642_v11 = vpop.f32.mrf.mxu0 }
 0x331   : > { %v16616_v46 = vpop.f32.mrf.mxu1  ;;  %v4653_v59 = vpop.permute.xlu1 %4652  ;;  %19419 = vst [vmem:[#allocation343_spill] sm:$0xff] %v16642_v11 }
 0x332   : > { %19412 = vst [vmem:[#allocation336_spill] sm:$0xff] %v16616_v46  ;;  %v4651_v45 = vpop.permute.xlu0 %4650  ;;  %v16623_v5 = vsel %vm5067_vm4, %v5052_v19, %v4653_v59  ;;  %v12251_v7 = vpop.f32.mrf.mxu0 }
 0x333   : > { %19414 = vst [vmem:[#allocation338_spill] sm:$0xff] %v16623_v5  ;;  %v16626_v31 = vsel %vm5067_vm4, %v5051_v18, %v4651_v45  ;;  %v16628_v57 = vpop.f32.mrf.mxu1 }
 0x334   : > { %19415 = vst [vmem:[#allocation339_spill] sm:$0xff] %v16626_v31  ;;  %19416 = vst [vmem:[#allocation340_spill] sm:$0xff] %v16628_v57  ;;  %12303 = vmatprep.mubr.msk.f32.mxu0 %vm5198_vm5, %v16626_v31  ;;  %12499 = vmatprep.mubr.msk.f32.mxu1 %vm5198_vm5, %v16626_v31  ;;  %v16654_v11 = vpop.f32.mrf.mxu0 }
 0x335   : > { %v16634_v37 = vpop.f32.mrf.mxu1  ;;  %12304 = vmatmul.mubr.msk.f32.gmra.mxu0 %vm5198_vm5, %v16623_v5  ;;  %12500 = vmatmul.mubr.msk.f32.gmra.mxu1 %vm5198_vm5, %v16623_v5  ;;  %v3633_v19 = vpop.permute.xlu1 %3632  ;;  %19423 = vst [vmem:[#allocation347_spill] sm:$0xff] %v16654_v11 }
 0x336   : > { %19417 = vst [vmem:[#allocation341_spill] sm:$0xff] %v16634_v37  ;;  %v3631_v45 = vpop.permute.xlu0 %3630  ;;  %v4925_v57 = vsel %vm439_vm1, 1.0, %v3633_v19 }
 0x337   : > { %v16640_v18 = vpop.f32.mrf.mxu1  ;;  %v4924_v37 = vsel %vm439_vm1, 1.0, %v3631_v45 }
 0x338   : > { %19418 = vst [vmem:[#allocation342_spill] sm:$0xff] %v16640_v18 }
 0x339   : > { %v16644_v13 = vpop.f32.mrf.mxu1  ;;  %v4145_v59 = vpop.permute.xlu1 %4144 }
 0x33a   : > { %19420 = vst [vmem:[#allocation344_spill] sm:$0xff] %v16644_v13  ;;  %v4143_v54 = vpop.permute.xlu0 %4142  ;;  %v5054_v5 = vsel %vm4938_vm3, %v4925_v57, %v4145_v59  ;;  %v12254_v57 = vpop.f32.mrf.mxu0 }
 0x33b   : > { %v16646_v51 = vpop.f32.mrf.mxu1  ;;  %v5053_v31 = vsel %vm4938_vm3, %v4924_v37, %v4143_v54 }
 0x33c   : > { %19421 = vst [vmem:[#allocation345_spill] sm:$0xff] %v16646_v51 }
 0x33d   : > { %v16650_v46 = vpop.f32.mrf.mxu1  ;;  %v4657_v18 = vpop.permute.xlu1 %4656 }
 0x33e   : > { %19422 = vst [vmem:[#allocation346_spill] sm:$0xff] %v16650_v46  ;;  %v4655_v41 = vpop.permute.xlu0 %4654  ;;  %v16657_v13 = vsel %vm5067_vm4, %v5054_v5, %v4657_v18 }
 0x33f   : > { %19424 = vst [vmem:[#allocation348_spill] sm:$0xff] %v16657_v13  ;;  %v16660_v44 = vsel %vm5067_vm4, %v5053_v31, %v4655_v41  ;;  %v12441_v51 = vpop.f32.mrf.mxu1 }
 0x340   : > { %19425 = vst [vmem:[#allocation349_spill] sm:$0xff] %v16660_v44  ;;  %v16662_v19 = vmul.f32 %v12441_v51, %v12245_v39  ;;  %12306 = vmatprep.mubr.msk.f32.mxu0 %vm5198_vm5, %v16660_v44  ;;  %12502 = vmatprep.mubr.msk.f32.mxu1 %vm5198_vm5, %v16660_v44  ;;  %v16676_v39 = vpop.f32.mrf.mxu0 }
 0x341   : > { %v16668_v37 = vpop.f32.mrf.mxu1  ;;  %12307 = vmatmul.mubr.msk.f32.gmra.mxu0 %vm5198_vm5, %v16657_v13  ;;  %12503 = vmatmul.mubr.msk.f32.gmra.mxu1 %vm5198_vm5, %v16657_v13  ;;  %v3637_v31 = vpop.permute.xlu1 %3636  ;;  %19429 = vst [vmem:[#allocation353_spill] sm:$0xff] %v16676_v39 }
 0x342   : > { %19426 = vst [vmem:[#allocation350_spill] sm:$0xff] %v16662_v19  ;;  %19427 = vst [vmem:[#allocation351_spill] sm:$0xff] %v16668_v37  ;;  %v3635_v41 = vpop.permute.xlu0 %3634  ;;  %v12257_v54 = vpop.f32.mrf.mxu0  ;;  %v4927_v37 = vsel %vm439_vm1, 1.0, %v3637_v31 }
 0x343   : > { %v12444_v5 = vpop.f32.mrf.mxu1  ;;  %v4926_v46 = vsel %vm439_vm1, 1.0, %v3635_v41 }
 0x344   : > { %v16674_v51 = vmul.f32 %v12444_v5, %v12248_v61  ;;  %v16688_v39 = vpop.f32.mrf.mxu0 }
 0x345   : > { %v16678_v45 = vpop.f32.mrf.mxu1  ;;  %v4149_v18 = vpop.permute.xlu1 %4148  ;;  %19433 = vst [vmem:[#allocation357_spill] sm:$0xff] %v16688_v39 }
 0x346   : > { %19428 = vst [vmem:[#allocation352_spill] sm:$0xff] %v16674_v51  ;;  %19430 = vst [vmem:[#allocation354_spill] sm:$0xff] %v16678_v45  ;;  %v4147_v59 = vpop.permute.xlu0 %4146  ;;  %v5056_v44 = vsel %vm4938_vm3, %v4927_v37, %v4149_v18 }
 0x347   : > { %v12447_v19 = vpop.f32.mrf.mxu1  ;;  %v5055_v61 = vsel %vm4938_vm3, %v4926_v46, %v4147_v59  ;;  %v12260_v46 = vpop.f32.mrf.mxu0 }
 0x348   : > { %v16680_v11 = vmul.f32 %v12447_v19, %v12251_v7 }
 0x349   : > { %v16684_v13 = vpop.f32.mrf.mxu1  ;;  %v4661_v5 = vpop.permute.xlu1 %4660 }
 0x34a   : > { %19431 = vst [vmem:[#allocation355_spill] sm:$0xff] %v16680_v11  ;;  %19432 = vst [vmem:[#allocation356_spill] sm:$0xff] %v16684_v13  ;;  %v4659_v51 = vpop.permute.xlu0 %4658  ;;  %v16691_v45 = vsel %vm5067_vm4, %v5056_v44, %v4661_v5  ;;  %v16710_v18 = vpop.f32.mrf.mxu0 }
 0x34b   : > { %19434 = vst [vmem:[#allocation358_spill] sm:$0xff] %v16691_v45  ;;  %v16694_v7 = vsel %vm5067_vm4, %v5055_v61, %v4659_v51  ;;  %v12450_v19 = vpop.f32.mrf.mxu1  ;;  %19438 = vst [vmem:[#allocation362_spill] sm:$0xff] %v16710_v18 }
 0x34c   : > { %v16696_v31 = vmul.f32 %v12450_v19, %v12254_v57  ;;  %12309 = vmatprep.mubr.msk.f32.mxu0 %vm5198_vm5, %v16694_v7  ;;  %12505 = vmatprep.mubr.msk.f32.mxu1 %vm5198_vm5, %v16694_v7 }
 0x34d   : > { %v16702_v37 = vpop.f32.mrf.mxu1  ;;  %12310 = vmatmul.mubr.msk.f32.gmra.mxu0 %vm5198_vm5, %v16691_v45  ;;  %12506 = vmatmul.mubr.msk.f32.gmra.mxu1 %vm5198_vm5, %v16691_v45  ;;  %v3641_v44 = vpop.permute.xlu1 %3640 }
 0x34e   : > { %19435 = vst [vmem:[#allocation359_spill] sm:$0xff] %v16696_v31  ;;  %19436 = vst [vmem:[#allocation360_spill] sm:$0xff] %v16702_v37  ;;  %v3639_v41 = vpop.permute.xlu0 %3638  ;;  %v12263_v19 = vpop.f32.mrf.mxu0  ;;  %v4929_v39 = vsel %vm439_vm1, 1.0, %v3641_v44 }
 0x34f   : > { %v12453_v51 = vpop.f32.mrf.mxu1  ;;  %v4928_v37 = vsel %vm439_vm1, 1.0, %v3639_v41 }
 0x350   : > { %v16708_v57 = vmul.f32 %v12453_v51, %v12257_v54  ;;  %v16722_v18 = vpop.f32.mrf.mxu0 }
 0x351   : > { %v16712_v59 = vpop.f32.mrf.mxu1  ;;  %v4153_v61 = vpop.permute.xlu1 %4152  ;;  %19442 = vst [vmem:[#allocation366_spill] sm:$0xff] %v16722_v18 }
 0x352   : > { %19437 = vst [vmem:[#allocation361_spill] sm:$0xff] %v16708_v57  ;;  %19439 = vst [vmem:[#allocation363_spill] sm:$0xff] %v16712_v59  ;;  %v4151_v5 = vpop.permute.xlu0 %4150  ;;  %v5058_v45 = vsel %vm4938_vm3, %v4929_v39, %v4153_v61 }
 0x353   : > { %v12456_v31 = vpop.f32.mrf.mxu1  ;;  %v5057_v54 = vsel %vm4938_vm3, %v4928_v37, %v4151_v5 }
 0x354   : > { %v16714_v11 = vmul.f32 %v12456_v31, %v12260_v46 }
 0x355   : > { %v16718_v13 = vpop.f32.mrf.mxu1  ;;  %v4665_v51 = vpop.permute.xlu1 %4664 }
 0x356   : > { %19440 = vst [vmem:[#allocation364_spill] sm:$0xff] %v16714_v11  ;;  %19441 = vst [vmem:[#allocation365_spill] sm:$0xff] %v16718_v13  ;;  %v4663_v57 = vpop.permute.xlu0 %4662  ;;  %v16725_v59 = vsel %vm5067_vm4, %v5058_v45, %v4665_v51 }
 0x357   : > { %v16728_v31 = vsel %vm5067_vm4, %v5057_v54, %v4663_v57  ;;  %v12459_v46 = vpop.f32.mrf.mxu1 }
 0x358   : > { %v16730_v44 = vmul.f32 %v12459_v46, %v12263_v19  ;;  %12312 = vmatprep.mubr.msk.f32.mxu0 %vm5198_vm5, %v16728_v31  ;;  %12508 = vmatprep.mubr.msk.f32.mxu1 %vm5198_vm5, %v16728_v31 }
 0x359   : > { %v16736_v39 = vpop.f32.mrf.mxu1  ;;  %v12266_v37 = vpop.f32.mrf.mxu0  ;;  %12313 = vmatmul.mubr.msk.f32.gmra.mxu0 %vm5198_vm5, %v16725_v59  ;;  %12509 = vmatmul.mubr.msk.f32.gmra.mxu1 %vm5198_vm5, %v16725_v59 }
 0x35a   : > { %19443 = vst [vmem:[#allocation367_spill] sm:$0xff] %v16730_v44  ;;  %19444 = vst [vmem:[#allocation368_spill] sm:$0xff] %v16736_v39  ;;  %v3645_v45 = vpop.permute.xlu1 %3644  ;;  %v3643_v41 = vpop.permute.xlu0 %3642 }
 0x35b   : > { %v12462_v57 = vpop.f32.mrf.mxu1  ;;  %v4931_v54 = vsel %vm439_vm1, 1.0, %v3645_v45  ;;  %v4930_v51 = vsel %vm439_vm1, 1.0, %v3643_v41  ;;  %v16748_v18 = vpop.f32.mrf.mxu0 }
 0x35c   : > { %v16742_v61 = vmul.f32 %v12462_v57, %v12266_v37  ;;  %19446 = vst [vmem:[#allocation370_spill] sm:$0xff] %v16748_v18 }
 0x35d   : > { %v16756_v57 = vpop.f32.mrf.mxu1 }
 0x35e   : > { %19445 = vst [vmem:[#allocation369_spill] sm:$0xff] %v16742_v61  ;;  %v4157_v5 = vpop.permute.xlu1 %4156  ;;  %v4155_v19 = vpop.permute.xlu0 %4154  ;;  %19449 = vst [vmem:[#allocation373_spill] sm:$0xff] %v16756_v57 }
 0x35f   : > { %v5060_v46 = vsel %vm4938_vm3, %v4931_v54, %v4157_v5  ;;  %v5059_v44 = vsel %vm4938_vm3, %v4930_v51, %v4155_v19 }
 0x362   : > { %v4669_v11 = vpop.permute.xlu1 %4668  ;;  %v4667_v39 = vpop.permute.xlu0 %4666 }
 0x363   : > { %v16751_v13 = vsel %vm5067_vm4, %v5060_v46, %v4669_v11  ;;  %v16754_v37 = vsel %vm5067_vm4, %v5059_v44, %v4667_v39 }
 0x364   : > { %19447 = vst [vmem:[#allocation371_spill] sm:$0xff] %v16751_v13  ;;  %19448 = vst [vmem:[#allocation372_spill] sm:$0xff] %v16754_v37  ;;  %12315 = vmatprep.mubr.msk.f32.mxu0 %vm5198_vm5, %v16754_v37  ;;  %12511 = vmatprep.mubr.msk.f32.mxu1 %vm5198_vm5, %v16754_v37 }
 0x365   : > { %v12269_v45 = vpop.f32.mrf.mxu0  ;;  %12316 = vmatmul.mubr.msk.f32.gmra.mxu0 %vm5198_vm5, %v16751_v13  ;;  %12512 = vmatmul.mubr.msk.f32.gmra.mxu1 %vm5198_vm5, %v16751_v13 }
 0x366   : > { %v12465_v11 = vpop.f32.mrf.mxu1  ;;  %v3649_v41 = vpop.permute.xlu1 %3648 }
 0x367   : > { %v16766_v5 = vmul.f32 %v12465_v11, %v12269_v45  ;;  %v3647_v44 = vpop.permute.xlu0 %3646  ;;  %v4933_v54 = vsel %vm439_vm1, 1.0, %v3649_v41  ;;  %v16771_v57 = vpop.f32.mrf.mxu0 }
 0x368   : > { %v4932_v51 = vsel %vm439_vm1, 1.0, %v3647_v44  ;;  %19451 = vst [vmem:[#allocation375_spill] sm:$0xff] %v16771_v57  ;;  %v16777_v45 = vpop.f32.mrf.mxu1 }
 0x369   : > { %19450 = vst [vmem:[#allocation374_spill] sm:$0xff] %v16766_v5  ;;  %19453 = vst [vmem:[#allocation377_spill] sm:$0xff] %v16777_v45 }
 0x36a   : > { %v4161_v39 = vpop.permute.xlu1 %4160 }
 0x36b   : > { %v4159_v19 = vpop.permute.xlu0 %4158  ;;  %v5062_v46 = vsel %vm4938_vm3, %v4933_v54, %v4161_v39 }
 0x36c   : > { %v5061_v18 = vsel %vm4938_vm3, %v4932_v51, %v4159_v19 }
 0x36e   : > { %v4673_v61 = vpop.permute.xlu1 %4672 }
 0x36f   : > { %v16775_v13 = vsel %vm5067_vm4, %v5062_v46, %v4673_v61  ;;  %v4671_v37 = vpop.permute.xlu0 %4670 }
 0x370   : > { %19452 = vst [vmem:[#allocation376_spill] sm:$0xff] %v16775_v13  ;;  %v16780_v11 = vsel %vm5067_vm4, %v5061_v18, %v4671_v37 }
 0x371   : > { %19454 = vst [vmem:[#allocation378_spill] sm:$0xff] %v16780_v11  ;;  %12318 = vmatprep.mubr.msk.f32.mxu0 %vm5198_vm5, %v16780_v11  ;;  %12514 = vmatprep.mubr.msk.f32.mxu1 %vm5198_vm5, %v16780_v11  ;;  %v12272_v41 = vpop.f32.mrf.mxu0 }
 0x372   : > { %12319 = vmatmul.mubr.msk.f32.gmra.mxu0 %vm5198_vm5, %v16775_v13  ;;  %v12468_v44 = vpop.f32.mrf.mxu1  ;;  %12515 = vmatmul.mubr.msk.f32.gmra.mxu1 %vm5198_vm5, %v16775_v13  ;;  %v3653_v61 = vpop.permute.xlu1 %3652 }
 0x373   : > { %v16790_v39 = vmul.f32 %v12468_v44, %v12272_v41  ;;  %v3651_v19 = vpop.permute.xlu0 %3650  ;;  %v4935_v54 = vsel %vm439_vm1, 1.0, %v3653_v61  ;;  %v16795_v45 = vpop.f32.mrf.mxu0 }
 0x374   : > { %v4934_v51 = vsel %vm439_vm1, 1.0, %v3651_v19  ;;  %19456 = vst [vmem:[#allocation380_spill] sm:$0xff] %v16795_v45  ;;  %v16801_v41 = vpop.f32.mrf.mxu1 }
 0x375   : > { %19455 = vst [vmem:[#allocation379_spill] sm:$0xff] %v16790_v39  ;;  %19458 = vst [vmem:[#allocation382_spill] sm:$0xff] %v16801_v41 }
 0x376   : > { %v4165_v18 = vpop.permute.xlu1 %4164 }
 0x377   : > { %v4163_v37 = vpop.permute.xlu0 %4162  ;;  %v5064_v46 = vsel %vm4938_vm3, %v4935_v54, %v4165_v18 }
 0x378   : > { %v5063_v57 = vsel %vm4938_vm3, %v4934_v51, %v4163_v37 }
 0x37a   : > { %v4677_v5 = vpop.permute.xlu1 %4676 }
 0x37b   : > { %v16799_v11 = vsel %vm5067_vm4, %v5064_v46, %v4677_v5  ;;  %v4675_v13 = vpop.permute.xlu0 %4674 }
 0x37c   : > { %19457 = vst [vmem:[#allocation381_spill] sm:$0xff] %v16799_v11  ;;  %v16804_v44 = vsel %vm5067_vm4, %v5063_v57, %v4675_v13 }
 0x37d   : > { %19459 = vst [vmem:[#allocation383_spill] sm:$0xff] %v16804_v44  ;;  %12321 = vmatprep.mubr.msk.f32.mxu0 %vm5198_vm5, %v16804_v44  ;;  %12517 = vmatprep.mubr.msk.f32.mxu1 %vm5198_vm5, %v16804_v44  ;;  %v12275_v61 = vpop.f32.mrf.mxu0 }
 0x37e   : > { %12322 = vmatmul.mubr.msk.f32.gmra.mxu0 %vm5198_vm5, %v16799_v11  ;;  %v12471_v19 = vpop.f32.mrf.mxu1  ;;  %12518 = vmatmul.mubr.msk.f32.gmra.mxu1 %vm5198_vm5, %v16799_v11  ;;  %v3657_v5 = vpop.permute.xlu1 %3656 }
 0x37f   : > { %v16814_v18 = vmul.f32 %v12471_v19, %v12275_v61  ;;  %v3655_v37 = vpop.permute.xlu0 %3654  ;;  %v4937_v54 = vsel %vm439_vm1, 1.0, %v3657_v5  ;;  %v16819_v41 = vpop.f32.mrf.mxu0 }
 0x380   : > { %v4936_v51 = vsel %vm439_vm1, 1.0, %v3655_v37  ;;  %v16825_v61 = vpop.f32.mrf.mxu1 }
 0x381   : > { %19460 = vst [vmem:[#allocation384_spill] sm:$0xff] %v16814_v18  ;;  %v19543_v18 = vld [vmem:[#allocation123_spill] sm:$0xff] }
 0x382   : > { %v4169_v13 = vpop.permute.xlu1 %4168 }
 0x383   : > { %v4167_v57 = vpop.permute.xlu0 %4166  ;;  %v5066_v46 = vsel %vm4938_vm3, %v4937_v54, %v4169_v13  ;;  %v19462_v13 = vld [vmem:[#allocation31_spill] sm:$0xff] }
 0x384   : > { %v5065_v45 = vsel %vm4938_vm3, %v4936_v51, %v4167_v57  ;;  %v19465_v51 = vld [vmem:[#allocation33_spill] sm:$0xff] }
 0x386   : > { %v4681_v39 = vpop.permute.xlu1 %4680 }
 0x387   : > { %v16823_v44 = vsel %vm5067_vm4, %v5066_v46, %v4681_v39  ;;  %v4679_v11 = vpop.permute.xlu0 %4678 }
 0x388   : > { %v16828_v19 = vsel %vm5067_vm4, %v5065_v45, %v4679_v11 }
 0x389   : > { %12324 = vmatprep.mubr.msk.f32.mxu0 %vm5198_vm5, %v16828_v19  ;;  %12520 = vmatprep.mubr.msk.f32.mxu1 %vm5198_vm5, %v16828_v19  ;;  %v12278_v5 = vpop.f32.mrf.mxu0 }
 0x38a   : > { %12325 = vmatmul.mubr.msk.f32.gmra.mxu0 %vm5198_vm5, %v16823_v44  ;;  %v12474_v37 = vpop.f32.mrf.mxu1  ;;  %12521 = vmatmul.mubr.msk.f32.gmra.mxu1 %vm5198_vm5, %v16823_v44 }
 0x38b   : > { %v16838_v39 = vmul.f32 %v12474_v37, %v12278_v5  ;;  %12527 = vmatprep.mubr.msk.f32.mxu0 %vm5198_vm5, %v19130_v56  ;;  %12723 = vmatprep.mubr.msk.f32.mxu1 %vm5198_vm5, %v19130_v56  ;;  %v16856_v45 = vpop.f32.mrf.mxu0  ;;  %v19470_v37 = vld [vmem:[#allocation18_spill] sm:$0xff] }
 0x38d   : > { %19461 = vst [vmem:[#allocation385_spill] sm:$0xff] %v16838_v39 }
 0x38e   : > { %12528 = vmatmul.mubr.msk.f32.vlgmr.msra.gmra.mxu0 %vm5198_vm5, %v14377_v34  ;;  %12724 = vmatmul.mubr.msk.f32.vlgmr.msra.gmra.mxu1 %vm5198_vm5, %v14377_v34  ;;  %v16862_v34 = vpop.f32.mrf.mxu1 }
 0x38f   : > { %12530 = vmatprep.mubr.msk.f32.mxu0 %vm5198_vm5, %v14387_v43  ;;  %12726 = vmatprep.mubr.msk.f32.mxu1 %vm5198_vm5, %v14387_v43 }
 0x392   : > { %12531 = vmatmul.mubr.msk.f32.gmra.mxu0 %vm5198_vm5, %v14407_v2  ;;  %12727 = vmatmul.mubr.msk.f32.gmra.mxu1 %vm5198_vm5, %v14407_v2  ;;  %v19464_v2 = vld [vmem:[#allocation32_spill] sm:$0xff] }
 0x393   : > { %12533 = vmatprep.mubr.msk.f32.mxu0 %vm5198_vm5, %v14419_v21  ;;  %12729 = vmatprep.mubr.msk.f32.mxu1 %vm5198_vm5, %v14419_v21 }
 0x395   : > { %v12281_v56 = vpop.f32.mrf.mxu0 }
 0x396   : > { %v12477_v11 = vpop.f32.mrf.mxu1  ;;  %12534 = vmatmul.mubr.msk.f32.gmra.mxu0 %vm5198_vm5, %v19462_v13  ;;  %12730 = vmatmul.mubr.msk.f32.gmra.mxu1 %vm5198_vm5, %v19462_v13 }
 0x397   : > { %v16868_v43 = vmul.f32 %v12477_v11, %v12281_v56  ;;  %12536 = vmatprep.mubr.msk.f32.mxu0 %vm5198_vm5, %v19464_v2  ;;  %12732 = vmatprep.mubr.msk.f32.mxu1 %vm5198_vm5, %v19464_v2  ;;  %v16886_v21 = vpop.f32.mrf.mxu0  ;;  %v19474_v56 = vld [vmem:[#allocation22_spill] sm:$0xff]  ;;  %v19476_v2 = vld [vmem:[#allocation5_spill] sm:$0xff] }
 0x399   : > { %19463 = vst [vmem:[#allocation31_spill] sm:$0xff] %v16868_v43  ;;  %v19527_v43 = vld [vmem:[#allocation79_spill] sm:$0xff] }
 0x39a   : > { %12537 = vmatmul.mubr.msk.f32.gmra.mxu0 %vm5198_vm5, %v14469_v1  ;;  %12733 = vmatmul.mubr.msk.f32.gmra.mxu1 %vm5198_vm5, %v14469_v1  ;;  %v16892_v1 = vpop.f32.mrf.mxu1 }
 0x39b   : > { %12539 = vmatprep.mubr.msk.f32.mxu0 %vm5198_vm5, %v14479_v42  ;;  %12735 = vmatprep.mubr.msk.f32.mxu1 %vm5198_vm5, %v14479_v42 }
 0x39e   : > { %12540 = vmatmul.mubr.msk.f32.gmra.mxu0 %vm5198_vm5, %v14499_v55  ;;  %12736 = vmatmul.mubr.msk.f32.gmra.mxu1 %vm5198_vm5, %v14499_v55  ;;  %v19467_v55 = vld [vmem:[#allocation34_spill] sm:$0xff] }
 0x39f   : > { %12542 = vmatprep.mubr.msk.f32.mxu0 %vm5198_vm5, %v14511_v63  ;;  %12738 = vmatprep.mubr.msk.f32.mxu1 %vm5198_vm5, %v14511_v63 }
 0x3a1   : > { %v12284_v57 = vpop.f32.mrf.mxu0 }
 0x3a2   : > { %v12480_v54 = vpop.f32.mrf.mxu1  ;;  %12543 = vmatmul.mubr.msk.f32.gmra.mxu0 %vm5198_vm5, %v19465_v51  ;;  %12739 = vmatmul.mubr.msk.f32.gmra.mxu1 %vm5198_vm5, %v19465_v51 }
 0x3a3   : > { %v16898_v42 = vmul.f32 %v12480_v54, %v12284_v57  ;;  %12545 = vmatprep.mubr.msk.f32.mxu0 %vm5198_vm5, %v19467_v55  ;;  %12741 = vmatprep.mubr.msk.f32.mxu1 %vm5198_vm5, %v19467_v55  ;;  %v16916_v63 = vpop.f32.mrf.mxu0  ;;  %v19481_v55 = vld [vmem:[#allocation19_spill] sm:$0xff] }
 0x3a4   : > { %19468 = vst [vmem:[#allocation33_spill] sm:$0xff] %v16916_v63 }
 0x3a5   : > { %19466 = vst [vmem:[#allocation32_spill] sm:$0xff] %v16898_v42 }
 0x3a6   : > { %12546 = vmatmul.mubr.msk.f32.gmra.mxu0 %vm5198_vm5, %v14561_v48  ;;  %12742 = vmatmul.mubr.msk.f32.gmra.mxu1 %vm5198_vm5, %v14561_v48  ;;  %v16922_v48 = vpop.f32.mrf.mxu1 }
 0x3a7   : > { %12548 = vmatprep.mubr.msk.f32.mxu0 %vm5198_vm5, %v14571_v16  ;;  %12744 = vmatprep.mubr.msk.f32.mxu1 %vm5198_vm5, %v14571_v16  ;;  %19469 = vst [vmem:[#allocation34_spill] sm:$0xff] %v16922_v48  ;;  %v19605_v48 = vld [vmem:[#allocation295_spill] sm:$0xff] }
 0x3aa   : > { %12549 = vmatmul.mubr.msk.f32.gmra.mxu0 %vm5198_vm5, %v14591_v26  ;;  %12745 = vmatmul.mubr.msk.f32.gmra.mxu1 %vm5198_vm5, %v14591_v26  ;;  %v19472_v26 = vld [vmem:[#allocation20_spill] sm:$0xff] }
 0x3ab   : > { %12551 = vmatprep.mubr.msk.f32.mxu0 %vm5198_vm5, %v14608_v14  ;;  %12747 = vmatprep.mubr.msk.f32.mxu1 %vm5198_vm5, %v14608_v14 }
 0x3ad   : > { %v12287_v46 = vpop.f32.mrf.mxu0 }
 0x3ae   : > { %v12483_v5 = vpop.f32.mrf.mxu1  ;;  %12552 = vmatmul.mubr.msk.f32.gmra.mxu0 %vm5198_vm5, %v19470_v37  ;;  %12748 = vmatmul.mubr.msk.f32.gmra.mxu1 %vm5198_vm5, %v19470_v37  ;;  %v19487_v37 = vld [vmem:[#allocation9_spill] sm:$0xff] }
 0x3af   : > { %v16928_v16 = vmul.f32 %v12483_v5, %v12287_v46  ;;  %12554 = vmatprep.mubr.msk.f32.mxu0 %vm5198_vm5, %v19472_v26  ;;  %12750 = vmatprep.mubr.msk.f32.mxu1 %vm5198_vm5, %v19472_v26  ;;  %v16946_v14 = vpop.f32.mrf.mxu0  ;;  %v19485_v46 = vld [vmem:[#allocation6_spill] sm:$0xff] }
 0x3b0   : > { %19473 = vst [vmem:[#allocation20_spill] sm:$0xff] %v16946_v14  ;;  %v19602_v14 = vld [vmem:[#allocation282_spill] sm:$0xff] }
 0x3b1   : > { %19471 = vst [vmem:[#allocation18_spill] sm:$0xff] %v16928_v16 }
 0x3b2   : > { %12555 = vmatmul.mubr.msk.f32.gmra.mxu0 %vm5198_vm5, %v14658_v32  ;;  %12751 = vmatmul.mubr.msk.f32.gmra.mxu1 %vm5198_vm5, %v14658_v32  ;;  %v16952_v32 = vpop.f32.mrf.mxu1 }
 0x3b3   : > { %12557 = vmatprep.mubr.msk.f32.mxu0 %vm5198_vm5, %v14668_v22  ;;  %12753 = vmatprep.mubr.msk.f32.mxu1 %vm5198_vm5, %v14668_v22  ;;  %19475 = vst [vmem:[#allocation22_spill] sm:$0xff] %v16952_v32  ;;  %v19598_v32 = vld [vmem:[#allocation283_spill] sm:$0xff] }
 0x3b6   : > { %12558 = vmatmul.mubr.msk.f32.gmra.mxu0 %vm5198_vm5, %v14688_v35  ;;  %12754 = vmatmul.mubr.msk.f32.gmra.mxu1 %vm5198_vm5, %v14688_v35  ;;  %v19478_v35 = vld [vmem:[#allocation7_spill] sm:$0xff] }
 0x3b7   : > { %12560 = vmatprep.mubr.msk.f32.mxu0 %vm5198_vm5, %v19474_v56  ;;  %12756 = vmatprep.mubr.msk.f32.mxu1 %vm5198_vm5, %v19474_v56 }
 0x3b9   : > { %v12290_v11 = vpop.f32.mrf.mxu0 }
 0x3ba   : > { %v12486_v13 = vpop.f32.mrf.mxu1  ;;  %12561 = vmatmul.mubr.msk.f32.gmra.mxu0 %vm5198_vm5, %v19476_v2  ;;  %12757 = vmatmul.mubr.msk.f32.gmra.mxu1 %vm5198_vm5, %v19476_v2  ;;  %v19491_v2 = vld [vmem:[#allocation25_spill] sm:$0xff] }
 0x3bb   : > { %v16958_v22 = vmul.f32 %v12486_v13, %v12290_v11  ;;  %12563 = vmatprep.mubr.msk.f32.mxu0 %vm5198_vm5, %v19478_v35  ;;  %12759 = vmatprep.mubr.msk.f32.mxu1 %vm5198_vm5, %v19478_v35  ;;  %v16976_v57 = vpop.f32.mrf.mxu0  ;;  %v19489_v11 = vld [vmem:[#allocation26_spill] sm:$0xff]  ;;  %v19492_v35 = vld [vmem:[#allocation23_spill] sm:$0xff] }
 0x3bc   : > { %19479 = vst [vmem:[#allocation7_spill] sm:$0xff] %v16976_v57 }
 0x3bd   : > { %19477 = vst [vmem:[#allocation5_spill] sm:$0xff] %v16958_v22  ;;  %v19518_v22 = vld [vmem:[#allocation59_spill] sm:$0xff] }
 0x3be   : > { %12564 = vmatmul.mubr.msk.f32.gmra.mxu0 %vm5198_vm5, %v14750_v49  ;;  %12760 = vmatmul.mubr.msk.f32.gmra.mxu1 %vm5198_vm5, %v14750_v49  ;;  %v16982_v49 = vpop.f32.mrf.mxu1 }
 0x3bf   : > { %12566 = vmatprep.mubr.msk.f32.mxu0 %vm5198_vm5, %v14760_v62  ;;  %12762 = vmatprep.mubr.msk.f32.mxu1 %vm5198_vm5, %v14760_v62  ;;  %19480 = vst [vmem:[#allocation386_spill] sm:$0xff] %v16982_v49  ;;  %v19594_v49 = vld [vmem:[#allocation64_spill] sm:$0xff] }
 0x3c2   : > { %12567 = vmatmul.mubr.msk.f32.gmra.mxu0 %vm5198_vm5, %v14780_v23  ;;  %12763 = vmatmul.mubr.msk.f32.gmra.mxu1 %vm5198_vm5, %v14780_v23  ;;  %v19483_v23 = vld [vmem:[#allocation21_spill] sm:$0xff] }
 0x3c3   : > { %12569 = vmatprep.mubr.msk.f32.mxu0 %vm5198_vm5, %v14790_v24  ;;  %12765 = vmatprep.mubr.msk.f32.mxu1 %vm5198_vm5, %v14790_v24  ;;  %v19484_v24 = vld [vmem:[#allocation24_spill] sm:$0xff] }
 0x3c5   : > { %v12293_v54 = vpop.f32.mrf.mxu0 }
 0x3c6   : > { %v12489_v51 = vpop.f32.mrf.mxu1  ;;  %12570 = vmatmul.mubr.msk.f32.gmra.mxu0 %vm5198_vm5, %v19481_v55  ;;  %12766 = vmatmul.mubr.msk.f32.gmra.mxu1 %vm5198_vm5, %v19481_v55 }
 0x3c7   : > { %v16988_v62 = vmul.f32 %v12489_v51, %v12293_v54  ;;  %12572 = vmatprep.mubr.msk.f32.mxu0 %vm5198_vm5, %v19483_v23  ;;  %12768 = vmatprep.mubr.msk.f32.mxu1 %vm5198_vm5, %v19483_v23  ;;  %v17006_v5 = vpop.f32.mrf.mxu0  ;;  %v19493_v54 = vld [vmem:[#allocation8_spill] sm:$0xff] }
 0x3c8   : > { %19486 = vst [vmem:[#allocation21_spill] sm:$0xff] %v17006_v5  ;;  %v19494_v51 = vld [vmem:[#allocation28_spill] sm:$0xff]  ;;  %v19591_v5 = vld [vmem:[#allocation271_spill] sm:$0xff] }
 0x3c9   : > { %19482 = vst [vmem:[#allocation19_spill] sm:$0xff] %v16988_v62  ;;  %v19517_v62 = vld [vmem:[#allocation51_spill] sm:$0xff] }
 0x3ca   : > { %12573 = vmatmul.mubr.msk.f32.gmra.mxu0 %vm5198_vm5, %v14836_v10  ;;  %12769 = vmatmul.mubr.msk.f32.gmra.mxu1 %vm5198_vm5, %v14836_v10  ;;  %v17012_v10 = vpop.f32.mrf.mxu1 }
 0x3cb   : > { %12575 = vmatprep.mubr.msk.f32.mxu0 %vm5198_vm5, %v19484_v24  ;;  %12771 = vmatprep.mubr.msk.f32.mxu1 %vm5198_vm5, %v19484_v24  ;;  %19488 = vst [vmem:[#allocation24_spill] sm:$0xff] %v17012_v10  ;;  %v19497_v24 = vld [vmem:[#allocation27_spill] sm:$0xff]  ;;  %v19588_v10 = vld [vmem:[#allocation258_spill] sm:$0xff] }
 0x3ce   : > { %12576 = vmatmul.mubr.msk.f32.gmra.mxu0 %vm5198_vm5, %v19485_v46  ;;  %12772 = vmatmul.mubr.msk.f32.gmra.mxu1 %vm5198_vm5, %v19485_v46 }
 0x3cf   : > { %12578 = vmatprep.mubr.msk.f32.mxu0 %vm5198_vm5, %v19487_v37  ;;  %12774 = vmatprep.mubr.msk.f32.mxu1 %vm5198_vm5, %v19487_v37 }
 0x3d1   : > { %v12296_v26 = vpop.f32.mrf.mxu0 }
 0x3d2   : > { %v12492_v56 = vpop.f32.mrf.mxu1  ;;  %12579 = vmatmul.mubr.msk.f32.gmra.mxu0 %vm5198_vm5, %v19489_v11  ;;  %12775 = vmatmul.mubr.msk.f32.gmra.mxu1 %vm5198_vm5, %v19489_v11  ;;  %v19500_v11 = vld [vmem:[#allocation13_spill] sm:$0xff] }
 0x3d3   : > { %v17018_v13 = vmul.f32 %v12492_v56, %v12296_v26  ;;  %12581 = vmatprep.mubr.msk.f32.mxu0 %vm5198_vm5, %v19491_v2  ;;  %12777 = vmatprep.mubr.msk.f32.mxu1 %vm5198_vm5, %v19491_v2  ;;  %v17036_v55 = vpop.f32.mrf.mxu0  ;;  %v19499_v56 = vld [vmem:[#allocation11_spill] sm:$0xff]  ;;  %v19501_v2 = vld [vmem:[#allocation10_spill] sm:$0xff] }
 0x3d4   : > { %19495 = vst [vmem:[#allocation9_spill] sm:$0xff] %v17036_v55  ;;  %v17038_v23 = vpop.f32.mrf.mxu1 }
 0x3d5   : > { %19490 = vst [vmem:[#allocation6_spill] sm:$0xff] %v17018_v13  ;;  %19496 = vst [vmem:[#allocation26_spill] sm:$0xff] %v17038_v23  ;;  %v19586_v23 = vld [vmem:[#allocation259_spill] sm:$0xff] }
 0x3d6   : > { %12582 = vmatmul.mubr.msk.f32.gmra.mxu0 %vm5198_vm5, %v19492_v35  ;;  %12778 = vmatmul.mubr.msk.f32.gmra.mxu1 %vm5198_vm5, %v19492_v35  ;;  %v19502_v35 = vld [vmem:[#allocation12_spill] sm:$0xff] }
 0x3d7   : > { %12584 = vmatprep.mubr.msk.f32.mxu0 %vm5198_vm5, %v19493_v54  ;;  %12780 = vmatprep.mubr.msk.f32.mxu1 %vm5198_vm5, %v19493_v54  ;;  %v19503_v54 = vld [vmem:[#allocation29_spill] sm:$0xff] }
 0x3da   : > { %12585 = vmatmul.mubr.msk.f32.gmra.mxu0 %vm5198_vm5, %v19494_v51  ;;  %12781 = vmatmul.mubr.msk.f32.gmra.mxu1 %vm5198_vm5, %v19494_v51 }
 0x3db   : > { %12587 = vmatprep.mubr.msk.f32.mxu0 %vm5198_vm5, %v19497_v24  ;;  %12783 = vmatprep.mubr.msk.f32.mxu1 %vm5198_vm5, %v19497_v24 }
 0x3dd   : > { %v12299_v46 = vpop.f32.mrf.mxu0  ;;  %v12495_v37 = vpop.f32.mrf.mxu1 }
 0x3de   : > { %v17044_v26 = vmul.f32 %v12495_v37, %v12299_v46  ;;  %12588 = vmatmul.mubr.msk.f32.gmra.mxu0 %vm5198_vm5, %v19499_v56  ;;  %12784 = vmatmul.mubr.msk.f32.gmra.mxu1 %vm5198_vm5, %v19499_v56  ;;  %v19506_v46 = vld [vmem:[#allocation14_spill] sm:$0xff] }
 0x3df   : > { %12590 = vmatprep.mubr.msk.f32.mxu0 %vm5198_vm5, %v19500_v11  ;;  %12786 = vmatprep.mubr.msk.f32.mxu1 %vm5198_vm5, %v19500_v11  ;;  %v17066_v51 = vpop.f32.mrf.mxu0  ;;  %v17068_v24 = vpop.f32.mrf.mxu1 }
 0x3e0   : > { %19498 = vst [vmem:[#allocation25_spill] sm:$0xff] %v17044_v26  ;;  %19504 = vst [vmem:[#allocation23_spill] sm:$0xff] %v17066_v51 }
 0x3e1   : > { %19505 = vst [vmem:[#allocation8_spill] sm:$0xff] %v17068_v24  ;;  %v19585_v24 = vld [vmem:[#allocation214_spill] sm:$0xff] }
 0x3e2   : > { %12591 = vmatmul.mubr.msk.f32.gmra.mxu0 %vm5198_vm5, %v19501_v2  ;;  %12787 = vmatmul.mubr.msk.f32.gmra.mxu1 %vm5198_vm5, %v19501_v2  ;;  %v19508_v2 = vld [vmem:[#allocation15_spill] sm:$0xff] }
 0x3e3   : > { %12593 = vmatprep.mubr.msk.f32.mxu0 %vm5198_vm5, %v19502_v35  ;;  %12789 = vmatprep.mubr.msk.f32.mxu1 %vm5198_vm5, %v19502_v35  ;;  %v19509_v35 = vld [vmem:[#allocation36_spill] sm:$0xff] }
 0x3e6   : > { %12594 = vmatmul.mubr.msk.f32.gmra.mxu0 %vm5198_vm5, %v19503_v54  ;;  %12790 = vmatmul.mubr.msk.f32.gmra.mxu1 %vm5198_vm5, %v19503_v54  ;;  %v17095_v54 = vld [vmem:[%s18790_s4] ss:$0 sm:$0xff] }
 0x3e7   : > { %12596 = vmatprep.mubr.msk.f32.mxu0 %vm5198_vm5, %v19506_v46  ;;  %12792 = vmatprep.mubr.msk.f32.mxu1 %vm5198_vm5, %v19506_v46  ;;  %v19510_v46 = vld [vmem:[#allocation43_spill] sm:$0xff] }
 0x3e9   : > { %v12302_v37 = vpop.f32.mrf.mxu0  ;;  %v12498_v56 = vpop.f32.mrf.mxu1 }
 0x3ea   : > { %v17074_v11 = vmul.f32 %v12498_v56, %v12302_v37  ;;  %12597 = vmatmul.mubr.msk.f32.gmra.mxu0 %vm5198_vm5, %v19508_v2  ;;  %12793 = vmatmul.mubr.msk.f32.gmra.mxu1 %vm5198_vm5, %v19508_v2  ;;  %v19513_v56 = vld [vmem:[#allocation52_spill] sm:$0xff] }
 0x3eb   : > { %12599 = vmatprep.mubr.msk.f32.mxu0 %vm5198_vm5, %v19509_v35  ;;  %12795 = vmatprep.mubr.msk.f32.mxu1 %vm5198_vm5, %v19509_v35  ;;  %v17101_v37 = vpop.f32.mrf.mxu0  ;;  %v19515_v35 = vld [vmem:[#allocation16_spill] sm:$0xff] }
 0x3ec   : > { %19507 = vst [vmem:[#allocation28_spill] sm:$0xff] %v17074_v11  ;;  %19511 = vst [vmem:[#allocation27_spill] sm:$0xff] %v17101_v37  ;;  %v17115_v11 = vadd.f32 %v17095_v54, %v19515_v35 }
 0x3ee   : > { %12600 = vmatmul.mubr.msk.f32.gmra.mxu0 %vm5198_vm5, %v19202_v38  ;;  %12796 = vmatmul.mubr.msk.f32.gmra.mxu1 %vm5198_vm5, %v19202_v38  ;;  %v17103_v38 = vpop.f32.mrf.mxu1 }
 0x3ef   : > { %12602 = vmatprep.mubr.msk.f32.mxu0 %vm5198_vm5, %v19205_v0  ;;  %12798 = vmatprep.mubr.msk.f32.mxu1 %vm5198_vm5, %v19205_v0  ;;  %19512 = vst [vmem:[#allocation11_spill] sm:$0xff] %v17103_v38  ;;  %v19514_v0 = vld [vmem:[#allocation17_spill] sm:$0xff] }
 0x3f0   : > { %v17111_v2 = vadd.f32 %v19514_v0, %v17095_v54  ;;  %v19519_v0 = vld [vmem:[#allocation38_spill] sm:$0xff]  ;;  %v19581_v38 = vld [vmem:[#allocation213_spill] sm:$0xff] }
 0x3f1   : > { %v17131_v35 = vadd.f32 %v17095_v54, %v19519_v0  ;;  %v19523_v0 = vld [vmem:[#allocation72_spill] sm:$0xff] }
 0x3f2   : > { %12603 = vmatmul.mubr.msk.f32.gmra.mxu0 %vm5198_vm5, %v19510_v46  ;;  %12799 = vmatmul.mubr.msk.f32.gmra.mxu1 %vm5198_vm5, %v19510_v46 }
 0x3f3   : > { %12605 = vmatprep.mubr.msk.f32.mxu0 %vm5198_vm5, %v19513_v56  ;;  %12801 = vmatprep.mubr.msk.f32.mxu1 %vm5198_vm5, %v19513_v56  ;;  %v9180_v56 = vadd.f32 %v17111_v2, %v17115_v11 }
 0x3f5   : > { %v12305_v26 = vpop.f32.mrf.mxu0  ;;  %v12501_v46 = vpop.f32.mrf.mxu1 }
 0x3f6   : > { %v17117_v13 = vmul.f32 %v12501_v46, %v12305_v26  ;;  %12606 = vmatmul.mubr.msk.f32.gmra.mxu0 %vm5198_vm5, %v19517_v62  ;;  %12802 = vmatmul.mubr.msk.f32.gmra.mxu1 %vm5198_vm5, %v19517_v62  ;;  %v9181_v26 = vadd.f32 %v9180_v56, %v17131_v35 }
 0x3f7   : > { %12608 = vmatprep.mubr.msk.f32.mxu0 %vm5198_vm5, %v19518_v22  ;;  %12804 = vmatprep.mubr.msk.f32.mxu1 %vm5198_vm5, %v19518_v22  ;;  %v19520_v22 = vld [vmem:[#allocation37_spill] sm:$0xff]  ;;  %v17150_v46 = vpop.f32.mrf.mxu0 }
 0x3f8   : > { %19516 = vst [vmem:[#allocation13_spill] sm:$0xff] %v17117_v13  ;;  %v17143_v62 = vadd.f32 %v19520_v22, %v17095_v54  ;;  %19521 = vst [vmem:[#allocation10_spill] sm:$0xff] %v17150_v46  ;;  %v19524_v22 = vld [vmem:[#allocation40_spill] sm:$0xff]  ;;  %v19580_v46 = vld [vmem:[#allocation111_spill] sm:$0xff] }
 0x3f9   : > { %v17161_v56 = vadd.f32 %v17095_v54, %v19524_v22  ;;  %v6997_v37 = vmul.f32 %v19581_v38, %v19580_v46 }
 0x3fa   : > { %12609 = vmatmul.mubr.msk.f32.gmra.mxu0 %vm5198_vm5, %v15262_v33  ;;  %12805 = vmatmul.mubr.msk.f32.gmra.mxu1 %vm5198_vm5, %v15262_v33  ;;  %v17152_v33 = vpop.f32.mrf.mxu1 }
 0x3fb   : > { %12611 = vmatprep.mubr.msk.f32.mxu0 %vm5198_vm5, %v15308_v47  ;;  %12807 = vmatprep.mubr.msk.f32.mxu1 %vm5198_vm5, %v15308_v47  ;;  %19522 = vst [vmem:[#allocation12_spill] sm:$0xff] %v17152_v33  ;;  %v9182_v47 = vadd.f32 %v9181_v26, %v17143_v62  ;;  %v19528_v26 = vld [vmem:[#allocation39_spill] sm:$0xff] }
 0x3fd   : > { %v9183_v22 = vadd.f32 %v9182_v47, %v17161_v56 }
 0x3fe   : > { %12612 = vmatmul.mubr.msk.f32.gmra.mxu0 %vm5198_vm5, %v15304_v28  ;;  %12808 = vmatmul.mubr.msk.f32.gmra.mxu1 %vm5198_vm5, %v15304_v28  ;;  %v19526_v28 = vld [vmem:[#allocation71_spill] sm:$0xff] }
 0x3ff   : > { %12614 = vmatprep.mubr.msk.f32.mxu0 %vm5198_vm5, %v19523_v0  ;;  %12810 = vmatprep.mubr.msk.f32.mxu1 %vm5198_vm5, %v19523_v0  ;;  %v17175_v0 = vadd.f32 %v19528_v26, %v17095_v54 }
 0x401   : > { %v12308_v13 = vpop.f32.mrf.mxu0  ;;  %v12504_v16 = vpop.f32.mrf.mxu1 }
 0x402   : > { %v17163_v42 = vmul.f32 %v12504_v16, %v12308_v13  ;;  %12615 = vmatmul.mubr.msk.f32.gmra.mxu0 %vm5198_vm5, %v19526_v28  ;;  %12811 = vmatmul.mubr.msk.f32.gmra.mxu1 %vm5198_vm5, %v19526_v28  ;;  %v19529_v16 = vld [vmem:[#allocation42_spill] sm:$0xff] }
 0x403   : > { %12617 = vmatprep.mubr.msk.f32.mxu0 %vm5198_vm5, %v19527_v43  ;;  %12813 = vmatprep.mubr.msk.f32.mxu1 %vm5198_vm5, %v19527_v43  ;;  %v9184_v43 = vadd.f32 %v9183_v22, %v17175_v0  ;;  %v17189_v13 = vadd.f32 %v17095_v54, %v19529_v16  ;;  %v17195_v47 = vpop.f32.mrf.mxu0 }
 0x404   : > { %19525 = vst [vmem:[#allocation29_spill] sm:$0xff] %v17163_v42  ;;  %19530 = vst [vmem:[#allocation14_spill] sm:$0xff] %v17195_v47  ;;  %v19570_v47 = vld [vmem:[#allocation211_spill] sm:$0xff] }
 0x405   : > { %v9185_v26 = vadd.f32 %v9184_v43, %v17189_v13 }
 0x406   : > { %12618 = vmatmul.mubr.msk.f32.gmra.mxu0 %vm5198_vm5, %v15391_v25  ;;  %12814 = vmatmul.mubr.msk.f32.gmra.mxu1 %vm5198_vm5, %v15391_v25  ;;  %v17197_v25 = vpop.f32.mrf.mxu1 }
 0x407   : > { %12620 = vmatprep.mubr.msk.f32.mxu0 %vm5198_vm5, %v15442_v3  ;;  %12816 = vmatprep.mubr.msk.f32.mxu1 %vm5198_vm5, %v15442_v3  ;;  %19531 = vst [vmem:[#allocation15_spill] sm:$0xff] %v17197_v25  ;;  %v19532_v3 = vld [vmem:[#allocation41_spill] sm:$0xff] }
 0x408   : > { %v17205_v28 = vadd.f32 %v19532_v3, %v17095_v54  ;;  %v19535_v3 = vld [vmem:[#allocation46_spill] sm:$0xff] }
 0x409   : > { %v17221_v43 = vadd.f32 %v17095_v54, %v19535_v3  ;;  %v19540_v3 = vld [vmem:[#allocation48_spill] sm:$0xff] }
 0x40a   : > { %12621 = vmatmul.mubr.msk.f32.gmra.mxu0 %vm5198_vm5, %v15437_v27  ;;  %12817 = vmatmul.mubr.msk.f32.gmra.mxu1 %vm5198_vm5, %v15437_v27  ;;  %v19534_v27 = vld [vmem:[#allocation98_spill] sm:$0xff] }
 0x40b   : > { %12623 = vmatprep.mubr.msk.f32.mxu0 %vm5198_vm5, %v15494_v20  ;;  %12819 = vmatprep.mubr.msk.f32.mxu1 %vm5198_vm5, %v15494_v20  ;;  %v9186_v20 = vadd.f32 %v9185_v26, %v17205_v28 }
 0x40d   : > { %v12311_v22 = vpop.f32.mrf.mxu0  ;;  %v12507_v16 = vpop.f32.mrf.mxu1  ;;  %v9187_v26 = vadd.f32 %v9186_v20, %v17221_v43  ;;  %v17251_v20 = vadd.f32 %v17095_v54, %v19540_v3 }
 0x40e   : > { %v17208_v42 = vmul.f32 %v12507_v16, %v12311_v22  ;;  %12624 = vmatmul.mubr.msk.f32.gmra.mxu0 %vm5198_vm5, %v15489_v58  ;;  %12820 = vmatmul.mubr.msk.f32.gmra.mxu1 %vm5198_vm5, %v15489_v58  ;;  %v19536_v58 = vld [vmem:[#allocation45_spill] sm:$0xff] }
 0x40f   : > { %12626 = vmatprep.mubr.msk.f32.mxu0 %vm5198_vm5, %v19534_v27  ;;  %12822 = vmatprep.mubr.msk.f32.mxu1 %vm5198_vm5, %v19534_v27  ;;  %v17233_v22 = vadd.f32 %v19536_v58, %v17095_v54  ;;  %v17240_v16 = vpop.f32.mrf.mxu0  ;;  %v19539_v27 = vld [vmem:[#allocation113_spill] sm:$0xff] }
 0x410   : > { %19533 = vst [vmem:[#allocation36_spill] sm:$0xff] %v17208_v42  ;;  %19537 = vst [vmem:[#allocation43_spill] sm:$0xff] %v17240_v16 }
 0x412   : > { %12627 = vmatmul.mubr.msk.f32.gmra.mxu0 %vm5198_vm5, %v15535_v12  ;;  %12823 = vmatmul.mubr.msk.f32.gmra.mxu1 %vm5198_vm5, %v15535_v12  ;;  %v17242_v12 = vpop.f32.mrf.mxu1 }
 0x413   : > { %12629 = vmatprep.mubr.msk.f32.mxu0 %vm5198_vm5, %v15586_v4  ;;  %12825 = vmatprep.mubr.msk.f32.mxu1 %vm5198_vm5, %v15586_v4  ;;  %19538 = vst [vmem:[#allocation52_spill] sm:$0xff] %v17242_v12  ;;  %v9188_v4 = vadd.f32 %v9187_v26, %v17233_v22  ;;  %v19545_v12 = vld [vmem:[#allocation47_spill] sm:$0xff] }
 0x416   : > { %12630 = vmatmul.mubr.msk.f32.gmra.mxu0 %vm5198_vm5, %v15583_v9  ;;  %12826 = vmatmul.mubr.msk.f32.gmra.mxu1 %vm5198_vm5, %v15583_v9  ;;  %v19542_v9 = vld [vmem:[#allocation112_spill] sm:$0xff] }
 0x417   : > { %12632 = vmatprep.mubr.msk.f32.mxu0 %vm5198_vm5, %v19539_v27  ;;  %12828 = vmatprep.mubr.msk.f32.mxu1 %vm5198_vm5, %v19539_v27 }
 0x419   : > { %v12314_v58 = vpop.f32.mrf.mxu0  ;;  %v12510_v42 = vpop.f32.mrf.mxu1 }
 0x41a   : > { %v17253_v39 = vmul.f32 %v12510_v42, %v12314_v58  ;;  %12633 = vmatmul.mubr.msk.f32.gmra.mxu0 %vm5198_vm5, %v19542_v9  ;;  %12829 = vmatmul.mubr.msk.f32.gmra.mxu1 %vm5198_vm5, %v19542_v9  ;;  %v17267_v42 = vadd.f32 %v19545_v12, %v17095_v54  ;;  %v9189_v58 = vadd.f32 %v9188_v4, %v17251_v20  ;;  %v19546_v9 = vld [vmem:[#allocation50_spill] sm:$0xff] }
 0x41b   : > { %12635 = vmatprep.mubr.msk.f32.mxu0 %vm5198_vm5, %v19543_v18  ;;  %12831 = vmatprep.mubr.msk.f32.mxu1 %vm5198_vm5, %v19543_v18  ;;  %v6239_v26 = vpop.f32.mrf.mxu0  ;;  %v6947_v27 = vpop.f32.mrf.mxu1  ;;  %v17281_v12 = vadd.f32 %v17095_v54, %v19546_v9 }
 0x41c   : > { %19541 = vst [vmem:[#allocation17_spill] sm:$0xff] %v17253_v39  ;;  %v17263_v3 = vmul.f32 %v6947_v27, %v6239_v26  ;;  %v9190_v18 = vadd.f32 %v9189_v58, %v17267_v42  ;;  %v19559_v39 = vld [vmem:[#allocation178_spill] sm:$0xff] }
 0x41e   : > { %19544 = vst [vmem:[#allocation16_spill] sm:$0xff] %v17263_v3  ;;  %12636 = vmatmul.mubr.msk.f32.gmra.mxu0 %vm5198_vm5, %v15683_v8  ;;  %12832 = vmatmul.mubr.msk.f32.gmra.mxu1 %vm5198_vm5, %v15683_v8  ;;  %v19547_v8 = vld [vmem:[#allocation49_spill] sm:$0xff]  ;;  %v9191_v4 = vadd.f32 %v9190_v18, %v17281_v12 }
 0x41f   : > { %12638 = vmatprep.mubr.msk.f32.mxu0 %vm5198_vm5, %v15739_v36  ;;  %12834 = vmatprep.mubr.msk.f32.mxu1 %vm5198_vm5, %v15739_v36  ;;  %v17293_v36 = vadd.f32 %v19547_v8, %v17095_v54 }
 0x421   : > { %v9192_v18 = vadd.f32 %v9191_v4, %v17293_v36 }
 0x422   : > { %12639 = vmatmul.mubr.msk.f32.gmra.mxu0 %vm5198_vm5, %v15736_v60  ;;  %12835 = vmatmul.mubr.msk.f32.gmra.mxu1 %vm5198_vm5, %v15736_v60  ;;  %v19549_v60 = vld [vmem:[#allocation149_spill] sm:$0xff] }
 0x423   : > { %12641 = vmatprep.mubr.msk.f32.mxu0 %vm5198_vm5, %v15790_v29  ;;  %12837 = vmatprep.mubr.msk.f32.mxu1 %vm5198_vm5, %v15790_v29 }
 0x425   : > { %v12317_v26 = vpop.f32.mrf.mxu0  ;;  %v12513_v27 = vpop.f32.mrf.mxu1 }
 0x426   : > { %v17296_v58 = vmul.f32 %v12513_v27, %v12317_v26  ;;  %12642 = vmatmul.mubr.msk.f32.gmra.mxu0 %vm5198_vm5, %v15787_v15  ;;  %12838 = vmatmul.mubr.msk.f32.gmra.mxu1 %vm5198_vm5, %v15787_v15  ;;  %v19551_v26 = vld [vmem:[#allocation54_spill] sm:$0xff]  ;;  %v19552_v15 = vld [vmem:[#allocation53_spill] sm:$0xff] }
 0x427   : > { %12644 = vmatprep.mubr.msk.f32.mxu0 %vm5198_vm5, %v19549_v60  ;;  %12840 = vmatprep.mubr.msk.f32.mxu1 %vm5198_vm5, %v19549_v60  ;;  %v6249_v29 = vpop.f32.mrf.mxu0  ;;  %v6957_v9 = vpop.f32.mrf.mxu1  ;;  %v17311_v27 = vadd.f32 %v17095_v54, %v19551_v26  ;;  %v17323_v60 = vadd.f32 %v19552_v15, %v17095_v54  ;;  %v19554_v26 = vld [vmem:[#allocation168_spill] sm:$0xff]  ;;  %v19556_v15 = vld [vmem:[#allocation179_spill] sm:$0xff] }
 0x428   : > { %19548 = vst [vmem:[#allocation51_spill] sm:$0xff] %v17296_v58  ;;  %v17306_v8 = vmul.f32 %v6957_v9, %v6249_v29 }
 0x429   : > { %v9193_v4 = vadd.f32 %v9192_v18, %v17311_v27 }
 0x42a   : > { %19550 = vst [vmem:[#allocation59_spill] sm:$0xff] %v17306_v8  ;;  %12645 = vmatmul.mubr.msk.f32.gmra.mxu0 %vm5198_vm5, %v15840_v6  ;;  %12841 = vmatmul.mubr.msk.f32.gmra.mxu1 %vm5198_vm5, %v15840_v6 }
 0x42b   : > { %12647 = vmatprep.mubr.msk.f32.mxu0 %vm5198_vm5, %v15894_v52  ;;  %12843 = vmatprep.mubr.msk.f32.mxu1 %vm5198_vm5, %v15894_v52  ;;  %v9194_v6 = vadd.f32 %v9193_v4, %v17323_v60  ;;  %v19553_v52 = vld [vmem:[#allocation56_spill] sm:$0xff] }
 0x42c   : > { %v17337_v29 = vadd.f32 %v17095_v54, %v19553_v52  ;;  %v19557_v52 = vld [vmem:[#allocation55_spill] sm:$0xff] }
 0x42d   : > { %v17351_v58 = vadd.f32 %v19557_v52, %v17095_v54 }
 0x42e   : > { %12648 = vmatmul.mubr.msk.f32.gmra.mxu0 %vm5198_vm5, %v15891_v30  ;;  %12844 = vmatmul.mubr.msk.f32.gmra.mxu1 %vm5198_vm5, %v15891_v30  ;;  %v9195_v8 = vadd.f32 %v9194_v6, %v17337_v29  ;;  %v19562_v6 = vld [vmem:[#allocation189_spill] sm:$0xff] }
 0x42f   : > { %12650 = vmatprep.mubr.msk.f32.mxu0 %vm5198_vm5, %v15947_v17  ;;  %12846 = vmatprep.mubr.msk.f32.mxu1 %vm5198_vm5, %v15947_v17 }
 0x432   : > { %v12320_v9 = vpop.f32.mrf.mxu0  ;;  %v12516_v18 = vpop.f32.mrf.mxu1  ;;  %12651 = vmatmul.mubr.msk.f32.gmra.mxu0 %vm5198_vm5, %v19554_v26  ;;  %12847 = vmatmul.mubr.msk.f32.gmra.mxu1 %vm5198_vm5, %v19554_v26  ;;  %v19561_v26 = vld [vmem:[#allocation58_spill] sm:$0xff] }
 0x433   : > { %v17343_v30 = vmul.f32 %v12516_v18, %v12320_v9  ;;  %12653 = vmatprep.mubr.msk.f32.mxu0 %vm5198_vm5, %v19556_v15  ;;  %12849 = vmatprep.mubr.msk.f32.mxu1 %vm5198_vm5, %v19556_v15  ;;  %v19560_v9 = vld [vmem:[#allocation190_spill] sm:$0xff]  ;;  %v9196_v18 = vadd.f32 %v9195_v8, %v17351_v58  ;;  %v17367_v15 = vadd.f32 %v17095_v54, %v19561_v26  ;;  %v19565_v26 = vld [vmem:[#allocation200_spill] sm:$0xff] }
 0x434   : > { %v6259_v17 = vpop.f32.mrf.mxu0  ;;  %v6967_v4 = vpop.f32.mrf.mxu1 }
 0x435   : > { %19555 = vst [vmem:[#allocation38_spill] sm:$0xff] %v17343_v30  ;;  %v17354_v3 = vmul.f32 %v6967_v4, %v6259_v17  ;;  %v19563_v17 = vld [vmem:[#allocation201_spill] sm:$0xff]  ;;  %v9197_v8 = vadd.f32 %v9196_v18, %v17367_v15 }
 0x436   : > { %12654 = vmatmul.mubr.msk.f32.gmra.mxu0 %vm5198_vm5, %v19559_v39  ;;  %12850 = vmatmul.mubr.msk.f32.gmra.mxu1 %vm5198_vm5, %v19559_v39  ;;  %v19564_v39 = vld [vmem:[#allocation57_spill] sm:$0xff] }
 0x437   : > { %19558 = vst [vmem:[#allocation37_spill] sm:$0xff] %v17354_v3  ;;  %12656 = vmatprep.mubr.msk.f32.mxu0 %vm5198_vm5, %v19560_v9  ;;  %12852 = vmatprep.mubr.msk.f32.mxu1 %vm5198_vm5, %v19560_v9  ;;  %v17379_v4 = vadd.f32 %v19564_v39, %v17095_v54  ;;  %v19567_v3 = vld [vmem:[#allocation212_spill] sm:$0xff]  ;;  %v19568_v30 = vld [vmem:[#allocation61_spill] sm:$0xff] }
 0x438   : > { %v17395_v16 = vadd.f32 %v17095_v54, %v19568_v30 }
 0x439   : > { %v9198_v18 = vadd.f32 %v9197_v8, %v17379_v4 }
 0x43a   : > { %12657 = vmatmul.mubr.msk.f32.gmra.mxu0 %vm5198_vm5, %v19562_v6  ;;  %12853 = vmatmul.mubr.msk.f32.gmra.mxu1 %vm5198_vm5, %v19562_v6 }
 0x43b   : > { %12659 = vmatprep.mubr.msk.f32.mxu0 %vm5198_vm5, %v19563_v17  ;;  %12855 = vmatprep.mubr.msk.f32.mxu1 %vm5198_vm5, %v19563_v17  ;;  %v9199_v30 = vadd.f32 %v9198_v18, %v17395_v16 }
 0x43e   : > { %v12323_v52 = vpop.f32.mrf.mxu0  ;;  %v12519_v9 = vpop.f32.mrf.mxu1  ;;  %12660 = vmatmul.mubr.msk.f32.gmra.mxu0 %vm5198_vm5, %v19565_v26  ;;  %12856 = vmatmul.mubr.msk.f32.gmra.mxu1 %vm5198_vm5, %v19565_v26  ;;  %v19574_v26 = vld [vmem:[#allocation235_spill] sm:$0xff] }
 0x43f   : > { %v17386_v6 = vmul.f32 %v12519_v9, %v12323_v52  ;;  %12662 = vmatprep.mubr.msk.f32.mxu0 %vm5198_vm5, %v19567_v3  ;;  %12858 = vmatprep.mubr.msk.f32.mxu1 %vm5198_vm5, %v19567_v3  ;;  %v19571_v52 = vld [vmem:[#allocation223_spill] sm:$0xff]  ;;  %v19572_v3 = vld [vmem:[#allocation60_spill] sm:$0xff]  ;;  %v19573_v9 = vld [vmem:[#allocation222_spill] sm:$0xff] }
 0x440   : > { %v6269_v17 = vpop.f32.mrf.mxu0  ;;  %v6977_v39 = vpop.f32.mrf.mxu1  ;;  %v17409_v8 = vadd.f32 %v19572_v3, %v17095_v54  ;;  %v19576_v3 = vld [vmem:[#allocation234_spill] sm:$0xff] }
 0x441   : > { %19566 = vst [vmem:[#allocation72_spill] sm:$0xff] %v17386_v6  ;;  %v17397_v25 = vmul.f32 %v6977_v39, %v6269_v17  ;;  %v19575_v17 = vld [vmem:[#allocation63_spill] sm:$0xff] }
 0x442   : > { %12663 = vmatmul.mubr.msk.f32.gmra.mxu0 %vm5198_vm5, %v19570_v47  ;;  %12859 = vmatmul.mubr.msk.f32.gmra.mxu1 %vm5198_vm5, %v19570_v47  ;;  %v9200_v47 = vadd.f32 %v9199_v30, %v17409_v8  ;;  %v17423_v39 = vadd.f32 %v17095_v54, %v19575_v17  ;;  %v19579_v17 = vld [vmem:[#allocation62_spill] sm:$0xff] }
 0x443   : > { %19569 = vst [vmem:[#allocation40_spill] sm:$0xff] %v17397_v25  ;;  %12665 = vmatprep.mubr.msk.f32.mxu0 %vm5198_vm5, %v19571_v52  ;;  %12861 = vmatprep.mubr.msk.f32.mxu1 %vm5198_vm5, %v19571_v52  ;;  %v19578_v25 = vld [vmem:[#allocation247_spill] sm:$0xff]  ;;  %v17437_v6 = vadd.f32 %v19579_v17, %v17095_v54 }
 0x444   : > { %v9201_v33 = vadd.f32 %v9200_v47, %v17423_v39 }
 0x446   : > { %12666 = vmatmul.mubr.msk.f32.gmra.mxu0 %vm5198_vm5, %v19573_v9  ;;  %12862 = vmatmul.mubr.msk.f32.gmra.mxu1 %vm5198_vm5, %v19573_v9  ;;  %v9202_v47 = vadd.f32 %v9201_v33, %v17437_v6 }
 0x447   : > { %12668 = vmatprep.mubr.msk.f32.mxu0 %vm5198_vm5, %v19574_v26  ;;  %12864 = vmatprep.mubr.msk.f32.mxu1 %vm5198_vm5, %v19574_v26 }
 0x44a   : > { %v12326_v52 = vpop.f32.mrf.mxu0  ;;  %v12522_v18 = vpop.f32.mrf.mxu1  ;;  %12669 = vmatmul.mubr.msk.f32.gmra.mxu0 %vm5198_vm5, %v19576_v3  ;;  %12865 = vmatmul.mubr.msk.f32.gmra.mxu1 %vm5198_vm5, %v19576_v3 }
 0x44b   : > { %v17429_v9 = vmul.f32 %v12522_v18, %v12326_v52  ;;  %12671 = vmatprep.mubr.msk.f32.mxu0 %vm5198_vm5, %v19578_v25  ;;  %12867 = vmatprep.mubr.msk.f32.mxu1 %vm5198_vm5, %v19578_v25  ;;  %v19583_v18 = vld [vmem:[#allocation246_spill] sm:$0xff]  ;;  %v19584_v25 = vld [vmem:[#allocation116_spill] sm:$0xff] }
 0x44c   : > { %v6279_v30 = vpop.f32.mrf.mxu0  ;;  %v6987_v26 = vpop.f32.mrf.mxu1  ;;  %v6996_v51 = vmul.f32 %v19585_v24, %v19584_v25 }
 0x44d   : > { %19577 = vst [vmem:[#allocation71_spill] sm:$0xff] %v17429_v9  ;;  %v17442_v3 = vmul.f32 %v6987_v26, %v6279_v30  ;;  %v19587_v30 = vld [vmem:[#allocation65_spill] sm:$0xff] }
 0x44e   : > { %v12529_v52 = vpop.f32.mrf.mxu0  ;;  %12672 = vmatmul.mubr.msk.f32.gmra.mxu0 %vm5198_vm5, %v19583_v18  ;;  %v12725_v9 = vpop.f32.mrf.mxu1  ;;  %12868 = vmatmul.mubr.msk.f32.gmra.mxu1 %vm5198_vm5, %v19583_v18  ;;  %v17457_v26 = vadd.f32 %v17095_v54, %v19587_v30 }
 0x44f   : > { %19582 = vst [vmem:[#allocation79_spill] sm:$0xff] %v17442_v3  ;;  %v7833_v17 = vmul.f32 %v12529_v52, %v6997_v37  ;;  %12674 = vmatprep.mubr.msk.f32.mxu0 %vm5198_vm5, %v19586_v23  ;;  %12870 = vmatprep.mubr.msk.f32.mxu1 %vm5198_vm5, %v19586_v23  ;;  %v19589_v37 = vld [vmem:[#allocation122_spill] sm:$0xff]  ;;  %v19590_v23 = vld [vmem:[#allocation217_spill] sm:$0xff] }
 0x450   : > { %v7193_v38 = vpop.f32.mrf.mxu0  ;;  %v8029_v46 = vpop.f32.mrf.mxu1  ;;  %v6998_v52 = vmul.f32 %v19590_v23, %v19589_v37  ;;  %v9203_v37 = vadd.f32 %v9202_v47, %v17457_v26  ;;  %v19595_v23 = vld [vmem:[#allocation270_spill] sm:$0xff] }
 0x451   : > { %v8669_v3 = vmul.f32 %v12725_v9, %v7833_v17  ;;  %v7832_v18 = vmul.f32 %v7193_v38, %v6996_v51  ;;  %v19592_v51 = vld [vmem:[#allocation119_spill] sm:$0xff]  ;;  %v19593_v9 = vld [vmem:[#allocation216_spill] sm:$0xff] }
 0x452   : > { %v12532_v55 = vpop.f32.mrf.mxu0  ;;  %12675 = vmatmul.mubr.msk.f32.gmra.mxu0 %vm5198_vm5, %v19588_v10  ;;  %v12728_v24 = vpop.f32.mrf.mxu1  ;;  %12871 = vmatmul.mubr.msk.f32.gmra.mxu1 %vm5198_vm5, %v19588_v10  ;;  %v6999_v17 = vmul.f32 %v19593_v9, %v19592_v51  ;;  %v17474_v10 = vadd.f32 %v19594_v49, %v17095_v54  ;;  %v19596_v51 = vld [vmem:[#allocation129_spill] sm:$0xff]  ;;  %v19597_v9 = vld [vmem:[#allocation220_spill] sm:$0xff] }
 0x453   : > { %v8797_v25 = vmul.f32 %v8669_v3, %v17111_v2  ;;  %v8668_v33 = vmul.f32 %v8029_v46, %v7832_v18  ;;  %12677 = vmatprep.mubr.msk.f32.mxu0 %vm5198_vm5, %v19591_v5  ;;  %12873 = vmatprep.mubr.msk.f32.mxu1 %vm5198_vm5, %v19591_v5  ;;  %v7000_v57 = vmul.f32 %v19597_v9, %v19596_v51 }
 0x454   : > { %v7203_v38 = vpop.f32.mrf.mxu0  ;;  %v8039_v30 = vpop.f32.mrf.mxu1  ;;  %v7835_v46 = vmul.f32 %v12532_v55, %v6999_v17  ;;  %v19600_v55 = vld [vmem:[#allocation219_spill] sm:$0xff] }
 0x455   : > { %v8796_v2 = vmul.f32 %v8668_v33, %v17115_v11  ;;  %v7834_v3 = vmul.f32 %v7203_v38, %v6998_v52  ;;  %8926 = vadd.xlane.f32.xlu1 %v8797_v25  ;;  %v19599_v11 = vld [vmem:[#allocation126_spill] sm:$0xff]  ;;  %v9204_v33 = vadd.f32 %v9203_v37, %v17474_v10  ;;  %v19601_v17 = vld [vmem:[#allocation67_spill] sm:$0xff] }
 0x456   : > { %v12535_v18 = vpop.f32.mrf.mxu0  ;;  %12678 = vmatmul.mubr.msk.f32.gmra.mxu0 %vm5198_vm5, %v19595_v23  ;;  %v12731_v5 = vpop.f32.mrf.mxu1  ;;  %12874 = vmatmul.mubr.msk.f32.gmra.mxu1 %vm5198_vm5, %v19595_v23  ;;  %v7001_v47 = vmul.f32 %v19600_v55, %v19599_v11  ;;  %v17493_v38 = vadd.f32 %v17095_v54, %v19601_v17  ;;  %v8671_v23 = vmul.f32 %v12728_v24, %v7835_v46  ;;  %v19604_v11 = vld [vmem:[#allocation226_spill] sm:$0xff] }
 0x457   : > { %v8670_v49 = vmul.f32 %v8039_v30, %v7834_v3  ;;  %12680 = vmatprep.mubr.msk.f32.mxu0 %vm5198_vm5, %v19598_v32  ;;  %12876 = vmatprep.mubr.msk.f32.mxu1 %vm5198_vm5, %v19598_v32 }
 0x458   : > { %8924 = vadd.xlane.f32.xlu0 %v8796_v2  ;;  %v7213_v52 = vpop.f32.mrf.mxu0  ;;  %v8049_v25 = vpop.f32.mrf.mxu1  ;;  %v7837_v51 = vmul.f32 %v12535_v18, %v7001_v47  ;;  %v19603_v2 = vld [vmem:[#allocation133_spill] sm:$0xff]  ;;  %v8799_v17 = vmul.f32 %v8671_v23, %v17143_v62  ;;  %v19612_v62 = vld [vmem:[#allocation136_spill] sm:$0xff] }
 0x459   : > { %v8798_v30 = vmul.f32 %v8670_v49, %v17131_v35  ;;  %v7836_v3 = vmul.f32 %v7213_v52, %v7000_v57  ;;  %v7002_v37 = vmul.f32 %v19604_v11, %v19603_v2  ;;  %v19606_v57 = vld [vmem:[#allocation35_spill] sm:$0xff]  ;;  %v19607_v35 = vld [vmem:[#allocation224_spill] sm:$0xff]  ;;  %v19608_v49 = vld [vmem:[#allocation66_spill] sm:$0xff] }
 0x45a   : > { %v12538_v9 = vpop.f32.mrf.mxu0  ;;  %12681 = vmatmul.mubr.msk.f32.gmra.mxu0 %vm5198_vm5, %v19602_v14  ;;  %v12734_v32 = vpop.f32.mrf.mxu1  ;;  %12877 = vmatmul.mubr.msk.f32.gmra.mxu1 %vm5198_vm5, %v19602_v14  ;;  %v7003_v24 = vmul.f32 %v19607_v35, %v19606_v57  ;;  %v17510_v47 = vadd.f32 %v19608_v49, %v17095_v54  ;;  %v9205_v14 = vadd.f32 %v9204_v33, %v17493_v38  ;;  %v19609_v11 = vld [vmem:[#allocation294_spill] sm:$0xff]  ;;  %v19610_v57 = vld [vmem:[#allocation139_spill] sm:$0xff]  ;;  %v19611_v35 = vld [vmem:[#allocation229_spill] sm:$0xff] }
 0x45b   : > { %v8672_v55 = vmul.f32 %v8049_v25, %v7836_v3  ;;  %12683 = vmatprep.mubr.msk.f32.mxu0 %vm5198_vm5, %v19605_v48  ;;  %12879 = vmatprep.mubr.msk.f32.mxu1 %vm5198_vm5, %v19605_v48  ;;  %v8673_v3 = vmul.f32 %v12731_v5, %v7837_v51  ;;  %v7004_v49 = vmul.f32 %v19611_v35, %v19610_v57 }
 0x45c   : > { %8928 = vadd.xlane.f32.xlu0 %v8798_v30  ;;  %v7223_v46 = vpop.f32.mrf.mxu0  ;;  %v8059_v18 = vpop.f32.mrf.mxu1  ;;  %v7839_v2 = vmul.f32 %v12538_v9, %v7003_v24  ;;  %v9206_v51 = vadd.f32 %v9205_v14, %v17510_v47  ;;  %v19614_v9 = vld [vmem:[#allocation69_spill] sm:$0xff] }
 0x45d   : > { %v8800_v52 = vmul.f32 %v8672_v55, %v17161_v56  ;;  %v7838_v25 = vmul.f32 %v7223_v46, %v7002_v37  ;;  %v19613_v56 = vld [vmem:[#allocation227_spill] sm:$0xff]  ;;  %v17530_v37 = vadd.f32 %v17095_v54, %v19614_v9  ;;  %v8801_v46 = vmul.f32 %v8673_v3, %v17175_v0  ;;  %v19615_v14 = vld [vmem:[#allocation145_spill] sm:$0xff]  ;;  %v19621_v9 = vld [vmem:[#allocation152_spill] sm:$0xff] }
 0x45e   : > { %v12541_v48 = vpop.f32.mrf.mxu0  ;;  %12684 = vmatmul.mubr.msk.f32.gmra.mxu0 %vm5198_vm5, %v19609_v11  ;;  %v12737_v30 = vpop.f32.mrf.mxu1  ;;  %12880 = vmatmul.mubr.msk.f32.gmra.mxu1 %vm5198_vm5, %v19609_v11  ;;  %v7005_v5 = vmul.f32 %v19613_v56, %v19612_v62  ;;  %v19618_v0 = vld [vmem:[#allocation231_spill] sm:$0xff] }
 0x45f   : > { %v8674_v63 = vmul.f32 %v8059_v18, %v7838_v25  ;;  %12686 = vmatprep.mubr.msk.f32.mxu0 %vm5198_vm5, %v16510_v40  ;;  %12882 = vmatprep.mubr.msk.f32.mxu1 %vm5198_vm5, %v16510_v40  ;;  %v8675_v18 = vmul.f32 %v12734_v32, %v7839_v2  ;;  %v19619_v2 = vld [vmem:[#allocation68_spill] sm:$0xff] }
 0x460   : > { %8932 = vadd.xlane.f32.xlu1 %v8800_v52  ;;  %8930 = vadd.xlane.f32.xlu0 %v8799_v17  ;;  %v7233_v33 = vpop.f32.mrf.mxu0  ;;  %v8069_v23 = vpop.f32.mrf.mxu1  ;;  %v7841_v40 = vmul.f32 %v12541_v48, %v7005_v5  ;;  %v19616_v17 = vld [vmem:[#allocation232_spill] sm:$0xff]  ;;  %v9207_v48 = vadd.f32 %v9206_v51, %v17530_v37 }
 0x461   : > { %v8802_v55 = vmul.f32 %v8674_v63, %v17189_v13  ;;  %v7840_v24 = vmul.f32 %v7233_v33, %v7004_v49  ;;  %v7006_v11 = vmul.f32 %v19616_v17, %v19615_v14  ;;  %v19617_v63 = vld [vmem:[#allocation142_spill] sm:$0xff]  ;;  %v8803_v62 = vmul.f32 %v8675_v18, %v17205_v28  ;;  %v19620_v33 = vld [vmem:[#allocation316_spill] sm:$0xff] }
 0x462   : > { %v12544_v25 = vpop.f32.mrf.mxu0  ;;  %12687 = vmatmul.mubr.msk.f32.gmra.mxu0 %vm5198_vm5, %v16507_v50  ;;  %v12740_v52 = vpop.f32.mrf.mxu1  ;;  %12883 = vmatmul.mubr.msk.f32.gmra.mxu1 %vm5198_vm5, %v16507_v50  ;;  %v7007_v13 = vmul.f32 %v19618_v0, %v19617_v63  ;;  %v17548_v50 = vadd.f32 %v19619_v2, %v17095_v54  ;;  %v8677_v56 = vmul.f32 %v12737_v30, %v7841_v40  ;;  %v19623_v51 = vld [vmem:[#allocation328_spill] sm:$0xff]  ;;  %v19626_v14 = vld [vmem:[#allocation30_spill] sm:$0xff] }
 0x463   : > { %v8676_v57 = vmul.f32 %v8069_v23, %v7840_v24  ;;  %12689 = vmatprep.mubr.msk.f32.mxu0 %vm5198_vm5, %v16552_v53  ;;  %12885 = vmatprep.mubr.msk.f32.mxu1 %vm5198_vm5, %v16552_v53  ;;  %v19624_v28 = vld [vmem:[#allocation148_spill] sm:$0xff]  ;;  %v17568_v17 = vadd.f32 %v17095_v54, %v19626_v14 }
 0x464   : > { %8936 = vadd.xlane.f32.xlu1 %v8802_v55  ;;  %8934 = vadd.xlane.f32.xlu0 %v8801_v46  ;;  %v7243_v32 = vpop.f32.mrf.mxu0  ;;  %v8079_v3 = vpop.f32.mrf.mxu1  ;;  %v7843_v53 = vmul.f32 %v12544_v25, %v7007_v13  ;;  %v19622_v55 = vld [vmem:[#allocation238_spill] sm:$0xff]  ;;  %v9208_v25 = vadd.f32 %v9207_v48, %v17548_v50  ;;  %v8805_v63 = vmul.f32 %v8677_v56, %v17233_v22  ;;  %v19631_v22 = vld [vmem:[#allocation155_spill] sm:$0xff]  ;;  %v19635_v14 = vld [vmem:[#allocation164_spill] sm:$0xff] }
 0x465   : > { %v8804_v35 = vmul.f32 %v8676_v57, %v17221_v43  ;;  %v7842_v49 = vmul.f32 %v7243_v32, %v7006_v11  ;;  %v7008_v24 = vmul.f32 %v19622_v55, %v19621_v9  ;;  %v19625_v43 = vld [vmem:[#allocation236_spill] sm:$0xff]  ;;  %v19628_v48 = vld [vmem:[#allocation158_spill] sm:$0xff] }
 0x466   : > { %v12547_v5 = vpop.f32.mrf.mxu0  ;;  %12690 = vmatmul.mubr.msk.f32.gmra.mxu0 %vm5198_vm5, %v19620_v33  ;;  %v12743_v23 = vpop.f32.mrf.mxu1  ;;  %12886 = vmatmul.mubr.msk.f32.gmra.mxu1 %vm5198_vm5, %v19620_v33  ;;  %v7009_v30 = vmul.f32 %v19625_v43, %v19624_v28  ;;  %v8679_v0 = vmul.f32 %v12740_v52, %v7843_v53  ;;  %v19630_v33 = vld [vmem:[#allocation339_spill] sm:$0xff]  ;;  %v9209_v55 = vadd.f32 %v9208_v25, %v17568_v17  ;;  %v19637_v25 = vld [vmem:[#allocation349_spill] sm:$0xff] }
 0x467   : > { %v8678_v46 = vmul.f32 %v8079_v3, %v7842_v49  ;;  %12692 = vmatprep.mubr.msk.f32.mxu0 %vm5198_vm5, %v19623_v51  ;;  %12888 = vmatprep.mubr.msk.f32.mxu1 %vm5198_vm5, %v19623_v51  ;;  %v19627_v3 = vld [vmem:[#allocation327_spill] sm:$0xff] }
 0x468   : > { %8940 = vadd.xlane.f32.xlu1 %v8804_v35  ;;  %8938 = vadd.xlane.f32.xlu0 %v8803_v62  ;;  %v7253_v18 = vpop.f32.mrf.mxu0  ;;  %v8089_v40 = vpop.f32.mrf.mxu1  ;;  %v7845_v13 = vmul.f32 %v12547_v5, %v7009_v30  ;;  %v19629_v35 = vld [vmem:[#allocation241_spill] sm:$0xff]  ;;  %v19633_v5 = vld [vmem:[#allocation70_spill] sm:$0xff]  ;;  %v8807_v51 = vmul.f32 %v8679_v0, %v17267_v42 }
 0x469   : > { %v8806_v11 = vmul.f32 %v8678_v46, %v17251_v20  ;;  %v7844_v57 = vmul.f32 %v7253_v18, %v7008_v24  ;;  %v7010_v49 = vmul.f32 %v19629_v35, %v19628_v48  ;;  %v19632_v20 = vld [vmem:[#allocation239_spill] sm:$0xff]  ;;  %v17586_v9 = vadd.f32 %v19633_v5, %v17095_v54  ;;  %v19634_v18 = vld [vmem:[#allocation338_spill] sm:$0xff]  ;;  %v19638_v42 = vld [vmem:[#allocation161_spill] sm:$0xff] }
 0x46a   : > { %v12550_v32 = vpop.f32.mrf.mxu0  ;;  %12693 = vmatmul.mubr.msk.f32.gmra.mxu0 %vm5198_vm5, %v19627_v3  ;;  %v12746_v2 = vpop.f32.mrf.mxu1  ;;  %12889 = vmatmul.mubr.msk.f32.gmra.mxu1 %vm5198_vm5, %v19627_v3  ;;  %v7011_v52 = vmul.f32 %v19632_v20, %v19631_v22  ;;  %v8681_v28 = vmul.f32 %v12743_v23, %v7845_v13  ;;  %v19640_v3 = vld [vmem:[#allocation74_spill] sm:$0xff] }
 0x46b   : > { %v8680_v62 = vmul.f32 %v8089_v40, %v7844_v57  ;;  %12695 = vmatprep.mubr.msk.f32.mxu0 %vm5198_vm5, %v19630_v33  ;;  %12891 = vmatprep.mubr.msk.f32.mxu1 %vm5198_vm5, %v19630_v33  ;;  %v17606_v48 = vadd.f32 %v17095_v54, %v19640_v3  ;;  %v19643_v5 = vld [vmem:[#allocation250_spill] sm:$0xff] }
 0x46c   : > { %8944 = vadd.xlane.f32.xlu1 %v8806_v11  ;;  %8942 = vadd.xlane.f32.xlu0 %v8805_v63  ;;  %v7263_v56 = vpop.f32.mrf.mxu0  ;;  %v8099_v53 = vpop.f32.mrf.mxu1  ;;  %v7847_v43 = vmul.f32 %v12550_v32, %v7011_v52  ;;  %v19636_v11 = vld [vmem:[#allocation244_spill] sm:$0xff]  ;;  %v9210_v32 = vadd.f32 %v9209_v55, %v17586_v9 }
 0x46d   : > { %v8808_v24 = vmul.f32 %v8680_v62, %v17281_v12  ;;  %v7846_v46 = vmul.f32 %v7263_v56, %v7010_v49  ;;  %v7012_v57 = vmul.f32 %v19636_v11, %v19635_v14  ;;  %v19639_v12 = vld [vmem:[#allocation243_spill] sm:$0xff]  ;;  %v8809_v62 = vmul.f32 %v8681_v28, %v17293_v36  ;;  %v19641_v52 = vld [vmem:[#allocation348_spill] sm:$0xff]  ;;  %v19646_v28 = vld [vmem:[#allocation73_spill] sm:$0xff] }
 0x46e   : > { %v12553_v30 = vpop.f32.mrf.mxu0  ;;  %12696 = vmatmul.mubr.msk.f32.gmra.mxu0 %vm5198_vm5, %v19634_v18  ;;  %v12749_v40 = vpop.f32.mrf.mxu1  ;;  %12892 = vmatmul.mubr.msk.f32.gmra.mxu1 %vm5198_vm5, %v19634_v18  ;;  %v7013_v23 = vmul.f32 %v19639_v12, %v19638_v42  ;;  %v8683_v33 = vmul.f32 %v12746_v2, %v7847_v43  ;;  %v19644_v36 = vld [vmem:[#allocation167_spill] sm:$0xff]  ;;  %v17624_v43 = vadd.f32 %v19646_v28, %v17095_v54  ;;  %v19648_v12 = vld [vmem:[#allocation177_spill] sm:$0xff] }
 0x46f   : > { %v8682_v63 = vmul.f32 %v8099_v53, %v7846_v46  ;;  %12698 = vmatprep.mubr.msk.f32.mxu0 %vm5198_vm5, %v19637_v25  ;;  %12894 = vmatprep.mubr.msk.f32.mxu1 %vm5198_vm5, %v19637_v25  ;;  %v19642_v53 = vld [vmem:[#allocation171_spill] sm:$0xff]  ;;  %v19647_v25 = vld [vmem:[#allocation358_spill] sm:$0xff] }
 0x470   : > { %8948 = vadd.xlane.f32.xlu1 %v8808_v24  ;;  %8946 = vadd.xlane.f32.xlu0 %v8807_v51  ;;  %v7273_v0 = vpop.f32.mrf.mxu0  ;;  %v8109_v13 = vpop.f32.mrf.mxu1  ;;  %v7849_v22 = vmul.f32 %v12553_v30, %v7013_v23  ;;  %v7014_v55 = vmul.f32 %v19643_v5, %v19642_v53  ;;  %v9211_v30 = vadd.f32 %v9210_v32, %v17606_v48  ;;  %v19649_v23 = vld [vmem:[#allocation253_spill] sm:$0xff]  ;;  %v19658_v28 = vld [vmem:[#allocation75_spill] sm:$0xff] }
 0x471   : > { %v8810_v35 = vmul.f32 %v8682_v63, %v17311_v27  ;;  %v7848_v49 = vmul.f32 %v7273_v0, %v7012_v57  ;;  %v19645_v27 = vld [vmem:[#allocation248_spill] sm:$0xff]  ;;  %v8811_v11 = vmul.f32 %v8683_v33, %v17323_v60  ;;  %v7016_v0 = vmul.f32 %v19649_v23, %v19648_v12  ;;  %v19650_v60 = vld [vmem:[#allocation174_spill] sm:$0xff]  ;;  %v19660_v23 = vld [vmem:[#allocation193_spill] sm:$0xff] }
 0x472   : > { %v12556_v20 = vpop.f32.mrf.mxu0  ;;  %12699 = vmatmul.mubr.msk.f32.gmra.mxu0 %vm5198_vm5, %v19641_v52  ;;  %v12752_v56 = vpop.f32.mrf.mxu1  ;;  %12895 = vmatmul.mubr.msk.f32.gmra.mxu1 %vm5198_vm5, %v19641_v52  ;;  %v7015_v2 = vmul.f32 %v19645_v27, %v19644_v36  ;;  %v8685_v57 = vmul.f32 %v12749_v40, %v7849_v22 }
 0x473   : > { %v8684_v24 = vmul.f32 %v8109_v13, %v7848_v49  ;;  %12701 = vmatprep.mubr.msk.f32.mxu0 %vm5198_vm5, %v16694_v7  ;;  %12897 = vmatprep.mubr.msk.f32.mxu1 %vm5198_vm5, %v16694_v7  ;;  %v19652_v49 = vld [vmem:[#allocation76_spill] sm:$0xff] }
 0x474   : > { %8952 = vadd.xlane.f32.xlu1 %v8810_v35  ;;  %8950 = vadd.xlane.f32.xlu0 %v8809_v62  ;;  %v7283_v46 = vpop.f32.mrf.mxu0  ;;  %v8119_v51 = vpop.f32.mrf.mxu1  ;;  %v7851_v7 = vmul.f32 %v12556_v20, %v7015_v2  ;;  %v9212_v35 = vadd.f32 %v9211_v30, %v17624_v43  ;;  %v17644_v62 = vadd.f32 %v17095_v54, %v19652_v49  ;;  %v19655_v2 = vld [vmem:[#allocation372_spill] sm:$0xff] }
 0x475   : > { %v8812_v18 = vmul.f32 %v8684_v24, %v17337_v29  ;;  %v7850_v14 = vmul.f32 %v7283_v46, %v7014_v55  ;;  %v19651_v29 = vld [vmem:[#allocation251_spill] sm:$0xff]  ;;  %v8813_v20 = vmul.f32 %v8685_v57, %v17351_v58  ;;  %v19653_v55 = vld [vmem:[#allocation185_spill] sm:$0xff]  ;;  %v19654_v24 = vld [vmem:[#allocation256_spill] sm:$0xff] }
 0x476   : > { %v12559_v63 = vpop.f32.mrf.mxu0  ;;  %12702 = vmatmul.mubr.msk.f32.gmra.mxu0 %vm5198_vm5, %v19647_v25  ;;  %v12755_v42 = vpop.f32.mrf.mxu1  ;;  %12898 = vmatmul.mubr.msk.f32.gmra.mxu1 %vm5198_vm5, %v19647_v25  ;;  %v7017_v40 = vmul.f32 %v19651_v29, %v19650_v60  ;;  %v8687_v52 = vmul.f32 %v12752_v56, %v7851_v7  ;;  %v7018_v36 = vmul.f32 %v19654_v24, %v19653_v55  ;;  %v19656_v58 = vld [vmem:[#allocation182_spill] sm:$0xff]  ;;  %v19659_v25 = vld [vmem:[#allocation371_spill] sm:$0xff] }
 0x477   : > { %v8686_v13 = vmul.f32 %v8119_v51, %v7850_v14  ;;  %12704 = vmatprep.mubr.msk.f32.mxu0 %vm5198_vm5, %v16728_v31  ;;  %12900 = vmatprep.mubr.msk.f32.mxu1 %vm5198_vm5, %v16728_v31  ;;  %v9213_v30 = vadd.f32 %v9212_v35, %v17644_v62  ;;  %v19662_v29 = vld [vmem:[#allocation378_spill] sm:$0xff] }
 0x478   : > { %8956 = vadd.xlane.f32.xlu1 %v8812_v18  ;;  %8954 = vadd.xlane.f32.xlu0 %v8811_v11  ;;  %v7293_v32 = vpop.f32.mrf.mxu0  ;;  %v8129_v3 = vpop.f32.mrf.mxu1  ;;  %v7853_v31 = vmul.f32 %v12559_v63, %v7017_v40  ;;  %v8815_v11 = vmul.f32 %v8687_v52, %v17379_v4  ;;  %v19664_v4 = vld [vmem:[#allocation260_spill] sm:$0xff]  ;;  %v19666_v55 = vld [vmem:[#allocation78_spill] sm:$0xff] }
 0x479   : > { %v8814_v33 = vmul.f32 %v8686_v13, %v17367_v15  ;;  %v7852_v22 = vmul.f32 %v7293_v32, %v7016_v0  ;;  %v19657_v15 = vld [vmem:[#allocation255_spill] sm:$0xff]  ;;  %v19661_v0 = vld [vmem:[#allocation262_spill] sm:$0xff]  ;;  %v17688_v24 = vadd.f32 %v17095_v54, %v19666_v55  ;;  %v19682_v55 = vld [vmem:[#allocation272_spill] sm:$0xff] }
 0x47a   : > { %v12562_v53 = vpop.f32.mrf.mxu0  ;;  %12705 = vmatmul.mubr.msk.f32.gmra.mxu0 %vm5198_vm5, %v16725_v59  ;;  %v12758_v5 = vpop.f32.mrf.mxu1  ;;  %12901 = vmatmul.mubr.msk.f32.gmra.mxu1 %vm5198_vm5, %v16725_v59  ;;  %v7019_v56 = vmul.f32 %v19657_v15, %v19656_v58  ;;  %v17662_v59 = vadd.f32 %v19658_v28, %v17095_v54  ;;  %v8689_v57 = vmul.f32 %v12755_v42, %v7853_v31  ;;  %v19665_v31 = vld [vmem:[#allocation376_spill] sm:$0xff]  ;;  %v19669_v58 = vld [vmem:[#allocation383_spill] sm:$0xff] }
 0x47b   : > { %v8688_v27 = vmul.f32 %v8129_v3, %v7852_v22  ;;  %12707 = vmatprep.mubr.msk.f32.mxu0 %vm5198_vm5, %v19655_v2  ;;  %12903 = vmatprep.mubr.msk.f32.mxu1 %vm5198_vm5, %v19655_v2  ;;  %v7020_v13 = vmul.f32 %v19661_v0, %v19660_v23  ;;  %v19674_v0 = vld [vmem:[#allocation207_spill] sm:$0xff] }
 0x47c   : > { %8960 = vadd.xlane.f32.xlu1 %v8814_v33  ;;  %8958 = vadd.xlane.f32.xlu0 %v8813_v20  ;;  %v7303_v46 = vpop.f32.mrf.mxu0  ;;  %v8139_v51 = vpop.f32.mrf.mxu1  ;;  %v7855_v7 = vmul.f32 %v12562_v53, %v7019_v56  ;;  %v9214_v3 = vadd.f32 %v9213_v30, %v17662_v59  ;;  %v8817_v33 = vmul.f32 %v8689_v57, %v17409_v8  ;;  %v19670_v8 = vld [vmem:[#allocation196_spill] sm:$0xff] }
 0x47d   : > { %v8816_v18 = vmul.f32 %v8688_v27, %v17395_v16  ;;  %v7854_v14 = vmul.f32 %v7303_v46, %v7018_v36  ;;  %v19663_v16 = vld [vmem:[#allocation188_spill] sm:$0xff]  ;;  %v19667_v36 = vld [vmem:[#allocation199_spill] sm:$0xff]  ;;  %v19668_v27 = vld [vmem:[#allocation265_spill] sm:$0xff] }
 0x47e   : > { %v12565_v63 = vpop.f32.mrf.mxu0  ;;  %12708 = vmatmul.mubr.msk.f32.gmra.mxu0 %vm5198_vm5, %v19659_v25  ;;  %v12761_v12 = vpop.f32.mrf.mxu1  ;;  %12904 = vmatmul.mubr.msk.f32.gmra.mxu1 %vm5198_vm5, %v19659_v25  ;;  %v7021_v42 = vmul.f32 %v19664_v4, %v19663_v16  ;;  %v8691_v22 = vmul.f32 %v12758_v5, %v7855_v7  ;;  %v19671_v5 = vld [vmem:[#allocation263_spill] sm:$0xff]  ;;  %v9215_v23 = vadd.f32 %v9214_v3, %v17688_v24 }
 0x47f   : > { %v8690_v60 = vmul.f32 %v8139_v51, %v7854_v14  ;;  %12710 = vmatprep.mubr.msk.f32.mxu0 %vm5198_vm5, %v19662_v29  ;;  %12906 = vmatprep.mubr.msk.f32.mxu1 %vm5198_vm5, %v19662_v29  ;;  %v7023_v15 = vmul.f32 %v19671_v5, %v19670_v8  ;;  %v19672_v51 = vld [vmem:[#allocation77_spill] sm:$0xff] }
 0x480   : > { %8964 = vadd.xlane.f32.xlu1 %v8816_v18  ;;  %8962 = vadd.xlane.f32.xlu0 %v8815_v11  ;;  %v7313_v40 = vpop.f32.mrf.mxu0  ;;  %v8149_v32 = vpop.f32.mrf.mxu1  ;;  %v7857_v20 = vmul.f32 %v12565_v63, %v7021_v42  ;;  %v17700_v28 = vadd.f32 %v19672_v51, %v17095_v54  ;;  %v8819_v14 = vmul.f32 %v8691_v22, %v17437_v6  ;;  %v19673_v63 = vld [vmem:[#allocation381_spill] sm:$0xff]  ;;  %v19676_v6 = vld [vmem:[#allocation204_spill] sm:$0xff] }
 0x481   : > { %v8818_v35 = vmul.f32 %v8690_v60, %v17423_v39  ;;  %v7856_v49 = vmul.f32 %v7313_v40, %v7020_v13  ;;  %v7022_v39 = vmul.f32 %v19668_v27, %v19667_v36  ;;  %v19675_v13 = vld [vmem:[#allocation268_spill] sm:$0xff]  ;;  %v19678_v22 = vld [vmem:[#allocation81_spill] sm:$0xff] }
 0x482   : > { %v12568_v52 = vpop.f32.mrf.mxu0  ;;  %12711 = vmatmul.mubr.msk.f32.gmra.mxu0 %vm5198_vm5, %v19665_v31  ;;  %v12764_v53 = vpop.f32.mrf.mxu1  ;;  %12907 = vmatmul.mubr.msk.f32.gmra.mxu1 %vm5198_vm5, %v19665_v31  ;;  %v8693_v11 = vmul.f32 %v12761_v12, %v7857_v20  ;;  %v7024_v60 = vmul.f32 %v19675_v13, %v19674_v0  ;;  %v17726_v20 = vadd.f32 %v17095_v54, %v19678_v22 }
 0x483   : > { %v8692_v2 = vmul.f32 %v8149_v32, %v7856_v49  ;;  %12713 = vmatprep.mubr.msk.f32.mxu0 %vm5198_vm5, %v19669_v58  ;;  %12909 = vmatprep.mubr.msk.f32.mxu1 %vm5198_vm5, %v19669_v58  ;;  %v7859_v57 = vmul.f32 %v12568_v52, %v7023_v15  ;;  %v19680_v52 = vld [vmem:[#allocation274_spill] sm:$0xff] }
 0x484   : > { %8968 = vadd.xlane.f32.xlu1 %v8818_v35  ;;  %8966 = vadd.xlane.f32.xlu0 %v8817_v33  ;;  %v7323_v56 = vpop.f32.mrf.mxu0  ;;  %v8159_v46 = vpop.f32.mrf.mxu1  ;;  %v8821_v32 = vmul.f32 %v8693_v11, %v17474_v10 }
 0x485   : > { %v8820_v30 = vmul.f32 %v8692_v2, %v17457_v26  ;;  %v7858_v18 = vmul.f32 %v7323_v56, %v7022_v39  ;;  %v19677_v26 = vld [vmem:[#allocation267_spill] sm:$0xff]  ;;  %v8695_v3 = vmul.f32 %v12764_v53, %v7859_v57  ;;  %v19681_v53 = vld [vmem:[#allocation210_spill] sm:$0xff] }
 0x486   : > { %v12571_v7 = vpop.f32.mrf.mxu0  ;;  %12714 = vmatmul.mubr.msk.f32.gmra.mxu0 %vm5198_vm5, %v19673_v63  ;;  %v12767_v25 = vpop.f32.mrf.mxu1  ;;  %12910 = vmatmul.mubr.msk.f32.gmra.mxu1 %vm5198_vm5, %v19673_v63  ;;  %v7025_v12 = vmul.f32 %v19677_v26, %v19676_v6  ;;  %v7027_v36 = vmul.f32 %v19682_v55, %v19681_v53  ;;  %v19687_v63 = vld [vmem:[#allocation275_spill] sm:$0xff]  ;;  %v17759_v53 = vld [vmem:[%s18790_s4] ss:$0 sm:$0xff]  ;;  %v19693_v55 = vld [vmem:[#allocation82_spill] sm:$0xff] }
 0x487   : > { %v8694_v29 = vmul.f32 %v8159_v46, %v7858_v18  ;;  %12716 = vmatprep.mubr.msk.f32.mxu0 %vm5198_vm5, %v16828_v19  ;;  %12912 = vmatprep.mubr.msk.f32.mxu1 %vm5198_vm5, %v16828_v19  ;;  %v9216_v19 = vadd.f32 %v9215_v23, %v17700_v28  ;;  %v8823_v58 = vmul.f32 %v8695_v3, %v17510_v47  ;;  %v19683_v46 = vld [vmem:[#allocation80_spill] sm:$0xff]  ;;  %v19684_v18 = vld [vmem:[#allocation221_spill] sm:$0xff] }
 0x488   : > { %8972 = vadd.xlane.f32.xlu1 %v8820_v30  ;;  %8970 = vadd.xlane.f32.xlu0 %v8819_v14  ;;  %v7333_v16 = vpop.f32.mrf.mxu0  ;;  %v8169_v4 = vpop.f32.mrf.mxu1  ;;  %v7861_v35 = vmul.f32 %v12571_v7, %v7025_v12  ;;  %v17736_v51 = vadd.f32 %v19683_v46, %v17095_v54  ;;  %v19685_v14 = vld [vmem:[#allocation277_spill] sm:$0xff]  ;;  %v19686_v7 = vld [vmem:[#allocation218_spill] sm:$0xff] }
 0x489   : > { %v8822_v42 = vmul.f32 %v8694_v29, %v17493_v38  ;;  %v7860_v40 = vmul.f32 %v7333_v16, %v7024_v60  ;;  %v19679_v38 = vld [vmem:[#allocation215_spill] sm:$0xff]  ;;  %v9217_v30 = vadd.f32 %v9216_v19, %v17726_v20  ;;  %v7028_v11 = vmul.f32 %v19685_v14, %v19684_v18 }
 0x48a   : > { %v12574_v49 = vpop.f32.mrf.mxu0  ;;  %12717 = vmatmul.mubr.msk.f32.gmra.mxu0 %vm5198_vm5, %v16823_v44  ;;  %v12770_v33 = vpop.f32.mrf.mxu1  ;;  %12913 = vmatmul.mubr.msk.f32.gmra.mxu1 %vm5198_vm5, %v16823_v44  ;;  %v7026_v31 = vmul.f32 %v19680_v52, %v19679_v38  ;;  %v8697_v8 = vmul.f32 %v12767_v25, %v7861_v35  ;;  %v19688_v16 = vld [vmem:[#allocation83_spill] sm:$0xff]  ;;  %v19691_v35 = vld [vmem:[#allocation225_spill] sm:$0xff] }
 0x48b   : > { %v8696_v10 = vmul.f32 %v8169_v4, %v7860_v40  ;;  %v7863_v5 = vmul.f32 %v12574_v49, %v7027_v36  ;;  %v9218_v12 = vadd.f32 %v9217_v30, %v17736_v51  ;;  %v17748_v4 = vadd.f32 %v17095_v54, %v19688_v16  ;;  %v19690_v40 = vld [vmem:[#allocation280_spill] sm:$0xff]  ;;  %v19692_v49 = vld [vmem:[#allocation279_spill] sm:$0xff] }
 0x48c   : > { %8976 = vadd.xlane.f32.xlu1 %v8822_v42  ;;  %8974 = vadd.xlane.f32.xlu0 %v8821_v32  ;;  %v7343_v27 = vpop.f32.mrf.mxu0  ;;  %v8179_v39 = vpop.f32.mrf.mxu1  ;;  %v8825_v13 = vmul.f32 %v8697_v8, %v17548_v50  ;;  %v19689_v42 = vld [vmem:[#allocation228_spill] sm:$0xff]  ;;  %v17763_v36 = vadd.f32 %v17759_v53, %v19693_v55 }
 0x48d   : > { %v8824_v2 = vmul.f32 %v8696_v10, %v17530_v37  ;;  %v7862_v44 = vmul.f32 %v7343_v27, %v7026_v31  ;;  %v7029_v37 = vmul.f32 %v19687_v63, %v19686_v7  ;;  %v8699_v60 = vmul.f32 %v12770_v33, %v7863_v5  ;;  %v19698_v63 = vld [vmem:[#allocation85_spill] sm:$0xff] }
 0x48e   : > { %v12577_v15 = vpop.f32.mrf.mxu0  ;;  %v12773_v56 = vpop.f32.mrf.mxu1  ;;  %v7030_v32 = vmul.f32 %v19690_v40, %v19689_v42  ;;  %v9219_v27 = vadd.f32 %v9218_v12, %v17748_v4 }
 0x48f   : > { %v8698_v57 = vmul.f32 %v8179_v39, %v7862_v44  ;;  %v7865_v29 = vmul.f32 %v12577_v15, %v7029_v37  ;;  %v8827_v38 = vmul.f32 %v8699_v60, %v17586_v9  ;;  %v19694_v39 = vld [vmem:[#allocation233_spill] sm:$0xff]  ;;  %v19696_v9 = vld [vmem:[#allocation230_spill] sm:$0xff]  ;;  %v2334_v37 = vadd.f32 %v17759_v53, %v19698_v63  ;;  %v19702_v60 = vld [vmem:[#allocation287_spill] sm:$0xff] }
 0x490   : > { %8980 = vadd.xlane.f32.xlu1 %v8824_v2  ;;  %8978 = vadd.xlane.f32.xlu0 %v8823_v58  ;;  %v7353_v47 = vpop.f32.mrf.mxu0  ;;  %v8189_v25 = vpop.f32.mrf.mxu1  ;;  %v19697_v58 = vld [vmem:[#allocation284_spill] sm:$0xff]  ;;  %v9220_v7 = vadd.f32 %v9219_v27, %v17763_v36 }
 0x491   : > { %v8826_v23 = vmul.f32 %v8698_v57, %v17568_v17  ;;  %v7864_v0 = vmul.f32 %v7353_v47, %v7028_v11  ;;  %v7031_v17 = vmul.f32 %v19692_v49, %v19691_v35  ;;  %v8701_v52 = vmul.f32 %v12773_v56, %v7865_v29  ;;  %v19699_v47 = vld [vmem:[#allocation240_spill] sm:$0xff] }
 0x492   : > { %v12580_v6 = vpop.f32.mrf.mxu0  ;;  %v12776_v26 = vpop.f32.mrf.mxu1  ;;  %v7033_v8 = vmul.f32 %v19697_v58, %v19696_v9  ;;  %v9221_v49 = vadd.f32 %v9220_v7, %v2334_v37  ;;  %v19709_v58 = vld [vmem:[#allocation252_spill] sm:$0xff] }
 0x493   : > { %v8700_v3 = vmul.f32 %v8189_v25, %v7864_v0  ;;  %v7867_v31 = vmul.f32 %v12580_v6, %v7031_v17  ;;  %v8829_v30 = vmul.f32 %v8701_v52, %v17624_v43  ;;  %v19700_v25 = vld [vmem:[#allocation289_spill] sm:$0xff] }
 0x494   : > { %8984 = vadd.xlane.f32.xlu1 %v8826_v23  ;;  %8982 = vadd.xlane.f32.xlu0 %v8825_v13  ;;  %v7363_v50 = vpop.f32.mrf.mxu0  ;;  %v8199_v33 = vpop.f32.mrf.mxu1  ;;  %v7034_v23 = vmul.f32 %v19700_v25, %v19699_v47  ;;  %v19701_v13 = vld [vmem:[#allocation237_spill] sm:$0xff]  ;;  %v19713_v25 = vld [vmem:[#allocation86_spill] sm:$0xff] }
 0x495   : > { %v8828_v19 = vmul.f32 %v8700_v3, %v17606_v48  ;;  %v7866_v22 = vmul.f32 %v7363_v50, %v7030_v32  ;;  %v19695_v48 = vld [vmem:[#allocation286_spill] sm:$0xff]  ;;  %v8703_v18 = vmul.f32 %v12776_v26, %v7867_v31  ;;  %v7035_v29 = vmul.f32 %v19702_v60, %v19701_v13  ;;  %v19703_v3 = vld [vmem:[#allocation84_spill] sm:$0xff]  ;;  %v19704_v17 = vld [vmem:[#allocation245_spill] sm:$0xff] }
 0x496   : > { %v12583_v54 = vpop.f32.mrf.mxu0  ;;  %v12779_v10 = vpop.f32.mrf.mxu1  ;;  %v7032_v2 = vmul.f32 %v19695_v48, %v19694_v39  ;;  %v17783_v35 = vadd.f32 %v17759_v53, %v19703_v3  ;;  %v19705_v50 = vld [vmem:[#allocation292_spill] sm:$0xff]  ;;  %v19714_v13 = vld [vmem:[#allocation257_spill] sm:$0xff] }
 0x497   : > { %v8702_v44 = vmul.f32 %v8199_v33, %v7866_v22  ;;  %v7869_v14 = vmul.f32 %v12583_v54, %v7033_v8  ;;  %v8831_v12 = vmul.f32 %v8703_v18, %v17662_v59  ;;  %v7036_v33 = vmul.f32 %v19705_v50, %v19704_v17  ;;  %v19706_v22 = vld [vmem:[#allocation242_spill] sm:$0xff]  ;;  %v19715_v60 = vld [vmem:[#allocation301_spill] sm:$0xff]  ;;  %v19719_v50 = vld [vmem:[#allocation88_spill] sm:$0xff] }
 0x498   : > { %8988 = vadd.xlane.f32.xlu1 %v8828_v19  ;;  %8986 = vadd.xlane.f32.xlu0 %v8827_v38  ;;  %v7373_v5 = vpop.f32.mrf.mxu0  ;;  %v8209_v15 = vpop.f32.mrf.mxu1  ;;  %v19707_v38 = vld [vmem:[#allocation291_spill] sm:$0xff]  ;;  %v19710_v8 = vld [vmem:[#allocation298_spill] sm:$0xff] }
 0x499   : > { %v8830_v56 = vmul.f32 %v8702_v44, %v17644_v62  ;;  %v7868_v46 = vmul.f32 %v7373_v5, %v7032_v2  ;;  %v8705_v16 = vmul.f32 %v12779_v10, %v7869_v14  ;;  %v7037_v52 = vmul.f32 %v19707_v38, %v19706_v22  ;;  %v19708_v44 = vld [vmem:[#allocation87_spill] sm:$0xff]  ;;  %v19722_v22 = vld [vmem:[#allocation304_spill] sm:$0xff] }
 0x49a   : > { %v12586_v11 = vpop.f32.mrf.mxu0  ;;  %v12782_v57 = vpop.f32.mrf.mxu1  ;;  %v9222_v2 = vadd.f32 %v9221_v49, %v17783_v35  ;;  %v2344_v9 = vadd.f32 %v17759_v53, %v19708_v44  ;;  %v7038_v5 = vmul.f32 %v19710_v8, %v19709_v58 }
 0x49b   : > { %v8704_v0 = vmul.f32 %v8209_v15, %v7868_v46  ;;  %v7871_v42 = vmul.f32 %v12586_v11, %v7035_v29  ;;  %v8833_v10 = vmul.f32 %v8705_v16, %v17700_v28  ;;  %v19712_v46 = vld [vmem:[#allocation296_spill] sm:$0xff]  ;;  %v7040_v29 = vmul.f32 %v19715_v60, %v19714_v13  ;;  %v19745_v60 = vld [vmem:[#allocation266_spill] sm:$0xff] }
 0x49c   : > { %8992 = vadd.xlane.f32.xlu1 %v8830_v56  ;;  %8990 = vadd.xlane.f32.xlu0 %v8829_v30  ;;  %v7383_v62 = vpop.f32.mrf.mxu0  ;;  %v8219_v43 = vpop.f32.mrf.mxu1  ;;  %v19711_v56 = vld [vmem:[#allocation249_spill] sm:$0xff] }
 0x49d   : > { %v8832_v6 = vmul.f32 %v8704_v0, %v17688_v24  ;;  %v7870_v26 = vmul.f32 %v7383_v62, %v7034_v23  ;;  %v8707_v55 = vmul.f32 %v12782_v57, %v7871_v42  ;;  %v7039_v30 = vmul.f32 %v19712_v46, %v19711_v56 }
 0x49e   : > { %v12589_v40 = vpop.f32.mrf.mxu0  ;;  %v12785_v32 = vpop.f32.mrf.mxu1  ;;  %v2349_v23 = vadd.f32 %v17759_v53, %v19713_v25  ;;  %v9223_v0 = vadd.f32 %v9222_v2, %v2344_v9  ;;  %v19731_v2 = vld [vmem:[#allocation92_spill] sm:$0xff] }
 0x49f   : > { %v8706_v19 = vmul.f32 %v8219_v43, %v7870_v26  ;;  %v7873_v27 = vmul.f32 %v12589_v40, %v7037_v52  ;;  %v8835_v11 = vmul.f32 %v8707_v55, %v17736_v51  ;;  %v19716_v43 = vld [vmem:[#allocation254_spill] sm:$0xff]  ;;  %v17831_v44 = vadd.f32 %v17759_v53, %v19731_v2 }
 0x4a0   : > { %8996 = vadd.xlane.f32.xlu1 %v8832_v6  ;;  %8994 = vadd.xlane.f32.xlu0 %v8831_v12  ;;  %v7393_v24 = vpop.f32.mrf.mxu0  ;;  %v8229_v59 = vpop.f32.mrf.mxu1  ;;  %v19717_v6 = vld [vmem:[#allocation299_spill] sm:$0xff]  ;;  %v17807_v17 = vadd.f32 %v9223_v0, %v2349_v23  ;;  %v19741_v0 = vld [vmem:[#allocation96_spill] sm:$0xff] }
 0x4a1   : > { %v8834_v31 = vmul.f32 %v8706_v19, %v17726_v20  ;;  %v7872_v54 = vmul.f32 %v7393_v24, %v7036_v33  ;;  %v8709_v57 = vmul.f32 %v12785_v32, %v7873_v27  ;;  %v7041_v26 = vmul.f32 %v19717_v6, %v19716_v43  ;;  %v19721_v19 = vld [vmem:[#allocation264_spill] sm:$0xff]  ;;  %v19723_v24 = vld [vmem:[#allocation89_spill] sm:$0xff]  ;;  %19732 = vst [vmem:[#allocation45_spill] sm:$0xff] %v17831_v44 }
 0x4a2   : > { %v12592_v39 = vpop.f32.mrf.mxu0  ;;  %v12788_v48 = vpop.f32.mrf.mxu1  ;;  %19718 = vst [vmem:[#allocation39_spill] sm:$0xff] %v17807_v17  ;;  %v17811_v33 = vadd.f32 %v17759_v53, %v19719_v50  ;;  %v7042_v38 = vmul.f32 %v19722_v22, %v19721_v19  ;;  %v17850_v13 = vadd.f32 %v17759_v53, %v19741_v0  ;;  %v19811_v17 = vld [vmem:[#allocation143_spill] sm:$0xff] }
 0x4a3   : > { %v8708_v15 = vmul.f32 %v8229_v59, %v7872_v54  ;;  %v7875_v7 = vmul.f32 %v12592_v39, %v7039_v30  ;;  %v8837_v42 = vmul.f32 %v8709_v57, %v17763_v36  ;;  %v19725_v59 = vld [vmem:[#allocation90_spill] sm:$0xff]  ;;  %v19728_v54 = vld [vmem:[#allocation303_spill] sm:$0xff] }
 0x4a4   : > { %9000 = vadd.xlane.f32.xlu1 %v8834_v31  ;;  %8998 = vadd.xlane.f32.xlu0 %v8833_v10  ;;  %v7403_v20 = vpop.f32.mrf.mxu0  ;;  %v8239_v28 = vpop.f32.mrf.mxu1  ;;  %19720 = vst [vmem:[#allocation42_spill] sm:$0xff] %v17811_v33  ;;  %v17821_v36 = vadd.f32 %v17759_v53, %v19725_v59  ;;  %v19727_v31 = vld [vmem:[#allocation261_spill] sm:$0xff]  ;;  %v19729_v39 = vld [vmem:[#allocation91_spill] sm:$0xff]  ;;  %19742 = vst [vmem:[#allocation123_spill] sm:$0xff] %v17850_v13 }
 0x4a5   : > { %v8836_v18 = vmul.f32 %v8708_v15, %v17748_v4  ;;  %v7874_v14 = vmul.f32 %v7403_v20, %v7038_v5  ;;  %v8711_v40 = vmul.f32 %v12788_v48, %v7875_v7  ;;  %v7043_v10 = vmul.f32 %v19728_v54, %v19727_v31  ;;  %v19733_v5 = vld [vmem:[#allocation93_spill] sm:$0xff]  ;;  %v19740_v7 = vld [vmem:[#allocation308_spill] sm:$0xff]  ;;  %v19755_v59 = vld [vmem:[#allocation103_spill] sm:$0xff] }
 0x4a6   : > { %v12595_v63 = vpop.f32.mrf.mxu0  ;;  %v12791_v47 = vpop.f32.mrf.mxu1  ;;  %19726 = vst [vmem:[#allocation98_spill] sm:$0xff] %v17821_v36  ;;  %v17827_v48 = vadd.f32 %v17759_v53, %v19729_v39  ;;  %v17835_v15 = vadd.f32 %v17759_v53, %v19733_v5  ;;  %v17877_v31 = vadd.f32 %v17759_v53, %v19755_v59  ;;  %v19757_v54 = vld [vmem:[#allocation276_spill] sm:$0xff] }
 0x4a7   : > { %v8710_v62 = vmul.f32 %v8239_v28, %v7874_v14  ;;  %v7877_v32 = vmul.f32 %v12595_v63, %v7041_v26  ;;  %v8839_v56 = vmul.f32 %v8711_v40, %v17783_v35  ;;  %v19743_v35 = vld [vmem:[#allocation97_spill] sm:$0xff]  ;;  %v19747_v26 = vld [vmem:[#allocation99_spill] sm:$0xff]  ;;  %v19759_v39 = vld [vmem:[#allocation104_spill] sm:$0xff] }
 0x4a8   : > { %9004 = vadd.xlane.f32.xlu1 %v8836_v18  ;;  %9002 = vadd.xlane.f32.xlu0 %v8835_v11  ;;  %v7413_v4 = vpop.f32.mrf.mxu0  ;;  %v8249_v12 = vpop.f32.mrf.mxu1  ;;  %19730 = vst [vmem:[#allocation46_spill] sm:$0xff] %v17827_v48  ;;  %19734 = vst [vmem:[#allocation113_spill] sm:$0xff] %v17835_v15  ;;  %v19735_v18 = vld [vmem:[#allocation94_spill] sm:$0xff]  ;;  %v19737_v11 = vld [vmem:[#allocation95_spill] sm:$0xff]  ;;  %v17883_v2 = vadd.f32 %v17759_v53, %v19759_v39 }
 0x4a9   : > { %v8838_v51 = vmul.f32 %v8710_v62, %v2334_v37  ;;  %v7876_v16 = vmul.f32 %v7413_v4, %v7040_v29  ;;  %v17817_v37 = vadd.f32 %v17759_v53, %v19723_v24  ;;  %v8713_v46 = vmul.f32 %v12791_v47, %v7877_v32  ;;  %v19746_v29 = vld [vmem:[#allocation306_spill] sm:$0xff]  ;;  %v19751_v40 = vld [vmem:[#allocation101_spill] sm:$0xff]  ;;  %19756 = vst [vmem:[#allocation53_spill] sm:$0xff] %v17877_v31 }
 0x4aa   : > { %v12598_v3 = vpop.f32.mrf.mxu0  ;;  %v12794_v49 = vpop.f32.mrf.mxu1  ;;  %v17840_v14 = vadd.f32 %v17759_v53, %v19735_v18  ;;  %v17844_v57 = vadd.f32 %v17759_v53, %v19737_v11  ;;  %v17854_v47 = vadd.f32 %v17759_v53, %v19743_v35  ;;  %v7045_v62 = vmul.f32 %v19746_v29, %v19745_v60  ;;  %19760 = vst [vmem:[#allocation56_spill] sm:$0xff] %v17883_v2  ;;  %v19767_v18 = vld [vmem:[#allocation107_spill] sm:$0xff] }
 0x4ab   : > { %v8712_v52 = vmul.f32 %v8249_v12, %v7876_v16  ;;  %19724 = vst [vmem:[#allocation41_spill] sm:$0xff] %v17817_v37  ;;  %v7879_v30 = vmul.f32 %v12598_v3, %v7043_v10  ;;  %v17860_v4 = vadd.f32 %v17759_v53, %v19747_v26  ;;  %v19749_v12 = vld [vmem:[#allocation100_spill] sm:$0xff]  ;;  %v17869_v32 = vadd.f32 %v17759_v53, %v19751_v40  ;;  %v19758_v10 = vld [vmem:[#allocation311_spill] sm:$0xff]  ;;  %v19773_v26 = vld [vmem:[#allocation110_spill] sm:$0xff] }
 0x4ac   : > { %9008 = vadd.xlane.f32.xlu1 %v8838_v51  ;;  %9006 = vadd.xlane.f32.xlu0 %v8837_v42  ;;  %v7423_v55 = vpop.f32.mrf.mxu0  ;;  %v8259_v27 = vpop.f32.mrf.mxu1  ;;  %19736 = vst [vmem:[#allocation48_spill] sm:$0xff] %v17840_v14  ;;  %19738 = vst [vmem:[#allocation112_spill] sm:$0xff] %v17844_v57  ;;  %v17864_v51 = vadd.f32 %v17759_v53, %v19749_v12  ;;  %v8841_v3 = vmul.f32 %v8713_v46, %v2349_v23  ;;  %v19761_v23 = vld [vmem:[#allocation105_spill] sm:$0xff] }
 0x4ad   : > { %v8840_v58 = vmul.f32 %v8712_v52, %v2344_v9  ;;  %v7878_v8 = vmul.f32 %v7423_v55, %v7042_v38  ;;  %v19739_v9 = vld [vmem:[#allocation269_spill] sm:$0xff]  ;;  %19744 = vst [vmem:[#allocation47_spill] sm:$0xff] %v17854_v47  ;;  %19748 = vst [vmem:[#allocation50_spill] sm:$0xff] %v17860_v4  ;;  %v8715_v50 = vmul.f32 %v12794_v49, %v7879_v30  ;;  %v19753_v52 = vld [vmem:[#allocation102_spill] sm:$0xff] }
 0x4ae   : > { %v12601_v20 = vpop.f32.mrf.mxu0  ;;  %v12797_v28 = vpop.f32.mrf.mxu1  ;;  %v7044_v63 = vmul.f32 %v19740_v7, %v19739_v9  ;;  %19750 = vst [vmem:[#allocation49_spill] sm:$0xff] %v17864_v51  ;;  %19752 = vst [vmem:[#allocation149_spill] sm:$0xff] %v17869_v32  ;;  %v17873_v24 = vadd.f32 %v17759_v53, %v19753_v52  ;;  %v7046_v55 = vmul.f32 %v19758_v10, %v19757_v54  ;;  %v19765_v30 = vld [vmem:[#allocation106_spill] sm:$0xff] }
 0x4af   : > { %v8714_v25 = vmul.f32 %v8259_v27, %v7878_v8  ;;  %v7881_v19 = vmul.f32 %v12601_v20, %v7045_v62  ;;  %v17887_v49 = vadd.f32 %v17759_v53, %v19761_v23  ;;  %v19764_v8 = vld [vmem:[#allocation309_spill] sm:$0xff]  ;;  %v17893_v20 = vadd.f32 %v17759_v53, %v19765_v30  ;;  %v19777_v52 = vld [vmem:[#allocation114_spill] sm:$0xff] }
 0x4b0   : > { %9012 = vadd.xlane.f32.xlu1 %v8840_v58  ;;  %9010 = vadd.xlane.f32.xlu0 %v8839_v56  ;;  %v7433_v43 = vpop.f32.mrf.mxu0  ;;  %v8269_v6 = vpop.f32.mrf.mxu1  ;;  %19754 = vst [vmem:[#allocation54_spill] sm:$0xff] %v17873_v24  ;;  %v19763_v58 = vld [vmem:[#allocation273_spill] sm:$0xff]  ;;  %v17897_v11 = vadd.f32 %v17759_v53, %v19767_v18  ;;  %v8843_v0 = vmul.f32 %v8715_v50, %v17811_v33  ;;  %v19784_v23 = vld [vmem:[#allocation118_spill] sm:$0xff] }
 0x4b1   : > { %v8842_v16 = vmul.f32 %v8714_v25, %v17817_v37  ;;  %v7880_v42 = vmul.f32 %v7433_v43, %v7044_v63  ;;  %19762 = vst [vmem:[#allocation168_spill] sm:$0xff] %v17887_v49  ;;  %v7047_v5 = vmul.f32 %v19764_v8, %v19763_v58  ;;  %19766 = vst [vmem:[#allocation179_spill] sm:$0xff] %v17893_v20  ;;  %v19769_v63 = vld [vmem:[#allocation108_spill] sm:$0xff]  ;;  %v19771_v43 = vld [vmem:[#allocation109_spill] sm:$0xff] }
 0x4b2   : > { %v12604_v22 = vpop.f32.mrf.mxu0  ;;  %v12800_v38 = vpop.f32.mrf.mxu1  ;;  %19768 = vst [vmem:[#allocation55_spill] sm:$0xff] %v17897_v11  ;;  %v17902_v25 = vadd.f32 %v17759_v53, %v19769_v63  ;;  %v8717_v35 = vmul.f32 %v12797_v28, %v7881_v19  ;;  %v17911_v12 = vadd.f32 %v17759_v53, %v19773_v26  ;;  %v17917_v59 = vadd.f32 %v17759_v53, %v19777_v52  ;;  %v19779_v28 = vld [vmem:[#allocation115_spill] sm:$0xff]  ;;  %v19781_v19 = vld [vmem:[#allocation278_spill] sm:$0xff]  ;;  %v19789_v26 = vld [vmem:[#allocation124_spill] sm:$0xff] }
 0x4b3   : > { %v8716_v27 = vmul.f32 %v8269_v6, %v7880_v42  ;;  %v7883_v60 = vmul.f32 %v12604_v22, %v7047_v5  ;;  %v17907_v6 = vadd.f32 %v17759_v53, %v19771_v43  ;;  %v19776_v42 = vld [vmem:[#allocation314_spill] sm:$0xff]  ;;  %v17921_v50 = vadd.f32 %v17759_v53, %v19779_v28  ;;  %v19782_v22 = vld [vmem:[#allocation313_spill] sm:$0xff] }
 0x4b4   : > { %9016 = vadd.xlane.f32.xlu1 %v8842_v16  ;;  %9014 = vadd.xlane.f32.xlu0 %v8841_v3  ;;  %v7443_v56 = vpop.f32.mrf.mxu0  ;;  %v8279_v46 = vpop.f32.mrf.mxu1  ;;  %19770 = vst [vmem:[#allocation178_spill] sm:$0xff] %v17902_v25  ;;  %19774 = vst [vmem:[#allocation58_spill] sm:$0xff] %v17911_v12  ;;  %v19775_v16 = vld [vmem:[#allocation281_spill] sm:$0xff]  ;;  %v7049_v54 = vmul.f32 %v19782_v22, %v19781_v19  ;;  %v17931_v58 = vadd.f32 %v17759_v53, %v19784_v23 }
 0x4b5   : > { %v8844_v9 = vmul.f32 %v8716_v27, %v17827_v48  ;;  %v7882_v7 = vmul.f32 %v7443_v56, %v7046_v55  ;;  %19772 = vst [vmem:[#allocation190_spill] sm:$0xff] %v17907_v6  ;;  %v7048_v40 = vmul.f32 %v19776_v42, %v19775_v16  ;;  %19778 = vst [vmem:[#allocation189_spill] sm:$0xff] %v17917_v59  ;;  %v19783_v27 = vld [vmem:[#allocation117_spill] sm:$0xff]  ;;  %v19786_v56 = vld [vmem:[#allocation120_spill] sm:$0xff] }
 0x4b6   : > { %v12607_v29 = vpop.f32.mrf.mxu0  ;;  %v12803_v62 = vpop.f32.mrf.mxu1  ;;  %19780 = vst [vmem:[#allocation201_spill] sm:$0xff] %v17921_v50  ;;  %v17927_v39 = vadd.f32 %v17759_v53, %v19783_v27  ;;  %19785 = vst [vmem:[#allocation57_spill] sm:$0xff] %v17931_v58  ;;  %v8845_v30 = vmul.f32 %v8717_v35, %v17821_v36  ;;  %v8719_v18 = vmul.f32 %v12800_v38, %v7883_v60  ;;  %v19790_v42 = vld [vmem:[#allocation288_spill] sm:$0xff]  ;;  %v19792_v28 = vld [vmem:[#allocation125_spill] sm:$0xff] }
 0x4b7   : > { %v8718_v3 = vmul.f32 %v8279_v46, %v7882_v7  ;;  %v17936_v46 = vadd.f32 %v17759_v53, %v19786_v56  ;;  %v17945_v16 = vadd.f32 %v17759_v53, %v19789_v26  ;;  %v17951_v19 = vadd.f32 %v17759_v53, %v19792_v28  ;;  %v19793_v38 = vld [vmem:[#allocation127_spill] sm:$0xff]  ;;  %v19794_v60 = vld [vmem:[#allocation285_spill] sm:$0xff]  ;;  %v19796_v27 = vld [vmem:[#allocation128_spill] sm:$0xff] }
 0x4b8   : > { %9020 = vadd.xlane.f32.xlu1 %v8844_v9  ;;  %9018 = vadd.xlane.f32.xlu0 %v8843_v0  ;;  %v7453_v10 = vpop.f32.mrf.mxu0  ;;  %v8289_v55 = vpop.f32.mrf.mxu1  ;;  %v7885_v9 = vmul.f32 %v12607_v29, %v7049_v54  ;;  %v19787_v0 = vld [vmem:[#allocation121_spill] sm:$0xff]  ;;  %v17955_v35 = vadd.f32 %v17759_v53, %v19793_v38  ;;  %v17961_v23 = vadd.f32 %v17759_v53, %v19796_v27  ;;  %v19798_v26 = vld [vmem:[#allocation131_spill] sm:$0xff]  ;;  %v19800_v27 = vld [vmem:[#allocation44_spill] sm:$0xff] }
 0x4b9   : > { %v8846_v8 = vmul.f32 %v8718_v3, %v17835_v15  ;;  %v7884_v5 = vmul.f32 %v7453_v10, %v7048_v40  ;;  %v17941_v43 = vadd.f32 %v17759_v53, %v19787_v0  ;;  %v19791_v40 = vld [vmem:[#allocation319_spill] sm:$0xff]  ;;  %v19795_v29 = vld [vmem:[#allocation317_spill] sm:$0xff] }
 0x4ba   : > { %v12610_v7 = vpop.f32.mrf.mxu0  ;;  %v12806_v63 = vpop.f32.mrf.mxu1  ;;  %v7050_v3 = vmul.f32 %v19791_v40, %v19790_v42  ;;  %v7051_v22 = vmul.f32 %v19795_v29, %v19794_v60  ;;  %v17970_v42 = vadd.f32 %v17759_v53, %v19798_v26  ;;  %v19799_v60 = vld [vmem:[#allocation132_spill] sm:$0xff]  ;;  %v19803_v26 = vld [vmem:[#allocation134_spill] sm:$0xff]  ;;  %v19810_v33 = vld [vmem:[#allocation141_spill] sm:$0xff] }
 0x4bb   : > { %19788 = vst [vmem:[#allocation200_spill] sm:$0xff] %v17941_v43  ;;  %v8720_v52 = vmul.f32 %v8289_v55, %v7884_v5  ;;  %v19797_v55 = vld [vmem:[#allocation130_spill] sm:$0xff]  ;;  %v17975_v29 = vadd.f32 %v17759_v53, %v19799_v60  ;;  %v17985_v15 = vadd.f32 %v17759_v53, %v19803_v26  ;;  %v19809_v26 = vld [vmem:[#allocation140_spill] sm:$0xff] }
 0x4bc   : > { %9024 = vadd.xlane.f32.xlu1 %v8846_v8  ;;  %9022 = vadd.xlane.f32.xlu0 %v8845_v30  ;;  %v7463_v54 = vpop.f32.mrf.mxu0  ;;  %v8299_v10 = vpop.f32.mrf.mxu1  ;;  %v17965_v5 = vadd.f32 %v17759_v53, %v19797_v55  ;;  %v8847_v8 = vmul.f32 %v8719_v18, %v17831_v44  ;;  %v8721_v30 = vmul.f32 %v12803_v62, %v7885_v9  ;;  %v19804_v62 = vld [vmem:[#allocation135_spill] sm:$0xff]  ;;  %v19805_v9 = vld [vmem:[#allocation290_spill] sm:$0xff]  ;;  %v19807_v44 = vld [vmem:[#allocation137_spill] sm:$0xff] }
 0x4bd   : > { %v8848_v56 = vmul.f32 %v8720_v52, %v17844_v57  ;;  %v7886_v0 = vmul.f32 %v7463_v54, %v7050_v3  ;;  %v7887_v40 = vmul.f32 %v12610_v7, %v7051_v22  ;;  %v17979_v55 = vadd.f32 %v17759_v53, %v19800_v27  ;;  %v19801_v52 = vld [vmem:[#allocation293_spill] sm:$0xff]  ;;  %v19802_v3 = vld [vmem:[#allocation322_spill] sm:$0xff]  ;;  %v19806_v7 = vld [vmem:[#allocation320_spill] sm:$0xff] }
 0x4be   : > { %v12613_v28 = vpop.f32.mrf.mxu0  ;;  %v12809_v38 = vpop.f32.mrf.mxu1  ;;  %v7052_v54 = vmul.f32 %v19802_v3, %v19801_v52  ;;  %v17989_v18 = vadd.f32 %v17759_v53, %v19804_v62  ;;  %v7053_v22 = vmul.f32 %v19806_v7, %v19805_v9  ;;  %v17995_v36 = vadd.f32 %v17759_v53, %v19807_v44 }
 0x4bf   : > { %v8722_v57 = vmul.f32 %v8299_v10, %v7886_v0  ;;  %v19808_v10 = vld [vmem:[#allocation138_spill] sm:$0xff]  ;;  %v18004_v62 = vadd.f32 %v17759_v53, %v19809_v26  ;;  %v18009_v44 = vadd.f32 %v17759_v53, %v19810_v33  ;;  %v19815_v26 = vld [vmem:[#allocation144_spill] sm:$0xff] }
 0x4c0   : > { %9028 = vadd.xlane.f32.xlu1 %v8848_v56  ;;  %9026 = vadd.xlane.f32.xlu0 %v8847_v8  ;;  %v7473_v60 = vpop.f32.mrf.mxu0  ;;  %v8309_v27 = vpop.f32.mrf.mxu1  ;;  %v17999_v0 = vadd.f32 %v17759_v53, %v19808_v10  ;;  %v8849_v56 = vmul.f32 %v8721_v30, %v17840_v14  ;;  %v8723_v8 = vmul.f32 %v12806_v63, %v7887_v40  ;;  %v19817_v63 = vld [vmem:[#allocation146_spill] sm:$0xff]  ;;  %v19819_v40 = vld [vmem:[#allocation297_spill] sm:$0xff]  ;;  %v19821_v14 = vld [vmem:[#allocation147_spill] sm:$0xff] }
 0x4c1   : > { %v8850_v52 = vmul.f32 %v8722_v57, %v17854_v47  ;;  %v7888_v3 = vmul.f32 %v7473_v60, %v7052_v54  ;;  %v7889_v9 = vmul.f32 %v12613_v28, %v7053_v22  ;;  %v18013_v10 = vadd.f32 %v17759_v53, %v19811_v17  ;;  %v19813_v57 = vld [vmem:[#allocation300_spill] sm:$0xff]  ;;  %v19814_v54 = vld [vmem:[#allocation325_spill] sm:$0xff] }
 0x4c2   : > { %v12616_v7 = vpop.f32.mrf.mxu0  ;;  %v12812_v48 = vpop.f32.mrf.mxu1  ;;  %v7054_v60 = vmul.f32 %v19814_v54, %v19813_v57  ;;  %v18019_v37 = vadd.f32 %v17759_v53, %v19815_v26  ;;  %v18023_v30 = vadd.f32 %v17759_v53, %v19817_v63  ;;  %v19820_v28 = vld [vmem:[#allocation324_spill] sm:$0xff]  ;;  %v19825_v26 = vld [vmem:[#allocation151_spill] sm:$0xff] }
 0x4c3   : > { %19812 = vst [vmem:[#allocation212_spill] sm:$0xff] %v18013_v10  ;;  %v8724_v47 = vmul.f32 %v8309_v27, %v7888_v3  ;;  %v7055_v33 = vmul.f32 %v19820_v28, %v19819_v40  ;;  %v18029_v10 = vadd.f32 %v17759_v53, %v19821_v14  ;;  %v19823_v27 = vld [vmem:[#allocation150_spill] sm:$0xff]  ;;  %v18038_v63 = vadd.f32 %v17759_v53, %v19825_v26  ;;  %v19831_v26 = vld [vmem:[#allocation156_spill] sm:$0xff] }
 0x4c4   : > { %19816 = vst [vmem:[#allocation61_spill] sm:$0xff] %v18019_v37  ;;  %19818 = vst [vmem:[#allocation211_spill] sm:$0xff] %v18023_v30  ;;  %9032 = vadd.xlane.f32.xlu1 %v8850_v52  ;;  %9030 = vadd.xlane.f32.xlu0 %v8849_v56  ;;  %v7483_v22 = vpop.f32.mrf.mxu0  ;;  %v8319_v17 = vpop.f32.mrf.mxu1  ;;  %v18033_v3 = vadd.f32 %v17759_v53, %v19823_v27  ;;  %v8851_v52 = vmul.f32 %v8723_v8, %v17850_v13  ;;  %v19826_v37 = vld [vmem:[#allocation153_spill] sm:$0xff]  ;;  %v19837_v13 = vld [vmem:[#allocation159_spill] sm:$0xff] }
 0x4c5   : > { %19822 = vst [vmem:[#allocation223_spill] sm:$0xff] %v18029_v10  ;;  %v8852_v57 = vmul.f32 %v8724_v47, %v17864_v51  ;;  %v7890_v54 = vmul.f32 %v7483_v22, %v7054_v60  ;;  %v8725_v56 = vmul.f32 %v12809_v38, %v7889_v9  ;;  %v7891_v40 = vmul.f32 %v12616_v7, %v7055_v33  ;;  %v19828_v10 = vld [vmem:[#allocation154_spill] sm:$0xff]  ;;  %v19829_v47 = vld [vmem:[#allocation305_spill] sm:$0xff]  ;;  %v19830_v60 = vld [vmem:[#allocation331_spill] sm:$0xff] }
 0x4c6   : > { %19824 = vst [vmem:[#allocation60_spill] sm:$0xff] %v18033_v3  ;;  %v12619_v28 = vpop.f32.mrf.mxu0  ;;  %v12815_v30 = vpop.f32.mrf.mxu1  ;;  %v18043_v14 = vadd.f32 %v17759_v53, %v19826_v37  ;;  %v18047_v27 = vadd.f32 %v17759_v53, %v19828_v10  ;;  %v7056_v22 = vmul.f32 %v19830_v60, %v19829_v47  ;;  %v18053_v3 = vadd.f32 %v17759_v53, %v19831_v26  ;;  %v19833_v38 = vld [vmem:[#allocation157_spill] sm:$0xff]  ;;  %v19835_v9 = vld [vmem:[#allocation302_spill] sm:$0xff] }
 0x4c7   : > { %v8726_v51 = vmul.f32 %v8319_v17, %v7890_v54  ;;  %v18057_v8 = vadd.f32 %v17759_v53, %v19833_v38  ;;  %v19836_v7 = vld [vmem:[#allocation329_spill] sm:$0xff]  ;;  %v19839_v17 = vld [vmem:[#allocation160_spill] sm:$0xff]  ;;  %v19840_v26 = vld [vmem:[#allocation162_spill] sm:$0xff] }
 0x4c8   : > { %19827 = vst [vmem:[#allocation222_spill] sm:$0xff] %v18043_v14  ;;  %19832 = vst [vmem:[#allocation235_spill] sm:$0xff] %v18053_v3  ;;  %v7057_v37 = vmul.f32 %v19836_v7, %v19835_v9  ;;  %9036 = vadd.xlane.f32.xlu1 %v8852_v57  ;;  %9034 = vadd.xlane.f32.xlu0 %v8851_v52  ;;  %v7493_v33 = vpop.f32.mrf.mxu0  ;;  %v8329_v10 = vpop.f32.mrf.mxu1  ;;  %v18063_v14 = vadd.f32 %v17759_v53, %v19837_v13 }
 0x4c9   : > { %19834 = vst [vmem:[#allocation63_spill] sm:$0xff] %v18057_v8  ;;  %v18067_v54 = vadd.f32 %v17759_v53, %v19839_v17  ;;  %v8854_v47 = vmul.f32 %v8726_v51, %v17873_v24  ;;  %v7892_v60 = vmul.f32 %v7493_v33, %v7056_v22  ;;  %v18072_v38 = vadd.f32 %v17759_v53, %v19840_v26  ;;  %v19842_v8 = vld [vmem:[#allocation163_spill] sm:$0xff]  ;;  %v19845_v51 = vld [vmem:[#allocation310_spill] sm:$0xff] }
 0x4ca   : > { %19838 = vst [vmem:[#allocation234_spill] sm:$0xff] %v18063_v14  ;;  %v8853_v57 = vmul.f32 %v8725_v56, %v17860_v4  ;;  %v8727_v52 = vmul.f32 %v12812_v48, %v7891_v40  ;;  %v7893_v9 = vmul.f32 %v12619_v28, %v7057_v37  ;;  %v12622_v7 = vpop.f32.mrf.mxu0  ;;  %v12818_v3 = vpop.f32.mrf.mxu1  ;;  %v18077_v13 = vadd.f32 %v17759_v53, %v19842_v8  ;;  %v19843_v14 = vld [vmem:[#allocation165_spill] sm:$0xff]  ;;  %v19846_v22 = vld [vmem:[#allocation334_spill] sm:$0xff]  ;;  %v19851_v40 = vld [vmem:[#allocation307_spill] sm:$0xff] }
 0x4cb   : > { %19841 = vst [vmem:[#allocation247_spill] sm:$0xff] %v18072_v38  ;;  %v18081_v17 = vadd.f32 %v17759_v53, %v19843_v14  ;;  %v7058_v33 = vmul.f32 %v19846_v22, %v19845_v51  ;;  %v8728_v24 = vmul.f32 %v8329_v10, %v7892_v60  ;;  %v19847_v26 = vld [vmem:[#allocation166_spill] sm:$0xff]  ;;  %v19849_v48 = vld [vmem:[#allocation169_spill] sm:$0xff]  ;;  %v19852_v28 = vld [vmem:[#allocation332_spill] sm:$0xff] }
 0x4cc   : > { %v18087_v38 = vadd.f32 %v17759_v53, %v19847_v26  ;;  %v18091_v56 = vadd.f32 %v17759_v53, %v19849_v48  ;;  %v7059_v8 = vmul.f32 %v19852_v28, %v19851_v40  ;;  %9040 = vadd.xlane.f32.xlu1 %v8854_v47  ;;  %9038 = vadd.xlane.f32.xlu0 %v8853_v57  ;;  %v7503_v37 = vpop.f32.mrf.mxu0  ;;  %v8339_v14 = vpop.f32.mrf.mxu1  ;;  %v19853_v4 = vld [vmem:[#allocation170_spill] sm:$0xff]  ;;  %v19855_v10 = vld [vmem:[#allocation172_spill] sm:$0xff]  ;;  %v19857_v26 = vld [vmem:[#allocation173_spill] sm:$0xff] }
 0x4cd   : > { %19844 = vst [vmem:[#allocation62_spill] sm:$0xff] %v18081_v17  ;;  %v18097_v17 = vadd.f32 %v17759_v53, %v19853_v4  ;;  %v18101_v60 = vadd.f32 %v17759_v53, %v19855_v10  ;;  %v8856_v51 = vmul.f32 %v8728_v24, %v17883_v2  ;;  %v7894_v22 = vmul.f32 %v7503_v37, %v7058_v33  ;;  %v19863_v24 = vld [vmem:[#allocation315_spill] sm:$0xff]  ;;  %v19864_v33 = vld [vmem:[#allocation336_spill] sm:$0xff] }
 0x4ce   : > { %19848 = vst [vmem:[#allocation111_spill] sm:$0xff] %v18087_v38  ;;  %19850 = vst [vmem:[#allocation213_spill] sm:$0xff] %v18091_v56  ;;  %v18106_v48 = vadd.f32 %v17759_v53, %v19857_v26  ;;  %v8855_v47 = vmul.f32 %v8727_v52, %v17869_v32  ;;  %v8729_v57 = vmul.f32 %v12815_v30, %v7893_v9  ;;  %v12625_v28 = vpop.f32.mrf.mxu0  ;;  %v12821_v56 = vpop.f32.mrf.mxu1  ;;  %v19859_v38 = vld [vmem:[#allocation175_spill] sm:$0xff]  ;;  %v19865_v26 = vld [vmem:[#allocation180_spill] sm:$0xff] }
 0x4cf   : > { %19854 = vst [vmem:[#allocation246_spill] sm:$0xff] %v18097_v17  ;;  %19856 = vst [vmem:[#allocation116_spill] sm:$0xff] %v18101_v60  ;;  %v7895_v40 = vmul.f32 %v12622_v7, %v7059_v8  ;;  %v18111_v4 = vadd.f32 %v17759_v53, %v19859_v38  ;;  %v19861_v17 = vld [vmem:[#allocation176_spill] sm:$0xff]  ;;  %v7060_v37 = vmul.f32 %v19864_v33, %v19863_v24  ;;  %v19867_v30 = vld [vmem:[#allocation181_spill] sm:$0xff] }
 0x4d0   : > { %19858 = vst [vmem:[#allocation214_spill] sm:$0xff] %v18106_v48  ;;  %v18115_v10 = vadd.f32 %v17759_v53, %v19861_v17  ;;  %v8730_v2 = vmul.f32 %v8339_v14, %v7894_v22  ;;  %v18121_v60 = vadd.f32 %v17759_v53, %v19865_v26  ;;  %v18125_v52 = vadd.f32 %v17759_v53, %v19867_v30  ;;  %v19869_v9 = vld [vmem:[#allocation312_spill] sm:$0xff]  ;;  %v19870_v7 = vld [vmem:[#allocation335_spill] sm:$0xff]  ;;  %v7513_v8 = vpop.f32.mrf.mxu0  ;;  %v8349_v17 = vpop.f32.mrf.mxu1  ;;  %v19875_v26 = vld [vmem:[#allocation186_spill] sm:$0xff] }
 0x4d1   : > { %19860 = vst [vmem:[#allocation259_spill] sm:$0xff] %v18111_v4  ;;  %v7061_v38 = vmul.f32 %v19870_v7, %v19869_v9  ;;  %9044 = vadd.xlane.f32.xlu1 %v8856_v51  ;;  %9042 = vadd.xlane.f32.xlu0 %v8855_v47  ;;  %v19871_v32 = vld [vmem:[#allocation183_spill] sm:$0xff]  ;;  %v19873_v14 = vld [vmem:[#allocation184_spill] sm:$0xff]  ;;  %v7896_v33 = vmul.f32 %v7513_v8, %v7060_v37  ;;  %v19882_v37 = vld [vmem:[#allocation341_spill] sm:$0xff] }
 0x4d2   : > { %19862 = vst [vmem:[#allocation65_spill] sm:$0xff] %v18115_v10  ;;  %19866 = vst [vmem:[#allocation258_spill] sm:$0xff] %v18121_v60  ;;  %v18131_v4 = vadd.f32 %v17759_v53, %v19871_v32  ;;  %v18135_v22 = vadd.f32 %v17759_v53, %v19873_v14  ;;  %v8858_v24 = vmul.f32 %v8730_v2, %v17893_v20  ;;  %v12628_v7 = vpop.f32.mrf.mxu0  ;;  %v12824_v60 = vpop.f32.mrf.mxu1  ;;  %v19881_v2 = vld [vmem:[#allocation321_spill] sm:$0xff]  ;;  %v19915_v10 = vld [vmem:[#allocation347_spill] sm:$0xff] }
 0x4d3   : > { %19868 = vst [vmem:[#allocation122_spill] sm:$0xff] %v18125_v52  ;;  %v18140_v30 = vadd.f32 %v17759_v53, %v19875_v26  ;;  %v8857_v51 = vmul.f32 %v8729_v57, %v17877_v31  ;;  %v8731_v47 = vmul.f32 %v12818_v3, %v7895_v40  ;;  %v7897_v9 = vmul.f32 %v12625_v28, %v7061_v38  ;;  %v19877_v52 = vld [vmem:[#allocation187_spill] sm:$0xff]  ;;  %v19883_v26 = vld [vmem:[#allocation192_spill] sm:$0xff]  ;;  %v19885_v3 = vld [vmem:[#allocation194_spill] sm:$0xff] }
 0x4d4   : > { %19872 = vst [vmem:[#allocation217_spill] sm:$0xff] %v18131_v4  ;;  %19874 = vst [vmem:[#allocation271_spill] sm:$0xff] %v18135_v22  ;;  %v18145_v32 = vadd.f32 %v17759_v53, %v19877_v52  ;;  %v19879_v4 = vld [vmem:[#allocation191_spill] sm:$0xff]  ;;  %v7062_v8 = vmul.f32 %v19882_v37, %v19881_v2  ;;  %v8732_v20 = vmul.f32 %v8349_v17, %v7896_v33  ;;  %v19887_v40 = vld [vmem:[#allocation318_spill] sm:$0xff]  ;;  %v7523_v38 = vpop.f32.mrf.mxu0 }
 0x4d5   : > { %19876 = vst [vmem:[#allocation119_spill] sm:$0xff] %v18140_v30  ;;  %v18149_v14 = vadd.f32 %v17759_v53, %v19879_v4  ;;  %v18155_v30 = vadd.f32 %v17759_v53, %v19883_v26  ;;  %v18159_v57 = vadd.f32 %v17759_v53, %v19885_v3  ;;  %v19888_v28 = vld [vmem:[#allocation340_spill] sm:$0xff]  ;;  %9048 = vadd.xlane.f32.xlu1 %v8858_v24  ;;  %v8359_v4 = vpop.f32.mrf.mxu1  ;;  %v19889_v31 = vld [vmem:[#allocation195_spill] sm:$0xff]  ;;  %v19891_v17 = vld [vmem:[#allocation197_spill] sm:$0xff] }
 0x4d6   : > { %19878 = vst [vmem:[#allocation216_spill] sm:$0xff] %v18145_v32  ;;  %v7063_v52 = vmul.f32 %v19888_v28, %v19887_v40  ;;  %9046 = vadd.xlane.f32.xlu0 %v8857_v51  ;;  %v18169_v33 = vadd.f32 %v17759_v53, %v19891_v17  ;;  %v8860_v2 = vmul.f32 %v8732_v20, %v17902_v25  ;;  %v19893_v26 = vld [vmem:[#allocation198_spill] sm:$0xff]  ;;  %v12631_v28 = vpop.f32.mrf.mxu0 }
 0x4d7   : > { %19880 = vst [vmem:[#allocation64_spill] sm:$0xff] %v18149_v14  ;;  %19884 = vst [vmem:[#allocation270_spill] sm:$0xff] %v18155_v30  ;;  %v18165_v14 = vadd.f32 %v17759_v53, %v19889_v31  ;;  %v7898_v37 = vmul.f32 %v7523_v38, %v7062_v8  ;;  %v18174_v3 = vadd.f32 %v17759_v53, %v19893_v26  ;;  %v19895_v30 = vld [vmem:[#allocation202_spill] sm:$0xff]  ;;  %v19900_v8 = vld [vmem:[#allocation344_spill] sm:$0xff] }
 0x4d8   : > { %19886 = vst [vmem:[#allocation129_spill] sm:$0xff] %v18159_v57  ;;  %19892 = vst [vmem:[#allocation283_spill] sm:$0xff] %v18169_v33  ;;  %v8859_v24 = vmul.f32 %v8731_v47, %v17887_v49  ;;  %v8733_v51 = vmul.f32 %v12821_v56, %v7897_v9  ;;  %v7899_v40 = vmul.f32 %v12628_v7, %v7063_v52  ;;  %v12827_v57 = vpop.f32.mrf.mxu1  ;;  %v19899_v20 = vld [vmem:[#allocation326_spill] sm:$0xff]  ;;  %v19903_v56 = vld [vmem:[#allocation209_spill] sm:$0xff]  ;;  %v7533_v52 = vpop.f32.mrf.mxu0 }
 0x4d9   : > { %19890 = vst [vmem:[#allocation220_spill] sm:$0xff] %v18165_v14  ;;  %19894 = vst [vmem:[#allocation126_spill] sm:$0xff] %v18174_v3  ;;  %v18179_v31 = vadd.f32 %v17759_v53, %v19895_v30  ;;  %v19897_v14 = vld [vmem:[#allocation203_spill] sm:$0xff]  ;;  %v7064_v38 = vmul.f32 %v19900_v8, %v19899_v20  ;;  %v8734_v25 = vmul.f32 %v8359_v4, %v7898_v37  ;;  %v19901_v26 = vld [vmem:[#allocation206_spill] sm:$0xff]  ;;  %9052 = vadd.xlane.f32.xlu1 %v8860_v2 }
 0x4da   : > { %v18183_v17 = vadd.f32 %v17759_v53, %v19897_v14  ;;  %v18189_v33 = vadd.f32 %v17759_v53, %v19901_v26  ;;  %v18193_v47 = vadd.f32 %v17759_v53, %v19903_v56  ;;  %v19905_v9 = vld [vmem:[#allocation323_spill] sm:$0xff]  ;;  %v19906_v7 = vld [vmem:[#allocation342_spill] sm:$0xff]  ;;  %9050 = vadd.xlane.f32.xlu0 %v8859_v24  ;;  %v8369_v14 = vpop.f32.mrf.mxu1  ;;  %v19909_v20 = vld [vmem:[#allocation333_spill] sm:$0xff]  ;;  %v8861_v56 = vmul.f32 %v8733_v51, %v17897_v11  ;;  %v12634_v2 = vpop.f32.mrf.mxu0 }
 0x4db   : > { %19896 = vst [vmem:[#allocation219_spill] sm:$0xff] %v18179_v31  ;;  %v7065_v30 = vmul.f32 %v19906_v7, %v19905_v9  ;;  %v19907_v49 = vld [vmem:[#allocation330_spill] sm:$0xff]  ;;  %v19908_v31 = vld [vmem:[#allocation345_spill] sm:$0xff]  ;;  %v8862_v8 = vmul.f32 %v8734_v25, %v17911_v12  ;;  %v7900_v26 = vmul.f32 %v7533_v52, %v7064_v38  ;;  %v19912_v3 = vld [vmem:[#allocation351_spill] sm:$0xff] }
 0x4dc   : > { %19898 = vst [vmem:[#allocation67_spill] sm:$0xff] %v18183_v17  ;;  %19902 = vst [vmem:[#allocation282_spill] sm:$0xff] %v18189_v33  ;;  %v7067_v17 = vmul.f32 %v19908_v31, %v19907_v49  ;;  %v19910_v4 = vld [vmem:[#allocation346_spill] sm:$0xff]  ;;  %v19911_v33 = vld [vmem:[#allocation337_spill] sm:$0xff]  ;;  %v12830_v24 = vpop.f32.mrf.mxu1 }
 0x4dd   : > { %19904 = vst [vmem:[#allocation133_spill] sm:$0xff] %v18193_v47  ;;  %v7066_v37 = vmul.f32 %v19910_v4, %v19909_v20  ;;  %v7068_v53 = vmul.f32 %v19912_v3, %v19911_v33  ;;  %v8735_v47 = vmul.f32 %v12824_v60, %v7899_v40  ;;  %v7901_v9 = vmul.f32 %v12631_v28, %v7065_v30  ;;  %v19913_v7 = vld [vmem:[#allocation343_spill] sm:$0xff]  ;;  %v19914_v32 = vld [vmem:[#allocation354_spill] sm:$0xff]  ;;  %v19916_v49 = vld [vmem:[#allocation356_spill] sm:$0xff] }
 0x4de   : > { %v7070_v22 = vmul.f32 %v19914_v32, %v19913_v7  ;;  %v18209_v31 = vmul.f32 %v19916_v49, %v19915_v10  ;;  %v19917_v20 = vld [vmem:[#allocation353_spill] sm:$0xff]  ;;  %v19918_v4 = vld [vmem:[#allocation360_spill] sm:$0xff]  ;;  %v8736_v38 = vmul.f32 %v8369_v14, %v7900_v26  ;;  %v19920_v33 = vld [vmem:[#allocation363_spill] sm:$0xff]  ;;  %9056 = vadd.xlane.f32.xlu1 %v8862_v8  ;;  %9054 = vadd.xlane.f32.xlu0 %v8861_v56  ;;  %v7543_v10 = vpop.f32.mrf.mxu0  ;;  %v8379_v7 = vpop.f32.mrf.mxu1 }
 0x4df   : > { %v18213_v25 = vmul.f32 %v19918_v4, %v19917_v20  ;;  %v19919_v52 = vld [vmem:[#allocation357_spill] sm:$0xff]  ;;  %v19921_v60 = vld [vmem:[#allocation362_spill] sm:$0xff]  ;;  %v19924_v30 = vld [vmem:[#allocation368_spill] sm:$0xff]  ;;  %v8863_v8 = vmul.f32 %v8735_v47, %v17907_v6  ;;  %v8737_v56 = vmul.f32 %v12827_v57, %v7901_v9 }
 0x4e0   : > { %v18217_v3 = vmul.f32 %v19920_v33, %v19919_v52  ;;  %v19922_v51 = vld [vmem:[#allocation365_spill] sm:$0xff]  ;;  %v19923_v28 = vld [vmem:[#allocation366_spill] sm:$0xff]  ;;  %v19927_v14 = vld [vmem:[#allocation375_spill] sm:$0xff]  ;;  %v8864_v33 = vmul.f32 %v8736_v38, %v17921_v50 }
 0x4e1   : > { %v18221_v40 = vmul.f32 %v19922_v51, %v19921_v60  ;;  %v18225_v32 = vmul.f32 %v19924_v30, %v19923_v28  ;;  %v19925_v49 = vld [vmem:[#allocation370_spill] sm:$0xff]  ;;  %v19926_v20 = vld [vmem:[#allocation373_spill] sm:$0xff]  ;;  %v7902_v60 = vmul.f32 %v7543_v10, %v7066_v37  ;;  %v19929_v51 = vld [vmem:[#allocation380_spill] sm:$0xff]  ;;  %v7903_v28 = vmul.f32 %v12634_v2, %v7067_v17  ;;  %v12637_v30 = vpop.f32.mrf.mxu0 }
 0x4e2   : > { %v18229_v4 = vmul.f32 %v19926_v20, %v19925_v49  ;;  %v19928_v26 = vld [vmem:[#allocation377_spill] sm:$0xff]  ;;  %v19930_v12 = vld [vmem:[#allocation382_spill] sm:$0xff]  ;;  %v18243_v49 = vmul.f32 %v16825_v61, %v16819_v41  ;;  %v18247_v20 = vmul.f32 %v16862_v34, %v16856_v45  ;;  %v18251_v37 = vmul.f32 %v16892_v1, %v16886_v21  ;;  %v19933_v57 = vld [vmem:[#allocation20_spill] sm:$0xff]  ;;  %9060 = vadd.xlane.f32.xlu1 %v8864_v33 }
 0x4e3   : > { %v18233_v52 = vmul.f32 %v19928_v26, %v19927_v14  ;;  %v18238_v11 = vmul.f32 %v19930_v12, %v19929_v51  ;;  %v8738_v38 = vmul.f32 %v8379_v7, %v7902_v60  ;;  %v12833_v12 = vpop.f32.mrf.mxu1  ;;  %v19931_v10 = vld [vmem:[#allocation33_spill] sm:$0xff]  ;;  %v19932_v14 = vld [vmem:[#allocation34_spill] sm:$0xff]  ;;  %v19935_v41 = vld [vmem:[#allocation7_spill] sm:$0xff]  ;;  %9058 = vadd.xlane.f32.xlu0 %v8863_v8  ;;  %v7553_v45 = vpop.f32.mrf.mxu0  ;;  %v8865_v33 = vmul.f32 %v8737_v56, %v17917_v59 }
 0x4e4   : > { %v18255_v47 = vmul.f32 %v19932_v14, %v19931_v10  ;;  %v19934_v17 = vld [vmem:[#allocation22_spill] sm:$0xff]  ;;  %v19937_v34 = vld [vmem:[#allocation21_spill] sm:$0xff]  ;;  %v19938_v21 = vld [vmem:[#allocation24_spill] sm:$0xff]  ;;  %v7904_v10 = vmul.f32 %v7553_v45, %v7068_v53  ;;  %v8739_v8 = vmul.f32 %v12830_v24, %v7903_v28 }
 0x4e5   : > { %v18259_v9 = vmul.f32 %v19934_v17, %v19933_v57  ;;  %v19936_v61 = vld [vmem:[#allocation386_spill] sm:$0xff]  ;;  %v18267_v1 = vmul.f32 %v19938_v21, %v19937_v34  ;;  %v19940_v7 = vld [vmem:[#allocation9_spill] sm:$0xff]  ;;  %v8866_v51 = vmul.f32 %v8738_v38, %v17931_v58  ;;  %v8389_v14 = vpop.f32.mrf.mxu1  ;;  %v8925_v57 = vpop.xlane.xlu0 %8924  ;;  %v19943_v17 = vld [vmem:[#allocation23_spill] sm:$0xff] }
 0x4e6   : > { %v18263_v2 = vmul.f32 %v19936_v61, %v19935_v41  ;;  %v19941_v26 = vld [vmem:[#allocation26_spill] sm:$0xff]  ;;  %v19944_v50 = vld [vmem:[#allocation8_spill] sm:$0xff]  ;;  %v8927_v34 = vpop.xlane.xlu1 %8926  ;;  %v12640_v21 = vpop.f32.mrf.mxu0  ;;  %v8740_v48 = vmul.f32 %v8389_v14, %v7904_v10  ;;  %v19947_v53 = vld [vmem:[#allocation27_spill] sm:$0xff] }
 0x4e7   : > { %19939 = vst [vmem:[#allocation226_spill] sm:$0xff] %v18267_v1  ;;  %v18271_v60 = vmul.f32 %v19941_v26, %v19940_v7  ;;  %v18276_v41 = vmul.f32 %v19944_v50, %v19943_v17  ;;  %v19945_v61 = vld [vmem:[#allocation350_spill] sm:$0xff]  ;;  %v9582_v7 = vmul.f32 %v8925_v57, %v8925_v57  ;;  %v19946_v26 = vld [vmem:[#allocation352_spill] sm:$0xff]  ;;  %v12836_v38 = vpop.f32.mrf.mxu1  ;;  %v19948_v45 = vld [vmem:[#allocation11_spill] sm:$0xff]  ;;  %9064 = vadd.xlane.f32.xlu1 %v8866_v51 }
 0x4e8   : > { %v7905_v6 = vmul.f32 %v12637_v30, %v19945_v61  ;;  %v18283_v58 = vmul.f32 %v19948_v45, %v19947_v53  ;;  %v19950_v1 = vld [vmem:[#allocation10_spill] sm:$0xff]  ;;  %v19951_v50 = vld [vmem:[#allocation12_spill] sm:$0xff]  ;;  %v19954_v24 = vld [vmem:[#allocation15_spill] sm:$0xff]  ;;  %9062 = vadd.xlane.f32.xlu0 %v8865_v33  ;;  %v7563_v30 = vpop.f32.mrf.mxu0  ;;  %v9583_v10 = vmul.f32 %v8927_v34, %v8927_v34  ;;  %v8868_v14 = vmul.f32 %v8740_v48, %v17941_v43 }
 0x4e9   : > { %19942 = vst [vmem:[#allocation295_spill] sm:$0xff] %v18271_v60  ;;  %v7907_v60 = vmul.f32 %v12640_v21, %v19946_v26  ;;  %v18287_v17 = vmul.f32 %v19951_v50, %v19950_v1  ;;  %v19953_v56 = vld [vmem:[#allocation14_spill] sm:$0xff]  ;;  %v9314_v61 = vsel %vm9313_vm6, %v8925_v57, 0.0  ;;  %v7906_v21 = vmul.f32 %v7563_v30, %v7070_v22  ;;  %v8399_v26 = vpop.f32.mrf.mxu1  ;;  %v8929_v53 = vpop.xlane.xlu0 %8928  ;;  %v19956_v48 = vld [vmem:[#allocation43_spill] sm:$0xff]  ;;  %v19957_v43 = vld [vmem:[#allocation52_spill] sm:$0xff] }
 0x4ea   : > { %19949 = vst [vmem:[#allocation35_spill] sm:$0xff] %v18283_v58  ;;  %v18291_v28 = vmul.f32 %v19954_v24, %v19953_v56  ;;  %v8867_v45 = vmul.f32 %v8739_v8, %v17927_v39  ;;  %v9315_v1 = vsel %vm9313_vm6, %v8927_v34, 0.0  ;;  %v8741_v50 = vmul.f32 %v12833_v12, %v7905_v6  ;;  %v19958_v30 = vld [vmem:[#allocation355_spill] sm:$0xff] }
 0x4eb   : > { %19952 = vst [vmem:[#allocation224_spill] sm:$0xff] %v18287_v17  ;;  %v9584_v59 = vmul.f32 %v8929_v53, %v8929_v53  ;;  %v12643_v17 = vpop.f32.mrf.mxu0  ;;  %v9710_v56 = vsel %vm9313_vm6, %v9582_v7, 0.0  ;;  %v8743_v51 = vmul.f32 %v12836_v38, %v7907_v60  ;;  %v8742_v33 = vmul.f32 %v8399_v26, %v7906_v21  ;;  %9068 = vadd.xlane.f32.xlu1 %v8868_v14  ;;  %v8933_v38 = vpop.xlane.xlu1 %8932 }
 0x4ec   : > { %19955 = vst [vmem:[#allocation66_spill] sm:$0xff] %v18291_v28  ;;  %v9317_v24 = vsel %vm9313_vm6, %v8929_v53, 0.0  ;;  %v12839_v28 = vpop.f32.mrf.mxu1  ;;  %v18301_v57 = vmul.f32 %v19957_v43, %v19956_v48  ;;  %v9316_v22 = vadd.f32 %v9315_v1, %v9314_v61  ;;  %v7909_v58 = vmul.f32 %v12643_v17, %v19958_v30  ;;  %9066 = vadd.xlane.f32.xlu0 %v8867_v45 }
 0x4ed   : > { %v7573_v8 = vpop.f32.mrf.mxu0  ;;  %v9711_v6 = vsel %vm9313_vm6, %v9583_v10, 0.0  ;;  %v8870_v12 = vmul.f32 %v8742_v33, %v17951_v19  ;;  %v9713_v60 = vsel %vm9313_vm6, %v9584_v59, 0.0  ;;  %v8869_v21 = vmul.f32 %v8741_v50, %v17936_v46  ;;  %v8931_v53 = vpop.xlane.xlu0 %8930 }
 0x4ee   : > { %v7908_v34 = vmul.f32 %v7573_v8, %v18209_v31  ;;  %v8409_v7 = vpop.f32.mrf.mxu1  ;;  %v9712_v43 = vadd.f32 %v9711_v6, %v9710_v56  ;;  %v9318_v26 = vadd.f32 %v9317_v24, %v9316_v22  ;;  %v9586_v61 = vmul.f32 %v8933_v38, %v8933_v38 }
 0x4ef   : > { %v12646_v17 = vpop.f32.mrf.mxu0  ;;  %v8871_v14 = vmul.f32 %v8743_v51, %v17945_v16  ;;  %v9319_v10 = vsel %vm9313_vm6, %v8931_v53, 0.0  ;;  %v9585_v1 = vmul.f32 %v8931_v53, %v8931_v53  ;;  %v8745_v59 = vmul.f32 %v12839_v28, %v7909_v58  ;;  %9072 = vadd.xlane.f32.xlu1 %v8870_v12  ;;  %v8937_v8 = vpop.xlane.xlu1 %8936 }
 0x4f0   : > { %v8744_v45 = vmul.f32 %v8409_v7, %v7908_v34  ;;  %v12842_v33 = vpop.f32.mrf.mxu1  ;;  %v9714_v48 = vadd.f32 %v9713_v60, %v9712_v43  ;;  %v9320_v30 = vadd.f32 %v9319_v10, %v9318_v26  ;;  %9070 = vadd.xlane.f32.xlu0 %v8869_v21  ;;  %v9321_v56 = vsel %vm9313_vm6, %v8933_v38, 0.0  ;;  %v19959_v60 = vld [vmem:[#allocation359_spill] sm:$0xff] }
 0x4f1   : > { %v7583_v31 = vpop.f32.mrf.mxu0  ;;  %v9715_v24 = vsel %vm9313_vm6, %v9585_v1, 0.0  ;;  %v9717_v6 = vsel %vm9313_vm6, %v9586_v61, 0.0  ;;  %v7911_v58 = vmul.f32 %v12646_v17, %v19959_v60  ;;  %v8935_v28 = vpop.xlane.xlu0 %8934  ;;  %v9588_v43 = vmul.f32 %v8937_v8, %v8937_v8  ;;  %v19960_v1 = vld [vmem:[#allocation361_spill] sm:$0xff] }
 0x4f2   : > { %v8872_v50 = vmul.f32 %v8744_v45, %v17961_v23  ;;  %v7910_v22 = vmul.f32 %v7583_v31, %v18213_v25  ;;  %v8419_v51 = vpop.f32.mrf.mxu1  ;;  %v9322_v34 = vadd.f32 %v9321_v56, %v9320_v30  ;;  %v9716_v7 = vadd.f32 %v9715_v24, %v9714_v48 }
 0x4f3   : > { %v12649_v12 = vpop.f32.mrf.mxu0  ;;  %v9323_v26 = vsel %vm9313_vm6, %v8935_v28, 0.0  ;;  %v9587_v53 = vmul.f32 %v8935_v28, %v8935_v28  ;;  %v8873_v45 = vmul.f32 %v8745_v59, %v17955_v35  ;;  %v9325_v17 = vsel %vm9313_vm6, %v8937_v8, 0.0 }
 0x4f4   : > { %v8746_v21 = vmul.f32 %v8419_v51, %v7910_v22  ;;  %v12845_v38 = vpop.f32.mrf.mxu1  ;;  %v9718_v10 = vadd.f32 %v9717_v6, %v9716_v7  ;;  %v9324_v25 = vadd.f32 %v9323_v26, %v9322_v34  ;;  %v7913_v31 = vmul.f32 %v12649_v12, %v19960_v1  ;;  %9076 = vadd.xlane.f32.xlu1 %v8872_v50  ;;  %v8941_v22 = vpop.xlane.xlu1 %8940  ;;  %v19961_v1 = vld [vmem:[#allocation364_spill] sm:$0xff] }
 0x4f5   : > { %v7593_v61 = vpop.f32.mrf.mxu0  ;;  %v9719_v30 = vsel %vm9313_vm6, %v9587_v53, 0.0  ;;  %9074 = vadd.xlane.f32.xlu0 %v8871_v14  ;;  %v8747_v51 = vmul.f32 %v12842_v33, %v7911_v58  ;;  %v9721_v59 = vsel %vm9313_vm6, %v9588_v43, 0.0  ;;  %v8939_v7 = vpop.xlane.xlu0 %8938  ;;  %v9590_v28 = vmul.f32 %v8941_v22, %v8941_v22 }
 0x4f6   : > { %v8874_v48 = vmul.f32 %v8746_v21, %v17970_v42  ;;  %v7912_v56 = vmul.f32 %v7593_v61, %v18217_v3  ;;  %v8429_v24 = vpop.f32.mrf.mxu1  ;;  %v9326_v6 = vadd.f32 %v9325_v17, %v9324_v25  ;;  %v9720_v34 = vadd.f32 %v9719_v30, %v9718_v10 }
 0x4f7   : > { %v12652_v60 = vpop.f32.mrf.mxu0  ;;  %v9327_v12 = vsel %vm9313_vm6, %v8939_v7, 0.0  ;;  %v9589_v21 = vmul.f32 %v8939_v7, %v8939_v7  ;;  %v8749_v53 = vmul.f32 %v12845_v38, %v7913_v31  ;;  %v9329_v58 = vsel %vm9313_vm6, %v8941_v22, 0.0 }
 0x4f8   : > { %v8748_v50 = vmul.f32 %v8429_v24, %v7912_v56  ;;  %v12848_v8 = vpop.f32.mrf.mxu1  ;;  %v9722_v26 = vadd.f32 %v9721_v59, %v9720_v34  ;;  %v9328_v14 = vadd.f32 %v9327_v12, %v9326_v6  ;;  %v7915_v3 = vmul.f32 %v12652_v60, %v19961_v1  ;;  %9080 = vadd.xlane.f32.xlu1 %v8874_v48  ;;  %v8945_v17 = vpop.xlane.xlu1 %8944 }
 0x4f9   : > { %v7603_v61 = vpop.f32.mrf.mxu0  ;;  %v9723_v43 = vsel %vm9313_vm6, %v9589_v21, 0.0  ;;  %9078 = vadd.xlane.f32.xlu0 %v8873_v45  ;;  %v8875_v30 = vmul.f32 %v8747_v51, %v17965_v5  ;;  %v9725_v38 = vsel %vm9313_vm6, %v9590_v28, 0.0  ;;  %v8943_v24 = vpop.xlane.xlu0 %8942  ;;  %v9592_v6 = vmul.f32 %v8945_v17, %v8945_v17 }
 0x4fa   : > { %v8876_v33 = vmul.f32 %v8748_v50, %v17979_v55  ;;  %v7914_v10 = vmul.f32 %v7603_v61, %v18221_v40  ;;  %v8439_v25 = vpop.f32.mrf.mxu1  ;;  %v9330_v31 = vadd.f32 %v9329_v58, %v9328_v14  ;;  %v9724_v56 = vadd.f32 %v9723_v43, %v9722_v26  ;;  %v19962_v43 = vld [vmem:[#allocation367_spill] sm:$0xff] }
 0x4fb   : > { %v12655_v48 = vpop.f32.mrf.mxu0  ;;  %v9331_v34 = vsel %vm9313_vm6, %v8943_v24, 0.0  ;;  %v9591_v22 = vmul.f32 %v8943_v24, %v8943_v24  ;;  %v8877_v45 = vmul.f32 %v8749_v53, %v17975_v29  ;;  %v8751_v40 = vmul.f32 %v12848_v8, %v7915_v3  ;;  %v19963_v24 = vld [vmem:[#allocation369_spill] sm:$0xff] }
 0x4fc   : > { %v8750_v59 = vmul.f32 %v8439_v25, %v7914_v10  ;;  %v12851_v7 = vpop.f32.mrf.mxu1  ;;  %v9726_v60 = vadd.f32 %v9725_v38, %v9724_v56  ;;  %v9332_v50 = vadd.f32 %v9331_v34, %v9330_v31  ;;  %9084 = vadd.xlane.f32.xlu1 %v8876_v33  ;;  %v9333_v28 = vsel %vm9313_vm6, %v8945_v17, 0.0  ;;  %v8949_v1 = vpop.xlane.xlu1 %8948 }
 0x4fd   : > { %v7613_v12 = vpop.f32.mrf.mxu0  ;;  %v9727_v21 = vsel %vm9313_vm6, %v9591_v22, 0.0  ;;  %9082 = vadd.xlane.f32.xlu0 %v8875_v30  ;;  %v9729_v61 = vsel %vm9313_vm6, %v9592_v6, 0.0  ;;  %v7917_v8 = vmul.f32 %v12655_v48, %v19962_v43  ;;  %v8947_v3 = vpop.xlane.xlu0 %8946  ;;  %v9594_v25 = vmul.f32 %v8949_v1, %v8949_v1 }
 0x4fe   : > { %v8878_v51 = vmul.f32 %v8750_v59, %v17989_v18  ;;  %v7916_v26 = vmul.f32 %v7613_v12, %v18225_v32  ;;  %v8449_v14 = vpop.f32.mrf.mxu1  ;;  %v9334_v58 = vadd.f32 %v9333_v28, %v9332_v50  ;;  %v9728_v53 = vadd.f32 %v9727_v21, %v9726_v60 }
 0x4ff   : > { %v12658_v33 = vpop.f32.mrf.mxu0  ;;  %v9335_v38 = vsel %vm9313_vm6, %v8947_v3, 0.0  ;;  %v9593_v17 = vmul.f32 %v8947_v3, %v8947_v3  ;;  %v8879_v30 = vmul.f32 %v8751_v40, %v17985_v15  ;;  %v9337_v48 = vsel %vm9313_vm6, %v8949_v1, 0.0 }
 0x500   : > { %v8752_v10 = vmul.f32 %v8449_v14, %v7916_v26  ;;  %v12854_v31 = vpop.f32.mrf.mxu1  ;;  %v9730_v56 = vadd.f32 %v9729_v61, %v9728_v53  ;;  %v9336_v32 = vadd.f32 %v9335_v38, %v9334_v58  ;;  %v7919_v59 = vmul.f32 %v12658_v33, %v19963_v24  ;;  %9088 = vadd.xlane.f32.xlu1 %v8878_v51  ;;  %v8953_v12 = vpop.xlane.xlu1 %8952 }
 0x501   : > { %v7623_v6 = vpop.f32.mrf.mxu0  ;;  %v9731_v22 = vsel %vm9313_vm6, %v9593_v17, 0.0  ;;  %9086 = vadd.xlane.f32.xlu0 %v8877_v45  ;;  %v8753_v28 = vmul.f32 %v12851_v7, %v7917_v8  ;;  %v9733_v40 = vsel %vm9313_vm6, %v9594_v25, 0.0  ;;  %v8951_v14 = vpop.xlane.xlu0 %8950  ;;  %v9596_v58 = vmul.f32 %v8953_v12, %v8953_v12 }
 0x502   : > { %v8880_v34 = vmul.f32 %v8752_v10, %v17999_v0  ;;  %v7918_v60 = vmul.f32 %v7623_v6, %v18229_v4  ;;  %v8459_v50 = vpop.f32.mrf.mxu1  ;;  %v9338_v21 = vadd.f32 %v9337_v48, %v9336_v32  ;;  %v9732_v26 = vadd.f32 %v9731_v22, %v9730_v56  ;;  %v19964_v10 = vld [vmem:[#allocation374_spill] sm:$0xff] }
 0x503   : > { %v12661_v61 = vpop.f32.mrf.mxu0  ;;  %v9339_v53 = vsel %vm9313_vm6, %v8951_v14, 0.0  ;;  %v9595_v43 = vmul.f32 %v8951_v14, %v8951_v14  ;;  %v8755_v33 = vmul.f32 %v12854_v31, %v7919_v59  ;;  %v9341_v8 = vsel %vm9313_vm6, %v8953_v12, 0.0 }
 0x504   : > { %v8754_v51 = vmul.f32 %v8459_v50, %v7918_v60  ;;  %v12857_v1 = vpop.f32.mrf.mxu1  ;;  %v9734_v3 = vadd.f32 %v9733_v40, %v9732_v26  ;;  %v9340_v45 = vadd.f32 %v9339_v53, %v9338_v21  ;;  %v7921_v4 = vmul.f32 %v12661_v61, %v19964_v10  ;;  %9092 = vadd.xlane.f32.xlu1 %v8880_v34  ;;  %v8957_v32 = vpop.xlane.xlu1 %8956 }
 0x505   : > { %v7633_v38 = vpop.f32.mrf.mxu0  ;;  %v9735_v25 = vsel %vm9313_vm6, %v9595_v43, 0.0  ;;  %9090 = vadd.xlane.f32.xlu0 %v8879_v30  ;;  %v8881_v24 = vmul.f32 %v8753_v28, %v17995_v36  ;;  %v9737_v31 = vsel %vm9313_vm6, %v9596_v58, 0.0  ;;  %v8955_v48 = vpop.xlane.xlu0 %8954  ;;  %v9598_v60 = vmul.f32 %v8957_v32, %v8957_v32  ;;  %v19965_v28 = vld [vmem:[#allocation61_spill] sm:$0xff] }
 0x506   : > { %v8882_v7 = vmul.f32 %v8754_v51, %v18009_v44  ;;  %v7920_v17 = vmul.f32 %v7633_v38, %v18233_v52  ;;  %v8469_v56 = vpop.f32.mrf.mxu1  ;;  %v9342_v59 = vadd.f32 %v9341_v8, %v9340_v45  ;;  %v9736_v6 = vadd.f32 %v9735_v25, %v9734_v3  ;;  %v19966_v38 = vld [vmem:[#allocation379_spill] sm:$0xff] }
 0x507   : > { %v12664_v34 = vpop.f32.mrf.mxu0  ;;  %v9343_v50 = vsel %vm9313_vm6, %v8955_v48, 0.0  ;;  %v9597_v12 = vmul.f32 %v8955_v48, %v8955_v48  ;;  %v8883_v30 = vmul.f32 %v8755_v33, %v18004_v62  ;;  %v8757_v52 = vmul.f32 %v12857_v1, %v7921_v4 }
 0x508   : > { %v8756_v22 = vmul.f32 %v8469_v56, %v7920_v17  ;;  %v12860_v40 = vpop.f32.mrf.mxu1  ;;  %v9738_v21 = vadd.f32 %v9737_v31, %v9736_v6  ;;  %v9344_v26 = vadd.f32 %v9343_v50, %v9342_v59  ;;  %9096 = vadd.xlane.f32.xlu1 %v8882_v7  ;;  %v9345_v51 = vsel %vm9313_vm6, %v8957_v32, 0.0  ;;  %v8961_v3 = vpop.xlane.xlu1 %8960  ;;  %v19967_v31 = vld [vmem:[#allocation212_spill] sm:$0xff] }
 0x509   : > { %v7643_v14 = vpop.f32.mrf.mxu0  ;;  %v9739_v58 = vsel %vm9313_vm6, %v9597_v12, 0.0  ;;  %9094 = vadd.xlane.f32.xlu0 %v8881_v24  ;;  %v9741_v45 = vsel %vm9313_vm6, %v9598_v60, 0.0  ;;  %v7923_v1 = vmul.f32 %v12664_v34, %v19966_v38  ;;  %v8959_v4 = vpop.xlane.xlu0 %8958  ;;  %v9600_v25 = vmul.f32 %v8961_v3, %v8961_v3  ;;  %v19968_v6 = vld [vmem:[#allocation384_spill] sm:$0xff]  ;;  %v19969_v60 = vld [vmem:[#allocation223_spill] sm:$0xff] }
 0x50a   : > { %v8884_v61 = vmul.f32 %v8756_v22, %v19965_v28  ;;  %v7922_v53 = vmul.f32 %v7643_v14, %v18238_v11  ;;  %v8479_v43 = vpop.f32.mrf.mxu1  ;;  %v9346_v10 = vadd.f32 %v9345_v51, %v9344_v26  ;;  %v9740_v33 = vadd.f32 %v9739_v58, %v9738_v21 }
 0x50b   : > { %v12667_v7 = vpop.f32.mrf.mxu0  ;;  %v9347_v17 = vsel %vm9313_vm6, %v8959_v4, 0.0  ;;  %v9599_v56 = vmul.f32 %v8959_v4, %v8959_v4  ;;  %v8885_v24 = vmul.f32 %v8757_v52, %v19967_v31  ;;  %v9349_v34 = vsel %vm9313_vm6, %v8961_v3, 0.0 }
 0x50c   : > { %v8758_v8 = vmul.f32 %v8479_v43, %v7922_v53  ;;  %v12863_v32 = vpop.f32.mrf.mxu1  ;;  %v9742_v59 = vadd.f32 %v9741_v45, %v9740_v33  ;;  %v9348_v11 = vadd.f32 %v9347_v17, %v9346_v10  ;;  %v7925_v48 = vmul.f32 %v12667_v7, %v19968_v6  ;;  %9100 = vadd.xlane.f32.xlu1 %v8884_v61  ;;  %v8965_v14 = vpop.xlane.xlu1 %8964  ;;  %v19971_v6 = vld [vmem:[#allocation211_spill] sm:$0xff] }
 0x50d   : > { %v7653_v22 = vpop.f32.mrf.mxu0  ;;  %v9743_v12 = vsel %vm9313_vm6, %v9599_v56, 0.0  ;;  %9098 = vadd.xlane.f32.xlu0 %v8883_v30  ;;  %v8759_v51 = vmul.f32 %v12860_v40, %v7923_v1  ;;  %v9745_v52 = vsel %vm9313_vm6, %v9600_v25, 0.0  ;;  %v8963_v43 = vpop.xlane.xlu0 %8962  ;;  %v9602_v10 = vmul.f32 %v8965_v14, %v8965_v14 }
 0x50e   : > { %v8886_v50 = vmul.f32 %v8758_v8, %v19969_v60  ;;  %v7924_v21 = vmul.f32 %v7653_v22, %v18243_v49  ;;  %v8489_v26 = vpop.f32.mrf.mxu1  ;;  %v9350_v58 = vadd.f32 %v9349_v34, %v9348_v11  ;;  %v9744_v53 = vadd.f32 %v9743_v12, %v9742_v59  ;;  %v19970_v8 = vld [vmem:[#allocation385_spill] sm:$0xff] }
 0x50f   : > { %v12670_v45 = vpop.f32.mrf.mxu0  ;;  %v9351_v33 = vsel %vm9313_vm6, %v8963_v43, 0.0  ;;  %v9601_v38 = vmul.f32 %v8963_v43, %v8963_v43  ;;  %v8761_v7 = vmul.f32 %v12863_v32, %v7925_v48  ;;  %v9353_v1 = vsel %vm9313_vm6, %v8965_v14, 0.0 }
 0x510   : > { %v8760_v61 = vmul.f32 %v8489_v26, %v7924_v21  ;;  %v12866_v3 = vpop.f32.mrf.mxu1  ;;  %v9746_v4 = vadd.f32 %v9745_v52, %v9744_v53  ;;  %v9352_v30 = vadd.f32 %v9351_v33, %v9350_v58  ;;  %v7927_v49 = vmul.f32 %v12670_v45, %v19970_v8  ;;  %9104 = vadd.xlane.f32.xlu1 %v8886_v50  ;;  %v8969_v11 = vpop.xlane.xlu1 %8968  ;;  %v19972_v53 = vld [vmem:[#allocation60_spill] sm:$0xff] }
 0x511   : > { %v7663_v17 = vpop.f32.mrf.mxu0  ;;  %v9747_v25 = vsel %vm9313_vm6, %v9601_v38, 0.0  ;;  %9102 = vadd.xlane.f32.xlu0 %v8885_v24  ;;  %v8887_v22 = vmul.f32 %v8759_v51, %v19971_v6  ;;  %v9749_v32 = vsel %vm9313_vm6, %v9602_v10, 0.0  ;;  %v8967_v12 = vpop.xlane.xlu0 %8966  ;;  %v9604_v26 = vmul.f32 %v8969_v11, %v8969_v11 }
 0x512   : > { %v8888_v40 = vmul.f32 %v8760_v61, %v18038_v63  ;;  %v7926_v56 = vmul.f32 %v7663_v17, %v18247_v20  ;;  %v8499_v59 = vpop.f32.mrf.mxu1  ;;  %v9354_v48 = vadd.f32 %v9353_v1, %v9352_v30  ;;  %v9748_v34 = vadd.f32 %v9747_v25, %v9746_v4  ;;  %v19973_v1 = vld [vmem:[#allocation31_spill] sm:$0xff] }
 0x513   : > { %v12673_v50 = vpop.f32.mrf.mxu0  ;;  %v9355_v52 = vsel %vm9313_vm6, %v8967_v12, 0.0  ;;  %v9603_v14 = vmul.f32 %v8967_v12, %v8967_v12  ;;  %v8889_v24 = vmul.f32 %v8761_v7, %v19972_v53  ;;  %v8763_v20 = vmul.f32 %v12866_v3, %v7927_v49  ;;  %v19975_v12 = vld [vmem:[#allocation32_spill] sm:$0xff] }
 0x514   : > { %v8762_v21 = vmul.f32 %v8499_v59, %v7926_v56  ;;  %v12869_v58 = vpop.f32.mrf.mxu1  ;;  %v9750_v43 = vadd.f32 %v9749_v32, %v9748_v34  ;;  %v9356_v45 = vadd.f32 %v9355_v52, %v9354_v48  ;;  %9108 = vadd.xlane.f32.xlu1 %v8888_v40  ;;  %v9357_v10 = vsel %vm9313_vm6, %v8969_v11, 0.0  ;;  %v8973_v30 = vpop.xlane.xlu1 %8972  ;;  %v19974_v48 = vld [vmem:[#allocation222_spill] sm:$0xff]  ;;  %v19976_v52 = vld [vmem:[#allocation63_spill] sm:$0xff] }
 0x515   : > { %v7673_v61 = vpop.f32.mrf.mxu0  ;;  %v9751_v33 = vsel %vm9313_vm6, %v9603_v14, 0.0  ;;  %9106 = vadd.xlane.f32.xlu0 %v8887_v22  ;;  %v9753_v8 = vsel %vm9313_vm6, %v9604_v26, 0.0  ;;  %v7929_v3 = vmul.f32 %v12673_v50, %v19973_v1  ;;  %v8971_v49 = vpop.xlane.xlu0 %8970  ;;  %v9606_v56 = vmul.f32 %v8973_v30, %v8973_v30 }
 0x516   : > { %v8890_v51 = vmul.f32 %v8762_v21, %v18047_v27  ;;  %v7928_v38 = vmul.f32 %v7673_v61, %v18251_v37  ;;  %v8509_v4 = vpop.f32.mrf.mxu1  ;;  %v9358_v17 = vadd.f32 %v9357_v10, %v9356_v45  ;;  %v9752_v7 = vadd.f32 %v9751_v33, %v9750_v43 }
 0x517   : > { %v12676_v40 = vpop.f32.mrf.mxu0  ;;  %v9359_v59 = vsel %vm9313_vm6, %v8971_v49, 0.0  ;;  %v9605_v11 = vmul.f32 %v8971_v49, %v8971_v49  ;;  %v8891_v22 = vmul.f32 %v8763_v20, %v19974_v48  ;;  %v9361_v50 = vsel %vm9313_vm6, %v8973_v30, 0.0 }
 0x518   : > { %v8764_v25 = vmul.f32 %v8509_v4, %v7928_v38  ;;  %v12872_v32 = vpop.f32.mrf.mxu1  ;;  %v9754_v34 = vadd.f32 %v9753_v8, %v9752_v7  ;;  %v9360_v37 = vadd.f32 %v9359_v59, %v9358_v17  ;;  %v7931_v21 = vmul.f32 %v12676_v40, %v19975_v12  ;;  %9112 = vadd.xlane.f32.xlu1 %v8890_v51  ;;  %v8977_v10 = vpop.xlane.xlu1 %8976  ;;  %v19977_v59 = vld [vmem:[#allocation18_spill] sm:$0xff] }
 0x519   : > { %v7683_v26 = vpop.f32.mrf.mxu0  ;;  %v9755_v43 = vsel %vm9313_vm6, %v9605_v11, 0.0  ;;  %9110 = vadd.xlane.f32.xlu0 %v8889_v24  ;;  %v8765_v33 = vmul.f32 %v12869_v58, %v7929_v3  ;;  %v9757_v20 = vsel %vm9313_vm6, %v9606_v56, 0.0  ;;  %v8975_v8 = vpop.xlane.xlu0 %8974  ;;  %v9608_v7 = vmul.f32 %v8977_v10, %v8977_v10 }
 0x51a   : > { %v8892_v14 = vmul.f32 %v8764_v25, %v19976_v52  ;;  %v7930_v45 = vmul.f32 %v7683_v26, %v18255_v47  ;;  %v8519_v61 = vpop.f32.mrf.mxu1  ;;  %v9362_v38 = vadd.f32 %v9361_v50, %v9360_v37  ;;  %v9756_v4 = vadd.f32 %v9755_v43, %v9754_v34  ;;  %v19978_v26 = vld [vmem:[#allocation235_spill] sm:$0xff] }
 0x51b   : > { %v12679_v17 = vpop.f32.mrf.mxu0  ;;  %v9363_v1 = vsel %vm9313_vm6, %v8975_v8, 0.0  ;;  %v9607_v49 = vmul.f32 %v8975_v8, %v8975_v8  ;;  %v8767_v25 = vmul.f32 %v12872_v32, %v7931_v21  ;;  %v9365_v3 = vsel %vm9313_vm6, %v8977_v10, 0.0  ;;  %v19979_v8 = vld [vmem:[#allocation234_spill] sm:$0xff] }
 0x51c   : > { %v8766_v51 = vmul.f32 %v8519_v61, %v7930_v45  ;;  %v12875_v30 = vpop.f32.mrf.mxu1  ;;  %v9758_v40 = vadd.f32 %v9757_v20, %v9756_v4  ;;  %v9364_v24 = vadd.f32 %v9363_v1, %v9362_v38  ;;  %v7933_v47 = vmul.f32 %v12679_v17, %v19977_v59  ;;  %9116 = vadd.xlane.f32.xlu1 %v8892_v14  ;;  %v8981_v12 = vpop.xlane.xlu1 %8980 }
 0x51d   : > { %v7693_v11 = vpop.f32.mrf.mxu0  ;;  %v9759_v56 = vsel %vm9313_vm6, %v9607_v49, 0.0  ;;  %9114 = vadd.xlane.f32.xlu0 %v8891_v22  ;;  %v8893_v50 = vmul.f32 %v8765_v33, %v19978_v26  ;;  %v9761_v32 = vsel %vm9313_vm6, %v9608_v7, 0.0  ;;  %v8979_v45 = vpop.xlane.xlu0 %8978  ;;  %v9610_v20 = vmul.f32 %v8981_v12, %v8981_v12 }
 0x51e   : > { %v8894_v58 = vmul.f32 %v8766_v51, %v18067_v54  ;;  %v7932_v34 = vmul.f32 %v7693_v11, %v18259_v9  ;;  %v8529_v37 = vpop.f32.mrf.mxu1  ;;  %v9366_v21 = vadd.f32 %v9365_v3, %v9364_v24  ;;  %v9760_v43 = vadd.f32 %v9759_v56, %v9758_v40  ;;  %v19980_v56 = vld [vmem:[#allocation5_spill] sm:$0xff] }
 0x51f   : > { %v12682_v14 = vpop.f32.mrf.mxu0  ;;  %v9367_v38 = vsel %vm9313_vm6, %v8979_v45, 0.0  ;;  %v9609_v10 = vmul.f32 %v8979_v45, %v8979_v45  ;;  %v8895_v22 = vmul.f32 %v8767_v25, %v19979_v8  ;;  %v8769_v9 = vmul.f32 %v12875_v30, %v7933_v47 }
 0x520   : > { %v8768_v61 = vmul.f32 %v8529_v37, %v7932_v34  ;;  %v12878_v4 = vpop.f32.mrf.mxu1  ;;  %v9762_v17 = vadd.f32 %v9761_v32, %v9760_v43  ;;  %v9368_v51 = vadd.f32 %v9367_v38, %v9366_v21  ;;  %9120 = vadd.xlane.f32.xlu1 %v8894_v58  ;;  %v9369_v7 = vsel %vm9313_vm6, %v8981_v12, 0.0  ;;  %v8985_v59 = vpop.xlane.xlu1 %8984  ;;  %v19981_v43 = vld [vmem:[#allocation247_spill] sm:$0xff] }
 0x521   : > { %v7703_v1 = vpop.f32.mrf.mxu0  ;;  %v9763_v49 = vsel %vm9313_vm6, %v9609_v10, 0.0  ;;  %9118 = vadd.xlane.f32.xlu0 %v8893_v50  ;;  %v9765_v11 = vsel %vm9313_vm6, %v9610_v20, 0.0  ;;  %v7935_v30 = vmul.f32 %v12682_v14, %v19980_v56  ;;  %v8983_v47 = vpop.xlane.xlu0 %8982  ;;  %v9612_v37 = vmul.f32 %v8985_v59, %v8985_v59  ;;  %v19983_v10 = vld [vmem:[#allocation111_spill] sm:$0xff] }
 0x522   : > { %v8896_v33 = vmul.f32 %v8768_v61, %v18077_v13  ;;  %v7934_v40 = vmul.f32 %v7703_v1, %v18263_v2  ;;  %v8539_v24 = vpop.f32.mrf.mxu1  ;;  %v9370_v3 = vadd.f32 %v9369_v7, %v9368_v51  ;;  %v9764_v25 = vadd.f32 %v9763_v49, %v9762_v17  ;;  %v19982_v61 = vld [vmem:[#allocation19_spill] sm:$0xff]  ;;  %v19984_v1 = vld [vmem:[#allocation226_spill] sm:$0xff] }
 0x523   : > { %v12685_v58 = vpop.f32.mrf.mxu0  ;;  %v9371_v32 = vsel %vm9313_vm6, %v8983_v47, 0.0  ;;  %v9611_v12 = vmul.f32 %v8983_v47, %v8983_v47  ;;  %v8897_v50 = vmul.f32 %v8769_v9, %v19981_v43  ;;  %v9373_v14 = vsel %vm9313_vm6, %v8985_v59, 0.0 }
 0x524   : > { %v8770_v34 = vmul.f32 %v8539_v24, %v7934_v40  ;;  %v12881_v21 = vpop.f32.mrf.mxu1  ;;  %v9766_v45 = vadd.f32 %v9765_v11, %v9764_v25  ;;  %v9372_v2 = vadd.f32 %v9371_v32, %v9370_v3  ;;  %v7937_v38 = vmul.f32 %v12685_v58, %v19982_v61  ;;  %9124 = vadd.xlane.f32.xlu1 %v8896_v33  ;;  %v8989_v40 = vpop.xlane.xlu1 %8988  ;;  %v19985_v61 = vld [vmem:[#allocation6_spill] sm:$0xff] }
 0x525   : > { %v7713_v20 = vpop.f32.mrf.mxu0  ;;  %v9767_v51 = vsel %vm9313_vm6, %v9611_v12, 0.0  ;;  %9122 = vadd.xlane.f32.xlu0 %v8895_v22  ;;  %v8771_v24 = vmul.f32 %v12878_v4, %v7935_v30  ;;  %v9769_v9 = vsel %vm9313_vm6, %v9612_v37, 0.0  ;;  %v8987_v25 = vpop.xlane.xlu0 %8986  ;;  %v9614_v47 = vmul.f32 %v8989_v40, %v8989_v40  ;;  %v19986_v4 = vld [vmem:[#allocation246_spill] sm:$0xff] }
 0x526   : > { %v8898_v17 = vmul.f32 %v8770_v34, %v19983_v10  ;;  %v7936_v7 = vmul.f32 %v7713_v20, %v19984_v1  ;;  %v8549_v49 = vpop.f32.mrf.mxu1  ;;  %v9374_v11 = vadd.f32 %v9373_v14, %v9372_v2  ;;  %v9768_v3 = vadd.f32 %v9767_v51, %v9766_v45  ;;  %v19987_v2 = vld [vmem:[#allocation295_spill] sm:$0xff] }
 0x527   : > { %v12688_v56 = vpop.f32.mrf.mxu0  ;;  %v9375_v58 = vsel %vm9313_vm6, %v8987_v25, 0.0  ;;  %v9613_v34 = vmul.f32 %v8987_v25, %v8987_v25  ;;  %v8773_v12 = vmul.f32 %v12881_v21, %v7937_v38  ;;  %v9377_v37 = vsel %vm9313_vm6, %v8989_v40, 0.0 }
 0x528   : > { %v8772_v33 = vmul.f32 %v8549_v49, %v7936_v7  ;;  %v12884_v59 = vpop.f32.mrf.mxu1  ;;  %v9770_v32 = vadd.f32 %v9769_v9, %v9768_v3  ;;  %v9376_v22 = vadd.f32 %v9375_v58, %v9374_v11  ;;  %v7939_v20 = vmul.f32 %v12688_v56, %v19985_v61  ;;  %9128 = vadd.xlane.f32.xlu1 %v8898_v17  ;;  %v8993_v7 = vpop.xlane.xlu1 %8992  ;;  %v19988_v49 = vld [vmem:[#allocation62_spill] sm:$0xff] }
 0x529   : > { %v7723_v1 = vpop.f32.mrf.mxu0  ;;  %v9771_v45 = vsel %vm9313_vm6, %v9613_v34, 0.0  ;;  %9126 = vadd.xlane.f32.xlu0 %v8897_v50  ;;  %v8899_v25 = vmul.f32 %v8771_v24, %v19988_v49  ;;  %v9773_v21 = vsel %vm9313_vm6, %v9614_v47, 0.0  ;;  %v8991_v11 = vpop.xlane.xlu0 %8990  ;;  %v9616_v56 = vmul.f32 %v8993_v7, %v8993_v7  ;;  %v19989_v34 = vld [vmem:[#allocation213_spill] sm:$0xff]  ;;  %v19990_v24 = vld [vmem:[#allocation214_spill] sm:$0xff] }
 0x52a   : > { %v8900_v30 = vmul.f32 %v8772_v33, %v19986_v4  ;;  %v7938_v14 = vmul.f32 %v7723_v1, %v19987_v2  ;;  %v8559_v51 = vpop.f32.mrf.mxu1  ;;  %v9378_v38 = vadd.f32 %v9377_v37, %v9376_v22  ;;  %v9772_v9 = vadd.f32 %v9771_v45, %v9770_v32 }
 0x52b   : > { %v12691_v17 = vpop.f32.mrf.mxu0  ;;  %v9379_v33 = vsel %vm9313_vm6, %v8991_v11, 0.0  ;;  %v9615_v40 = vmul.f32 %v8991_v11, %v8991_v11  ;;  %v8901_v50 = vmul.f32 %v8773_v12, %v19989_v34  ;;  %v8775_v1 = vmul.f32 %v12884_v59, %v7939_v20 }
 0x52c   : > { %v8774_v3 = vmul.f32 %v8559_v51, %v7938_v14  ;;  %v12887_v58 = vpop.f32.mrf.mxu1  ;;  %v9774_v61 = vadd.f32 %v9773_v21, %v9772_v9  ;;  %v9380_v2 = vadd.f32 %v9379_v33, %v9378_v38  ;;  %9132 = vadd.xlane.f32.xlu1 %v8900_v30  ;;  %v9381_v47 = vsel %vm9313_vm6, %v8993_v7, 0.0  ;;  %v8997_v45 = vpop.xlane.xlu1 %8996  ;;  %v19991_v21 = vld [vmem:[#allocation25_spill] sm:$0xff]  ;;  %v19992_v33 = vld [vmem:[#allocation116_spill] sm:$0xff] }
 0x52d   : > { %v7733_v4 = vpop.f32.mrf.mxu0  ;;  %v9775_v32 = vsel %vm9313_vm6, %v9615_v40, 0.0  ;;  %9130 = vadd.xlane.f32.xlu0 %v8899_v25  ;;  %v9777_v14 = vsel %vm9313_vm6, %v9616_v56, 0.0  ;;  %v7941_v59 = vmul.f32 %v12691_v17, %v19991_v21  ;;  %v8995_v20 = vpop.xlane.xlu0 %8994  ;;  %v9618_v9 = vmul.f32 %v8997_v45, %v8997_v45 }
 0x52e   : > { %v8902_v49 = vmul.f32 %v8774_v3, %v19990_v24  ;;  %v7940_v22 = vmul.f32 %v7733_v4, %v18276_v41  ;;  %v8569_v37 = vpop.f32.mrf.mxu1  ;;  %v9382_v51 = vadd.f32 %v9381_v47, %v9380_v2  ;;  %v9776_v12 = vadd.f32 %v9775_v32, %v9774_v61  ;;  %v19993_v4 = vld [vmem:[#allocation28_spill] sm:$0xff]  ;;  %v19994_v2 = vld [vmem:[#allocation65_spill] sm:$0xff]  ;;  %v19995_v32 = vld [vmem:[#allocation35_spill] sm:$0xff] }
 0x52f   : > { %v12694_v30 = vpop.f32.mrf.mxu0  ;;  %v9383_v11 = vsel %vm9313_vm6, %v8995_v20, 0.0  ;;  %v9617_v7 = vmul.f32 %v8995_v20, %v8995_v20  ;;  %v8903_v25 = vmul.f32 %v8775_v1, %v19992_v33  ;;  %v9385_v17 = vsel %vm9313_vm6, %v8997_v45, 0.0  ;;  %v19996_v33 = vld [vmem:[#allocation13_spill] sm:$0xff] }
 0x530   : > { %v8776_v38 = vmul.f32 %v8569_v37, %v7940_v22  ;;  %v12890_v3 = vpop.f32.mrf.mxu1  ;;  %v9778_v40 = vadd.f32 %v9777_v14, %v9776_v12  ;;  %v9384_v41 = vadd.f32 %v9383_v11, %v9382_v51  ;;  %v7943_v24 = vmul.f32 %v12694_v30, %v19993_v4  ;;  %9136 = vadd.xlane.f32.xlu1 %v8902_v49  ;;  %v9001_v21 = vpop.xlane.xlu1 %9000 }
 0x531   : > { %v7743_v56 = vpop.f32.mrf.mxu0  ;;  %v9779_v47 = vsel %vm9313_vm6, %v9617_v7, 0.0  ;;  %9134 = vadd.xlane.f32.xlu0 %v8901_v50  ;;  %v8777_v20 = vmul.f32 %v12887_v58, %v7941_v59  ;;  %v9781_v1 = vsel %vm9313_vm6, %v9618_v9, 0.0  ;;  %v8999_v12 = vpop.xlane.xlu0 %8998  ;;  %v9620_v11 = vmul.f32 %v9001_v21, %v9001_v21  ;;  %v19997_v58 = vld [vmem:[#allocation122_spill] sm:$0xff] }
 0x532   : > { %v8904_v61 = vmul.f32 %v8776_v38, %v19994_v2  ;;  %v7942_v22 = vmul.f32 %v7743_v56, %v19995_v32  ;;  %v8579_v37 = vpop.f32.mrf.mxu1  ;;  %v9386_v14 = vadd.f32 %v9385_v17, %v9384_v41  ;;  %v9780_v51 = vadd.f32 %v9779_v47, %v9778_v40  ;;  %v19998_v41 = vld [vmem:[#allocation224_spill] sm:$0xff] }
 0x533   : > { %v12697_v30 = vpop.f32.mrf.mxu0  ;;  %v9387_v38 = vsel %vm9313_vm6, %v8999_v12, 0.0  ;;  %v9619_v4 = vmul.f32 %v8999_v12, %v8999_v12  ;;  %v8779_v7 = vmul.f32 %v12890_v3, %v7943_v24  ;;  %v9389_v9 = vsel %vm9313_vm6, %v9001_v21, 0.0 }
 0x534   : > { %v8778_v49 = vmul.f32 %v8579_v37, %v7942_v22  ;;  %v12893_v45 = vpop.f32.mrf.mxu1  ;;  %v9782_v2 = vadd.f32 %v9781_v1, %v9780_v51  ;;  %v9388_v50 = vadd.f32 %v9387_v38, %v9386_v14  ;;  %v7945_v56 = vmul.f32 %v12697_v30, %v19996_v33  ;;  %9140 = vadd.xlane.f32.xlu1 %v8904_v61  ;;  %v9005_v22 = vpop.xlane.xlu1 %9004  ;;  %v19999_v37 = vld [vmem:[#allocation259_spill] sm:$0xff]  ;;  %v20000_v38 = vld [vmem:[#allocation258_spill] sm:$0xff] }
 0x535   : > { %v7753_v32 = vpop.f32.mrf.mxu0  ;;  %v9783_v40 = vsel %vm9313_vm6, %v9619_v4, 0.0  ;;  %9138 = vadd.xlane.f32.xlu0 %v8903_v25  ;;  %v8905_v12 = vmul.f32 %v8777_v20, %v19999_v37  ;;  %v9785_v24 = vsel %vm9313_vm6, %v9620_v11, 0.0  ;;  %v9003_v33 = vpop.xlane.xlu0 %9002  ;;  %v9622_v51 = vmul.f32 %v9005_v22, %v9005_v22  ;;  %v20001_v20 = vld [vmem:[#allocation271_spill] sm:$0xff] }
 0x536   : > { %v8906_v59 = vmul.f32 %v8778_v49, %v19997_v58  ;;  %v7944_v17 = vmul.f32 %v7753_v32, %v19998_v41  ;;  %v8589_v47 = vpop.f32.mrf.mxu1  ;;  %v9390_v3 = vadd.f32 %v9389_v9, %v9388_v50  ;;  %v9784_v1 = vadd.f32 %v9783_v40, %v9782_v2  ;;  %v20002_v50 = vld [vmem:[#allocation66_spill] sm:$0xff] }
 0x537   : > { %v12700_v61 = vpop.f32.mrf.mxu0  ;;  %v9391_v30 = vsel %vm9313_vm6, %v9003_v33, 0.0  ;;  %v9621_v21 = vmul.f32 %v9003_v33, %v9003_v33  ;;  %v8907_v25 = vmul.f32 %v8779_v7, %v20000_v38  ;;  %v8781_v32 = vmul.f32 %v12893_v45, %v7945_v56 }
 0x538   : > { %v8780_v14 = vmul.f32 %v8589_v47, %v7944_v17  ;;  %v12896_v49 = vpop.f32.mrf.mxu1  ;;  %v9786_v4 = vadd.f32 %v9785_v24, %v9784_v1  ;;  %v9392_v41 = vadd.f32 %v9391_v30, %v9390_v3  ;;  %9144 = vadd.xlane.f32.xlu1 %v8906_v59  ;;  %v9393_v11 = vsel %vm9313_vm6, %v9005_v22, 0.0  ;;  %v9009_v17 = vpop.xlane.xlu1 %9008  ;;  %v20003_v24 = vld [vmem:[#allocation29_spill] sm:$0xff] }
 0x539   : > { %v7763_v58 = vpop.f32.mrf.mxu0  ;;  %v9787_v2 = vsel %vm9313_vm6, %v9621_v21, 0.0  ;;  %9142 = vadd.xlane.f32.xlu0 %v8905_v12  ;;  %v9789_v47 = vsel %vm9313_vm6, %v9622_v51, 0.0  ;;  %v7947_v45 = vmul.f32 %v12700_v61, %v20003_v24  ;;  %v9007_v56 = vpop.xlane.xlu0 %9006  ;;  %v9624_v1 = vmul.f32 %v9009_v17, %v9009_v17  ;;  %v20004_v21 = vld [vmem:[#allocation217_spill] sm:$0xff] }
 0x53a   : > { %v8908_v37 = vmul.f32 %v8780_v14, %v20001_v20  ;;  %v7946_v9 = vmul.f32 %v7763_v58, %v20002_v50  ;;  %v8599_v40 = vpop.f32.mrf.mxu1  ;;  %v9394_v33 = vadd.f32 %v9393_v11, %v9392_v41  ;;  %v9788_v7 = vadd.f32 %v9787_v2, %v9786_v4  ;;  %v20005_v50 = vld [vmem:[#allocation36_spill] sm:$0xff] }
 0x53b   : > { %v12703_v59 = vpop.f32.mrf.mxu0  ;;  %v9395_v14 = vsel %vm9313_vm6, %v9007_v56, 0.0  ;;  %v9623_v22 = vmul.f32 %v9007_v56, %v9007_v56  ;;  %v8909_v12 = vmul.f32 %v8781_v32, %v20004_v21  ;;  %v20006_v41 = vld [vmem:[#allocation216_spill] sm:$0xff]  ;;  %v9397_v61 = vsel %vm9313_vm6, %v9009_v17, 0.0 }
 0x53c   : > { %v8782_v3 = vmul.f32 %v8599_v40, %v7946_v9  ;;  %v12899_v30 = vpop.f32.mrf.mxu1  ;;  %v9790_v20 = vadd.f32 %v9789_v47, %v9788_v7  ;;  %v9396_v58 = vadd.f32 %v9395_v14, %v9394_v33  ;;  %v7949_v38 = vmul.f32 %v12703_v59, %v20005_v50  ;;  %9148 = vadd.xlane.f32.xlu1 %v8908_v37  ;;  %v9013_v40 = vpop.xlane.xlu1 %9012 }
 0x53d   : > { %v7773_v51 = vpop.f32.mrf.mxu0  ;;  %v9791_v11 = vsel %vm9313_vm6, %v9623_v22, 0.0  ;;  %9146 = vadd.xlane.f32.xlu0 %v8907_v25  ;;  %v8783_v24 = vmul.f32 %v12896_v49, %v7947_v45  ;;  %v9793_v32 = vsel %vm9313_vm6, %v9624_v1, 0.0  ;;  %v9011_v7 = vpop.xlane.xlu0 %9010  ;;  %v9626_v59 = vmul.f32 %v9013_v40, %v9013_v40  ;;  %v20008_v49 = vld [vmem:[#allocation270_spill] sm:$0xff] }
 0x53e   : > { %v8910_v4 = vmul.f32 %v8782_v3, %v20006_v41  ;;  %v7948_v2 = vmul.f32 %v7773_v51, %v18301_v57  ;;  %v8609_v9 = vpop.f32.mrf.mxu1  ;;  %v9398_v47 = vadd.f32 %v9397_v61, %v9396_v58  ;;  %v9792_v33 = vadd.f32 %v9791_v11, %v9790_v20  ;;  %v20007_v41 = vld [vmem:[#allocation17_spill] sm:$0xff]  ;;  %v20009_v58 = vld [vmem:[#allocation16_spill] sm:$0xff] }
 0x53f   : > { %v12706_v56 = vpop.f32.mrf.mxu0  ;;  %v9399_v3 = vsel %vm9313_vm6, %v9011_v7, 0.0  ;;  %v9625_v14 = vmul.f32 %v9011_v7, %v9011_v7  ;;  %v8785_v22 = vmul.f32 %v12899_v30, %v7949_v38  ;;  %v9401_v1 = vsel %vm9313_vm6, %v9013_v40, 0.0 }
 0x540   : > { %v8784_v37 = vmul.f32 %v8609_v9, %v7948_v2  ;;  %v12902_v17 = vpop.f32.mrf.mxu1  ;;  %v9794_v50 = vadd.f32 %v9793_v32, %v9792_v33  ;;  %v9400_v25 = vadd.f32 %v9399_v3, %v9398_v47  ;;  %v7951_v57 = vmul.f32 %v12706_v56, %v20007_v41  ;;  %9152 = vadd.xlane.f32.xlu1 %v8910_v4  ;;  %v9017_v2 = vpop.xlane.xlu1 %9016  ;;  %v20010_v9 = vld [vmem:[#allocation119_spill] sm:$0xff]  ;;  %v20011_v3 = vld [vmem:[#allocation64_spill] sm:$0xff] }
 0x541   : > { %v7783_v51 = vpop.f32.mrf.mxu0  ;;  %v9795_v20 = vsel %vm9313_vm6, %v9625_v14, 0.0  ;;  %9150 = vadd.xlane.f32.xlu0 %v8909_v12  ;;  %v8911_v7 = vmul.f32 %v8783_v24, %v20010_v9  ;;  %v9797_v38 = vsel %vm9313_vm6, %v9626_v59, 0.0  ;;  %v9015_v41 = vpop.xlane.xlu0 %9014  ;;  %v9628_v33 = vmul.f32 %v9017_v2, %v9017_v2  ;;  %v20012_v24 = vld [vmem:[#allocation220_spill] sm:$0xff] }
 0x542   : > { %v8912_v45 = vmul.f32 %v8784_v37, %v20008_v49  ;;  %v7950_v61 = vmul.f32 %v7783_v51, %v20009_v58  ;;  %v8619_v11 = vpop.f32.mrf.mxu1  ;;  %v9402_v30 = vadd.f32 %v9401_v1, %v9400_v25  ;;  %v9796_v32 = vadd.f32 %v9795_v20, %v9794_v50  ;;  %v20013_v25 = vld [vmem:[#allocation59_spill] sm:$0xff] }
 0x543   : > { %v12709_v4 = vpop.f32.mrf.mxu0  ;;  %v9403_v56 = vsel %vm9313_vm6, %v9015_v41, 0.0  ;;  %v9627_v40 = vmul.f32 %v9015_v41, %v9015_v41  ;;  %v8913_v12 = vmul.f32 %v8785_v22, %v20011_v3  ;;  %v8787_v51 = vmul.f32 %v12902_v17, %v7951_v57 }
 0x544   : > { %v8786_v47 = vmul.f32 %v8619_v11, %v7950_v61  ;;  %v12905_v37 = vpop.f32.mrf.mxu1  ;;  %v9798_v14 = vadd.f32 %v9797_v38, %v9796_v32  ;;  %v9404_v58 = vadd.f32 %v9403_v56, %v9402_v30  ;;  %9156 = vadd.xlane.f32.xlu1 %v8912_v45  ;;  %v9405_v59 = vsel %vm9313_vm6, %v9017_v2, 0.0  ;;  %v9021_v61 = vpop.xlane.xlu1 %9020  ;;  %v20014_v38 = vld [vmem:[#allocation51_spill] sm:$0xff] }
 0x545   : > { %v7793_v49 = vpop.f32.mrf.mxu0  ;;  %v9799_v50 = vsel %vm9313_vm6, %v9627_v40, 0.0  ;;  %9154 = vadd.xlane.f32.xlu0 %v8911_v7  ;;  %v9801_v11 = vsel %vm9313_vm6, %v9628_v33, 0.0  ;;  %v7953_v17 = vmul.f32 %v12709_v4, %v20014_v38  ;;  %v9019_v57 = vpop.xlane.xlu0 %9018  ;;  %v9630_v32 = vmul.f32 %v9021_v61, %v9021_v61  ;;  %v20015_v40 = vld [vmem:[#allocation129_spill] sm:$0xff] }
 0x546   : > { %v8914_v9 = vmul.f32 %v8786_v47, %v20012_v24  ;;  %v7952_v1 = vmul.f32 %v7793_v49, %v20013_v25  ;;  %v8629_v20 = vpop.f32.mrf.mxu1  ;;  %v9406_v41 = vadd.f32 %v9405_v59, %v9404_v58  ;;  %v9800_v22 = vadd.f32 %v9799_v50, %v9798_v14  ;;  %v20016_v25 = vld [vmem:[#allocation38_spill] sm:$0xff]  ;;  %v20018_v50 = vld [vmem:[#allocation37_spill] sm:$0xff] }
 0x547   : > { %v12712_v45 = vpop.f32.mrf.mxu0  ;;  %v9407_v47 = vsel %vm9313_vm6, %v9019_v57, 0.0  ;;  %v9629_v2 = vmul.f32 %v9019_v57, %v9019_v57  ;;  %v8915_v7 = vmul.f32 %v8787_v51, %v20015_v40  ;;  %v20017_v58 = vld [vmem:[#allocation126_spill] sm:$0xff]  ;;  %v9409_v4 = vsel %vm9313_vm6, %v9021_v61, 0.0  ;;  %v20019_v40 = vld [vmem:[#allocation72_spill] sm:$0xff] }
 0x548   : > { %v8788_v30 = vmul.f32 %v8629_v20, %v7952_v1  ;;  %v12908_v56 = vpop.f32.mrf.mxu1  ;;  %v9802_v24 = vadd.f32 %v9801_v11, %v9800_v22  ;;  %v9408_v49 = vadd.f32 %v9407_v47, %v9406_v41  ;;  %v7955_v3 = vmul.f32 %v12712_v45, %v20016_v25  ;;  %9160 = vadd.xlane.f32.xlu1 %v8914_v9  ;;  %v9025_v38 = vpop.xlane.xlu1 %9024 }
 0x549   : > { %v7803_v33 = vpop.f32.mrf.mxu0  ;;  %v9803_v59 = vsel %vm9313_vm6, %v9629_v2, 0.0  ;;  %9158 = vadd.xlane.f32.xlu0 %v8913_v12  ;;  %v8789_v57 = vmul.f32 %v12905_v37, %v7953_v17  ;;  %v9805_v51 = vsel %vm9313_vm6, %v9630_v32, 0.0  ;;  %v9023_v22 = vpop.xlane.xlu0 %9022  ;;  %v9632_v47 = vmul.f32 %v9025_v38, %v9025_v38  ;;  %v20020_v37 = vld [vmem:[#allocation67_spill] sm:$0xff] }
 0x54a   : > { %v8916_v14 = vmul.f32 %v8788_v30, %v20017_v58  ;;  %v7954_v1 = vmul.f32 %v7803_v33, %v20018_v50  ;;  %v8639_v20 = vpop.f32.mrf.mxu1  ;;  %v9410_v11 = vadd.f32 %v9409_v4, %v9408_v49  ;;  %v9804_v41 = vadd.f32 %v9803_v59, %v9802_v24  ;;  %v20021_v49 = vld [vmem:[#allocation40_spill] sm:$0xff] }
 0x54b   : > { %v12715_v45 = vpop.f32.mrf.mxu0  ;;  %v9411_v30 = vsel %vm9313_vm6, %v9023_v22, 0.0  ;;  %v9631_v25 = vmul.f32 %v9023_v22, %v9023_v22  ;;  %v8791_v2 = vmul.f32 %v12908_v56, %v7955_v3  ;;  %v9413_v32 = vsel %vm9313_vm6, %v9025_v38, 0.0 }
 0x54c   : > { %v8790_v9 = vmul.f32 %v8639_v20, %v7954_v1  ;;  %v12911_v61 = vpop.f32.mrf.mxu1  ;;  %v9806_v58 = vadd.f32 %v9805_v51, %v9804_v41  ;;  %v9412_v12 = vadd.f32 %v9411_v30, %v9410_v11  ;;  %v7957_v33 = vmul.f32 %v12715_v45, %v20019_v40  ;;  %9164 = vadd.xlane.f32.xlu1 %v8916_v14  ;;  %v9029_v1 = vpop.xlane.xlu1 %9028  ;;  %v20022_v20 = vld [vmem:[#allocation283_spill] sm:$0xff] }
 0x54d   : > { %v7813_v50 = vpop.f32.mrf.mxu0  ;;  %v9807_v24 = vsel %vm9313_vm6, %v9631_v25, 0.0  ;;  %9162 = vadd.xlane.f32.xlu0 %v8915_v7  ;;  %v8917_v22 = vmul.f32 %v8789_v57, %v20022_v20  ;;  %v9809_v3 = vsel %vm9313_vm6, %v9632_v47, 0.0  ;;  %v9027_v40 = vpop.xlane.xlu0 %9026  ;;  %v9634_v41 = vmul.f32 %v9029_v1, %v9029_v1  ;;  %v20023_v30 = vld [vmem:[#allocation219_spill] sm:$0xff]  ;;  %v20024_v57 = vld [vmem:[#allocation282_spill] sm:$0xff] }
 0x54e   : > { %v8918_v17 = vmul.f32 %v8790_v9, %v20020_v37  ;;  %v7956_v4 = vmul.f32 %v7813_v50, %v20021_v49  ;;  %v8649_v59 = vpop.f32.mrf.mxu1  ;;  %v9414_v56 = vadd.f32 %v9413_v32, %v9412_v12  ;;  %v9808_v51 = vadd.f32 %v9807_v24, %v9806_v58  ;;  %v20025_v12 = vld [vmem:[#allocation79_spill] sm:$0xff] }
 0x54f   : > { %v12718_v14 = vpop.f32.mrf.mxu0  ;;  %v9415_v45 = vsel %vm9313_vm6, %v9027_v40, 0.0  ;;  %v9633_v38 = vmul.f32 %v9027_v40, %v9027_v40  ;;  %v8919_v7 = vmul.f32 %v8791_v2, %v20023_v30  ;;  %v8793_v50 = vmul.f32 %v12911_v61, %v7957_v33  ;;  %v20026_v2 = vld [vmem:[#allocation71_spill] sm:$0xff] }
 0x550   : > { %v8792_v11 = vmul.f32 %v8649_v59, %v7956_v4  ;;  %v12914_v9 = vpop.f32.mrf.mxu1  ;;  %v9810_v25 = vadd.f32 %v9809_v3, %v9808_v51  ;;  %v9416_v49 = vadd.f32 %v9415_v45, %v9414_v56  ;;  %9168 = vadd.xlane.f32.xlu1 %v8918_v17  ;;  %v9417_v47 = vsel %vm9313_vm6, %v9029_v1, 0.0  ;;  %v9033_v24 = vpop.xlane.xlu1 %9032  ;;  %v13303_v1 = vld [vmem:[%s18790_s4] ss:$0 sm:$0xff] }
 0x551   : > { %v7823_v37 = vpop.f32.mrf.mxu0  ;;  %v9811_v58 = vsel %vm9313_vm6, %v9633_v38, 0.0  ;;  %9166 = vadd.xlane.f32.xlu0 %v8917_v22  ;;  %v9813_v4 = vsel %vm9313_vm6, %v9634_v41, 0.0  ;;  %v7959_v3 = vmul.f32 %v12718_v14, %v20026_v2  ;;  %v9031_v33 = vpop.xlane.xlu0 %9030  ;;  %v9636_v56 = vmul.f32 %v9033_v24, %v9033_v24  ;;  %v20027_v22 = vld [vmem:[#allocation205_spill] sm:$0xff] }
 0x552   : > { %v8920_v20 = vmul.f32 %v8792_v11, %v20024_v57  ;;  %v7958_v32 = vmul.f32 %v7823_v37, %v20025_v12  ;;  %v9418_v59 = vadd.f32 %v9417_v47, %v9416_v49  ;;  %v9812_v40 = vadd.f32 %v9811_v58, %v9810_v25  ;;  %v8659_v61 = vpop.f32.mrf.mxu1  ;;  %v20028_v38 = vld [vmem:[#allocation41_spill] sm:$0xff]  ;;  %v20029_v25 = vld [vmem:[#allocation39_spill] sm:$0xff] }
 0x553   : > { %v9419_v51 = vsel %vm9313_vm6, %v9031_v33, 0.0  ;;  %v9635_v11 = vmul.f32 %v9031_v33, %v9031_v33  ;;  %v18514_v37 = vadd.f32 %v13303_v1, %v20027_v22  ;;  %v9225_v14 = vadd.f32 %v20029_v25, %v20028_v38  ;;  %v20030_v49 = vld [vmem:[#allocation133_spill] sm:$0xff] }
 0x554   : > { %v8794_v17 = vmul.f32 %v8659_v61, %v7958_v32  ;;  %v9814_v45 = vadd.f32 %v9813_v4, %v9812_v40  ;;  %v9420_v41 = vadd.f32 %v9419_v51, %v9418_v59  ;;  %9172 = vadd.xlane.f32.xlu1 %v8920_v20  ;;  %v9421_v58 = vsel %vm9313_vm6, %v9033_v24, 0.0  ;;  %v9037_v32 = vpop.xlane.xlu1 %9036  ;;  %v20031_v51 = vld [vmem:[#allocation208_spill] sm:$0xff] }
 0x555   : > { %v9815_v12 = vsel %vm9313_vm6, %v9635_v11, 0.0  ;;  %9170 = vadd.xlane.f32.xlu0 %v8919_v7  ;;  %v8921_v2 = vmul.f32 %v8793_v50, %v18514_v37  ;;  %v8795_v61 = vmul.f32 %v12914_v9, %v7959_v3  ;;  %v9035_v57 = vpop.xlane.xlu0 %9034  ;;  %v9817_v4 = vsel %vm9313_vm6, %v9636_v56, 0.0  ;;  %v20032_v3 = vld [vmem:[#allocation42_spill] sm:$0xff] }
 0x556   : > { %v8922_v47 = vmul.f32 %v8794_v17, %v20030_v49  ;;  %v9422_v33 = vadd.f32 %v9421_v58, %v9420_v41  ;;  %v9816_v22 = vadd.f32 %v9815_v12, %v9814_v45  ;;  %v9638_v20 = vmul.f32 %v9037_v32, %v9037_v32 }
 0x557   : > { %v9423_v59 = vsel %vm9313_vm6, %v9035_v57, 0.0  ;;  %v9637_v40 = vmul.f32 %v9035_v57, %v9035_v57  ;;  %v18525_v17 = vadd.f32 %v13303_v1, %v20031_v51  ;;  %v9425_v7 = vsel %vm9313_vm6, %v9037_v32, 0.0 }
 0x558   : > { %v9818_v24 = vadd.f32 %v9817_v4, %v9816_v22  ;;  %v9424_v38 = vadd.f32 %v9423_v59, %v9422_v33  ;;  %9176 = vadd.xlane.f32.xlu1 %v8922_v47  ;;  %v9041_v9 = vpop.xlane.xlu1 %9040  ;;  %v9226_v11 = vadd.f32 %v9225_v14, %v20032_v3  ;;  %v9821_v57 = vsel %vm9313_vm6, %v9638_v20, 0.0  ;;  %v20033_v14 = vld [vmem:[#allocation46_spill] sm:$0xff] }
 0x559   : > { %v9819_v50 = vsel %vm9313_vm6, %v9637_v40, 0.0  ;;  %9174 = vadd.xlane.f32.xlu0 %v8921_v2  ;;  %v8923_v56 = vmul.f32 %v8795_v61, %v18525_v17  ;;  %v9039_v25 = vpop.xlane.xlu0 %9038  ;;  %v9640_v1 = vmul.f32 %v9041_v9, %v9041_v9  ;;  %v9429_v32 = vsel %vm9313_vm6, %v9041_v9, 0.0 }
 0x55a   : > { %v9426_v45 = vadd.f32 %v9425_v7, %v9424_v38  ;;  %v9820_v41 = vadd.f32 %v9819_v50, %v9818_v24  ;;  %v9427_v58 = vsel %vm9313_vm6, %v9039_v25, 0.0  ;;  %v9639_v12 = vmul.f32 %v9039_v25, %v9039_v25 }
 0x55b   : > { %v9227_v4 = vadd.f32 %v9226_v11, %v20033_v14  ;;  %v9825_v51 = vsel %vm9313_vm6, %v9640_v1, 0.0 }
 0x55c   : > { %v9822_v47 = vadd.f32 %v9821_v57, %v9820_v41  ;;  %v9428_v33 = vadd.f32 %v9427_v58, %v9426_v45  ;;  %v9823_v2 = vsel %vm9313_vm6, %v9639_v12, 0.0  ;;  %v9045_v22 = vpop.xlane.xlu1 %9044 }
 0x55d   : > { %9178 = vadd.xlane.f32.xlu0 %v8923_v56  ;;  %v9043_v40 = vpop.xlane.xlu0 %9042  ;;  %v9642_v20 = vmul.f32 %v9045_v22, %v9045_v22  ;;  %v9433_v3 = vsel %vm9313_vm6, %v9045_v22, 0.0  ;;  %v20034_v56 = vld [vmem:[#allocation98_spill] sm:$0xff] }
 0x55e   : > { %v9430_v61 = vadd.f32 %v9429_v32, %v9428_v33  ;;  %v9824_v59 = vadd.f32 %v9823_v2, %v9822_v47  ;;  %v9431_v24 = vsel %vm9313_vm6, %v9043_v40, 0.0  ;;  %v9641_v38 = vmul.f32 %v9043_v40, %v9043_v40 }
 0x55f   : > { %v9228_v41 = vadd.f32 %v9227_v4, %v20034_v56  ;;  %v9829_v58 = vsel %vm9313_vm6, %v9642_v20, 0.0 }
 0x560   : > { %v9826_v7 = vadd.f32 %v9825_v51, %v9824_v59  ;;  %v9432_v50 = vadd.f32 %v9431_v24, %v9430_v61  ;;  %v9827_v9 = vsel %vm9313_vm6, %v9641_v38, 0.0  ;;  %v9049_v45 = vpop.xlane.xlu1 %9048  ;;  %v20035_v61 = vld [vmem:[#allocation113_spill] sm:$0xff] }
 0x561   : > { %v9047_v57 = vpop.xlane.xlu0 %9046  ;;  %v9644_v12 = vmul.f32 %v9049_v45, %v9049_v45  ;;  %v9437_v2 = vsel %vm9313_vm6, %v9049_v45, 0.0  ;;  %v9229_v59 = vadd.f32 %v9228_v41, %v20035_v61 }
 0x562   : > { %v9434_v25 = vadd.f32 %v9433_v3, %v9432_v50  ;;  %v9828_v11 = vadd.f32 %v9827_v9, %v9826_v7  ;;  %v9435_v1 = vsel %vm9313_vm6, %v9047_v57, 0.0  ;;  %v9643_v47 = vmul.f32 %v9047_v57, %v9047_v57 }
 0x563   : > { %v9833_v24 = vsel %vm9313_vm6, %v9644_v12, 0.0 }
 0x564   : > { %v9830_v33 = vadd.f32 %v9829_v58, %v9828_v11  ;;  %v9436_v32 = vadd.f32 %v9435_v1, %v9434_v25  ;;  %v9831_v22 = vsel %vm9313_vm6, %v9643_v47, 0.0  ;;  %v9053_v14 = vpop.xlane.xlu1 %9052  ;;  %v20036_v25 = vld [vmem:[#allocation45_spill] sm:$0xff] }
 0x565   : > { %v9051_v51 = vpop.xlane.xlu0 %9050  ;;  %v9646_v38 = vmul.f32 %v9053_v14, %v9053_v14  ;;  %v9441_v9 = vsel %vm9313_vm6, %v9053_v14, 0.0  ;;  %v9230_v11 = vadd.f32 %v9229_v59, %v20036_v25 }
 0x566   : > { %v9438_v40 = vadd.f32 %v9437_v2, %v9436_v32  ;;  %v9832_v4 = vadd.f32 %v9831_v22, %v9830_v33  ;;  %v9439_v20 = vsel %vm9313_vm6, %v9051_v51, 0.0  ;;  %v9645_v7 = vmul.f32 %v9051_v51, %v9051_v51 }
 0x567   : > { %v9837_v1 = vsel %vm9313_vm6, %v9646_v38, 0.0 }
 0x568   : > { %v9834_v50 = vadd.f32 %v9833_v24, %v9832_v4  ;;  %v9440_v3 = vadd.f32 %v9439_v20, %v9438_v40  ;;  %v9835_v45 = vsel %vm9313_vm6, %v9645_v7, 0.0  ;;  %v9057_v56 = vpop.xlane.xlu1 %9056  ;;  %v20037_v40 = vld [vmem:[#allocation112_spill] sm:$0xff] }
 0x569   : > { %v9055_v58 = vpop.xlane.xlu0 %9054  ;;  %v9648_v47 = vmul.f32 %v9057_v56, %v9057_v56  ;;  %v9445_v22 = vsel %vm9313_vm6, %v9057_v56, 0.0  ;;  %v9231_v4 = vadd.f32 %v9230_v11, %v20037_v40 }
 0x56a   : > { %v9442_v57 = vadd.f32 %v9441_v9, %v9440_v3  ;;  %v9836_v41 = vadd.f32 %v9835_v45, %v9834_v50  ;;  %v9443_v12 = vsel %vm9313_vm6, %v9055_v58, 0.0  ;;  %v9647_v33 = vmul.f32 %v9055_v58, %v9055_v58 }
 0x56b   : > { %v9841_v20 = vsel %vm9313_vm6, %v9648_v47, 0.0 }
 0x56c   : > { %v9838_v32 = vadd.f32 %v9837_v1, %v9836_v41  ;;  %v9444_v2 = vadd.f32 %v9443_v12, %v9442_v57  ;;  %v9839_v14 = vsel %vm9313_vm6, %v9647_v33, 0.0  ;;  %v9061_v61 = vpop.xlane.xlu1 %9060  ;;  %v20038_v57 = vld [vmem:[#allocation48_spill] sm:$0xff] }
 0x56d   : > { %v9059_v24 = vpop.xlane.xlu0 %9058  ;;  %v9650_v7 = vmul.f32 %v9061_v61, %v9061_v61  ;;  %v9449_v45 = vsel %vm9313_vm6, %v9061_v61, 0.0  ;;  %v9232_v41 = vadd.f32 %v9231_v4, %v20038_v57 }
 0x56e   : > { %v9446_v51 = vadd.f32 %v9445_v22, %v9444_v2  ;;  %v9840_v59 = vadd.f32 %v9839_v14, %v9838_v32  ;;  %v9447_v38 = vsel %vm9313_vm6, %v9059_v24, 0.0  ;;  %v9649_v50 = vmul.f32 %v9059_v24, %v9059_v24 }
 0x56f   : > { %v9845_v12 = vsel %vm9313_vm6, %v9650_v7, 0.0 }
 0x570   : > { %v9842_v3 = vadd.f32 %v9841_v20, %v9840_v59  ;;  %v9448_v9 = vadd.f32 %v9447_v38, %v9446_v51  ;;  %v9843_v56 = vsel %vm9313_vm6, %v9649_v50, 0.0  ;;  %v9065_v25 = vpop.xlane.xlu1 %9064  ;;  %v20039_v51 = vld [vmem:[#allocation47_spill] sm:$0xff] }
 0x571   : > { %v9063_v1 = vpop.xlane.xlu0 %9062  ;;  %v9652_v33 = vmul.f32 %v9065_v25, %v9065_v25  ;;  %v9453_v14 = vsel %vm9313_vm6, %v9065_v25, 0.0  ;;  %v9233_v59 = vadd.f32 %v9232_v41, %v20039_v51 }
 0x572   : > { %v9450_v58 = vadd.f32 %v9449_v45, %v9448_v9  ;;  %v9844_v11 = vadd.f32 %v9843_v56, %v9842_v3  ;;  %v9451_v47 = vsel %vm9313_vm6, %v9063_v1, 0.0  ;;  %v9651_v32 = vmul.f32 %v9063_v1, %v9063_v1 }
 0x573   : > { %v9849_v38 = vsel %vm9313_vm6, %v9652_v33, 0.0 }
 0x574   : > { %v9846_v2 = vadd.f32 %v9845_v12, %v9844_v11  ;;  %v9452_v22 = vadd.f32 %v9451_v47, %v9450_v58  ;;  %v9847_v61 = vsel %vm9313_vm6, %v9651_v32, 0.0  ;;  %v9069_v40 = vpop.xlane.xlu1 %9068  ;;  %v20040_v58 = vld [vmem:[#allocation123_spill] sm:$0xff] }
 0x575   : > { %v9067_v20 = vpop.xlane.xlu0 %9066  ;;  %v9654_v50 = vmul.f32 %v9069_v40, %v9069_v40  ;;  %v9457_v56 = vsel %vm9313_vm6, %v9069_v40, 0.0  ;;  %v9234_v11 = vadd.f32 %v9233_v59, %v20040_v58 }
 0x576   : > { %v9848_v24 = vadd.f32 %v9847_v61, %v9846_v2  ;;  %v9454_v4 = vadd.f32 %v9453_v14, %v9452_v22  ;;  %v9455_v7 = vsel %vm9313_vm6, %v9067_v20, 0.0  ;;  %v9653_v3 = vmul.f32 %v9067_v20, %v9067_v20 }
 0x577   : > { %v9853_v47 = vsel %vm9313_vm6, %v9654_v50, 0.0 }
 0x578   : > { %v9850_v9 = vadd.f32 %v9849_v38, %v9848_v24  ;;  %v9456_v45 = vadd.f32 %v9455_v7, %v9454_v4  ;;  %v9851_v25 = vsel %vm9313_vm6, %v9653_v3, 0.0  ;;  %v9073_v57 = vpop.xlane.xlu1 %9072  ;;  %v20041_v24 = vld [vmem:[#allocation49_spill] sm:$0xff] }
 0x579   : > { %v9071_v12 = vpop.xlane.xlu0 %9070  ;;  %v9656_v32 = vmul.f32 %v9073_v57, %v9073_v57  ;;  %v9461_v61 = vsel %vm9313_vm6, %v9073_v57, 0.0  ;;  %v9235_v4 = vadd.f32 %v9234_v11, %v20041_v24 }
 0x57a   : > { %v9852_v1 = vadd.f32 %v9851_v25, %v9850_v9  ;;  %v9458_v41 = vadd.f32 %v9457_v56, %v9456_v45  ;;  %v9459_v33 = vsel %vm9313_vm6, %v9071_v12, 0.0  ;;  %v9655_v2 = vmul.f32 %v9071_v12, %v9071_v12 }
 0x57b   : > { %v9857_v7 = vsel %vm9313_vm6, %v9656_v32, 0.0 }
 0x57c   : > { %v9854_v22 = vadd.f32 %v9853_v47, %v9852_v1  ;;  %v9460_v14 = vadd.f32 %v9459_v33, %v9458_v41  ;;  %v9855_v40 = vsel %vm9313_vm6, %v9655_v2, 0.0  ;;  %v20042_v1 = vld [vmem:[#allocation50_spill] sm:$0xff] }
 0x57d   : > { %v9077_v51 = vpop.xlane.xlu1 %9076  ;;  %v9236_v41 = vadd.f32 %v9235_v4, %v20042_v1 }
 0x57e   : > { %v9856_v20 = vadd.f32 %v9855_v40, %v9854_v22  ;;  %v9462_v59 = vadd.f32 %v9461_v61, %v9460_v14  ;;  %v9075_v38 = vpop.xlane.xlu0 %9074  ;;  %v9658_v3 = vmul.f32 %v9077_v51, %v9077_v51  ;;  %v9465_v25 = vsel %vm9313_vm6, %v9077_v51, 0.0 }
 0x57f   : > { %v9463_v50 = vsel %vm9313_vm6, %v9075_v38, 0.0  ;;  %v9657_v9 = vmul.f32 %v9075_v38, %v9075_v38 }
 0x580   : > { %v9858_v45 = vadd.f32 %v9857_v7, %v9856_v20  ;;  %v9464_v56 = vadd.f32 %v9463_v50, %v9462_v59  ;;  %v9861_v33 = vsel %vm9313_vm6, %v9658_v3, 0.0  ;;  %v20043_v20 = vld [vmem:[#allocation54_spill] sm:$0xff] }
 0x581   : > { %v9859_v57 = vsel %vm9313_vm6, %v9657_v9, 0.0  ;;  %v9081_v58 = vpop.xlane.xlu1 %9080  ;;  %v9237_v59 = vadd.f32 %v9236_v41, %v20043_v20 }
 0x582   : > { %v9860_v12 = vadd.f32 %v9859_v57, %v9858_v45  ;;  %v9466_v11 = vadd.f32 %v9465_v25, %v9464_v56  ;;  %v9079_v47 = vpop.xlane.xlu0 %9078  ;;  %v9660_v2 = vmul.f32 %v9081_v58, %v9081_v58  ;;  %v9469_v40 = vsel %vm9313_vm6, %v9081_v58, 0.0 }
 0x583   : > { %v9467_v32 = vsel %vm9313_vm6, %v9079_v47, 0.0  ;;  %v9659_v22 = vmul.f32 %v9079_v47, %v9079_v47 }
 0x584   : > { %v9862_v14 = vadd.f32 %v9861_v33, %v9860_v12  ;;  %v9468_v61 = vadd.f32 %v9467_v32, %v9466_v11  ;;  %v9865_v50 = vsel %vm9313_vm6, %v9660_v2, 0.0  ;;  %v20044_v12 = vld [vmem:[#allocation149_spill] sm:$0xff] }
 0x585   : > { %v9863_v51 = vsel %vm9313_vm6, %v9659_v22, 0.0  ;;  %v9085_v24 = vpop.xlane.xlu1 %9084  ;;  %v9238_v11 = vadd.f32 %v9237_v59, %v20044_v12 }
 0x586   : > { %v9864_v38 = vadd.f32 %v9863_v51, %v9862_v14  ;;  %v9470_v4 = vadd.f32 %v9469_v40, %v9468_v61  ;;  %v9083_v7 = vpop.xlane.xlu0 %9082  ;;  %v9662_v9 = vmul.f32 %v9085_v24, %v9085_v24  ;;  %v9473_v57 = vsel %vm9313_vm6, %v9085_v24, 0.0 }
 0x587   : > { %v9471_v3 = vsel %vm9313_vm6, %v9083_v7, 0.0  ;;  %v9661_v45 = vmul.f32 %v9083_v7, %v9083_v7 }
 0x588   : > { %v9866_v56 = vadd.f32 %v9865_v50, %v9864_v38  ;;  %v9472_v25 = vadd.f32 %v9471_v3, %v9470_v4  ;;  %v9869_v32 = vsel %vm9313_vm6, %v9662_v9, 0.0  ;;  %v20045_v38 = vld [vmem:[#allocation56_spill] sm:$0xff] }
 0x589   : > { %v9867_v58 = vsel %vm9313_vm6, %v9661_v45, 0.0  ;;  %v9089_v1 = vpop.xlane.xlu1 %9088  ;;  %v9239_v4 = vadd.f32 %v9238_v11, %v20045_v38 }
 0x58a   : > { %v9868_v47 = vadd.f32 %v9867_v58, %v9866_v56  ;;  %v9474_v41 = vadd.f32 %v9473_v57, %v9472_v25  ;;  %v9087_v33 = vpop.xlane.xlu0 %9086  ;;  %v9664_v22 = vmul.f32 %v9089_v1, %v9089_v1  ;;  %v9477_v51 = vsel %vm9313_vm6, %v9089_v1, 0.0 }
 0x58b   : > { %v9475_v2 = vsel %vm9313_vm6, %v9087_v33, 0.0  ;;  %v9663_v14 = vmul.f32 %v9087_v33, %v9087_v33 }
 0x58c   : > { %v9870_v61 = vadd.f32 %v9869_v32, %v9868_v47  ;;  %v9476_v40 = vadd.f32 %v9475_v2, %v9474_v41  ;;  %v9873_v3 = vsel %vm9313_vm6, %v9664_v22, 0.0  ;;  %v20046_v47 = vld [vmem:[#allocation53_spill] sm:$0xff] }
 0x58d   : > { %v9871_v24 = vsel %vm9313_vm6, %v9663_v14, 0.0  ;;  %v9093_v20 = vpop.xlane.xlu1 %9092  ;;  %v9240_v41 = vadd.f32 %v9239_v4, %v20046_v47 }
 0x58e   : > { %v9872_v7 = vadd.f32 %v9871_v24, %v9870_v61  ;;  %v9478_v59 = vadd.f32 %v9477_v51, %v9476_v40  ;;  %v9091_v50 = vpop.xlane.xlu0 %9090  ;;  %v9666_v45 = vmul.f32 %v9093_v20, %v9093_v20  ;;  %v9481_v58 = vsel %vm9313_vm6, %v9093_v20, 0.0 }
 0x58f   : > { %v9479_v9 = vsel %vm9313_vm6, %v9091_v50, 0.0  ;;  %v9665_v56 = vmul.f32 %v9091_v50, %v9091_v50 }
 0x590   : > { %v9874_v25 = vadd.f32 %v9873_v3, %v9872_v7  ;;  %v9480_v57 = vadd.f32 %v9479_v9, %v9478_v59  ;;  %v9877_v2 = vsel %vm9313_vm6, %v9666_v45, 0.0  ;;  %v20047_v7 = vld [vmem:[#allocation179_spill] sm:$0xff] }
 0x591   : > { %v9875_v1 = vsel %vm9313_vm6, %v9665_v56, 0.0  ;;  %v9097_v12 = vpop.xlane.xlu1 %9096  ;;  %v9241_v59 = vadd.f32 %v9240_v41, %v20047_v7 }
 0x592   : > { %v9876_v33 = vadd.f32 %v9875_v1, %v9874_v25  ;;  %v9482_v11 = vadd.f32 %v9481_v58, %v9480_v57  ;;  %v9095_v32 = vpop.xlane.xlu0 %9094  ;;  %v9668_v14 = vmul.f32 %v9097_v12, %v9097_v12  ;;  %v9485_v24 = vsel %vm9313_vm6, %v9097_v12, 0.0 }
 0x593   : > { %v9483_v22 = vsel %vm9313_vm6, %v9095_v32, 0.0  ;;  %v9667_v61 = vmul.f32 %v9095_v32, %v9095_v32 }
 0x594   : > { %v9878_v40 = vadd.f32 %v9877_v2, %v9876_v33  ;;  %v9484_v51 = vadd.f32 %v9483_v22, %v9482_v11  ;;  %v9881_v9 = vsel %vm9313_vm6, %v9668_v14, 0.0  ;;  %v20048_v33 = vld [vmem:[#allocation168_spill] sm:$0xff] }
 0x595   : > { %v9879_v20 = vsel %vm9313_vm6, %v9667_v61, 0.0  ;;  %v9101_v38 = vpop.xlane.xlu1 %9100  ;;  %v9242_v11 = vadd.f32 %v9241_v59, %v20048_v33 }
 0x596   : > { %v9880_v50 = vadd.f32 %v9879_v20, %v9878_v40  ;;  %v9486_v4 = vadd.f32 %v9485_v24, %v9484_v51  ;;  %v9099_v3 = vpop.xlane.xlu0 %9098  ;;  %v9670_v56 = vmul.f32 %v9101_v38, %v9101_v38  ;;  %v9489_v1 = vsel %vm9313_vm6, %v9101_v38, 0.0 }
 0x597   : > { %v9487_v45 = vsel %vm9313_vm6, %v9099_v3, 0.0  ;;  %v9669_v25 = vmul.f32 %v9099_v3, %v9099_v3 }
 0x598   : > { %v9882_v57 = vadd.f32 %v9881_v9, %v9880_v50  ;;  %v9488_v58 = vadd.f32 %v9487_v45, %v9486_v4  ;;  %v9885_v22 = vsel %vm9313_vm6, %v9670_v56, 0.0  ;;  %v20049_v50 = vld [vmem:[#allocation178_spill] sm:$0xff] }
 0x599   : > { %v9883_v12 = vsel %vm9313_vm6, %v9669_v25, 0.0  ;;  %v9105_v47 = vpop.xlane.xlu1 %9104  ;;  %v9243_v4 = vadd.f32 %v9242_v11, %v20049_v50 }
 0x59a   : > { %v9884_v32 = vadd.f32 %v9883_v12, %v9882_v57  ;;  %v9490_v41 = vadd.f32 %v9489_v1, %v9488_v58  ;;  %v9103_v2 = vpop.xlane.xlu0 %9102  ;;  %v9672_v61 = vmul.f32 %v9105_v47, %v9105_v47  ;;  %v9493_v20 = vsel %vm9313_vm6, %v9105_v47, 0.0 }
 0x59b   : > { %v9491_v14 = vsel %vm9313_vm6, %v9103_v2, 0.0  ;;  %v9671_v40 = vmul.f32 %v9103_v2, %v9103_v2 }
 0x59c   : > { %v9886_v51 = vadd.f32 %v9885_v22, %v9884_v32  ;;  %v9492_v24 = vadd.f32 %v9491_v14, %v9490_v41  ;;  %v9889_v45 = vsel %vm9313_vm6, %v9672_v61, 0.0  ;;  %v20050_v32 = vld [vmem:[#allocation55_spill] sm:$0xff] }
 0x59d   : > { %v9887_v38 = vsel %vm9313_vm6, %v9671_v40, 0.0  ;;  %v9109_v7 = vpop.xlane.xlu1 %9108  ;;  %v9244_v41 = vadd.f32 %v9243_v4, %v20050_v32 }
 0x59e   : > { %v9888_v3 = vadd.f32 %v9887_v38, %v9886_v51  ;;  %v9494_v59 = vadd.f32 %v9493_v20, %v9492_v24  ;;  %v9107_v9 = vpop.xlane.xlu0 %9106  ;;  %v9674_v25 = vmul.f32 %v9109_v7, %v9109_v7  ;;  %v9497_v12 = vsel %vm9313_vm6, %v9109_v7, 0.0 }
 0x59f   : > { %v9495_v56 = vsel %vm9313_vm6, %v9107_v9, 0.0  ;;  %v9673_v57 = vmul.f32 %v9107_v9, %v9107_v9 }
 0x5a0   : > { %v9890_v58 = vadd.f32 %v9889_v45, %v9888_v3  ;;  %v9496_v1 = vadd.f32 %v9495_v56, %v9494_v59  ;;  %v9893_v14 = vsel %vm9313_vm6, %v9674_v25, 0.0  ;;  %v20051_v3 = vld [vmem:[#allocation58_spill] sm:$0xff] }
 0x5a1   : > { %v9891_v47 = vsel %vm9313_vm6, %v9673_v57, 0.0  ;;  %v9113_v33 = vpop.xlane.xlu1 %9112  ;;  %v9245_v59 = vadd.f32 %v9244_v41, %v20051_v3 }
 0x5a2   : > { %v9892_v2 = vadd.f32 %v9891_v47, %v9890_v58  ;;  %v9498_v11 = vadd.f32 %v9497_v12, %v9496_v1  ;;  %v9111_v22 = vpop.xlane.xlu0 %9110  ;;  %v9676_v40 = vmul.f32 %v9113_v33, %v9113_v33  ;;  %v9501_v38 = vsel %vm9313_vm6, %v9113_v33, 0.0 }
 0x5a3   : > { %v9499_v61 = vsel %vm9313_vm6, %v9111_v22, 0.0  ;;  %v9675_v51 = vmul.f32 %v9111_v22, %v9111_v22 }
 0x5a4   : > { %v9894_v24 = vadd.f32 %v9893_v14, %v9892_v2  ;;  %v9500_v20 = vadd.f32 %v9499_v61, %v9498_v11  ;;  %v9897_v56 = vsel %vm9313_vm6, %v9676_v40, 0.0  ;;  %v20052_v2 = vld [vmem:[#allocation190_spill] sm:$0xff] }
 0x5a5   : > { %v9895_v7 = vsel %vm9313_vm6, %v9675_v51, 0.0  ;;  %v9117_v50 = vpop.xlane.xlu1 %9116  ;;  %v9246_v11 = vadd.f32 %v9245_v59, %v20052_v2 }
 0x5a6   : > { %v9896_v9 = vadd.f32 %v9895_v7, %v9894_v24  ;;  %v9502_v4 = vadd.f32 %v9501_v38, %v9500_v20  ;;  %v9115_v45 = vpop.xlane.xlu0 %9114  ;;  %v9678_v57 = vmul.f32 %v9117_v50, %v9117_v50  ;;  %v9505_v47 = vsel %vm9313_vm6, %v9117_v50, 0.0 }
 0x5a7   : > { %v9503_v25 = vsel %vm9313_vm6, %v9115_v45, 0.0  ;;  %v9677_v58 = vmul.f32 %v9115_v45, %v9115_v45 }
 0x5a8   : > { %v9898_v1 = vadd.f32 %v9897_v56, %v9896_v9  ;;  %v9504_v12 = vadd.f32 %v9503_v25, %v9502_v4  ;;  %v9901_v61 = vsel %vm9313_vm6, %v9678_v57, 0.0  ;;  %v20053_v9 = vld [vmem:[#allocation201_spill] sm:$0xff] }
 0x5a9   : > { %v9899_v33 = vsel %vm9313_vm6, %v9677_v58, 0.0  ;;  %v9121_v32 = vpop.xlane.xlu1 %9120  ;;  %v9247_v4 = vadd.f32 %v9246_v11, %v20053_v9 }
 0x5aa   : > { %v9900_v22 = vadd.f32 %v9899_v33, %v9898_v1  ;;  %v9506_v41 = vadd.f32 %v9505_v47, %v9504_v12  ;;  %v9119_v14 = vpop.xlane.xlu0 %9118  ;;  %v9680_v51 = vmul.f32 %v9121_v32, %v9121_v32  ;;  %v9509_v7 = vsel %vm9313_vm6, %v9121_v32, 0.0 }
 0x5ab   : > { %v9507_v40 = vsel %vm9313_vm6, %v9119_v14, 0.0  ;;  %v9679_v24 = vmul.f32 %v9119_v14, %v9119_v14 }
 0x5ac   : > { %v9902_v20 = vadd.f32 %v9901_v61, %v9900_v22  ;;  %v9508_v38 = vadd.f32 %v9507_v40, %v9506_v41  ;;  %v9905_v25 = vsel %vm9313_vm6, %v9680_v51, 0.0  ;;  %v20054_v22 = vld [vmem:[#allocation189_spill] sm:$0xff] }
 0x5ad   : > { %v9903_v50 = vsel %vm9313_vm6, %v9679_v24, 0.0  ;;  %v9125_v3 = vpop.xlane.xlu1 %9124  ;;  %v9248_v41 = vadd.f32 %v9247_v4, %v20054_v22 }
 0x5ae   : > { %v9904_v45 = vadd.f32 %v9903_v50, %v9902_v20  ;;  %v9510_v59 = vadd.f32 %v9509_v7, %v9508_v38  ;;  %v9123_v56 = vpop.xlane.xlu0 %9122  ;;  %v9682_v58 = vmul.f32 %v9125_v3, %v9125_v3  ;;  %v9513_v33 = vsel %vm9313_vm6, %v9125_v3, 0.0 }
 0x5af   : > { %v9511_v57 = vsel %vm9313_vm6, %v9123_v56, 0.0  ;;  %v9681_v1 = vmul.f32 %v9123_v56, %v9123_v56 }
 0x5b0   : > { %v9906_v12 = vadd.f32 %v9905_v25, %v9904_v45  ;;  %v9512_v47 = vadd.f32 %v9511_v57, %v9510_v59  ;;  %v9909_v40 = vsel %vm9313_vm6, %v9682_v58, 0.0  ;;  %v20055_v45 = vld [vmem:[#allocation57_spill] sm:$0xff] }
 0x5b1   : > { %v9907_v32 = vsel %vm9313_vm6, %v9681_v1, 0.0  ;;  %v9129_v2 = vpop.xlane.xlu1 %9128  ;;  %v9249_v59 = vadd.f32 %v9248_v41, %v20055_v45  ;;  %v20056_v45 = vld [vmem:[#allocation200_spill] sm:$0xff] }
 0x5b2   : > { %v9908_v14 = vadd.f32 %v9907_v32, %v9906_v12  ;;  %v9514_v11 = vadd.f32 %v9513_v33, %v9512_v47  ;;  %v9127_v61 = vpop.xlane.xlu0 %9126  ;;  %v9684_v24 = vmul.f32 %v9129_v2, %v9129_v2  ;;  %v9517_v50 = vsel %vm9313_vm6, %v9129_v2, 0.0 }
 0x5b3   : > { %v9515_v51 = vsel %vm9313_vm6, %v9127_v61, 0.0  ;;  %v9683_v20 = vmul.f32 %v9127_v61, %v9127_v61 }
 0x5b4   : > { %v9910_v38 = vadd.f32 %v9909_v40, %v9908_v14  ;;  %v9516_v7 = vadd.f32 %v9515_v51, %v9514_v11  ;;  %v9913_v57 = vsel %vm9313_vm6, %v9684_v24, 0.0  ;;  %v9250_v14 = vadd.f32 %v9249_v59, %v17927_v39 }
 0x5b5   : > { %v9911_v3 = vsel %vm9313_vm6, %v9683_v20, 0.0  ;;  %v9133_v9 = vpop.xlane.xlu1 %9132 }
 0x5b6   : > { %v9912_v56 = vadd.f32 %v9911_v3, %v9910_v38  ;;  %v9518_v4 = vadd.f32 %v9517_v50, %v9516_v7  ;;  %v9131_v25 = vpop.xlane.xlu0 %9130  ;;  %v9686_v1 = vmul.f32 %v9133_v9, %v9133_v9  ;;  %v9521_v32 = vsel %vm9313_vm6, %v9133_v9, 0.0 }
 0x5b7   : > { %v9519_v58 = vsel %vm9313_vm6, %v9131_v25, 0.0  ;;  %v9685_v12 = vmul.f32 %v9131_v25, %v9131_v25 }
 0x5b8   : > { %v9914_v47 = vadd.f32 %v9913_v57, %v9912_v56  ;;  %v9520_v33 = vadd.f32 %v9519_v58, %v9518_v4  ;;  %v9917_v40 = vsel %vm9313_vm6, %v9686_v1, 0.0  ;;  %v9251_v56 = vadd.f32 %v9250_v14, %v20056_v45 }
 0x5b9   : > { %v9915_v2 = vsel %vm9313_vm6, %v9685_v12, 0.0  ;;  %v9137_v22 = vpop.xlane.xlu1 %9136 }
 0x5ba   : > { %v9916_v11 = vadd.f32 %v9915_v2, %v9914_v47  ;;  %v9522_v41 = vadd.f32 %v9521_v32, %v9520_v33  ;;  %v9135_v61 = vpop.xlane.xlu0 %9134  ;;  %v9688_v51 = vmul.f32 %v9137_v22, %v9137_v22  ;;  %v9525_v50 = vsel %vm9313_vm6, %v9137_v22, 0.0 }
 0x5bb   : > { %v9523_v24 = vsel %vm9313_vm6, %v9135_v61, 0.0  ;;  %v9687_v20 = vmul.f32 %v9135_v61, %v9135_v61  ;;  %v9252_v22 = vadd.f32 %v9251_v56, %v17936_v46 }
 0x5bc   : > { %v9918_v38 = vadd.f32 %v9917_v40, %v9916_v11  ;;  %v9524_v7 = vadd.f32 %v9523_v24, %v9522_v41  ;;  %v9921_v25 = vsel %vm9313_vm6, %v9688_v51, 0.0 }
 0x5bd   : > { %v9919_v3 = vsel %vm9313_vm6, %v9687_v20, 0.0  ;;  %v9141_v9 = vpop.xlane.xlu1 %9140 }
 0x5be   : > { %v9920_v4 = vadd.f32 %v9919_v3, %v9918_v38  ;;  %v9526_v39 = vadd.f32 %v9525_v50, %v9524_v7  ;;  %v9139_v59 = vpop.xlane.xlu0 %9138  ;;  %v9690_v57 = vmul.f32 %v9141_v9, %v9141_v9  ;;  %v9529_v33 = vsel %vm9313_vm6, %v9141_v9, 0.0 }
 0x5bf   : > { %v9527_v1 = vsel %vm9313_vm6, %v9139_v59, 0.0  ;;  %v9689_v58 = vmul.f32 %v9139_v59, %v9139_v59  ;;  %v9253_v9 = vadd.f32 %v9252_v22, %v17951_v19 }
 0x5c0   : > { %v9922_v12 = vadd.f32 %v9921_v25, %v9920_v4  ;;  %v9528_v47 = vadd.f32 %v9527_v1, %v9526_v39  ;;  %v9925_v61 = vsel %vm9313_vm6, %v9690_v57, 0.0 }
 0x5c1   : > { %v9923_v32 = vsel %vm9313_vm6, %v9689_v58, 0.0  ;;  %v9145_v2 = vpop.xlane.xlu1 %9144 }
 0x5c2   : > { %v9924_v11 = vadd.f32 %v9923_v32, %v9922_v12  ;;  %v9530_v14 = vadd.f32 %v9529_v33, %v9528_v47  ;;  %v9143_v41 = vpop.xlane.xlu0 %9142  ;;  %v9692_v40 = vmul.f32 %v9145_v2, %v9145_v2  ;;  %v9533_v7 = vsel %vm9313_vm6, %v9145_v2, 0.0 }
 0x5c3   : > { %v9531_v51 = vsel %vm9313_vm6, %v9143_v41, 0.0  ;;  %v9691_v24 = vmul.f32 %v9143_v41, %v9143_v41  ;;  %v9254_v33 = vadd.f32 %v9253_v9, %v17945_v16 }
 0x5c4   : > { %v9926_v20 = vadd.f32 %v9925_v61, %v9924_v11  ;;  %v9532_v38 = vadd.f32 %v9531_v51, %v9530_v14  ;;  %v9929_v4 = vsel %vm9313_vm6, %v9692_v40, 0.0 }
 0x5c5   : > { %v9927_v50 = vsel %vm9313_vm6, %v9691_v24, 0.0  ;;  %v9149_v3 = vpop.xlane.xlu1 %9148 }
 0x5c6   : > { %v9928_v45 = vadd.f32 %v9927_v50, %v9926_v20  ;;  %v9534_v46 = vadd.f32 %v9533_v7, %v9532_v38  ;;  %v9147_v56 = vpop.xlane.xlu0 %9146  ;;  %v9694_v39 = vmul.f32 %v9149_v3, %v9149_v3  ;;  %v9537_v58 = vsel %vm9313_vm6, %v9149_v3, 0.0 }
 0x5c7   : > { %v9535_v59 = vsel %vm9313_vm6, %v9147_v56, 0.0  ;;  %v9693_v25 = vmul.f32 %v9147_v56, %v9147_v56  ;;  %v9255_v38 = vadd.f32 %v9254_v33, %v17961_v23 }
 0x5c8   : > { %v9930_v57 = vadd.f32 %v9929_v4, %v9928_v45  ;;  %v9536_v1 = vadd.f32 %v9535_v59, %v9534_v46  ;;  %v9933_v22 = vsel %vm9313_vm6, %v9694_v39, 0.0 }
 0x5c9   : > { %v9931_v12 = vsel %vm9313_vm6, %v9693_v25, 0.0  ;;  %v9153_v47 = vpop.xlane.xlu1 %9152 }
 0x5ca   : > { %v9932_v32 = vadd.f32 %v9931_v12, %v9930_v57  ;;  %v9538_v19 = vadd.f32 %v9537_v58, %v9536_v1  ;;  %v9151_v2 = vpop.xlane.xlu0 %9150  ;;  %v9696_v11 = vmul.f32 %v9153_v47, %v9153_v47  ;;  %v9541_v51 = vsel %vm9313_vm6, %v9153_v47, 0.0 }
 0x5cb   : > { %v9539_v14 = vsel %vm9313_vm6, %v9151_v2, 0.0  ;;  %v9695_v41 = vmul.f32 %v9151_v2, %v9151_v2  ;;  %v9256_v57 = vadd.f32 %v9255_v38, %v17955_v35 }
 0x5cc   : > { %v9934_v61 = vadd.f32 %v9933_v22, %v9932_v32  ;;  %v9540_v40 = vadd.f32 %v9539_v14, %v9538_v19  ;;  %v9937_v3 = vsel %vm9313_vm6, %v9696_v11, 0.0 }
 0x5cd   : > { %v9935_v24 = vsel %vm9313_vm6, %v9695_v41, 0.0  ;;  %v9157_v20 = vpop.xlane.xlu1 %9156  ;;  %v9257_v41 = vadd.f32 %v9256_v57, %v17970_v42 }
 0x5ce   : > { %v9936_v7 = vadd.f32 %v9935_v24, %v9934_v61  ;;  %v9542_v16 = vadd.f32 %v9541_v51, %v9540_v40  ;;  %v9155_v50 = vpop.xlane.xlu0 %9154  ;;  %v9698_v9 = vmul.f32 %v9157_v20, %v9157_v20  ;;  %v9545_v39 = vsel %vm9313_vm6, %v9157_v20, 0.0 }
 0x5cf   : > { %v9543_v45 = vsel %vm9313_vm6, %v9155_v50, 0.0  ;;  %v9697_v46 = vmul.f32 %v9155_v50, %v9155_v50 }
 0x5d0   : > { %v9938_v56 = vadd.f32 %v9937_v3, %v9936_v7  ;;  %v9544_v4 = vadd.f32 %v9543_v45, %v9542_v16  ;;  %v9941_v12 = vsel %vm9313_vm6, %v9698_v9, 0.0  ;;  %v9258_v45 = vadd.f32 %v9257_v41, %v17965_v5 }
 0x5d1   : > { %v9939_v59 = vsel %vm9313_vm6, %v9697_v46, 0.0  ;;  %v9161_v25 = vpop.xlane.xlu1 %9160 }
 0x5d2   : > { %v9940_v1 = vadd.f32 %v9939_v59, %v9938_v56  ;;  %v9546_v23 = vadd.f32 %v9545_v39, %v9544_v4  ;;  %v9159_v58 = vpop.xlane.xlu0 %9158  ;;  %v9700_v47 = vmul.f32 %v9161_v25, %v9161_v25  ;;  %v9549_v22 = vsel %vm9313_vm6, %v9161_v25, 0.0 }
 0x5d3   : > { %v9547_v33 = vsel %vm9313_vm6, %v9159_v58, 0.0  ;;  %v9699_v32 = vmul.f32 %v9159_v58, %v9159_v58 }
 0x5d4   : > { %v9942_v19 = vadd.f32 %v9941_v12, %v9940_v1  ;;  %v9548_v2 = vadd.f32 %v9547_v33, %v9546_v23  ;;  %v9945_v51 = vsel %vm9313_vm6, %v9700_v47, 0.0  ;;  %v9259_v47 = vadd.f32 %v9258_v45, %v17979_v55 }
 0x5d5   : > { %v9943_v11 = vsel %vm9313_vm6, %v9699_v32, 0.0  ;;  %v9165_v14 = vpop.xlane.xlu1 %9164 }
 0x5d6   : > { %v9944_v61 = vadd.f32 %v9943_v11, %v9942_v19  ;;  %v9550_v35 = vadd.f32 %v9549_v22, %v9548_v2  ;;  %v9163_v40 = vpop.xlane.xlu0 %9162  ;;  %v9702_v24 = vmul.f32 %v9165_v14, %v9165_v14  ;;  %v9553_v50 = vsel %vm9313_vm6, %v9165_v14, 0.0 }
 0x5d7   : > { %v9551_v20 = vsel %vm9313_vm6, %v9163_v40, 0.0  ;;  %v9701_v38 = vmul.f32 %v9163_v40, %v9163_v40 }
 0x5d8   : > { %v9946_v7 = vadd.f32 %v9945_v51, %v9944_v61  ;;  %v9552_v16 = vadd.f32 %v9551_v20, %v9550_v35  ;;  %v9949_v4 = vsel %vm9313_vm6, %v9702_v24, 0.0  ;;  %v9260_v51 = vadd.f32 %v9259_v47, %v17975_v29 }
 0x5d9   : > { %v9947_v3 = vsel %vm9313_vm6, %v9701_v38, 0.0  ;;  %v9169_v9 = vpop.xlane.xlu1 %9168 }
 0x5da   : > { %v9948_v46 = vadd.f32 %v9947_v3, %v9946_v7  ;;  %v9554_v42 = vadd.f32 %v9553_v50, %v9552_v16  ;;  %v9167_v56 = vpop.xlane.xlu0 %9166  ;;  %v9704_v39 = vmul.f32 %v9169_v9, %v9169_v9  ;;  %v9557_v23 = vsel %vm9313_vm6, %v9169_v9, 0.0 }
 0x5db   : > { %v9555_v59 = vsel %vm9313_vm6, %v9167_v56, 0.0  ;;  %v9703_v25 = vmul.f32 %v9167_v56, %v9167_v56  ;;  %v9261_v29 = vadd.f32 %v9260_v51, %v17989_v18  ;;  %v20062_v51 = vld [vmem:[#allocation259_spill] sm:$0xff] }
 0x5dc   : > { %v9950_v57 = vadd.f32 %v9949_v4, %v9948_v46  ;;  %v9556_v1 = vadd.f32 %v9555_v59, %v9554_v42  ;;  %v9953_v19 = vsel %vm9313_vm6, %v9704_v39, 0.0 }
 0x5dd   : > { %v9951_v58 = vsel %vm9313_vm6, %v9703_v25, 0.0  ;;  %v9173_v12 = vpop.xlane.xlu1 %9172 }
 0x5de   : > { %v9952_v33 = vadd.f32 %v9951_v58, %v9950_v57  ;;  %v9558_v5 = vadd.f32 %v9557_v23, %v9556_v1  ;;  %v9171_v32 = vpop.xlane.xlu0 %9170  ;;  %v9706_v2 = vmul.f32 %v9173_v12, %v9173_v12  ;;  %v9561_v61 = vsel %vm9313_vm6, %v9173_v12, 0.0 }
 0x5df   : > { %v9559_v22 = vsel %vm9313_vm6, %v9171_v32, 0.0  ;;  %v9705_v11 = vmul.f32 %v9171_v32, %v9171_v32  ;;  %v9262_v12 = vadd.f32 %v9261_v29, %v17985_v15 }
 0x5e0   : > { %v9954_v14 = vadd.f32 %v9953_v19, %v9952_v33  ;;  %v9560_v41 = vadd.f32 %v9559_v22, %v9558_v5  ;;  %v9957_v38 = vsel %vm9313_vm6, %v9706_v2, 0.0 }
 0x5e1   : > { %v9955_v35 = vsel %vm9313_vm6, %v9705_v11, 0.0  ;;  %v9177_v40 = vpop.xlane.xlu1 %9176  ;;  %v9263_v47 = vadd.f32 %v9262_v12, %v17999_v0 }
 0x5e2   : > { %v9956_v24 = vadd.f32 %v9955_v35, %v9954_v14  ;;  %v9562_v55 = vadd.f32 %v9561_v61, %v9560_v41  ;;  %v9175_v20 = vpop.xlane.xlu0 %9174  ;;  %v9708_v7 = vmul.f32 %v9177_v40, %v9177_v40  ;;  %v9565_v45 = vsel %vm9313_vm6, %v9177_v40, 0.0  ;;  %v20057_v14 = vld [vmem:[#allocation62_spill] sm:$0xff]  ;;  %v20060_v35 = vld [vmem:[#allocation116_spill] sm:$0xff]  ;;  %v20061_v40 = vld [vmem:[#allocation65_spill] sm:$0xff] }
 0x5e3   : > { %v9563_v16 = vsel %vm9313_vm6, %v9175_v20, 0.0  ;;  %v9707_v50 = vmul.f32 %v9175_v20, %v9175_v20  ;;  %v9264_v33 = vadd.f32 %v9263_v47, %v17995_v36  ;;  %v20058_v41 = vld [vmem:[#allocation246_spill] sm:$0xff]  ;;  %v20065_v20 = vld [vmem:[#allocation271_spill] sm:$0xff] }
 0x5e4   : > { %v9958_v3 = vadd.f32 %v9957_v38, %v9956_v24  ;;  %v9564_v9 = vadd.f32 %v9563_v16, %v9562_v55  ;;  %v9961_v39 = vsel %vm9313_vm6, %v9708_v7, 0.0  ;;  %v20059_v61 = vld [vmem:[#allocation214_spill] sm:$0xff]  ;;  %v20066_v7 = vld [vmem:[#allocation216_spill] sm:$0xff] }
 0x5e5   : > { %v9959_v46 = vsel %vm9313_vm6, %v9707_v50, 0.0  ;;  %v9265_v18 = vadd.f32 %v9264_v33, %v18009_v44  ;;  %v20063_v24 = vld [vmem:[#allocation122_spill] sm:$0xff]  ;;  %v20067_v50 = vld [vmem:[#allocation119_spill] sm:$0xff] }
 0x5e6   : > { %v9960_v42 = vadd.f32 %v9959_v46, %v9958_v3  ;;  %v9566_v56 = vadd.f32 %v9565_v45, %v9564_v9  ;;  %v9179_v4 = vpop.xlane.xlu0 %9178  ;;  %v20064_v55 = vld [vmem:[#allocation258_spill] sm:$0xff]  ;;  %v20069_v45 = vld [vmem:[#allocation64_spill] sm:$0xff] }
 0x5e7   : > { %v9567_v59 = vsel %vm9313_vm6, %v9179_v4, 0.0  ;;  %v9709_v25 = vmul.f32 %v9179_v4, %v9179_v4  ;;  %v9266_v5 = vadd.f32 %v9265_v18, %v18004_v62  ;;  %v20068_v3 = vld [vmem:[#allocation270_spill] sm:$0xff] }
 0x5e8   : > { %v9568_v57 = vadd.f32 %v9567_v59, %v9566_v56  ;;  %v9962_v1 = vadd.f32 %v9961_v39, %v9960_v42  ;;  %v20070_v59 = vld [vmem:[#allocation220_spill] sm:$0xff] }
 0x5e9   : > { %v9963_v23 = vsel %vm9313_vm6, %v9709_v25, 0.0  ;;  %v9267_v32 = vadd.f32 %v9266_v5, %v19965_v28 }
 0x5ea   : > { %9569 = vadd.xlane.f32.xlu1 %v9568_v57  ;;  %v9964_v58 = vadd.f32 %v9963_v23, %v9962_v1 }
 0x5eb   : > { %v9268_v19 = vadd.f32 %v9267_v32, %v19967_v31  ;;  %v20072_v32 = vld [vmem:[#allocation126_spill] sm:$0xff] }
 0x5ec   : > { %9965 = vadd.xlane.f32.xlu0 %v9964_v58 }
 0x5ed   : > { %v9269_v2 = vadd.f32 %v9268_v19, %v19969_v60 }
 0x5ef   : > { %v9270_v22 = vadd.f32 %v9269_v2, %v19971_v6 }
 0x5f1   : > { %v9271_v11 = vadd.f32 %v9270_v22, %v18038_v63  ;;  %v20073_v22 = vld [vmem:[#allocation283_spill] sm:$0xff] }
 0x5f3   : > { %v9272_v15 = vadd.f32 %v9271_v11, %v19972_v53 }
 0x5f5   : > { %v9273_v0 = vadd.f32 %v9272_v15, %v18047_v27  ;;  %v20074_v15 = vld [vmem:[#allocation67_spill] sm:$0xff] }
 0x5f7   : > { %v9274_v36 = vadd.f32 %v9273_v0, %v19974_v48 }
 0x5f9   : > { %v9275_v44 = vadd.f32 %v9274_v36, %v19976_v52 }
 0x5fb   : > { %v9276_v62 = vadd.f32 %v9275_v44, %v19978_v26  ;;  %v20075_v44 = vld [vmem:[#allocation282_spill] sm:$0xff] }
 0x5fd   : > { %v9277_v28 = vadd.f32 %v9276_v62, %v18067_v54 }
 0x5ff   : > { %v9278_v31 = vadd.f32 %v9277_v28, %v19979_v8 }
 0x601   : > { %v9279_v60 = vadd.f32 %v9278_v31, %v18077_v13 }
 0x603   : > { %v9280_v6 = vadd.f32 %v9279_v60, %v19981_v43 }
 0x605   : > { %v9281_v63 = vadd.f32 %v9280_v6, %v19983_v10 }
 0x607   : > { %v9282_v53 = vadd.f32 %v9281_v63, %v20057_v14 }
 0x609   : > { %v9283_v27 = vadd.f32 %v9282_v53, %v20058_v41 }
 0x60b   : > { %v9284_v48 = vadd.f32 %v9283_v27, %v19989_v34  ;;  %v9578_v27 = vld [vmem:[%s18792_s6] sm:$0x1] }
 0x60d   : > { %v9285_v52 = vadd.f32 %v9284_v48, %v20059_v61 }
 0x60f   : > { %v9286_v26 = vadd.f32 %v9285_v52, %v20060_v35  ;;  %v9978_v35 = vld [vmem:[#allocation2] sm:$0x1] }
 0x611   : > { %v9287_v54 = vadd.f32 %v9286_v26, %v20061_v40 }
 0x613   : > { %v9288_v8 = vadd.f32 %v9287_v54, %v20062_v51 }
 0x615   : > { %v9289_v13 = vadd.f32 %v9288_v8, %v20063_v24 }
 0x617   : > { %v9290_v43 = vadd.f32 %v9289_v13, %v20064_v55 }
 0x619   : > { %v9291_v10 = vadd.f32 %v9290_v43, %v20065_v20 }
 0x61b   : > { %v9292_v38 = vadd.f32 %v9291_v10, %v20004_v21  ;;  %v20071_v21 = vld [vmem:[#allocation129_spill] sm:$0xff] }
 0x61d   : > { %v9293_v16 = vadd.f32 %v9292_v38, %v20066_v7 }
 0x61f   : > { %v9294_v34 = vadd.f32 %v9293_v16, %v20067_v50 }
 0x621   : > { %v9295_v9 = vadd.f32 %v9294_v34, %v20068_v3 }
 0x623   : > { %v9296_v46 = vadd.f32 %v9295_v9, %v20069_v45 }
 0x625   : > { %v9297_v25 = vadd.f32 %v9296_v46, %v20070_v59 }
 0x627   : > { %v9298_v12 = vadd.f32 %v9297_v25, %v20071_v21 }
 0x629   : > { %v9299_v19 = vadd.f32 %v9298_v12, %v20072_v32 }
 0x62b   : > { %v9300_v11 = vadd.f32 %v9299_v19, %v20073_v22 }
 0x62d   : > { %v9301_v0 = vadd.f32 %v9300_v11, %v20074_v15 }
 0x62f   : > { %v9302_v36 = vadd.f32 %v9301_v0, %v20023_v30 }
 0x631   : > { %v9303_v62 = vadd.f32 %v9302_v36, %v20075_v44 }
 0x633   : > { %v9304_v28 = vadd.f32 %v9303_v62, %v18514_v37  ;;  %v9974_v37 = vld [vmem:[%s18792_s6 + $0x1] sm:$0x1] }
 0x635   : > { %v9305_v31 = vadd.f32 %v9304_v28, %v20030_v49 }
 0x637   : > { %v9306_v60 = vadd.f32 %v9305_v31, %v18525_v17 }
 0x639   : > { %v9307_v6 = vrot.slane %v9306_v60, 4 }
 0x63b   : > { %v9308_v63 = vadd.f32 %v9307_v6, %v9306_v60 }
 0x63d   : > { %v9309_v14 = vrot.slane %v9308_v63, 2 }
 0x63f   : > { %v9310_v53 = vadd.f32 %v9309_v14, %v9308_v63 }
 0x641   : > { %v9311_v41 = vrot.slane %v9310_v53, 1 }
 0x643   : > { %v9312_v48 = vadd.f32 %v9311_v41, %v9310_v53 }
 0x673   : > { %v9570_v42 = vpop.xlane.xlu1 %9569 }
 0x674   : > { %v9571_v56 = vrot.slane %v9570_v42, 4 }
 0x675   : > { %v9966_v4 = vpop.xlane.xlu0 %9965 }
 0x676   : > { %v9572_v29 = vadd.f32 %v9571_v56, %v9570_v42  ;;  %v9967_v39 = vrot.slane %v9966_v4, 4 }
 0x678   : > { %v9573_v57 = vrot.slane %v9572_v29, 2  ;;  %v9968_v1 = vadd.f32 %v9967_v39, %v9966_v4 }
 0x67a   : > { %v9969_v23 = vrot.slane %v9968_v1, 2  ;;  %v9574_v58 = vadd.f32 %v9573_v57, %v9572_v29 }
 0x67c   : > { %v9970_v47 = vadd.f32 %v9969_v23, %v9968_v1  ;;  %v9575_v33 = vrot.slane %v9574_v58, 1 }
 0x67e   : > { %v9576_v18 = vadd.f32 %v9575_v33, %v9574_v58  ;;  %v9971_v5 = vrot.slane %v9970_v47, 1 }
 0x680   : > { %12915 = vpush %v9576_v18  ;;  %v9972_v2 = vadd.f32 %v9971_v5, %v9970_v47 }
 0x682   : > { %12917 = vpush %v9972_v2 }
 0x6b1   : > { %s12916_s20 = spop %12915 }
 0x6b2   : > { %v9579_v30 = vstv %s12916_s20 }
 0x6b3   : > { %v9580_v49 = vmul.f32 %v9579_v30, %v9578_v27  ;;  %s12918_s23 = spop %12917 }
 0x6b4   : > { %v9975_v17 = vstv %s12918_s23 }
 0x6b5   : > { %v9581_v61 = vadd.f32 %v9580_v49, %v9312_v48  ;;  %v9976_v52 = vmul.f32 %v9975_v17, %v9974_v37 }
 0x6b7   : > { %v9977_v26 = vadd.f32 %v9976_v52, %v9581_v61 }
 0x6b9   : > { %v9979_v40 = vadd.f32 %v9978_v35, %v9977_v26 }
 0x6bb   : > { %9980 = vst [vmem:[#allocation2] sm:$0x1] %v9979_v40 }
 0x6bc   : > { %13317 = shalt.err (!%p13314_p13)
}
 0x6bd   : > { %12920 = dma.vmem_to_hbm [thread:$0]  (%p18762_p6), %s9991_s29, 16, %s18793_s7, [#allocation3]  }
 0x6be   : > { %13341 = dma.done.wait (%p18762_p6), [#allocation3], 16  }
 0x6bf   : > { %13343 = vsyncadd (%p18762_p6), [#allocation3], 4294967280 }
 0x6c0 PF: > { %s18_s26 = sadd.s32 1, %s13354_s26   ;;  %s20077_s24 = smov %s13350_s25 }
 0x6c1   : > { %p15_p0 = scmp.ge.s32.totalorder %s18_s26, 4   ;;  %s20078_s25 = smov %s20080_s28 }
 0x6c3   :  { %17 = sbr.rel (!%p15_p0) target bundleno = 2 (0x2), region = 83 }
 0x6c8   :  { %10003 = vsyncpa [#allocation3], 1 }
 0x6c9   :  { %10005 = vsyncpa [#allocation3 + $0x1], 1 }

</bundles_post_ra>
